<compile_context>
chip_gen: v6e
topology: v6e:2x2x1
jax: 0.10.0
libtpu: 0.0.40
codegen_flags: <defaults>
</compile_context>

<pallas_src>
import numpy as np
import jax
import jax.numpy as jnp
from jax import lax
from jax.experimental import pallas as pl
from jax.experimental.pallas import tpu as pltpu

EPS = 1e-5          # BatchNorm1d eps (PyTorch default)

# ---- static network geometry (layer3 hard-codes 16*762 => input length 3072) ----
L_IN = 3072
K1, C1 = 10, 8      # layer1 kernel / out-channels
K2, C2 = 8, 16      # layer2 kernel / out-channels
LP2_REAL = 762      # layer2 pooled length (true)
LP2 = 768           # lane-padded layer2 length (multiple of 128)
J1 = LP2 + 4        # de-interleaved layer1 length needed by layer2 slices
XP = 1024           # per-phase padded input length (4 phases -> 4096 >= 1 + 3072)
N3 = 256            # layer3 width
CH = 8              # w3 channels streamed per grid step (8*768*256 bf16 = 3 MiB)


# ---------------------------------------------------------------------------
# Fused Pallas kernel
# ---------------------------------------------------------------------------
def _fused_conv_mlp_kernel(xph_ref, w1b_ref, sh1_ref, w2k_ref, sh2_ref,
                           w3_ref, b3_ref, emb_ref, wca_ref, wcb_ref, bc_ref,
                           wot_ref, bo_ref, o_ref,
                           h1eo_scr, h2_scr, h3_scr):
    """Grid axis streams w3 channel blocks; step 0 also runs both conv layers."""
    kblk = pl.program_id(0)
    nk = pl.num_programs(0)
    B = h2_scr.shape[0]
    ch = w3_ref.shape[0]            # channels of w3 in this block
    lp2 = h2_scr.shape[2]
    j1 = h1eo_scr.shape[1]

    # ---------------- step 0: conv1 + conv2 (+BN+ReLU+pool) into VMEM ----------
    @pl.when(kblk == 0)
    def _convs():
        h3_scr[...] = jnp.zeros_like(h3_scr)
        sh1 = sh1_ref[...]                                   # (8, 1)  BN shift
        sh2 = sh2_ref[...]                                   # (16, 1) BN shift
        for b in range(B):
            # layer1: one MXU matmul over (4 shifts x 4 input phases).
            xstk = jnp.concatenate(
                [xph_ref[b, :, pl.ds(s, j1)] for s in range(4)], axis=0)  # (16, j1)
            acc1 = jnp.dot(w1b_ref[...], xstk,
                           preferred_element_type=jnp.float32)            # (32, j1)
            # rows 0..7 / 8..15 -> conv outputs at pool-pair positions (4j, 4j+1)
            # rows 16..23 / 24..31 -> positions (4j+2, 4j+3)
            h1e = jnp.maximum(jnp.maximum(acc1[0:C1], acc1[C1:2 * C1]) + sh1, 0.0)
            h1o = jnp.maximum(jnp.maximum(acc1[2 * C1:3 * C1],
                                          acc1[3 * C1:4 * C1]) + sh1, 0.0)
            h1eo_scr[pl.ds(0, C1), :] = h1e                  # h1 even positions
            h1eo_scr[pl.ds(C1, C1), :] = h1o                 # h1 odd positions

            # layer2: 5 MXU matmuls over lane-shifted slices of h1 (even/odd).
            acc2 = jnp.zeros((2 * C2, lp2), jnp.float32)
            for s in range(w2k_ref.shape[0]):
                acc2 = acc2 + jnp.dot(w2k_ref[s],
                                      h1eo_scr[:, pl.ds(s, lp2)],
                                      preferred_element_type=jnp.float32)
            # rows 0..15 = conv2 at even positions, 16..31 = odd; max == MaxPool(2,2)
            h2_scr[b] = jnp.maximum(
                jnp.maximum(acc2[0:C2], acc2[C2:2 * C2]) + sh2, 0.0)

    # ------------- every step: streamed layer3 partial for this w3 block -------
    c0 = pl.multiple_of(kblk * ch, ch)
    xblk = [h2_scr[b, pl.ds(c0, ch), :] for b in range(B)]   # B x (ch, lp2)
    acc3 = jnp.zeros((B, w3_ref.shape[2]), jnp.float32)
    for cl in range(ch):
        xc = jnp.concatenate([xb[cl:cl + 1, :] for xb in xblk], axis=0)  # (B, lp2)
        acc3 = acc3 + jnp.dot(xc.astype(jnp.bfloat16), w3_ref[cl],
                              preferred_element_type=jnp.float32)
    h3_scr[...] = h3_scr[...] + acc3

    # ------------- last step: bias + concat_layer + out_layer + softmax --------
    @pl.when(kblk == nk - 1)
    def _head():
        h3 = h3_scr[...] + b3_ref[...]
        hc = (jnp.dot(h3, wca_ref[...], preferred_element_type=jnp.float32)
              + jnp.dot(emb_ref[...], wcb_ref[...], preferred_element_type=jnp.float32)
              + bc_ref[...])
        hc = jnp.maximum(hc, 0.0)
        z = jnp.dot(hc, wot_ref[...], preferred_element_type=jnp.float32) + bo_ref[...]
        z = jnp.maximum(z, 0.0)
        m = jnp.max(z, axis=-1, keepdims=True)
        e = jnp.exp(z - m)
        o_ref[...] = e / jnp.sum(e, axis=-1, keepdims=True)


# ---------------------------------------------------------------------------
# Parameter preparation (host-side, one time): fold BN, repack conv weights
# into "phase matmul" form, re-block/zero-pad w3 and cast it to bf16.
# ---------------------------------------------------------------------------
def _fold_bn(gamma, beta, mean, var, conv_bias):
    scale = np.asarray(gamma, np.float32) / np.sqrt(np.asarray(var, np.float32) + EPS)
    shift = np.asarray(beta, np.float32) + (np.asarray(conv_bias, np.float32)
                                            - np.asarray(mean, np.float32)) * scale
    return scale, shift


def prepare_params(p, n_class):
    s1, t1 = _fold_bn(p["gamma1"], p["beta1"], p["mean1"], p["var1"], p["b1"])
    s2, t2 = _fold_bn(p["gamma2"], p["beta2"], p["mean2"], p["var2"], p["b2"])
    w1 = np.asarray(p["w1"], np.float32)                     # (8, 1, 10)
    w2 = np.asarray(p["w2"], np.float32)                     # (16, 8, 8)

    # layer1: conv output at position 4j+r equals
    #   sum_{s,q} w1b[r*8+co, 4s+q] * xphase_q[j+s], with BN scale folded in.
    w1b = np.zeros((4 * C1, 16), np.float32)
    for r in range(4):
        for s in range(4):
            for q in range(4):
                k = 4 * s + q - r
                if 0 <= k < K1:
                    w1b[r * C1:(r + 1) * C1, 4 * s + q] = w1[:, 0, k] * s1

    # layer2: acc[row, p] = sum_s (w2k[s] @ h1eo[:, p+s])[row]
    #   h1eo rows 0..7 = h1 even positions, 8..15 = h1 odd positions;
    #   acc rows 0..15 = conv2 at even positions, 16..31 = odd positions.
    w2k = np.zeros((K2 // 2 + 1, 2 * C2, 2 * C1), np.float32)
    for s in range(K2 // 2):
        w2k[s, 0:C2, 0:C1] = w2[:, :, 2 * s] * s2[:, None]
        w2k[s, 0:C2, C1:2 * C1] = w2[:, :, 2 * s + 1] * s2[:, None]
        w2k[s, C2:2 * C2, C1:2 * C1] = w2[:, :, 2 * s] * s2[:, None]
        w2k[s + 1, C2:2 * C2, 0:C1] = w2[:, :, 2 * s + 1] * s2[:, None]

    # layer3 weight: (256, 16*762) -> (16, 768, 256); zero rows for the lane pad.
    # Stored bf16 so the dominant HBM stream is halved.
    w3 = np.asarray(p["w3"], np.float32).reshape(N3, C2, LP2_REAL)
    w3r = np.zeros((C2, LP2, N3), np.float32)
    w3r[:, :LP2_REAL, :] = np.transpose(w3, (1, 2, 0))
    wct = np.asarray(p["wc"], np.float32).T                  # (512, 256)

    return dict(
        w1b=jnp.asarray(w1b),
        sh1=jnp.asarray(t1.reshape(C1, 1)),
        w2k=jnp.asarray(w2k),
        sh2=jnp.asarray(t2.reshape(C2, 1)),
        w3r=jnp.asarray(w3r, dtype=jnp.bfloat16),
        b3=jnp.asarray(np.asarray(p["b3"], np.float32).reshape(1, N3)),
        wca=jnp.asarray(wct[:N3]),
        wcb=jnp.asarray(wct[N3:]),
        bc=jnp.asarray(np.asarray(p["bc"], np.float32).reshape(1, N3)),
        wot=jnp.asarray(np.asarray(p["wo"], np.float32).T),
        bo=jnp.asarray(np.asarray(p["bo"], np.float32).reshape(1, n_class)),
    )


# ---------------------------------------------------------------------------
# Forward (single fused pallas_call)
# ---------------------------------------------------------------------------
def conv_forward(x, embedding, kp):
    # TODO(synk): F.dropout / nn.Dropout are stochastic train-mode ops; treated
    # as inference-mode identities, and BatchNorm1d uses its running statistics.
    B, L = x.shape
    assert L == L_IN, "layer3 hard-codes 16*762, i.e. input length 3072"
    # Zero-pad (conv padding=1 + slack) and decompose into 4 interleaved phases
    # so both conv+pool stages reduce to contiguous-slice matmuls in the kernel.
    xpad = jnp.zeros((B, 4 * XP), jnp.float32).at[:, 1:1 + L].set(x)
    xph = xpad.reshape(B, XP, 4).transpose(0, 2, 1)          # (B, 4, XP)

    n_class = kp["wot"].shape[1]
    nk = C2 // CH                                            # w3 channel blocks
    const2 = lambda k: (0, 0)
    const3 = lambda k: (0, 0, 0)

    return pl.pallas_call(
        _fused_conv_mlp_kernel,
        out_shape=jax.ShapeDtypeStruct((B, n_class), jnp.float32),
        grid=(nk,),
        in_specs=[
            pl.BlockSpec((B, 4, XP), const3),                 # phase-decomposed x
            pl.BlockSpec(kp["w1b"].shape, const2),            # layer1 weight (scaled)
            pl.BlockSpec(kp["sh1"].shape, const2),            # layer1 BN shift
            pl.BlockSpec(kp["w2k"].shape, const3),            # layer2 weight (scaled)
            pl.BlockSpec(kp["sh2"].shape, const2),            # layer2 BN shift
            pl.BlockSpec((CH, LP2, N3), lambda k: (k, 0, 0)),  # streamed w3 (bf16)
            pl.BlockSpec(kp["b3"].shape, const2),
            pl.BlockSpec((B, N3), const2),                    # embedding
            pl.BlockSpec(kp["wca"].shape, const2),
            pl.BlockSpec(kp["wcb"].shape, const2),
            pl.BlockSpec(kp["bc"].shape, const2),
            pl.BlockSpec(kp["wot"].shape, const2),
            pl.BlockSpec(kp["bo"].shape, const2),
        ],
        out_specs=pl.BlockSpec((B, n_class), const2),
        scratch_shapes=[
            pltpu.VMEM((2 * C1, J1), jnp.float32),            # h1 (even/odd rows)
            pltpu.VMEM((2, C2, LP2), jnp.float32),            # h2 (flatten source)
            pltpu.VMEM((2, N3), jnp.float32),                 # layer3 accumulator
        ],
        # TODO(synk): single "arbitrary" reduction axis leaves v7x's 2nd TensorCore
        # idle; splitting w3's output columns per core needs a cross-core h3 merge.
        compiler_params=pltpu.CompilerParams(dimension_semantics=("arbitrary",)),
    )(xph, kp["w1b"], kp["sh1"], kp["w2k"], kp["sh2"], kp["w3r"], kp["b3"],
      embedding, kp["wca"], kp["wcb"], kp["bc"], kp["wot"], kp["bo"])


# ---------------------------------------------------------------------------
# Deterministic parameters and pure-JAX reference for validation
# ---------------------------------------------------------------------------
def init_params(key, n_class):
    ks = jax.random.split(key, 10)
    p = {}
    p["w1"] = 0.1 * jax.random.normal(ks[0], (8, 1, 10), jnp.float32)     # Conv1d(1,8,10)
    p["b1"] = 0.1 * jax.random.normal(ks[1], (8,), jnp.float32)
    p["w2"] = 0.1 * jax.random.normal(ks[2], (16, 8, 8), jnp.float32)     # Conv1d(8,16,8)
    p["b2"] = 0.1 * jax.random.normal(ks[3], (16,), jnp.float32)
    for i, c in ((1, 8), (2, 16)):                                        # BatchNorm1d defaults
        p[f"gamma{i}"] = jnp.ones((c,), jnp.float32)
        p[f"beta{i}"] = jnp.zeros((c,), jnp.float32)
        p[f"mean{i}"] = jnp.zeros((c,), jnp.float32)
        p[f"var{i}"] = jnp.ones((c,), jnp.float32)
    p["w3"] = 0.02 * jax.random.normal(ks[4], (256, 16 * 762), jnp.float32)  # Linear(12192,256)
    p["b3"] = 0.02 * jax.random.normal(ks[5], (256,), jnp.float32)
    p["wc"] = 0.05 * jax.random.normal(ks[6], (256, 512), jnp.float32)       # Linear(512,256)
    p["bc"] = 0.05 * jax.random.normal(ks[7], (256,), jnp.float32)
    p["wo"] = 0.05 * jax.random.normal(ks[8], (n_class, 256), jnp.float32)   # Linear(256,n_class)
    p["bo"] = 0.05 * jax.random.normal(ks[9], (n_class,), jnp.float32)
    return p


def reference_forward(x, embedding, p):
    B = x.shape[0]
    dn = ("NCH", "OIH", "NCH")

    def bn(h, i):
        return ((h - p[f"mean{i}"][None, :, None])
                / jnp.sqrt(p[f"var{i}"][None, :, None] + EPS)
                * p[f"gamma{i}"][None, :, None] + p[f"beta{i}"][None, :, None])

    h = lax.conv_general_dilated(x[:, None, :], p["w1"], (1,), [(1, 1)],
                                 dimension_numbers=dn) + p["b1"][None, :, None]
    h = jnp.maximum(bn(h, 1), 0.0)
    h = lax.reduce_window(h, -jnp.inf, lax.max, (1, 1, 2), (1, 1, 2), "VALID")
    h = lax.conv_general_dilated(h, p["w2"], (1,), [(0, 0)],
                                 dimension_numbers=dn) + p["b2"][None, :, None]
    h = jnp.maximum(bn(h, 2), 0.0)
    h = lax.reduce_window(h, -jnp.inf, lax.max, (1, 1, 2), (1, 1, 2), "VALID")
    xf = h.reshape(B, -1)
    h3 = xf @ p["w3"].T + p["b3"]
    hc = jnp.maximum(jnp.concatenate([h3, embedding], axis=1) @ p["wc"].T + p["bc"], 0.0)
    z = jnp.maximum(hc @ p["wo"].T + p["bo"], 0.0)
    return jax.nn.softmax(z, axis=1)


if __name__ == "__main__":
    B, L, n_class = 2, 3072, 5      # L=3072 -> flatten dim 16*762 as hard-coded in layer3
    key = jax.random.PRNGKey(0)
    kparam, kx, ke = jax.random.split(key, 3)
    params = init_params(kparam, n_class)
    x = jax.random.normal(kx, (B, L), jnp.float32)
    embedding = jax.random.normal(ke, (B, 256), jnp.float32)

    kprep = prepare_params(params, n_class)
    out = jax.block_until_ready(jax.jit(conv_forward)(x, embedding, kprep))
    ref = jax.block_until_ready(reference_forward(x, embedding, params))

    assert out.shape == (B, n_class)
    # w3 is streamed in bf16 (per perf guidance); 2e-3 covers its quantization
    # over the 12192-long contraction.  All conv/pool/BN indexing is exact.
    np.testing.assert_allclose(np.asarray(out), np.asarray(ref), rtol=2e-3, atol=2e-3)
    assert np.allclose(np.asarray(out).sum(axis=1), 1.0, atol=1e-4)
    print("KERNEL_OK")
</pallas_src>

<mosaic_0001>
module attributes {stable_mosaic.version = 11 : i64} {
  func.func @_fused_conv_mlp_kernel(%arg0: i32, %arg1: memref<2x4x1024xf32, #tpu.memory_space<vmem>>, %arg2: memref<32x16xf32, #tpu.memory_space<vmem>>, %arg3: memref<8x1xf32, #tpu.memory_space<vmem>>, %arg4: memref<5x32x16xf32, #tpu.memory_space<vmem>>, %arg5: memref<16x1xf32, #tpu.memory_space<vmem>>, %arg6: memref<8x768x256xbf16, #tpu.memory_space<vmem>>, %arg7: memref<1x256xf32, #tpu.memory_space<vmem>>, %arg8: memref<2x256xf32, #tpu.memory_space<vmem>>, %arg9: memref<256x256xf32, #tpu.memory_space<vmem>>, %arg10: memref<256x256xf32, #tpu.memory_space<vmem>>, %arg11: memref<1x256xf32, #tpu.memory_space<vmem>>, %arg12: memref<256x5xf32, #tpu.memory_space<vmem>>, %arg13: memref<1x5xf32, #tpu.memory_space<vmem>>, %arg14: memref<2x5xf32, #tpu.memory_space<vmem>>, %arg15: memref<16x772xf32, #tpu.memory_space<vmem>>, %arg16: memref<2x16x768xf32, #tpu.memory_space<vmem>>, %arg17: memref<2x256xf32, #tpu.memory_space<vmem>>) attributes {dimension_semantics = [#tpu.dimension_semantics<arbitrary>], iteration_bounds = array<i64: 2>, scalar_prefetch = 0 : i64, scratch_operands = 3 : i64, tpu.core_type = #tpu.core_type<tc>, window_params = [{pipeline_mode = #tpu.pipeline_mode<synchronous>, transform_indices = @transform_0, window_bounds = array<i64: 2, 4, 1024>}, {pipeline_mode = #tpu.pipeline_mode<synchronous>, transform_indices = @transform_1, window_bounds = array<i64: 32, 16>}, {pipeline_mode = #tpu.pipeline_mode<synchronous>, transform_indices = @transform_2, window_bounds = array<i64: 8, 1>}, {pipeline_mode = #tpu.pipeline_mode<synchronous>, transform_indices = @transform_3, window_bounds = array<i64: 5, 32, 16>}, {pipeline_mode = #tpu.pipeline_mode<synchronous>, transform_indices = @transform_4, window_bounds = array<i64: 16, 1>}, {transform_indices = @transform_5, window_bounds = array<i64: 8, 768, 256>}, {pipeline_mode = #tpu.pipeline_mode<synchronous>, transform_indices = @transform_6, window_bounds = array<i64: 1, 256>}, {pipeline_mode = #tpu.pipeline_mode<synchronous>, transform_indices = @transform_7, window_bounds = array<i64: 2, 256>}, {pipeline_mode = #tpu.pipeline_mode<synchronous>, transform_indices = @transform_8, window_bounds = array<i64: 256, 256>}, {pipeline_mode = #tpu.pipeline_mode<synchronous>, transform_indices = @transform_9, window_bounds = array<i64: 256, 256>}, {pipeline_mode = #tpu.pipeline_mode<synchronous>, transform_indices = @transform_10, window_bounds = array<i64: 1, 256>}, {pipeline_mode = #tpu.pipeline_mode<synchronous>, transform_indices = @transform_11, window_bounds = array<i64: 256, 5>}, {pipeline_mode = #tpu.pipeline_mode<synchronous>, transform_indices = @transform_12, window_bounds = array<i64: 1, 5>}, {pipeline_mode = #tpu.pipeline_mode<synchronous>, transform_indices = @transform_13, window_bounds = array<i64: 2, 5>}]} {
    %c0_i32 = arith.constant 0 : i32
    %0 = arith.cmpi eq, %arg0, %c0_i32 : i32
    %1 = arith.extui %0 : i1 to i32
    %c0_i32_0 = arith.constant 0 : i32
    %2 = arith.cmpi ne, %1, %c0_i32_0 : i32
    scf.if %2 {
      %cst_34 = arith.constant 0.000000e+00 : f32
      %82 = vector.broadcast %cst_34 : f32 to vector<2x256xf32>
      %c0_35 = arith.constant 0 : index
      %c0_36 = arith.constant 0 : index
      %83 = vector.load %arg17[%c0_35, %c0_36] : memref<2x256xf32, #tpu.memory_space<vmem>>, vector<2x256xf32>
      tpu.vector_store %arg17[%c0_35, %c0_36], %82 {strides = array<i32>} : memref<2x256xf32, #tpu.memory_space<vmem>>, vector<2x256xf32>,
      %c0_37 = arith.constant 0 : index
      %c0_38 = arith.constant 0 : index
      %84 = vector.load %arg3[%c0_37, %c0_38] : memref<8x1xf32, #tpu.memory_space<vmem>>, vector<8x1xf32>
      %c0_39 = arith.constant 0 : index
      %c0_40 = arith.constant 0 : index
      %85 = vector.load %arg5[%c0_39, %c0_40] : memref<16x1xf32, #tpu.memory_space<vmem>>, vector<16x1xf32>
      %c0_41 = arith.constant 0 : index
      %c0_42 = arith.constant 0 : index
      %c0_43 = arith.constant 0 : index
      %86 = vector.load %arg1[%c0_41, %c0_42, %c0_43] : memref<2x4x1024xf32, #tpu.memory_space<vmem>>, vector<1x4x772xf32>
      %87 = vector.shape_cast %86 : vector<1x4x772xf32> to vector<4x772xf32>
      %c0_44 = arith.constant 0 : index
      %c0_45 = arith.constant 0 : index
      %c1_46 = arith.constant 1 : index
      %88 = vector.load %arg1[%c0_44, %c0_45, %c1_46] : memref<2x4x1024xf32, #tpu.memory_space<vmem>>, vector<1x4x772xf32>
      %89 = vector.shape_cast %88 : vector<1x4x772xf32> to vector<4x772xf32>
      %c0_47 = arith.constant 0 : index
      %c0_48 = arith.constant 0 : index
      %c2_49 = arith.constant 2 : index
      %90 = vector.load %arg1[%c0_47, %c0_48, %c2_49] : memref<2x4x1024xf32, #tpu.memory_space<vmem>>, vector<1x4x772xf32>
      %91 = vector.shape_cast %90 : vector<1x4x772xf32> to vector<4x772xf32>
      %c0_50 = arith.constant 0 : index
      %c0_51 = arith.constant 0 : index
      %c3_52 = arith.constant 3 : index
      %92 = vector.load %arg1[%c0_50, %c0_51, %c3_52] : memref<2x4x1024xf32, #tpu.memory_space<vmem>>, vector<1x4x772xf32>
      %93 = vector.shape_cast %92 : vector<1x4x772xf32> to vector<4x772xf32>
      %94 = tpu.concatenate %87, %89, %91, %93 in 0 : vector<4x772xf32>, vector<4x772xf32>, vector<4x772xf32>, vector<4x772xf32> -> vector<16x772xf32>
      %c0_53 = arith.constant 0 : index
      %c0_54 = arith.constant 0 : index
      %95 = vector.load %arg2[%c0_53, %c0_54] : memref<32x16xf32, #tpu.memory_space<vmem>>, vector<32x16xf32>
      %cst_55 = arith.constant dense<0.000000e+00> : vector<32x772xf32>
      %96 = tpu.matmul %95, %94, %cst_55 {dimension_numbers = #tpu.dot_dimension_numbers<[1], [0], [0], [1], [0, 0, 1, 1], [], []>} : vector<32x16xf32>, vector<16x772xf32>, vector<32x772xf32> -> vector<32x772xf32>
      %97 = vector.extract_strided_slice %96 {offsets = [0, 0], sizes = [8, 772], strides = [1, 1]} : vector<32x772xf32> to vector<8x772xf32>
      %98 = vector.extract_strided_slice %96 {offsets = [8, 0], sizes = [8, 772], strides = [1, 1]} : vector<32x772xf32> to vector<8x772xf32>
      %99 = arith.maximumf %97, %98 : vector<8x772xf32>
      %100 = vector.broadcast %84 : vector<8x1xf32> to vector<8x772xf32>
      %101 = arith.addf %99, %100 : vector<8x772xf32>
      %cst_56 = arith.constant 0.000000e+00 : f32
      %102 = vector.broadcast %cst_56 : f32 to vector<8x772xf32>
      %103 = arith.maximumf %101, %102 : vector<8x772xf32>
      %104 = vector.extract_strided_slice %96 {offsets = [16, 0], sizes = [8, 772], strides = [1, 1]} : vector<32x772xf32> to vector<8x772xf32>
      %105 = vector.extract_strided_slice %96 {offsets = [24, 0], sizes = [8, 772], strides = [1, 1]} : vector<32x772xf32> to vector<8x772xf32>
      %106 = arith.maximumf %104, %105 : vector<8x772xf32>
      %107 = vector.broadcast %84 : vector<8x1xf32> to vector<8x772xf32>
      %108 = arith.addf %106, %107 : vector<8x772xf32>
      %cst_57 = arith.constant 0.000000e+00 : f32
      %109 = vector.broadcast %cst_57 : f32 to vector<8x772xf32>
      %110 = arith.maximumf %108, %109 : vector<8x772xf32>
      %c0_58 = arith.constant 0 : index
      %c0_59 = arith.constant 0 : index
      %111 = vector.load %arg15[%c0_58, %c0_59] : memref<16x772xf32, #tpu.memory_space<vmem>>, vector<8x772xf32>
      tpu.vector_store %arg15[%c0_58, %c0_59], %103 {strides = array<i32>} : memref<16x772xf32, #tpu.memory_space<vmem>>, vector<8x772xf32>,
      %c8 = arith.constant 8 : index
      %c0_60 = arith.constant 0 : index
      %112 = vector.load %arg15[%c8, %c0_60] : memref<16x772xf32, #tpu.memory_space<vmem>>, vector<8x772xf32>
      tpu.vector_store %arg15[%c8, %c0_60], %110 {strides = array<i32>} : memref<16x772xf32, #tpu.memory_space<vmem>>, vector<8x772xf32>,
      %cst_61 = arith.constant 0.000000e+00 : f32
      %113 = vector.broadcast %cst_61 : f32 to vector<32x768xf32>
      %c0_62 = arith.constant 0 : index
      %c0_63 = arith.constant 0 : index
      %c0_64 = arith.constant 0 : index
      %114 = vector.load %arg4[%c0_62, %c0_63, %c0_64] : memref<5x32x16xf32, #tpu.memory_space<vmem>>, vector<1x32x16xf32>
      %115 = vector.shape_cast %114 : vector<1x32x16xf32> to vector<32x16xf32>
      %c0_65 = arith.constant 0 : index
      %c0_66 = arith.constant 0 : index
      %116 = vector.load %arg15[%c0_65, %c0_66] : memref<16x772xf32, #tpu.memory_space<vmem>>, vector<16x768xf32>
      %cst_67 = arith.constant dense<0.000000e+00> : vector<32x768xf32>
      %117 = tpu.matmul %115, %116, %cst_67 {dimension_numbers = #tpu.dot_dimension_numbers<[1], [0], [0], [1], [0, 0, 1, 1], [], []>} : vector<32x16xf32>, vector<16x768xf32>, vector<32x768xf32> -> vector<32x768xf32>
      %118 = arith.addf %113, %117 : vector<32x768xf32>
      %c1_68 = arith.constant 1 : index
      %c0_69 = arith.constant 0 : index
      %c0_70 = arith.constant 0 : index
      %119 = vector.load %arg4[%c1_68, %c0_69, %c0_70] : memref<5x32x16xf32, #tpu.memory_space<vmem>>, vector<1x32x16xf32>
      %120 = vector.shape_cast %119 : vector<1x32x16xf32> to vector<32x16xf32>
      %c0_71 = arith.constant 0 : index
      %c1_72 = arith.constant 1 : index
      %121 = vector.load %arg15[%c0_71, %c1_72] : memref<16x772xf32, #tpu.memory_space<vmem>>, vector<16x768xf32>
      %cst_73 = arith.constant dense<0.000000e+00> : vector<32x768xf32>
      %122 = tpu.matmul %120, %121, %cst_73 {dimension_numbers = #tpu.dot_dimension_numbers<[1], [0], [0], [1], [0, 0, 1, 1], [], []>} : vector<32x16xf32>, vector<16x768xf32>, vector<32x768xf32> -> vector<32x768xf32>
      %123 = arith.addf %118, %122 : vector<32x768xf32>
      %c2_74 = arith.constant 2 : index
      %c0_75 = arith.constant 0 : index
      %c0_76 = arith.constant 0 : index
      %124 = vector.load %arg4[%c2_74, %c0_75, %c0_76] : memref<5x32x16xf32, #tpu.memory_space<vmem>>, vector<1x32x16xf32>
      %125 = vector.shape_cast %124 : vector<1x32x16xf32> to vector<32x16xf32>
      %c0_77 = arith.constant 0 : index
      %c2_78 = arith.constant 2 : index
      %126 = vector.load %arg15[%c0_77, %c2_78] : memref<16x772xf32, #tpu.memory_space<vmem>>, vector<16x768xf32>
      %cst_79 = arith.constant dense<0.000000e+00> : vector<32x768xf32>
      %127 = tpu.matmul %125, %126, %cst_79 {dimension_numbers = #tpu.dot_dimension_numbers<[1], [0], [0], [1], [0, 0, 1, 1], [], []>} : vector<32x16xf32>, vector<16x768xf32>, vector<32x768xf32> -> vector<32x768xf32>
      %128 = arith.addf %123, %127 : vector<32x768xf32>
      %c3_80 = arith.constant 3 : index
      %c0_81 = arith.constant 0 : index
      %c0_82 = arith.constant 0 : index
      %129 = vector.load %arg4[%c3_80, %c0_81, %c0_82] : memref<5x32x16xf32, #tpu.memory_space<vmem>>, vector<1x32x16xf32>
      %130 = vector.shape_cast %129 : vector<1x32x16xf32> to vector<32x16xf32>
      %c0_83 = arith.constant 0 : index
      %c3_84 = arith.constant 3 : index
      %131 = vector.load %arg15[%c0_83, %c3_84] : memref<16x772xf32, #tpu.memory_space<vmem>>, vector<16x768xf32>
      %cst_85 = arith.constant dense<0.000000e+00> : vector<32x768xf32>
      %132 = tpu.matmul %130, %131, %cst_85 {dimension_numbers = #tpu.dot_dimension_numbers<[1], [0], [0], [1], [0, 0, 1, 1], [], []>} : vector<32x16xf32>, vector<16x768xf32>, vector<32x768xf32> -> vector<32x768xf32>
      %133 = arith.addf %128, %132 : vector<32x768xf32>
      %c4_86 = arith.constant 4 : index
      %c0_87 = arith.constant 0 : index
      %c0_88 = arith.constant 0 : index
      %134 = vector.load %arg4[%c4_86, %c0_87, %c0_88] : memref<5x32x16xf32, #tpu.memory_space<vmem>>, vector<1x32x16xf32>
      %135 = vector.shape_cast %134 : vector<1x32x16xf32> to vector<32x16xf32>
      %c0_89 = arith.constant 0 : index
      %c4_90 = arith.constant 4 : index
      %136 = vector.load %arg15[%c0_89, %c4_90] : memref<16x772xf32, #tpu.memory_space<vmem>>, vector<16x768xf32>
      %cst_91 = arith.constant dense<0.000000e+00> : vector<32x768xf32>
      %137 = tpu.matmul %135, %136, %cst_91 {dimension_numbers = #tpu.dot_dimension_numbers<[1], [0], [0], [1], [0, 0, 1, 1], [], []>} : vector<32x16xf32>, vector<16x768xf32>, vector<32x768xf32> -> vector<32x768xf32>
      %138 = arith.addf %133, %137 : vector<32x768xf32>
      %139 = vector.extract_strided_slice %138 {offsets = [0, 0], sizes = [16, 768], strides = [1, 1]} : vector<32x768xf32> to vector<16x768xf32>
      %140 = vector.extract_strided_slice %138 {offsets = [16, 0], sizes = [16, 768], strides = [1, 1]} : vector<32x768xf32> to vector<16x768xf32>
      %141 = arith.maximumf %139, %140 : vector<16x768xf32>
      %142 = vector.broadcast %85 : vector<16x1xf32> to vector<16x768xf32>
      %143 = arith.addf %141, %142 : vector<16x768xf32>
      %cst_92 = arith.constant 0.000000e+00 : f32
      %144 = vector.broadcast %cst_92 : f32 to vector<16x768xf32>
      %145 = arith.maximumf %143, %144 : vector<16x768xf32>
      %c0_93 = arith.constant 0 : index
      %c0_94 = arith.constant 0 : index
      %c0_95 = arith.constant 0 : index
      %146 = vector.load %arg16[%c0_93, %c0_94, %c0_95] : memref<2x16x768xf32, #tpu.memory_space<vmem>>, vector<1x16x768xf32>
      %147 = vector.shape_cast %146 : vector<1x16x768xf32> to vector<16x768xf32>
      %148 = vector.shape_cast %145 : vector<16x768xf32> to vector<1x16x768xf32>
      tpu.vector_store %arg16[%c0_93, %c0_94, %c0_95], %148 {strides = array<i32>} : memref<2x16x768xf32, #tpu.memory_space<vmem>>, vector<1x16x768xf32>,
      %c1_96 = arith.constant 1 : index
      %c0_97 = arith.constant 0 : index
      %c0_98 = arith.constant 0 : index
      %149 = vector.load %arg1[%c1_96, %c0_97, %c0_98] : memref<2x4x1024xf32, #tpu.memory_space<vmem>>, vector<1x4x772xf32>
      %150 = vector.shape_cast %149 : vector<1x4x772xf32> to vector<4x772xf32>
      %c1_99 = arith.constant 1 : index
      %c0_100 = arith.constant 0 : index
      %c1_101 = arith.constant 1 : index
      %151 = vector.load %arg1[%c1_99, %c0_100, %c1_101] : memref<2x4x1024xf32, #tpu.memory_space<vmem>>, vector<1x4x772xf32>
      %152 = vector.shape_cast %151 : vector<1x4x772xf32> to vector<4x772xf32>
      %c1_102 = arith.constant 1 : index
      %c0_103 = arith.constant 0 : index
      %c2_104 = arith.constant 2 : index
      %153 = vector.load %arg1[%c1_102, %c0_103, %c2_104] : memref<2x4x1024xf32, #tpu.memory_space<vmem>>, vector<1x4x772xf32>
      %154 = vector.shape_cast %153 : vector<1x4x772xf32> to vector<4x772xf32>
      %c1_105 = arith.constant 1 : index
      %c0_106 = arith.constant 0 : index
      %c3_107 = arith.constant 3 : index
      %155 = vector.load %arg1[%c1_105, %c0_106, %c3_107] : memref<2x4x1024xf32, #tpu.memory_space<vmem>>, vector<1x4x772xf32>
      %156 = vector.shape_cast %155 : vector<1x4x772xf32> to vector<4x772xf32>
      %157 = tpu.concatenate %150, %152, %154, %156 in 0 : vector<4x772xf32>, vector<4x772xf32>, vector<4x772xf32>, vector<4x772xf32> -> vector<16x772xf32>
      %c0_108 = arith.constant 0 : index
      %c0_109 = arith.constant 0 : index
      %158 = vector.load %arg2[%c0_108, %c0_109] : memref<32x16xf32, #tpu.memory_space<vmem>>, vector<32x16xf32>
      %cst_110 = arith.constant dense<0.000000e+00> : vector<32x772xf32>
      %159 = tpu.matmul %158, %157, %cst_110 {dimension_numbers = #tpu.dot_dimension_numbers<[1], [0], [0], [1], [0, 0, 1, 1], [], []>} : vector<32x16xf32>, vector<16x772xf32>, vector<32x772xf32> -> vector<32x772xf32>
      %160 = vector.extract_strided_slice %159 {offsets = [0, 0], sizes = [8, 772], strides = [1, 1]} : vector<32x772xf32> to vector<8x772xf32>
      %161 = vector.extract_strided_slice %159 {offsets = [8, 0], sizes = [8, 772], strides = [1, 1]} : vector<32x772xf32> to vector<8x772xf32>
      %162 = arith.maximumf %160, %161 : vector<8x772xf32>
      %163 = vector.broadcast %84 : vector<8x1xf32> to vector<8x772xf32>
      %164 = arith.addf %162, %163 : vector<8x772xf32>
      %cst_111 = arith.constant 0.000000e+00 : f32
      %165 = vector.broadcast %cst_111 : f32 to vector<8x772xf32>
      %166 = arith.maximumf %164, %165 : vector<8x772xf32>
      %167 = vector.extract_strided_slice %159 {offsets = [16, 0], sizes = [8, 772], strides = [1, 1]} : vector<32x772xf32> to vector<8x772xf32>
      %168 = vector.extract_strided_slice %159 {offsets = [24, 0], sizes = [8, 772], strides = [1, 1]} : vector<32x772xf32> to vector<8x772xf32>
      %169 = arith.maximumf %167, %168 : vector<8x772xf32>
      %170 = vector.broadcast %84 : vector<8x1xf32> to vector<8x772xf32>
      %171 = arith.addf %169, %170 : vector<8x772xf32>
      %cst_112 = arith.constant 0.000000e+00 : f32
      %172 = vector.broadcast %cst_112 : f32 to vector<8x772xf32>
      %173 = arith.maximumf %171, %172 : vector<8x772xf32>
      %c0_113 = arith.constant 0 : index
      %c0_114 = arith.constant 0 : index
      %174 = vector.load %arg15[%c0_113, %c0_114] : memref<16x772xf32, #tpu.memory_space<vmem>>, vector<8x772xf32>
      tpu.vector_store %arg15[%c0_113, %c0_114], %166 {strides = array<i32>} : memref<16x772xf32, #tpu.memory_space<vmem>>, vector<8x772xf32>,
      %c8_115 = arith.constant 8 : index
      %c0_116 = arith.constant 0 : index
      %175 = vector.load %arg15[%c8_115, %c0_116] : memref<16x772xf32, #tpu.memory_space<vmem>>, vector<8x772xf32>
      tpu.vector_store %arg15[%c8_115, %c0_116], %173 {strides = array<i32>} : memref<16x772xf32, #tpu.memory_space<vmem>>, vector<8x772xf32>,
      %cst_117 = arith.constant 0.000000e+00 : f32
      %176 = vector.broadcast %cst_117 : f32 to vector<32x768xf32>
      %c0_118 = arith.constant 0 : index
      %c0_119 = arith.constant 0 : index
      %c0_120 = arith.constant 0 : index
      %177 = vector.load %arg4[%c0_118, %c0_119, %c0_120] : memref<5x32x16xf32, #tpu.memory_space<vmem>>, vector<1x32x16xf32>
      %178 = vector.shape_cast %177 : vector<1x32x16xf32> to vector<32x16xf32>
      %c0_121 = arith.constant 0 : index
      %c0_122 = arith.constant 0 : index
      %179 = vector.load %arg15[%c0_121, %c0_122] : memref<16x772xf32, #tpu.memory_space<vmem>>, vector<16x768xf32>
      %cst_123 = arith.constant dense<0.000000e+00> : vector<32x768xf32>
      %180 = tpu.matmul %178, %179, %cst_123 {dimension_numbers = #tpu.dot_dimension_numbers<[1], [0], [0], [1], [0, 0, 1, 1], [], []>} : vector<32x16xf32>, vector<16x768xf32>, vector<32x768xf32> -> vector<32x768xf32>
      %181 = arith.addf %176, %180 : vector<32x768xf32>
      %c1_124 = arith.constant 1 : index
      %c0_125 = arith.constant 0 : index
      %c0_126 = arith.constant 0 : index
      %182 = vector.load %arg4[%c1_124, %c0_125, %c0_126] : memref<5x32x16xf32, #tpu.memory_space<vmem>>, vector<1x32x16xf32>
      %183 = vector.shape_cast %182 : vector<1x32x16xf32> to vector<32x16xf32>
      %c0_127 = arith.constant 0 : index
      %c1_128 = arith.constant 1 : index
      %184 = vector.load %arg15[%c0_127, %c1_128] : memref<16x772xf32, #tpu.memory_space<vmem>>, vector<16x768xf32>
      %cst_129 = arith.constant dense<0.000000e+00> : vector<32x768xf32>
      %185 = tpu.matmul %183, %184, %cst_129 {dimension_numbers = #tpu.dot_dimension_numbers<[1], [0], [0], [1], [0, 0, 1, 1], [], []>} : vector<32x16xf32>, vector<16x768xf32>, vector<32x768xf32> -> vector<32x768xf32>
      %186 = arith.addf %181, %185 : vector<32x768xf32>
      %c2_130 = arith.constant 2 : index
      %c0_131 = arith.constant 0 : index
      %c0_132 = arith.constant 0 : index
      %187 = vector.load %arg4[%c2_130, %c0_131, %c0_132] : memref<5x32x16xf32, #tpu.memory_space<vmem>>, vector<1x32x16xf32>
      %188 = vector.shape_cast %187 : vector<1x32x16xf32> to vector<32x16xf32>
      %c0_133 = arith.constant 0 : index
      %c2_134 = arith.constant 2 : index
      %189 = vector.load %arg15[%c0_133, %c2_134] : memref<16x772xf32, #tpu.memory_space<vmem>>, vector<16x768xf32>
      %cst_135 = arith.constant dense<0.000000e+00> : vector<32x768xf32>
      %190 = tpu.matmul %188, %189, %cst_135 {dimension_numbers = #tpu.dot_dimension_numbers<[1], [0], [0], [1], [0, 0, 1, 1], [], []>} : vector<32x16xf32>, vector<16x768xf32>, vector<32x768xf32> -> vector<32x768xf32>
      %191 = arith.addf %186, %190 : vector<32x768xf32>
      %c3_136 = arith.constant 3 : index
      %c0_137 = arith.constant 0 : index
      %c0_138 = arith.constant 0 : index
      %192 = vector.load %arg4[%c3_136, %c0_137, %c0_138] : memref<5x32x16xf32, #tpu.memory_space<vmem>>, vector<1x32x16xf32>
      %193 = vector.shape_cast %192 : vector<1x32x16xf32> to vector<32x16xf32>
      %c0_139 = arith.constant 0 : index
      %c3_140 = arith.constant 3 : index
      %194 = vector.load %arg15[%c0_139, %c3_140] : memref<16x772xf32, #tpu.memory_space<vmem>>, vector<16x768xf32>
      %cst_141 = arith.constant dense<0.000000e+00> : vector<32x768xf32>
      %195 = tpu.matmul %193, %194, %cst_141 {dimension_numbers = #tpu.dot_dimension_numbers<[1], [0], [0], [1], [0, 0, 1, 1], [], []>} : vector<32x16xf32>, vector<16x768xf32>, vector<32x768xf32> -> vector<32x768xf32>
      %196 = arith.addf %191, %195 : vector<32x768xf32>
      %c4_142 = arith.constant 4 : index
      %c0_143 = arith.constant 0 : index
      %c0_144 = arith.constant 0 : index
      %197 = vector.load %arg4[%c4_142, %c0_143, %c0_144] : memref<5x32x16xf32, #tpu.memory_space<vmem>>, vector<1x32x16xf32>
      %198 = vector.shape_cast %197 : vector<1x32x16xf32> to vector<32x16xf32>
      %c0_145 = arith.constant 0 : index
      %c4_146 = arith.constant 4 : index
      %199 = vector.load %arg15[%c0_145, %c4_146] : memref<16x772xf32, #tpu.memory_space<vmem>>, vector<16x768xf32>
      %cst_147 = arith.constant dense<0.000000e+00> : vector<32x768xf32>
      %200 = tpu.matmul %198, %199, %cst_147 {dimension_numbers = #tpu.dot_dimension_numbers<[1], [0], [0], [1], [0, 0, 1, 1], [], []>} : vector<32x16xf32>, vector<16x768xf32>, vector<32x768xf32> -> vector<32x768xf32>
      %201 = arith.addf %196, %200 : vector<32x768xf32>
      %202 = vector.extract_strided_slice %201 {offsets = [0, 0], sizes = [16, 768], strides = [1, 1]} : vector<32x768xf32> to vector<16x768xf32>
      %203 = vector.extract_strided_slice %201 {offsets = [16, 0], sizes = [16, 768], strides = [1, 1]} : vector<32x768xf32> to vector<16x768xf32>
      %204 = arith.maximumf %202, %203 : vector<16x768xf32>
      %205 = vector.broadcast %85 : vector<16x1xf32> to vector<16x768xf32>
      %206 = arith.addf %204, %205 : vector<16x768xf32>
      %cst_148 = arith.constant 0.000000e+00 : f32
      %207 = vector.broadcast %cst_148 : f32 to vector<16x768xf32>
      %208 = arith.maximumf %206, %207 : vector<16x768xf32>
      %c1_149 = arith.constant 1 : index
      %c0_150 = arith.constant 0 : index
      %c0_151 = arith.constant 0 : index
      %209 = vector.load %arg16[%c1_149, %c0_150, %c0_151] : memref<2x16x768xf32, #tpu.memory_space<vmem>>, vector<1x16x768xf32>
      %210 = vector.shape_cast %209 : vector<1x16x768xf32> to vector<16x768xf32>
      %211 = vector.shape_cast %208 : vector<16x768xf32> to vector<1x16x768xf32>
      tpu.vector_store %arg16[%c1_149, %c0_150, %c0_151], %211 {strides = array<i32>} : memref<2x16x768xf32, #tpu.memory_space<vmem>>, vector<1x16x768xf32>,
    } else {
    }
    %c8_i32 = arith.constant 8 : i32
    %3 = arith.muli %arg0, %c8_i32 : i32
    %4 = tpu.assume_multiple %3, 8 : i32
    %c0 = arith.constant 0 : index
    %5 = arith.index_cast %4 : i32 to index
    %c0_1 = arith.constant 0 : index
    %6 = vector.load %arg16[%c0, %5, %c0_1] : memref<2x16x768xf32, #tpu.memory_space<vmem>>, vector<1x8x768xf32>
    %7 = vector.shape_cast %6 : vector<1x8x768xf32> to vector<8x768xf32>
    %c1 = arith.constant 1 : index
    %8 = arith.index_cast %4 : i32 to index
    %c0_2 = arith.constant 0 : index
    %9 = vector.load %arg16[%c1, %8, %c0_2] : memref<2x16x768xf32, #tpu.memory_space<vmem>>, vector<1x8x768xf32>
    %10 = vector.shape_cast %9 : vector<1x8x768xf32> to vector<8x768xf32>
    %cst = arith.constant 0.000000e+00 : f32
    %11 = vector.broadcast %cst : f32 to vector<2x256xf32>
    %12 = vector.extract_strided_slice %7 {offsets = [0, 0], sizes = [1, 768], strides = [1, 1]} : vector<8x768xf32> to vector<1x768xf32>
    %13 = vector.extract_strided_slice %10 {offsets = [0, 0], sizes = [1, 768], strides = [1, 1]} : vector<8x768xf32> to vector<1x768xf32>
    %14 = tpu.concatenate %12, %13 in 0 : vector<1x768xf32>, vector<1x768xf32> -> vector<2x768xf32>
    %15 = arith.truncf %14 : vector<2x768xf32> to vector<2x768xbf16>
    %c0_3 = arith.constant 0 : index
    %c0_4 = arith.constant 0 : index
    %c0_5 = arith.constant 0 : index
    %16 = vector.load %arg6[%c0_3, %c0_4, %c0_5] : memref<8x768x256xbf16, #tpu.memory_space<vmem>>, vector<1x768x256xbf16>
    %17 = vector.shape_cast %16 : vector<1x768x256xbf16> to vector<768x256xbf16>
    %cst_6 = arith.constant dense<0.000000e+00> : vector<2x256xf32>
    %18 = tpu.matmul %15, %17, %cst_6 {dimension_numbers = #tpu.dot_dimension_numbers<[1], [0], [0], [1], [0, 0, 1, 1], [], []>} : vector<2x768xbf16>, vector<768x256xbf16>, vector<2x256xf32> -> vector<2x256xf32>
    %19 = arith.addf %11, %18 : vector<2x256xf32>
    %20 = vector.extract_strided_slice %7 {offsets = [1, 0], sizes = [1, 768], strides = [1, 1]} : vector<8x768xf32> to vector<1x768xf32>
    %21 = vector.extract_strided_slice %10 {offsets = [1, 0], sizes = [1, 768], strides = [1, 1]} : vector<8x768xf32> to vector<1x768xf32>
    %22 = tpu.concatenate %20, %21 in 0 : vector<1x768xf32>, vector<1x768xf32> -> vector<2x768xf32>
    %23 = arith.truncf %22 : vector<2x768xf32> to vector<2x768xbf16>
    %c1_7 = arith.constant 1 : index
    %c0_8 = arith.constant 0 : index
    %c0_9 = arith.constant 0 : index
    %24 = vector.load %arg6[%c1_7, %c0_8, %c0_9] : memref<8x768x256xbf16, #tpu.memory_space<vmem>>, vector<1x768x256xbf16>
    %25 = vector.shape_cast %24 : vector<1x768x256xbf16> to vector<768x256xbf16>
    %cst_10 = arith.constant dense<0.000000e+00> : vector<2x256xf32>
    %26 = tpu.matmul %23, %25, %cst_10 {dimension_numbers = #tpu.dot_dimension_numbers<[1], [0], [0], [1], [0, 0, 1, 1], [], []>} : vector<2x768xbf16>, vector<768x256xbf16>, vector<2x256xf32> -> vector<2x256xf32>
    %27 = arith.addf %19, %26 : vector<2x256xf32>
    %28 = vector.extract_strided_slice %7 {offsets = [2, 0], sizes = [1, 768], strides = [1, 1]} : vector<8x768xf32> to vector<1x768xf32>
    %29 = vector.extract_strided_slice %10 {offsets = [2, 0], sizes = [1, 768], strides = [1, 1]} : vector<8x768xf32> to vector<1x768xf32>
    %30 = tpu.concatenate %28, %29 in 0 : vector<1x768xf32>, vector<1x768xf32> -> vector<2x768xf32>
    %31 = arith.truncf %30 : vector<2x768xf32> to vector<2x768xbf16>
    %c2 = arith.constant 2 : index
    %c0_11 = arith.constant 0 : index
    %c0_12 = arith.constant 0 : index
    %32 = vector.load %arg6[%c2, %c0_11, %c0_12] : memref<8x768x256xbf16, #tpu.memory_space<vmem>>, vector<1x768x256xbf16>
    %33 = vector.shape_cast %32 : vector<1x768x256xbf16> to vector<768x256xbf16>
    %cst_13 = arith.constant dense<0.000000e+00> : vector<2x256xf32>
    %34 = tpu.matmul %31, %33, %cst_13 {dimension_numbers = #tpu.dot_dimension_numbers<[1], [0], [0], [1], [0, 0, 1, 1], [], []>} : vector<2x768xbf16>, vector<768x256xbf16>, vector<2x256xf32> -> vector<2x256xf32>
    %35 = arith.addf %27, %34 : vector<2x256xf32>
    %36 = vector.extract_strided_slice %7 {offsets = [3, 0], sizes = [1, 768], strides = [1, 1]} : vector<8x768xf32> to vector<1x768xf32>
    %37 = vector.extract_strided_slice %10 {offsets = [3, 0], sizes = [1, 768], strides = [1, 1]} : vector<8x768xf32> to vector<1x768xf32>
    %38 = tpu.concatenate %36, %37 in 0 : vector<1x768xf32>, vector<1x768xf32> -> vector<2x768xf32>
    %39 = arith.truncf %38 : vector<2x768xf32> to vector<2x768xbf16>
    %c3 = arith.constant 3 : index
    %c0_14 = arith.constant 0 : index
    %c0_15 = arith.constant 0 : index
    %40 = vector.load %arg6[%c3, %c0_14, %c0_15] : memref<8x768x256xbf16, #tpu.memory_space<vmem>>, vector<1x768x256xbf16>
    %41 = vector.shape_cast %40 : vector<1x768x256xbf16> to vector<768x256xbf16>
    %cst_16 = arith.constant dense<0.000000e+00> : vector<2x256xf32>
    %42 = tpu.matmul %39, %41, %cst_16 {dimension_numbers = #tpu.dot_dimension_numbers<[1], [0], [0], [1], [0, 0, 1, 1], [], []>} : vector<2x768xbf16>, vector<768x256xbf16>, vector<2x256xf32> -> vector<2x256xf32>
    %43 = arith.addf %35, %42 : vector<2x256xf32>
    %44 = vector.extract_strided_slice %7 {offsets = [4, 0], sizes = [1, 768], strides = [1, 1]} : vector<8x768xf32> to vector<1x768xf32>
    %45 = vector.extract_strided_slice %10 {offsets = [4, 0], sizes = [1, 768], strides = [1, 1]} : vector<8x768xf32> to vector<1x768xf32>
    %46 = tpu.concatenate %44, %45 in 0 : vector<1x768xf32>, vector<1x768xf32> -> vector<2x768xf32>
    %47 = arith.truncf %46 : vector<2x768xf32> to vector<2x768xbf16>
    %c4 = arith.constant 4 : index
    %c0_17 = arith.constant 0 : index
    %c0_18 = arith.constant 0 : index
    %48 = vector.load %arg6[%c4, %c0_17, %c0_18] : memref<8x768x256xbf16, #tpu.memory_space<vmem>>, vector<1x768x256xbf16>
    %49 = vector.shape_cast %48 : vector<1x768x256xbf16> to vector<768x256xbf16>
    %cst_19 = arith.constant dense<0.000000e+00> : vector<2x256xf32>
    %50 = tpu.matmul %47, %49, %cst_19 {dimension_numbers = #tpu.dot_dimension_numbers<[1], [0], [0], [1], [0, 0, 1, 1], [], []>} : vector<2x768xbf16>, vector<768x256xbf16>, vector<2x256xf32> -> vector<2x256xf32>
    %51 = arith.addf %43, %50 : vector<2x256xf32>
    %52 = vector.extract_strided_slice %7 {offsets = [5, 0], sizes = [1, 768], strides = [1, 1]} : vector<8x768xf32> to vector<1x768xf32>
    %53 = vector.extract_strided_slice %10 {offsets = [5, 0], sizes = [1, 768], strides = [1, 1]} : vector<8x768xf32> to vector<1x768xf32>
    %54 = tpu.concatenate %52, %53 in 0 : vector<1x768xf32>, vector<1x768xf32> -> vector<2x768xf32>
    %55 = arith.truncf %54 : vector<2x768xf32> to vector<2x768xbf16>
    %c5 = arith.constant 5 : index
    %c0_20 = arith.constant 0 : index
    %c0_21 = arith.constant 0 : index
    %56 = vector.load %arg6[%c5, %c0_20, %c0_21] : memref<8x768x256xbf16, #tpu.memory_space<vmem>>, vector<1x768x256xbf16>
    %57 = vector.shape_cast %56 : vector<1x768x256xbf16> to vector<768x256xbf16>
    %cst_22 = arith.constant dense<0.000000e+00> : vector<2x256xf32>
    %58 = tpu.matmul %55, %57, %cst_22 {dimension_numbers = #tpu.dot_dimension_numbers<[1], [0], [0], [1], [0, 0, 1, 1], [], []>} : vector<2x768xbf16>, vector<768x256xbf16>, vector<2x256xf32> -> vector<2x256xf32>
    %59 = arith.addf %51, %58 : vector<2x256xf32>
    %60 = vector.extract_strided_slice %7 {offsets = [6, 0], sizes = [1, 768], strides = [1, 1]} : vector<8x768xf32> to vector<1x768xf32>
    %61 = vector.extract_strided_slice %10 {offsets = [6, 0], sizes = [1, 768], strides = [1, 1]} : vector<8x768xf32> to vector<1x768xf32>
    %62 = tpu.concatenate %60, %61 in 0 : vector<1x768xf32>, vector<1x768xf32> -> vector<2x768xf32>
    %63 = arith.truncf %62 : vector<2x768xf32> to vector<2x768xbf16>
    %c6 = arith.constant 6 : index
    %c0_23 = arith.constant 0 : index
    %c0_24 = arith.constant 0 : index
    %64 = vector.load %arg6[%c6, %c0_23, %c0_24] : memref<8x768x256xbf16, #tpu.memory_space<vmem>>, vector<1x768x256xbf16>
    %65 = vector.shape_cast %64 : vector<1x768x256xbf16> to vector<768x256xbf16>
    %cst_25 = arith.constant dense<0.000000e+00> : vector<2x256xf32>
    %66 = tpu.matmul %63, %65, %cst_25 {dimension_numbers = #tpu.dot_dimension_numbers<[1], [0], [0], [1], [0, 0, 1, 1], [], []>} : vector<2x768xbf16>, vector<768x256xbf16>, vector<2x256xf32> -> vector<2x256xf32>
    %67 = arith.addf %59, %66 : vector<2x256xf32>
    %68 = vector.extract_strided_slice %7 {offsets = [7, 0], sizes = [1, 768], strides = [1, 1]} : vector<8x768xf32> to vector<1x768xf32>
    %69 = vector.extract_strided_slice %10 {offsets = [7, 0], sizes = [1, 768], strides = [1, 1]} : vector<8x768xf32> to vector<1x768xf32>
    %70 = tpu.concatenate %68, %69 in 0 : vector<1x768xf32>, vector<1x768xf32> -> vector<2x768xf32>
    %71 = arith.truncf %70 : vector<2x768xf32> to vector<2x768xbf16>
    %c7 = arith.constant 7 : index
    %c0_26 = arith.constant 0 : index
    %c0_27 = arith.constant 0 : index
    %72 = vector.load %arg6[%c7, %c0_26, %c0_27] : memref<8x768x256xbf16, #tpu.memory_space<vmem>>, vector<1x768x256xbf16>
    %73 = vector.shape_cast %72 : vector<1x768x256xbf16> to vector<768x256xbf16>
    %cst_28 = arith.constant dense<0.000000e+00> : vector<2x256xf32>
    %74 = tpu.matmul %71, %73, %cst_28 {dimension_numbers = #tpu.dot_dimension_numbers<[1], [0], [0], [1], [0, 0, 1, 1], [], []>} : vector<2x768xbf16>, vector<768x256xbf16>, vector<2x256xf32> -> vector<2x256xf32>
    %75 = arith.addf %67, %74 : vector<2x256xf32>
    %c0_29 = arith.constant 0 : index
    %c0_30 = arith.constant 0 : index
    %76 = vector.load %arg17[%c0_29, %c0_30] : memref<2x256xf32, #tpu.memory_space<vmem>>, vector<2x256xf32>
    %77 = arith.addf %76, %75 : vector<2x256xf32>
    %c0_31 = arith.constant 0 : index
    %c0_32 = arith.constant 0 : index
    %78 = vector.load %arg17[%c0_31, %c0_32] : memref<2x256xf32, #tpu.memory_space<vmem>>, vector<2x256xf32>
    tpu.vector_store %arg17[%c0_31, %c0_32], %77 {strides = array<i32>} : memref<2x256xf32, #tpu.memory_space<vmem>>, vector<2x256xf32>,
    %c1_i32 = arith.constant 1 : i32
    %79 = arith.cmpi eq, %arg0, %c1_i32 : i32
    %80 = arith.extui %79 : i1 to i32
    %c0_i32_33 = arith.constant 0 : i32
    %81 = arith.cmpi ne, %80, %c0_i32_33 : i32
    scf.if %81 {
      %c0_34 = arith.constant 0 : index
      %c0_35 = arith.constant 0 : index
      %82 = vector.load %arg17[%c0_34, %c0_35] : memref<2x256xf32, #tpu.memory_space<vmem>>, vector<2x256xf32>
      %c0_36 = arith.constant 0 : index
      %c0_37 = arith.constant 0 : index
      %83 = vector.load %arg7[%c0_36, %c0_37] : memref<1x256xf32, #tpu.memory_space<vmem>>, vector<1x256xf32>
      %84 = vector.broadcast %83 : vector<1x256xf32> to vector<2x256xf32>
      %85 = arith.addf %82, %84 : vector<2x256xf32>
      %c0_38 = arith.constant 0 : index
      %c0_39 = arith.constant 0 : index
      %86 = vector.load %arg9[%c0_38, %c0_39] : memref<256x256xf32, #tpu.memory_space<vmem>>, vector<256x256xf32>
      %cst_40 = arith.constant dense<0.000000e+00> : vector<2x256xf32>
      %87 = tpu.matmul %85, %86, %cst_40 {dimension_numbers = #tpu.dot_dimension_numbers<[1], [0], [0], [1], [0, 0, 1, 1], [], []>} : vector<2x256xf32>, vector<256x256xf32>, vector<2x256xf32> -> vector<2x256xf32>
      %c0_41 = arith.constant 0 : index
      %c0_42 = arith.constant 0 : index
      %88 = vector.load %arg8[%c0_41, %c0_42] : memref<2x256xf32, #tpu.memory_space<vmem>>, vector<2x256xf32>
      %c0_43 = arith.constant 0 : index
      %c0_44 = arith.constant 0 : index
      %89 = vector.load %arg10[%c0_43, %c0_44] : memref<256x256xf32, #tpu.memory_space<vmem>>, vector<256x256xf32>
      %cst_45 = arith.constant dense<0.000000e+00> : vector<2x256xf32>
      %90 = tpu.matmul %88, %89, %cst_45 {dimension_numbers = #tpu.dot_dimension_numbers<[1], [0], [0], [1], [0, 0, 1, 1], [], []>} : vector<2x256xf32>, vector<256x256xf32>, vector<2x256xf32> -> vector<2x256xf32>
      %91 = arith.addf %87, %90 : vector<2x256xf32>
      %c0_46 = arith.constant 0 : index
      %c0_47 = arith.constant 0 : index
      %92 = vector.load %arg11[%c0_46, %c0_47] : memref<1x256xf32, #tpu.memory_space<vmem>>, vector<1x256xf32>
      %93 = vector.broadcast %92 : vector<1x256xf32> to vector<2x256xf32>
      %94 = arith.addf %91, %93 : vector<2x256xf32>
      %cst_48 = arith.constant 0.000000e+00 : f32
      %95 = vector.broadcast %cst_48 : f32 to vector<2x256xf32>
      %96 = arith.maximumf %94, %95 : vector<2x256xf32>
      %c0_49 = arith.constant 0 : index
      %c0_50 = arith.constant 0 : index
      %97 = vector.load %arg12[%c0_49, %c0_50] : memref<256x5xf32, #tpu.memory_space<vmem>>, vector<256x5xf32>
      %cst_51 = arith.constant dense<0.000000e+00> : vector<2x5xf32>
      %98 = tpu.matmul %96, %97, %cst_51 {dimension_numbers = #tpu.dot_dimension_numbers<[1], [0], [0], [1], [0, 0, 1, 1], [], []>} : vector<2x256xf32>, vector<256x5xf32>, vector<2x5xf32> -> vector<2x5xf32>
      %c0_52 = arith.constant 0 : index
      %c0_53 = arith.constant 0 : index
      %99 = vector.load %arg13[%c0_52, %c0_53] : memref<1x5xf32, #tpu.memory_space<vmem>>, vector<1x5xf32>
      %100 = vector.broadcast %99 : vector<1x5xf32> to vector<2x5xf32>
      %101 = arith.addf %98, %100 : vector<2x5xf32>
      %cst_54 = arith.constant 0.000000e+00 : f32
      %102 = vector.broadcast %cst_54 : f32 to vector<2x5xf32>
      %103 = arith.maximumf %101, %102 : vector<2x5xf32>
      %cst_55 = arith.constant dense<0xFF800000> : vector<2xf32>
      %104 = vector.multi_reduction <maximumf>, %103, %cst_55 [1] : vector<2x5xf32> to vector<2xf32>
      %105 = vector.shape_cast %104 : vector<2xf32> to vector<2x1xf32>
      %106 = vector.broadcast %105 : vector<2x1xf32> to vector<2x5xf32>
      %107 = arith.subf %103, %106 : vector<2x5xf32>
      %108 = math.exp %107 : vector<2x5xf32>
      %cst_56 = arith.constant dense<0.000000e+00> : vector<2xf32>
      %109 = vector.multi_reduction <add>, %108, %cst_56 [1] : vector<2x5xf32> to vector<2xf32>
      %110 = vector.shape_cast %109 : vector<2xf32> to vector<2x1xf32>
      %111 = vector.broadcast %110 : vector<2x1xf32> to vector<2x5xf32>
      %112 = arith.divf %108, %111 : vector<2x5xf32>
      %c0_57 = arith.constant 0 : index
      %c0_58 = arith.constant 0 : index
      %113 = vector.load %arg14[%c0_57, %c0_58] : memref<2x5xf32, #tpu.memory_space<vmem>>, vector<2x5xf32>
      tpu.vector_store %arg14[%c0_57, %c0_58], %112 {strides = array<i32>} : memref<2x5xf32, #tpu.memory_space<vmem>>, vector<2x5xf32>,
    } else {
    }
    return
  }
  func.func @transform_0(%arg0: i32) -> (i32, i32, i32) {
    %c0_i32 = arith.constant 0 : i32
    %c0_i32_0 = arith.constant 0 : i32
    %c0_i32_1 = arith.constant 0 : i32
    %c0_i32_2 = arith.constant 0 : i32
    return %c0_i32, %c0_i32_0, %c0_i32_1 : i32, i32, i32
  }
  func.func @transform_1(%arg0: i32) -> (i32, i32) {
    %c0_i32 = arith.constant 0 : i32
    %c0_i32_0 = arith.constant 0 : i32
    %c0_i32_1 = arith.constant 0 : i32
    return %c0_i32, %c0_i32_0 : i32, i32
  }
  func.func @transform_2(%arg0: i32) -> (i32, i32) {
    %c0_i32 = arith.constant 0 : i32
    %c0_i32_0 = arith.constant 0 : i32
    %c0_i32_1 = arith.constant 0 : i32
    return %c0_i32, %c0_i32_0 : i32, i32
  }
  func.func @transform_3(%arg0: i32) -> (i32, i32, i32) {
    %c0_i32 = arith.constant 0 : i32
    %c0_i32_0 = arith.constant 0 : i32
    %c0_i32_1 = arith.constant 0 : i32
    %c0_i32_2 = arith.constant 0 : i32
    return %c0_i32, %c0_i32_0, %c0_i32_1 : i32, i32, i32
  }
  func.func @transform_4(%arg0: i32) -> (i32, i32) {
    %c0_i32 = arith.constant 0 : i32
    %c0_i32_0 = arith.constant 0 : i32
    %c0_i32_1 = arith.constant 0 : i32
    return %c0_i32, %c0_i32_0 : i32, i32
  }
  func.func @transform_5(%arg0: i32) -> (i32, i32, i32) {
    %c0_i32 = arith.constant 0 : i32
    %c0_i32_0 = arith.constant 0 : i32
    %c0_i32_1 = arith.constant 0 : i32
    return %arg0, %c0_i32, %c0_i32_0 : i32, i32, i32
  }
  func.func @transform_6(%arg0: i32) -> (i32, i32) {
    %c0_i32 = arith.constant 0 : i32
    %c0_i32_0 = arith.constant 0 : i32
    %c0_i32_1 = arith.constant 0 : i32
    return %c0_i32, %c0_i32_0 : i32, i32
  }
  func.func @transform_7(%arg0: i32) -> (i32, i32) {
    %c0_i32 = arith.constant 0 : i32
    %c0_i32_0 = arith.constant 0 : i32
    %c0_i32_1 = arith.constant 0 : i32
    return %c0_i32, %c0_i32_0 : i32, i32
  }
  func.func @transform_8(%arg0: i32) -> (i32, i32) {
    %c0_i32 = arith.constant 0 : i32
    %c0_i32_0 = arith.constant 0 : i32
    %c0_i32_1 = arith.constant 0 : i32
    return %c0_i32, %c0_i32_0 : i32, i32
  }
  func.func @transform_9(%arg0: i32) -> (i32, i32) {
    %c0_i32 = arith.constant 0 : i32
    %c0_i32_0 = arith.constant 0 : i32
    %c0_i32_1 = arith.constant 0 : i32
    return %c0_i32, %c0_i32_0 : i32, i32
  }
  func.func @transform_10(%arg0: i32) -> (i32, i32) {
    %c0_i32 = arith.constant 0 : i32
    %c0_i32_0 = arith.constant 0 : i32
    %c0_i32_1 = arith.constant 0 : i32
    return %c0_i32, %c0_i32_0 : i32, i32
  }
  func.func @transform_11(%arg0: i32) -> (i32, i32) {
    %c0_i32 = arith.constant 0 : i32
    %c0_i32_0 = arith.constant 0 : i32
    %c0_i32_1 = arith.constant 0 : i32
    return %c0_i32, %c0_i32_0 : i32, i32
  }
  func.func @transform_12(%arg0: i32) -> (i32, i32) {
    %c0_i32 = arith.constant 0 : i32
    %c0_i32_0 = arith.constant 0 : i32
    %c0_i32_1 = arith.constant 0 : i32
    return %c0_i32, %c0_i32_0 : i32, i32
  }
  func.func @transform_13(%arg0: i32) -> (i32, i32) {
    %c0_i32 = arith.constant 0 : i32
    %c0_i32_0 = arith.constant 0 : i32
    %c0_i32_1 = arith.constant 0 : i32
    return %c0_i32, %c0_i32_0 : i32, i32
  }
}

</mosaic_0001>

<bundles_post_ra>
// kernel: conv_forward.1
= control target key start
LH: loop header
LB: loop body
LE: loop exit
PB: predicated region body
PF: predicated region fallthrough
CT: control target
= control target key end

     0   :  { %s18122_s0 = inlined_call_operand.vmem [shape: f32[2,4,1024], index: 0, kind: input, shape index: {}]   ;;  %s18123_s1 = inlined_call_operand.vmem [shape: f32[32,16], index: 1, kind: input, shape index: {}]   ;;  %s18124_s2 = inlined_call_operand.vmem [shape: f32[8,1], index: 2, kind: input, shape index: {}]   ;;  %s18125_s3 = inlined_call_operand.vmem [shape: f32[5,32,16], index: 3, kind: input, shape index: {}]   ;;  %s18126_s4 = inlined_call_operand.vmem [shape: f32[16,1], index: 4, kind: input, shape index: {}]   ;;  %s18127_s5 = inlined_call_operand.hbm [shape: bf16[16,768,256], index: 5, kind: input, shape index: {}]   ;;  %s18128_s6 = inlined_call_operand.hbm [shape: f32[1,256], index: 6, kind: input, shape index: {}]   ;;  %s18129_s7 = inlined_call_operand.hbm [shape: f32[2,256], index: 7, kind: input, shape index: {}]   ;;  %s18130_s8 = inlined_call_operand.hbm [shape: f32[256,256], index: 8, kind: input, shape index: {}]   ;;  %s18131_s9 = inlined_call_operand.hbm [shape: f32[256,256], index: 9, kind: input, shape index: {}]   ;;  %s18132_s10 = inlined_call_operand.hbm [shape: f32[1,256], index: 10, kind: input, shape index: {}]   ;;  %s18133_s11 = inlined_call_operand.vmem [shape: f32[256,5], index: 11, kind: input, shape index: {}]   ;;  %s18134_s12 = inlined_call_operand.hbm [shape: f32[1,5], index: 12, kind: input, shape index: {}]   ;;  %s18135_s13 = inlined_call_operand.hbm [shape: f32[2,5], index: 13, kind: output, shape index: {}]  }
   0x1   :  { %18143 = sst [smem:[#allocation47_spill]] %s18128_s6 }
   0x2   :  { %18144 = sst [smem:[#allocation48_spill]] %s18129_s7 }
   0x3   :  { %18145 = sst [smem:[#allocation49_spill]] %s18130_s8 }
   0x4   :  { %18 = vsyncpa [#allocation6], 0 }
   0x5   :  { %20 = vsyncpa [#allocation6 + $0x1], 0 }
   0x6   :  { %21 = vsyncpa [#allocation9], 0 }
   0x7   :  { %22 = vsyncpa [#allocation12], 0 }
   0x8   :  { %23 = vsyncpa [#allocation15], 0 }
   0x9   :  { %24 = vsyncpa [#allocation7], 0  ;;  %s15094_s25 = smov 0   ;;  %s15096_s26 = smov 0  }
   0xa   :  { %s15098_s27 = smov 0   ;;  %s15100_s28 = smov 0  }
   0xb LB: > { %s15005_s29 = smov [#allocation8]   ;;  %s15115_s14 = sadd.s32 4294967295, %s15003_s28   ;;  %s15003_s28 = sphi %s15100_s28, %s18217_s28   ;;  %s14999_s27 = sphi %s15098_s27, %s18216_s27   ;;  %s14995_s26 = sphi %s15096_s26, %s18215_s26   ;;  %s14991_s25 = sphi %s15094_s25, %s18214_s25  }
   0xc   : > { %s362_s30 = sshll.u32 %s15005_s29, 4  ;;  %p11681_p0 = scmp.ge.s32.totalorder %s15003_s28, 1  ;;  %s363_s30 = int_to_ptr.vmem [resolvable:$true] %s362_s30 }
   0xd   : > { %p18138_p1 = scmp.eq.s32.totalorder %s15115_s14, 0  ;;  %p334_p2 = scmp.lt.s32.totalorder %s15003_s28, 3 }
   0xe   : > { %s15006_s16 = smov [#allocation11]   ;;  %s15007_s19 = smov [#allocation14]  }
   0xf   : > { %p15121_p4 = pnand %p11681_p0, %p334_p2  ;;  %s383_s17 = sshll.u32 %s15006_s16, 4  ;;  %s15127_s17 = int_to_ptr.vmem [resolvable:$true] %s383_s17 }
  0x10   : > { %s410_s20 = sshll.u32 %s15007_s19, 4  ;;  %s14756_s22 = scalar_lea.vmem %s363_s30, 32  ;;  %s15135_s20 = int_to_ptr.vmem [resolvable:$true] %s410_s20 }
  0x11   : > { %s18146_s15 = scalar_select %p15121_p4, 1, 0 }
  0x12   : > { %p13449_p5 = pneg %p15121_p4  ;;  %p14757_p8 = scmp.ne.s32.totalorder %s363_s30, %s14756_s22 }
  0x13   : > { %p14764_p11 = scmp.lt.s32.totalorder %s363_s30, %s363_s30  ;;  %p14765_p12 = scmp.lt.s32.totalorder %s14756_s22, %s14756_s22 }
  0x14   : > { %p15131_p6 = pnand %p13449_p5, %p18138_p1 }
  0x15   : > { %p14766_p13 = por %p14765_p12, %p14764_p11 }
  0x16   : > { %p15139_p7 = pneg %p15131_p6 }
  0x18   : > { %p14759_p9 = pnand %p14757_p8, %p15139_p7 }
  0x1a   : > { %p14760_p10 = pneg %p14759_p9 }
  0x1c   : > { %p14767_p0 = pnand %p14766_p13, %p14760_p10 }
  0x1e   : > { %14770 = shalt.err (!%p14767_p0)
}
  0x1f   : > { %s18149_s6 = sld [smem:[#allocation47_spill]]  ;;  %s14782_s29 = scalar_lea.vmem %s15127_s17, 8192 }
  0x20   : > { %p14783_p2 = scmp.ne.s32.totalorder %s15127_s17, %s14782_s29  ;;  %p14790_p9 = scmp.lt.s32.totalorder %s15127_s17, %s15127_s17 }
  0x21   : > { %p14791_p11 = scmp.lt.s32.totalorder %s14782_s29, %s14782_s29 }
  0x22   : > { %p14785_p5 = pnand %p14783_p2, %p15139_p7 }
  0x23   : > { %p14792_p10 = por %p14791_p11, %p14790_p9 }
  0x24   : > { %p14786_p8 = pneg %p14785_p5 }
  0x25   : > { %13452 = dma.hbm_to_vmem [thread:$0]  (!%p15131_p6), %s18149_s6, 32, %s363_s30, [#allocation9]  }
  0x26   : > { %p14793_p12 = pnand %p14792_p10, %p14786_p8 }
  0x28   : > { %14796 = shalt.err (!%p14793_p12)
}
  0x29   : > { %s18136_s16 = smov 256   ;;  %s18137_s19 = smov 16  }
  0x2a   : > { %s18150_s8 = sld [smem:[#allocation49_spill]]  ;;  %s14808_s23 = scalar_lea.vmem %s15135_s20, 32 }
  0x2b   : > { %p14809_p13 = scmp.ne.s32.totalorder %s15135_s20, %s14808_s23  ;;  %p14816_p5 = scmp.lt.s32.totalorder %s15135_s20, %s15135_s20 }
  0x2c   : > { %p14817_p8 = scmp.lt.s32.totalorder %s14808_s23, %s14808_s23 }
  0x2d   : > { %p14811_p0 = pnand %p14809_p13, %p15139_p7 }
  0x2e   : > { %p14818_p9 = por %p14817_p8, %p14816_p5 }
  0x2f   : > { %p14812_p2 = pneg %p14811_p0 }
  0x30   : > { %13458 = dma.hbm_to_vmem [thread:$0]  (!%p15131_p6), %s18150_s8, 8192, %s15127_s17, [#allocation12], %s18136_s16, %s18136_s16, %s18137_s19  }
  0x31   : > { %p14819_p11 = pnand %p14818_p9, %p14812_p2 }
  0x33   : > { %14822 = shalt.err (!%p14819_p11)
}
  0x34   : > { %13464 = dma.hbm_to_vmem [thread:$0]  (!%p15131_p6), %s18132_s10, 32, %s15135_s20, [#allocation15]  }
  0x35   : > { %s15010_s17 = smov [#allocation10]   ;;  %s15011_s22 = smov [#allocation13]  }
  0x36   : > { %s373_s30 = sshll.u32 %s15010_s17, 4  ;;  %s396_s16 = sshll.u32 %s15011_s22, 4  ;;  %s374_s30 = int_to_ptr.vmem [resolvable:$true] %s373_s30  ;;  %s397_s16 = int_to_ptr.vmem [resolvable:$true] %s396_s16 }
  0x37   : > { %s14834_s19 = scalar_lea.vmem %s374_s30, 64  ;;  %p14842_p0 = scmp.lt.s32.totalorder %s374_s30, %s374_s30 }
  0x38   : > { %p14835_p10 = scmp.ne.s32.totalorder %s374_s30, %s14834_s19  ;;  %p14843_p2 = scmp.lt.s32.totalorder %s14834_s19, %s14834_s19 }
  0x3a   : > { %p14837_p12 = pnand %p14835_p10, %p15139_p7  ;;  %p14844_p5 = por %p14843_p2, %p14842_p0 }
  0x3c   : > { %p14838_p13 = pneg %p14837_p12 }
  0x3e   : > { %p14845_p8 = pnand %p14844_p5, %p14838_p13 }
  0x40   : > { %14848 = shalt.err (!%p14845_p8)
}
  0x41   : > { %s18151_s7 = sld [smem:[#allocation48_spill]]  ;;  %s14860_s20 = scalar_lea.vmem %s397_s16, 8192 }
  0x42   : > { %p14861_p9 = scmp.ne.s32.totalorder %s397_s16, %s14860_s20  ;;  %p14868_p10 = scmp.lt.s32.totalorder %s397_s16, %s397_s16 }
  0x43   : > { %p14869_p12 = scmp.lt.s32.totalorder %s14860_s20, %s14860_s20 }
  0x44   : > { %p14863_p11 = pnand %p14861_p9, %p15139_p7 }
  0x45   : > { %p14870_p1 = por %p14869_p12, %p14868_p10 }
  0x46   : > { %p14864_p3 = pneg %p14863_p11 }
  0x47   : > { %13455 = dma.hbm_to_vmem [thread:$0]  (!%p15131_p6), %s18151_s7, 64, %s374_s30, [#allocation9]  }
  0x48   : > { %p14871_p4 = pnand %p14870_p1, %p14864_p3 }
  0x4a   : > { %14874 = shalt.err (!%p14871_p4)
}
  0x4b   : > { %s18152_s19 = smov 16   ;;  %s18153_s29 = smov 256  }
  0x4c   : > { %13461 = dma.hbm_to_vmem [thread:$0]  (!%p15131_p6), %s18131_s9, 8192, %s397_s16, [#allocation12], %s18153_s29, %s18153_s29, %s18152_s19  }
  0x4d   : > { %s15012_s30 = smov [#allocation16]  }
  0x4e   : > { %s424_s23 = sshll.u32 %s15012_s30, 4  ;;  %s425_s23 = int_to_ptr.vmem [resolvable:$true] %s424_s23 }
  0x4f   : > { %s14886_s24 = scalar_lea.vmem %s425_s23, 16  ;;  %s14893_s20 = scalar_lea.vmem %s425_s23, 32 }
  0x50   : > { %p14887_p13 = scmp.ne.s32.totalorder %s425_s23, %s14886_s24  ;;  %p14894_p1 = scmp.lt.s32.totalorder %s425_s23, %s425_s23 }
  0x51   : > { %p14895_p3 = scmp.lt.s32.totalorder %s14893_s20, %s14886_s24 }
  0x52   : > { %p14889_p0 = pnand %p14887_p13, %p15139_p7 }
  0x53   : > { %p14896_p4 = por %p14895_p3, %p14894_p1 }
  0x54   : > { %p14890_p2 = pneg %p14889_p0 }
  0x56   : > { %p14897_p5 = pnand %p14896_p4, %p14890_p2 }
  0x58   : > { %14900 = shalt.err (!%p14897_p5)
}
  0x59   : > { %13467 = dma.hbm_to_vmem [thread:$0]  (!%p15131_p6), %s18134_s12, 16, %s425_s23, [#allocation15]  }
  0x5a   : > { %s15202_s21 = sadd.s32 1, %s15003_s28   ;;  %s142_s18 = sadd.s32 1, %s14999_s27 }
  0x5b   : > { %s139_s16 = ssub.s32 %s15003_s28, %s15202_s21  ;;  %p149_p7 = scmp.ne.s32.totalorder %s14999_s27, %s14995_s26 }
  0x5c   : > { %p140_p8 = scmp.eq.s32.totalorder %s139_s16, 0  ;;  %p150_p9 = scmp.eq.s32.totalorder %s15003_s28, 0 }
  0x5d   : > { %p155_p11 = scmp.ne.s32.totalorder %s14995_s26, %s14991_s25  ;;  %p13478_p10 = scmp.lt.s32.totalorder %s15003_s28, 2 }
  0x5e   : > { %s15214_s6 = scalar_select %p140_p8, %s14999_s27, %s142_s18  }
  0x5f   : > { %p151_p12 = por %p150_p9, %p149_p7  ;;  %p18154_p13 = scmp.eq.s32.totalorder %s15115_s14, 0 }
  0x60   : > { %s435_s29 = sand.u32 1, %s14999_s27   ;;  %s13417_s22 = smul.u32 98304, %s15003_s28 }
  0x61   : > { %p15218_p0 = por %p18154_p13, %p155_p11  ;;  %s13416_s30 = smul.u32 6144, %s435_s29 }
  0x62   : > { %s15227_s20 = scalar_lea.hbm %s18127_s5, %s13417_s22  ;;  %p15229_p6 = pnand %p13478_p10, %p151_p12 }
  0x63   : > { %s18155_s19 = scalar_select %p15218_p0, 1, 0 }
  0x64   : > { %s439_s17 = scalar_lea.vmem [#allocation5], %s13416_s30  ;;  %s15235_s16 = scalar_lea.sflag [#allocation6], %s435_s29 }
  0x65   : > { %s447_s18 = sshll.u32 %s439_s17, 4  ;;  %s14901_s28 = scalar_lea.hbm %s15227_s20, 98304  ;;  %s15233_s18 = int_to_ptr.vmem [resolvable:$true] %s447_s18 }
  0x66   : > { %p14902_p2 = scmp.ne.s32.totalorder %s15227_s20, %s14901_s28  ;;  %p14903_p1 = pneg %p15229_p6 }
  0x67   : > { %s14906_s24 = scalar_lea.hbm %s18127_s5, 196608  ;;  %p14907_p5 = scmp.lt.s32.totalorder %s15227_s20, %s18127_s5 }
  0x68   : > { %p14904_p3 = pnand %p14903_p1, %p14902_p2  ;;  %p14908_p7 = scmp.lt.s32.totalorder %s14906_s24, %s14901_s28 }
  0x6a   : > { %p14905_p4 = pneg %p14904_p3  ;;  %p14909_p8 = por %p14908_p7, %p14907_p5 }
  0x6c   : > { %p14910_p9 = pnand %p14909_p8, %p14905_p4 }
  0x6e   : > { %14913 = shalt.err (!%p14910_p9)
}
  0x6f   : > { %s14914_s29 = scalar_lea.vmem %s15233_s18, 98304  ;;  %s15013_s30 = smov [#allocation5]  }
  0x70   : > { %p14915_p11 = scmp.ne.s32.totalorder %s15233_s18, %s14914_s29  ;;  %s14919_s17 = sshll.u32 %s15013_s30, 4  ;;  %s14920_s17 = int_to_ptr.vmem [resolvable:$false] %s14919_s17 }
  0x71   : > { %s14921_s22 = scalar_lea.vmem %s14920_s17, 196608  ;;  %p14922_p13 = scmp.lt.s32.totalorder %s15233_s18, %s14920_s17 }
  0x72   : > { %p14917_p10 = pnand %p14915_p11, %p14903_p1  ;;  %p14923_p2 = scmp.lt.s32.totalorder %s14921_s22, %s14914_s29 }
  0x74   : > { %p14918_p12 = pneg %p14917_p10  ;;  %p14924_p3 = por %p14923_p2, %p14922_p13 }
  0x76   : > { %p14925_p0 = pnand %p14924_p3, %p14918_p12 }
  0x78   : > { %14928 = shalt.err (!%p14925_p0)
}
  0x79   : > { %s15014_s7 = smov 128   ;;  %s15015_s8 = smov 8  }
  0x7a   : > { %13471 = dma.hbm_to_vmem [thread:$0]  (!%p15229_p6), %s15227_s20, 98304, %s15233_s18, %s15235_s16, %s15014_s7, %s15014_s7, %s15015_s8  }
  0x7b   : > { %p18157_p1 = scmp.ne.s32.totalorder %s18146_s15, 0 }
  0x7c   : > { %s461_s28 = sand.u32 (!%p18157_p1), 1, %s14995_s26   ;;  %p18158_p4 = scmp.ne.s32.totalorder (!%p18157_p1), %s18155_s19, 0 }
  0x7d   : > { %459 = sbr.rel (%p18157_p1) target bundleno = 3200 (0xc80), region = 72  ;;  %s462_s24 = scalar_lea.sflag (!%p18157_p1), [#allocation6], %s461_s28 }
  0x7e   : > { %s13418_s23 = smul.u32 (!%p18157_p1), 6144, %s461_s28 }
  0x80   : > { %s15259_s29 = scalar_lea.vmem (!%p18157_p1), [#allocation5], %s13418_s23 }
  0x82   : > { %14970 = dma.done.wait (%p18158_p4), %s462_s24, 98304  }
  0x83   : > { %14972 = vsyncadd (%p18158_p4), %s462_s24, 4294868992  ;;  %p18159_p0 = scmp.eq.s32.totalorder %s15115_s14, 0 }
  0x85   : > { %14974 = dma.done.wait (%p18159_p0), [#allocation9], 96   ;;  %p18160_p6 = pmov %p18159_p0 }
  0x86   : > { %p18161_p5 = pmov %p18159_p0 }
  0x87   : > { %14976 = vsyncadd (%p18160_p6), [#allocation9], 4294967200 }
  0x88   : > { %14978 = dma.done.wait (%p18161_p5), [#allocation12], 16384   ;;  %p18162_p7 = pmov %p18159_p0 }
  0x89   : > { %p18163_p8 = pmov %p18159_p0 }
  0x8a   : > { %14980 = vsyncadd (%p18162_p7), [#allocation12], 4294950912 }
  0x8b   : > { %14982 = dma.done.wait (%p18163_p8), [#allocation15], 48   ;;  %p18164_p9 = pmov %p18159_p0 }
  0x8c   : > { %p18165_p11 = scmp.ne.s32.totalorder %s15115_s14, 0 }
  0x8d   : > { %14984 = vsyncadd (%p18164_p9), [#allocation15], 4294967248 }
  0x8e   : > { %531 = sbr.rel (%p18165_p11) target bundleno = 1425 (0x591), region = 104 }
  0x93   : > { %v15282_v0 = vld [vmem:[%s18122_s0] sm:$0xff]  ;;  %v15287_v1 = vld [vmem:[%s18122_s0 + $0x8] sm:$0xff]  ;;  %s15016_s18 = smov 125   ;;  %s15017_s16 = smov 126   ;;  %v15018_v5 = vmov 0.0   ;;  %v15323_v7 = vld [vmem:[%s18122_s0 + $0x10] sm:$0xff] }
  0x94   : > { %612 = vrot.lane.b32.xlu1 %v15282_v0, %s15016_s18  ;;  %v15293_v2 = vcombine.high %v15282_v0, %v15282_v0  ;;  %v551_v3 = vcombine.low %v15287_v1, %v15287_v1  ;;  %v550_v4 = vcombine.low %v15282_v0, %v15282_v0  ;;  %746 = vmatprep.mubr.f32.mxu1 %v15018_v5  ;;  %s15019_s30 = smov 127   ;;  %v15344_v10 = vld [vmem:[%s18122_s0 + $0x18] sm:$0xf]  ;;  %v533_v12 = vld [vmem:[%s18124_s2] sm:$0xff]  ;;  %v15020_v13 = vmov 0   ;;  %v15372_v33 = vld [vmem:[%s18123_s1 + $0x10] sm:$0xff] }
  0x95   : > { %532 = vst [vmem:[#allocation4] sm:$0xf] %v15018_v5  ;;  %734 = vmatprep.mubr.f32.mxu0 %v15018_v5  ;;  %v15313_v6 = vcombine.high %v15287_v1, %v15287_v1  ;;  %v552_v8 = vcombine.low %v15323_v7, %v15323_v7  ;;  %v15335_v9 = vcombine.high %v15323_v7, %v15323_v7  ;;  %vm624_vm0 = vcmask 1022976   ;;  %v15377_v34 = vld [vmem:[%s18123_s1] sm:$0xff]  ;;  %v15389_v38 = vld [vmem:[%s18123_s1 + $0x18] sm:$0xff]  ;;  %v654_v39 = vld [vmem:[%s18123_s1 + $0x8] sm:$0xff] }
  0x96   : > { %584 = vrot.lane.b32.xlu0 %v15293_v2, %s15017_s16  ;;  %v553_v11 = vcombine.low %v15344_v10, %v15344_v10  ;;  %13537 = vset.pattern.permute.xlu1 %v15020_v13  ;;  %vm596_vm1 = vcmask 1031168   ;;  %vm638_vm2 = vcmask 1043456   ;;  %vm568_vm3 = vcmask 1039360   ;;  %s15021_s8 = smov 124  }
  0x97   : > { %13538 = vset.pattern.permute.xlu0 %v15020_v13  ;;  %vm657_vm4 = vcmask 130048   ;;  %vm1075_vm5 = vcmask 31744   ;;  %vm2484_vm6 = vcmask 1014784  }
  0x98   : > { %614 = vrot.lane.b32.xlu1 %v551_v3, %s15016_s18 }
  0x9a   : > { %586 = vrot.lane.b32.xlu0 %v15287_v1, %s15017_s16 }
  0x9c   : > { %610 = vrot.lane.b32.xlu1 %v550_v4, %s15016_s18 }
  0x9e   : > { %582 = vrot.lane.b32.xlu0 %v15282_v0, %s15017_s16 }
  0xa0   : > { %558 = vrot.lane.b32.xlu1 %v551_v3, %s15019_s30 }
  0xa2   : > { %556 = vrot.lane.b32.xlu0 %v15282_v0, %s15019_s30 }
  0xa4   : > { %588 = vrot.lane.b32.xlu1 %v15313_v6, %s15017_s16 }
  0xa6   : > { %554 = vrot.lane.b32.xlu0 %v550_v4, %s15019_s30 }
  0xa8   : > { %616 = vrot.lane.b32.xlu1 %v15287_v1, %s15016_s18 }
  0xaa   : > { %590 = vrot.lane.b32.xlu0 %v15323_v7, %s15017_s16 }
  0xac   : > { %560 = vrot.lane.b32.xlu1 %v15287_v1, %s15019_s30 }
  0xae   : > { %618 = vrot.lane.b32.xlu0 %v552_v8, %s15016_s18 }
  0xb0   : > { %592 = vrot.lane.b32.xlu1 %v15335_v9, %s15017_s16 }
  0xb2   : > { %562 = vrot.lane.b32.xlu0 %v552_v8, %s15019_s30 }
  0xb4   : > { %620 = vrot.lane.b32.xlu1 %v15323_v7, %s15016_s18 }
  0xb6   : > { %594 = vrot.lane.b32.xlu0 %v15344_v10, %s15017_s16 }
  0xb8   : > { %564 = vrot.lane.b32.xlu1 %v15323_v7, %s15019_s30 }
  0xba   : > { %622 = vrot.lane.b32.xlu0 %v553_v11, %s15016_s18 }
  0xbc   : > { %1031 = vperm.xlu1 %13537, %v533_v12  }
  0xbe   : > { %566 = vrot.lane.b32.xlu0 %v553_v11, %s15019_s30 }
 0x106   : > { %v613_v14 = vpop.permute.xlu1 %612 }
 0x108   : > { %v585_v15 = vpop.permute.xlu0 %584 }
 0x10a   : > { %v615_v16 = vpop.permute.xlu1 %614 }
 0x10b   : > { %v626_v17 = vsel %vm624_vm0, %v613_v14, %v615_v16 }
 0x10c   : > { %v587_v18 = vpop.permute.xlu0 %586 }
 0x10d   : > { %v598_v19 = vsel %vm596_vm1, %v585_v15, %v587_v18 }
 0x10e   : > { %v611_v20 = vpop.permute.xlu1 %610  ;;  %v647_v21 = vsel %vm638_vm2, %v598_v19, %v626_v17 }
 0x10f   : > { %698 = vmatprep.subr.mxu0 %v647_v21  ;;  %13412 = vmatprep.subr.mxu1 %v647_v21  ;;  %v625_v23 = vsel %vm624_vm0, %v611_v20, %v613_v14 }
 0x110   : > { %v583_v22 = vpop.permute.xlu0 %582 }
 0x111   : > { %v597_v24 = vsel %vm596_vm1, %v583_v22, %v585_v15 }
 0x112   : > { %v559_v25 = vpop.permute.xlu1 %558  ;;  %v646_v26 = vsel %vm638_vm2, %v597_v24, %v625_v23 }
 0x113   : > { %699 = vmatpush1.msra.mxu0 %v646_v26  ;;  %13414 = vmatpush1.msra.mxu1 %v646_v26 }
 0x114   : > { %v557_v27 = vpop.permute.xlu0 %556 }
 0x115   : > { %v570_v28 = vsel %vm568_vm3, %v557_v27, %v559_v25 }
 0x116   : > { %v589_v29 = vpop.permute.xlu1 %588  ;;  %v640_v30 = vsel %vm638_vm2, %v15293_v2, %v570_v28 }
 0x117   : > { %700 = vmatprep.subr.mxu0 %v640_v30  ;;  %13413 = vmatprep.subr.mxu1 %v640_v30  ;;  %v599_v45 = vsel %vm596_vm1, %v587_v18, %v589_v29 }
 0x118   : > { %v555_v31 = vpop.permute.xlu0 %554 }
 0x119   : > { %v569_v32 = vsel %vm568_vm3, %v555_v31, %v557_v27 }
 0x11a   : > { %v617_v35 = vpop.permute.xlu1 %616  ;;  %v639_v36 = vsel %vm638_vm2, %v15282_v0, %v569_v32 }
 0x11b   : > { %701 = vmatpush1.msra.mxu0 %v639_v36  ;;  %13415 = vmatpush1.msra.mxu1 %v639_v36  ;;  %v627_v41 = vsel %vm624_vm0, %v615_v16, %v617_v35 }
 0x11c   : > { %v591_v37 = vpop.permute.xlu0 %590  ;;  %11702 = vmatmul.mubr.msk.f32.vlgmr.msra.gmra.mxu1 %vm657_vm4, %v15372_v33  ;;  %11700 = vmatmul.mubr.msk.f32.vlgmr.msra.gmra.mxu0 %vm657_vm4, %v15377_v34  ;;  %v648_v48 = vsel %vm638_vm2, %v599_v45, %v627_v41 }
 0x11d   : > { %752 = vmatprep.mubr.f32.mxu1 %v15018_v5  ;;  %740 = vmatprep.mubr.f32.mxu0 %v15018_v5  ;;  %v600_v43 = vsel %vm596_vm1, %v589_v29, %v591_v37 }
 0x11e   : > { %v561_v40 = vpop.permute.xlu1 %560 }
 0x11f   : > { %v571_v49 = vsel %vm568_vm3, %v559_v25, %v561_v40 }
 0x120   : > { %v619_v42 = vpop.permute.xlu0 %618  ;;  %11703 = vmatmul.mubr.msk.f32.gmra.mxu1 %vm657_vm4, %v15389_v38  ;;  %11701 = vmatmul.mubr.msk.f32.gmra.mxu0 %vm657_vm4, %v654_v39  ;;  %v641_v54 = vsel %vm638_vm2, %v15287_v1, %v571_v49 }
 0x121   : > { %v628_v44 = vsel %vm624_vm0, %v617_v35, %v619_v42  ;;  %823 = vmatprep.mubr.f32.mxu1 %v15018_v5  ;;  %912 = vmatprep.mubr.f32.mxu0 %v15018_v5 }
 0x122   : > { %v593_v46 = vpop.permute.xlu1 %592  ;;  %v649_v47 = vsel %vm638_vm2, %v600_v43, %v628_v44 }
 0x123   : > { %787 = vmatprep.subr.mxu1 %v649_v47  ;;  %v601_v62 = vsel %vm596_vm1, %v591_v37, %v593_v46 }
 0x124   : > { %v563_v50 = vpop.permute.xlu0 %562  ;;  %788 = vmatpush1.msra.mxu1 %v648_v48 }
 0x125   : > { %v572_v51 = vsel %vm568_vm3, %v561_v40, %v563_v50 }
 0x126   : > { %v642_v52 = vsel %vm638_vm2, %v15313_v6, %v572_v51  ;;  %v621_v53 = vpop.permute.xlu1 %620 }
 0x127   : > { %789 = vmatprep.subr.mxu1 %v642_v52  ;;  %v629_v56 = vsel %vm624_vm0, %v619_v42, %v621_v53 }
 0x128   : > { %v595_v55 = vpop.permute.xlu0 %594  ;;  %790 = vmatpush1.msra.mxu1 %v641_v54  ;;  %v650_v0 = vsel %vm638_vm2, %v601_v62, %v629_v56 }
 0x129   : > { %11704 = vmatmul.mubr.msk.f32.vlgmr.msra.gmra.mxu1 %vm657_vm4, %v15377_v34  ;;  %v602_v58 = vsel %vm596_vm1, %v593_v46, %v595_v55 }
 0x12a   : > { %829 = vmatprep.mubr.f32.mxu1 %v15018_v5  ;;  %v565_v59 = vpop.permute.xlu1 %564 }
 0x12b   : > { %v573_v1 = vsel %vm568_vm3, %v563_v50, %v565_v59 }
 0x12c   : > { %v623_v57 = vpop.permute.xlu0 %622  ;;  %v643_v8 = vsel %vm638_vm2, %v15323_v7, %v573_v1 }
 0x12d   : > { %v630_v60 = vsel %vm624_vm0, %v621_v53, %v623_v57  ;;  %11705 = vmatmul.mubr.msk.f32.gmra.mxu1 %vm657_vm4, %v654_v39  ;;  %v652_v61 = vsel %vm638_vm2, %v595_v55, %v623_v57 }
 0x12e   : > { %13392 = vmatprep.subr.mxu1 %v652_v61  ;;  %v651_v63 = vsel %vm638_vm2, %v602_v58, %v630_v60  ;;  %835 = vmatprep.mubr.f32.mxu1 %v15018_v5 }
 0x12f   : > { %876 = vmatprep.subr.mxu0 %v651_v63  ;;  %13393 = vmatpush3.msra.mxu1 %v652_v61 }
 0x130   : > { %v567_v2 = vpop.permute.xlu0 %566  ;;  %877 = vmatpush1.msra.mxu0 %v650_v0 }
 0x131   : > { %v574_v3 = vsel %vm568_vm3, %v565_v59, %v567_v2  ;;  %11706 = vmatmul.mubr.msk.f32.gmra.mxu1 %vm657_vm4, %v15372_v33  ;;  %v645_v4 = vsel %vm638_vm2, %v15344_v10, %v567_v2 }
 0x132   : > { %13394 = vmatprep.subr.mxu1 %v645_v4  ;;  %v644_v6 = vsel %vm638_vm2, %v15335_v9, %v574_v3  ;;  %841 = vmatprep.mubr.f32.mxu1 %v15018_v5 }
 0x133   : > { %878 = vmatprep.subr.mxu0 %v644_v6  ;;  %13395 = vmatpush3.msra.mxu1 %v645_v4 }
 0x134   : > { %879 = vmatpush1.msra.mxu0 %v643_v8 }
 0x135   : > { %11707 = vmatmul.mubr.msk.f32.gmra.mxu1 %vm657_vm4, %v15389_v38  ;;  %11708 = vmatmul.mubr.msk.f32.vlgmr.msra.gmra.mxu0 %vm657_vm4, %v15377_v34 }
 0x136   : > { %918 = vmatprep.mubr.f32.mxu0 %v15018_v5  ;;  %13396 = vmatprep.mubr.msk.f32.mxu1 %vm657_vm4, %v15377_v34 }
 0x137   : > { %v15456_v12 = vpop.permute.xlu1 %1031 }
 0x139   : > { %11709 = vmatmul.mubr.msk.f32.gmra.mxu0 %vm657_vm4, %v654_v39  ;;  %13397 = vmatmul.mubr.msk.f32.vlgmr.msra.gmra.mxu1 %vm657_vm4, %v654_v39 }
 0x13a   : > { %924 = vmatprep.mubr.f32.mxu0 %v15018_v5  ;;  %13399 = vmatprep.mubr.msk.f32.mxu1 %vm657_vm4, %v15372_v33 }
 0x13d   : > { %11710 = vmatmul.mubr.msk.f32.gmra.mxu0 %vm657_vm4, %v15372_v33  ;;  %13400 = vmatmul.mubr.msk.f32.gmra.mxu1 %vm657_vm4, %v15389_v38 }
 0x13e   : > { %930 = vmatprep.mubr.f32.mxu0 %v15018_v5  ;;  %1249 = vmatprep.mubr.f32.mxu1 %v15018_v5 }
 0x141   : > { %11711 = vmatmul.mubr.msk.f32.gmra.mxu0 %vm657_vm4, %v15389_v38 }
 0x142   : > { %1338 = vmatprep.mubr.f32.mxu0 %v15018_v5 }
 0x1dc   : > { %v748_v7 = vpop.f32.mrf.mxu1  ;;  %v736_v9 = vpop.f32.mrf.mxu0 }
 0x1de   : > { %v750_v10 = vpop.f32.mrf.mxu1  ;;  %v738_v11 = vpop.f32.mrf.mxu0 }
 0x1e0   : > { %v754_v13 = vpop.f32.mrf.mxu1  ;;  %v742_v14 = vpop.f32.mrf.mxu0 }
 0x1e1   : > { %v1048_v15 = vmax.f32 %v748_v7, %v754_v13  ;;  %v1022_v39 = vmax.f32 %v736_v9, %v742_v14 }
 0x1e2   : > { %v756_v16 = vpop.f32.mrf.mxu1  ;;  %v744_v17 = vpop.f32.mrf.mxu0 }
 0x1e3   : > { %v1049_v18 = vmax.f32 %v750_v10, %v756_v16  ;;  %v1023_v19 = vmax.f32 %v738_v11, %v744_v17  ;;  %v1055_v20 = vadd.f32 %v1048_v15, %v15456_v12  ;;  %v1034_v47 = vadd.f32 %v15456_v12, %v1022_v39  ;;  %v15642_v39 = vld [vmem:[%s18125_s3 + $0x20] sm:$0xff] }
 0x1e5   : > { %v1056_v21 = vadd.f32 %v1049_v18, %v15456_v12  ;;  %v1035_v22 = vadd.f32 %v15456_v12, %v1023_v19  ;;  %v15461_v23 = vmax.f32 %v1055_v20, 0.0  ;;  %v15489_v57 = vmax.f32 %v1034_v47, 0.0  ;;  %v15600_v19 = vld [vmem:[%s18122_s0 + $0x20] sm:$0xff] }
 0x1e6   : > { %v15607_v20 = vcombine.high %v15600_v19, %v15600_v19 }
 0x1e7   : > { %v15463_v24 = vmax.f32 %v1035_v22, 0.0  ;;  %1135 = vrot.lane.b32.xlu0 %v15461_v23, %s15019_s30  ;;  %v15467_v25 = vmax.f32 %v1056_v21, 0.0  ;;  %v15615_v22 = vld [vmem:[%s18122_s0 + $0x28] sm:$0xff] }
 0x1e9   : > { %v825_v26 = vpop.f32.mrf.mxu1  ;;  %1123 = vrot.lane.b32.xlu1 %v15463_v24, %s15019_s30 }
 0x1eb   : > { %v827_v27 = vpop.f32.mrf.mxu1  ;;  %1137 = vrot.lane.b32.xlu0 %v15467_v25, %s15019_s30 }
 0x1ed   : > { %v831_v28 = vpop.f32.mrf.mxu1 }
 0x1ee   : > { %v1024_v29 = vmax.f32 %v825_v26, %v831_v28 }
 0x1ef   : > { %v833_v30 = vpop.f32.mrf.mxu1 }
 0x1f0   : > { %v1036_v31 = vadd.f32 %v15456_v12, %v1024_v29  ;;  %v1025_v32 = vmax.f32 %v827_v27, %v833_v30  ;;  %v2886_v27 = vcombine.low %v15615_v22, %v15615_v22 }
 0x1f1   : > { %v837_v33 = vpop.f32.mrf.mxu1 }
 0x1f2   : > { %v15474_v34 = vmax.f32 %v1036_v31, 0.0  ;;  %v1037_v35 = vadd.f32 %v15456_v12, %v1025_v32  ;;  %v2885_v31 = vcombine.low %v15600_v19, %v15600_v19 }
 0x1f3   : > { %v839_v36 = vpop.f32.mrf.mxu1 }
 0x1f4   : > { %1125 = vrot.lane.b32.xlu0 %v15474_v34, %s15019_s30  ;;  %v15479_v40 = vmax.f32 %v1037_v35, 0.0 }
 0x1f5   : > { %v843_v37 = vpop.f32.mrf.mxu1  ;;  %v914_v38 = vpop.f32.mrf.mxu0 }
 0x1f6   : > { %v1050_v41 = vmax.f32 %v837_v33, %v843_v37  ;;  %v15634_v33 = vcombine.high %v15615_v22, %v15615_v22 }
 0x1f7   : > { %v845_v42 = vpop.f32.mrf.mxu1  ;;  %v916_v43 = vpop.f32.mrf.mxu0 }
 0x1f8   : > { %v1057_v44 = vadd.f32 %v1050_v41, %v15456_v12  ;;  %1127 = vrot.lane.b32.xlu0 %v15479_v40, %s15019_s30  ;;  %v1051_v52 = vmax.f32 %v839_v36, %v845_v42 }
 0x1f9   : > { %v920_v45 = vpop.f32.mrf.mxu0  ;;  %v13398_v46 = vpop.f32.mrf.mxu1 }
 0x1fa   : > { %v15485_v48 = vmax.f32 %v1057_v44, 0.0  ;;  %v1026_v49 = vmax.f32 %v914_v38, %v920_v45  ;;  %v1058_v63 = vadd.f32 %v1051_v52, %v15456_v12  ;;  %v15654_v44 = vld [vmem:[%s18125_s3 + $0x28] sm:$0xff]  ;;  %v15661_v45 = vld [vmem:[%s18122_s0 + $0x30] sm:$0xff] }
 0x1fb   : > { %v922_v50 = vpop.f32.mrf.mxu0  ;;  %v1003_v51 = vpop.f32.mrf.mxu1 }
 0x1fc   : > { %v1027_v53 = vmax.f32 %v916_v43, %v922_v50  ;;  %v1028_v54 = vmax.f32 %v1003_v51, %v13398_v46  ;;  %1139 = vrot.lane.b32.xlu1 %v15485_v48, %s15019_s30  ;;  %v1038_v58 = vadd.f32 %v15456_v12, %v1026_v49  ;;  %v15505_v9 = vmax.f32 %v1058_v63, 0.0  ;;  %v15673_v50 = vld [vmem:[%s18125_s3 + $0x30] sm:$0xff] }
 0x1fd   : > { %v926_v55 = vpop.f32.mrf.mxu0  ;;  %v13401_v56 = vpop.f32.mrf.mxu1  ;;  %v2887_v49 = vcombine.low %v15661_v45, %v15661_v45 }
 0x1fe   : > { %v1039_v59 = vadd.f32 %v15456_v12, %v1027_v53  ;;  %v1040_v60 = vadd.f32 %v15456_v12, %v1028_v54  ;;  %v15499_v4 = vmax.f32 %v1038_v58, 0.0 }
 0x1ff   : > { %v928_v61 = vpop.f32.mrf.mxu0  ;;  %v1013_v62 = vpop.f32.mrf.mxu1 }
 0x200   : > { %v15495_v0 = vmax.f32 %v1039_v59, 0.0  ;;  %v1047_v1 = vmax.f32 %v1040_v60, 0.0  ;;  %v1054_v2 = vmax.f32 %v1013_v62, %v13401_v56  ;;  %1121 = vrot.lane.b32.xlu1 %v15489_v57, %s15019_s30  ;;  %v11719_v60 = vld [vmem:[%s18125_s3 + $0x38] sm:$0xff]  ;;  %v15705_v62 = vcombine.high %v15661_v45, %v15661_v45 }
 0x201   : > { %v932_v3 = vpop.f32.mrf.mxu0 }
 0x202   : > { %1076 = vst.msk [vmem:[#allocation2 + $0x30] sm:$0xff] %vm1075_vm5, %v1047_v1  ;;  %v1061_v6 = vadd.f32 %v1054_v2, %v15456_v12  ;;  %v1052_v8 = vmax.f32 %v926_v55, %v932_v3  ;;  %1131 = vrot.lane.b32.xlu0 %v15495_v0, %s15019_s30 }
 0x203   : > { %v934_v7 = vpop.f32.mrf.mxu0 }
 0x204   : > { %v1068_v10 = vmax.f32 %v1061_v6, 0.0  ;;  %v1059_v11 = vadd.f32 %v1052_v8, %v15456_v12  ;;  %v1053_v13 = vmax.f32 %v928_v61, %v934_v7  ;;  %1129 = vrot.lane.b32.xlu1 %v15499_v4, %s15019_s30  ;;  %v15698_v61 = vld [vmem:[%s18122_s0 + $0x38] sm:$0xf] }
 0x205   : > { %v2888_v2 = vcombine.low %v15698_v61, %v15698_v61 }
 0x206   : > { %1083 = vst.msk [vmem:[#allocation2 + $0x68] sm:$0xff] %vm1075_vm5, %v1068_v10  ;;  %v15511_v14 = vmax.f32 %v1059_v11, 0.0  ;;  %v1060_v15 = vadd.f32 %v1053_v13, %v15456_v12  ;;  %1141 = vrot.lane.b32.xlu0 %v15505_v9, %s15019_s30  ;;  %v1085_v11 = vld [vmem:[%s18125_s3 + $0x8] sm:$0xff] }
 0x208   : > { %v15516_v16 = vmax.f32 %v1060_v15, 0.0  ;;  %1143 = vrot.lane.b32.xlu1 %v15511_v14, %s15019_s30 }
 0x209   : > { %v1105_v18 = vld [vmem:[#allocation2 + $0x30] sm:$0xff] }
 0x20a   : > { %1145 = vrot.lane.b32.xlu0 %v15516_v16, %s15019_s30 }
 0x20d   : > { %v1106_v17 = vld [vmem:[#allocation2 + $0x68] sm:$0xff] }
 0x20e   : > { %1147 = vrot.lane.b32.xlu1 %v1106_v17, %s15019_s30  ;;  %1752 = vrot.lane.b32.xlu0 %v15467_v25, %s15017_s16 }
 0x212   : > { %1133 = vrot.lane.b32.xlu1 %v1105_v18, %s15019_s30  ;;  %1750 = vrot.lane.b32.xlu0 %v15461_v23, %s15017_s16 }
 0x216   : > { %1754 = vrot.lane.b32.xlu1 %v15485_v48, %s15017_s16  ;;  %1740 = vrot.lane.b32.xlu0 %v15474_v34, %s15017_s16 }
 0x21a   : > { %1738 = vrot.lane.b32.xlu1 %v15463_v24, %s15017_s16  ;;  %1756 = vrot.lane.b32.xlu0 %v15505_v9, %s15017_s16 }
 0x21e   : > { %1736 = vrot.lane.b32.xlu1 %v15489_v57, %s15017_s16  ;;  %1742 = vrot.lane.b32.xlu0 %v15479_v40, %s15017_s16 }
 0x222   : > { %1758 = vrot.lane.b32.xlu1 %v15511_v14, %s15017_s16  ;;  %1760 = vrot.lane.b32.xlu0 %v15516_v16, %s15017_s16 }
 0x226   : > { %1744 = vrot.lane.b32.xlu1 %v15499_v4, %s15017_s16  ;;  %1746 = vrot.lane.b32.xlu0 %v15495_v0, %s15017_s16 }
 0x22a   : > { %1748 = vrot.lane.b32.xlu1 %v1105_v18, %s15017_s16  ;;  %2112 = vrot.lane.b32.xlu0 %v15467_v25, %s15016_s18 }
 0x22e   : > { %2114 = vrot.lane.b32.xlu1 %v15485_v48, %s15016_s18  ;;  %2110 = vrot.lane.b32.xlu0 %v15461_v23, %s15016_s18 }
 0x232   : > { %2098 = vrot.lane.b32.xlu1 %v15463_v24, %s15016_s18  ;;  %2100 = vrot.lane.b32.xlu0 %v15474_v34, %s15016_s18 }
 0x236   : > { %2116 = vrot.lane.b32.xlu1 %v15505_v9, %s15016_s18  ;;  %2118 = vrot.lane.b32.xlu0 %v15511_v14, %s15016_s18 }
 0x23a   : > { %2096 = vrot.lane.b32.xlu1 %v15489_v57, %s15016_s18  ;;  %2102 = vrot.lane.b32.xlu0 %v15479_v40, %s15016_s18 }
 0x23e   : > { %1762 = vrot.lane.b32.xlu1 %v1106_v17, %s15017_s16  ;;  %2120 = vrot.lane.b32.xlu0 %v15516_v16, %s15016_s18 }
 0x242   : > { %2104 = vrot.lane.b32.xlu1 %v15499_v4, %s15016_s18  ;;  %2106 = vrot.lane.b32.xlu0 %v15495_v0, %s15016_s18 }
 0x246   : > { %2108 = vrot.lane.b32.xlu1 %v1105_v18, %s15016_s18  ;;  %2472 = vrot.lane.b32.xlu0 %v15467_v25, %s15021_s8 }
 0x24a   : > { %2474 = vrot.lane.b32.xlu1 %v15485_v48, %s15021_s8  ;;  %2470 = vrot.lane.b32.xlu0 %v15461_v23, %s15021_s8 }
 0x24e   : > { %2458 = vrot.lane.b32.xlu1 %v15463_v24, %s15021_s8  ;;  %2460 = vrot.lane.b32.xlu0 %v15474_v34, %s15021_s8 }
 0x252   : > { %2456 = vrot.lane.b32.xlu1 %v15489_v57, %s15021_s8  ;;  %2476 = vrot.lane.b32.xlu0 %v15505_v9, %s15021_s8 }
 0x256   : > { %2478 = vrot.lane.b32.xlu1 %v15511_v14, %s15021_s8  ;;  %2462 = vrot.lane.b32.xlu0 %v15479_v40, %s15021_s8 }
 0x259   : > { %v1136_v21 = vpop.permute.xlu0 %1135 }
 0x25a   : > { %2464 = vrot.lane.b32.xlu1 %v15499_v4, %s15021_s8  ;;  %2480 = vrot.lane.b32.xlu0 %v15516_v16, %s15021_s8 }
 0x25b   : > { %v1124_v28 = vpop.permute.xlu1 %1123 }
 0x25d   : > { %v1138_v26 = vpop.permute.xlu0 %1137 }
 0x25e   : > { %2122 = vrot.lane.b32.xlu1 %v1106_v17, %s15016_s18  ;;  %2466 = vrot.lane.b32.xlu0 %v15495_v0, %s15021_s8  ;;  %v1155_v36 = vsel %vm568_vm3, %v1136_v21, %v1138_v26 }
 0x262   : > { %2468 = vrot.lane.b32.xlu1 %v1105_v18, %s15021_s8  ;;  %2918 = vrot.lane.b32.xlu0 %v15607_v20, %s15017_s16 }
 0x266   : > { %2920 = vrot.lane.b32.xlu1 %v15615_v22, %s15017_s16  ;;  %2945 = vrot.lane.b32.xlu0 %v15600_v19, %s15016_s18  ;;  %v1126_v29 = vpop.permute.xlu0 %1125 }
 0x267   : > { %v1150_v37 = vsel %vm568_vm3, %v1124_v28, %v1126_v29 }
 0x26a   : > { %2947 = vrot.lane.b32.xlu1 %v2886_v27, %s15016_s18  ;;  %2916 = vrot.lane.b32.xlu0 %v15600_v19, %s15017_s16  ;;  %v1128_v35 = vpop.permute.xlu0 %1127 }
 0x26b   : > { %v1151_v55 = vsel %vm568_vm3, %v1126_v29, %v1128_v35 }
 0x26e   : > { %2482 = vrot.lane.b32.xlu1 %v1106_v17, %s15021_s8  ;;  %v1140_v30 = vpop.permute.xlu1 %1139  ;;  %2891 = vrot.lane.b32.xlu0 %v15600_v19, %s15019_s30 }
 0x26f   : > { %v1156_v32 = vsel %vm568_vm3, %v1138_v26, %v1140_v30  ;;  %v1087_v26 = vld [vmem:[%s18125_s3 + $0x18] sm:$0xff] }
 0x270   : > { %1213 = vmatprep.subr.mxu1 %v1156_v32 }
 0x271   : > { %1214 = vmatpush1.msra.mxu1 %v1155_v36 }
 0x272   : > { %2943 = vrot.lane.b32.xlu1 %v2885_v31, %s15016_s18  ;;  %1215 = vmatprep.subr.mxu1 %v1150_v37  ;;  %v1122_v38 = vpop.permute.xlu1 %1121  ;;  %v11744_v37 = vld [vmem:[%s18125_s3 + $0x40] sm:$0xff] }
 0x273   : > { %v1149_v41 = vsel %vm568_vm3, %v1122_v38, %v1124_v28  ;;  %2922 = vrot.lane.b32.xlu0 %v15634_v33, %s15017_s16 }
 0x274   : > { %1216 = vmatpush1.msra.mxu1 %v1149_v41  ;;  %v1132_v42 = vpop.permute.xlu0 %1131  ;;  %v11745_v41 = vld [vmem:[%s18125_s3 + $0x48] sm:$0xff] }
 0x275   : > { %11720 = vmatmul.mubr.msk.f32.vlgmr.msra.gmra.mxu1 %vm657_vm4, %v15642_v39 }
 0x276   : > { %2893 = vrot.lane.b32.xlu1 %v2886_v27, %s15019_s30  ;;  %v1130_v43 = vpop.permute.xlu1 %1129  ;;  %1255 = vmatprep.mubr.f32.mxu1 %v15018_v5 }
 0x277   : > { %2949 = vrot.lane.b32.xlu0 %v15615_v22, %s15016_s18  ;;  %v1152_v54 = vsel %vm568_vm3, %v1128_v35, %v1130_v43 }
 0x278   : > { %v1142_v46 = vpop.permute.xlu0 %1141 }
 0x279   : > { %11721 = vmatmul.mubr.msk.f32.gmra.mxu1 %vm657_vm4, %v15654_v44  ;;  %v1157_v53 = vsel %vm568_vm3, %v1140_v30, %v1142_v46 }
 0x27a   : > { %2924 = vrot.lane.b32.xlu1 %v15661_v45, %s15017_s16  ;;  %v1144_v47 = vpop.permute.xlu1 %1143  ;;  %1261 = vmatprep.mubr.f32.mxu1 %v15018_v5 }
 0x27b   : > { %2889 = vrot.lane.b32.xlu0 %v2885_v31, %s15019_s30  ;;  %v1158_v51 = vsel %vm568_vm3, %v1142_v46, %v1144_v47 }
 0x27c   : > { %1302 = vmatprep.subr.mxu0 %v1158_v51  ;;  %v1146_v52 = vpop.permute.xlu0 %1145  ;;  %v11747_v51 = vld [vmem:[%s18125_s3 + $0x58] sm:$0xff] }
 0x27d   : > { %1303 = vmatpush1.msra.mxu0 %v1157_v53  ;;  %11722 = vmatmul.mubr.msk.f32.gmra.mxu1 %vm657_vm4, %v15673_v50 }
 0x27e   : > { %2951 = vrot.lane.b32.xlu1 %v2887_v49, %s15016_s18  ;;  %1304 = vmatprep.subr.mxu0 %v1152_v54 }
 0x27f   : > { %2897 = vrot.lane.b32.xlu0 %v2887_v49, %s15019_s30  ;;  %1305 = vmatpush1.msra.mxu0 %v1151_v55 }
 0x280   : > { %v1148_v56 = vpop.permute.xlu1 %1147  ;;  %11724 = vmatmul.mubr.msk.f32.vlgmr.msra.gmra.mxu0 %vm657_vm4, %v15642_v39  ;;  %1492 = vmatprep.subr.mxu0 %v15467_v25  ;;  %v15687_v58 = vpop.permute.xlu0 %1752  ;;  %v1159_v25 = vsel %vm568_vm3, %v1144_v47, %v1146_v52 }
 0x281   : > { %v1160_v59 = vsel %vm568_vm3, %v1146_v52, %v1148_v56  ;;  %1267 = vmatprep.mubr.f32.mxu1 %v15018_v5  ;;  %1493 = vmatpush1.msra.mxu0 %v15461_v23 }
 0x282   : > { %2895 = vrot.lane.b32.xlu1 %v15615_v22, %s15019_s30  ;;  %1391 = vmatprep.subr.mxu1 %v1160_v59 }
 0x283   : > { %1392 = vmatpush1.msra.mxu1 %v1159_v25  ;;  %1494 = vmatprep.subr.mxu0 %v15463_v24  ;;  %v1153_v24 = vsel %vm568_vm3, %v1130_v43, %v1132_v42 }
 0x284   : > { %11723 = vmatmul.mubr.msk.f32.gmra.mxu1 %vm657_vm4, %v11719_v60  ;;  %v1134_v23 = vpop.permute.xlu1 %1133  ;;  %2928 = vrot.lane.b32.xlu0 %v15698_v61, %s15017_s16  ;;  %v1751_v63 = vpop.permute.xlu0 %1750 }
 0x285   : > { %1344 = vmatprep.mubr.f32.mxu0 %v15018_v5  ;;  %1495 = vmatpush1.msra.mxu0 %v15489_v57  ;;  %v1154_v1 = vsel %vm568_vm3, %v1132_v42, %v1134_v23 }
 0x286   : > { %2926 = vrot.lane.b32.xlu1 %v15705_v62, %s15017_s16  ;;  %11725 = vmatmul.mubr.msk.f32.gmra.mxu0 %vm657_vm4, %v15654_v44 }
 0x287   : > { %1393 = vmatprep.subr.mxu1 %v1154_v1  ;;  %1670 = vmatprep.subr.mxu0 %v15516_v16  ;;  %v1086_v16 = vld [vmem:[%s18125_s3 + $0x10] sm:$0xff] }
 0x288   : > { %1394 = vmatpush1.msra.mxu1 %v1153_v24  ;;  %1427 = vmatprep.mubr.f32.mxu1 %v15018_v5  ;;  %v15723_v57 = vpop.permute.xlu1 %1754  ;;  %v15725_v3 = vpop.permute.xlu0 %1740 }
 0x289   : > { %2955 = vrot.lane.b32.xlu0 %v2888_v2, %s15016_s18  ;;  %11728 = vmatmul.mubr.msk.f32.vlgmr.msra.gmra.mxu1 %vm657_vm4, %v15642_v39  ;;  %v1771_v7 = vsel %vm596_vm1, %v15687_v58, %v15723_v57 }
 0x28a   : > { %1581 = vmatprep.subr.mxu1 %v15505_v9  ;;  %1350 = vmatprep.mubr.f32.mxu0 %v15018_v5 }
 0x28b   : > { %1582 = vmatpush1.msra.mxu1 %v15485_v48  ;;  %2953 = vrot.lane.b32.xlu1 %v15661_v45, %s15016_s18 }
 0x28c   : > { %11726 = vmatmul.mubr.msk.f32.gmra.mxu0 %vm657_vm4, %v15673_v50  ;;  %1583 = vmatprep.subr.mxu1 %v15479_v40  ;;  %v1739_v6 = vpop.permute.xlu1 %1738  ;;  %v1757_v8 = vpop.permute.xlu0 %1756 }
 0x28d   : > { %1433 = vmatprep.mubr.f32.mxu1 %v15018_v5  ;;  %1584 = vmatpush1.msra.mxu1 %v15474_v34  ;;  %v1084_v34 = vld [vmem:[%s18125_s3] sm:$0xff]  ;;  %v1772_v29 = vsel %vm596_vm1, %v15723_v57, %v1757_v8 }
 0x28e   : > { %11729 = vmatmul.mubr.msk.f32.gmra.mxu1 %vm657_vm4, %v15654_v44  ;;  %1828 = vmatprep.subr.mxu1 %v1771_v7  ;;  %v11746_v44 = vld [vmem:[%s18125_s3 + $0x50] sm:$0xff]  ;;  %v11760_v7 = vld [vmem:[%s18125_s3 + $0x60] sm:$0xff] }
 0x28f   : > { %1356 = vmatprep.mubr.f32.mxu0 %v15018_v5  ;;  %2899 = vrot.lane.b32.xlu1 %v15661_v45, %s15019_s30 }
 0x290   : > { %11727 = vmatmul.mubr.msk.f32.gmra.mxu0 %vm657_vm4, %v11719_v60  ;;  %2901 = vrot.lane.b32.xlu0 %v2888_v2, %s15019_s30  ;;  %v1737_v40 = vpop.permute.xlu1 %1736  ;;  %v1743_v48 = vpop.permute.xlu0 %1742 }
 0x291   : > { %1439 = vmatprep.mubr.f32.mxu1 %v15018_v5  ;;  %1528 = vmatprep.mubr.f32.mxu0 %v15018_v5  ;;  %v1764_v17 = vsel %vm596_vm1, %v1737_v40, %v1739_v6  ;;  %v1766_v36 = vsel %vm596_vm1, %v15725_v3, %v1743_v48 }
 0x292   : > { %11730 = vmatmul.mubr.msk.f32.gmra.mxu1 %vm657_vm4, %v15673_v50 }
 0x293   : > { %1445 = vmatprep.mubr.f32.mxu1 %v15018_v5 }
 0x294   : > { %11732 = vmatmul.mubr.msk.f32.vlgmr.msra.gmra.mxu0 %vm657_vm4, %v1084_v34  ;;  %v15759_v9 = vpop.permute.xlu1 %1758  ;;  %v15761_v10 = vpop.permute.xlu0 %1760 }
 0x295   : > { %1671 = vmatpush1.msra.mxu0 %v15511_v14  ;;  %1534 = vmatprep.mubr.f32.mxu0 %v15018_v5  ;;  %v1773_v13 = vsel %vm596_vm1, %v1757_v8, %v15759_v9  ;;  %v1774_v50 = vsel %vm596_vm1, %v15759_v9, %v15761_v10 }
 0x296   : > { %1672 = vmatprep.subr.mxu0 %v15495_v0  ;;  %11731 = vmatmul.mubr.msk.f32.gmra.mxu1 %vm657_vm4, %v11719_v60  ;;  %v1770_v0 = vsel %vm596_vm1, %v1751_v63, %v15687_v58 }
 0x297   : > { %1673 = vmatpush1.msra.mxu0 %v15499_v4  ;;  %1617 = vmatprep.mubr.f32.mxu1 %v15018_v5  ;;  %v1765_v4 = vsel %vm596_vm1, %v1739_v6, %v15725_v3 }
 0x298   : > { %11733 = vmatmul.mubr.msk.f32.gmra.mxu0 %vm657_vm4, %v1085_v11  ;;  %1917 = vmatprep.subr.mxu0 %v1773_v13  ;;  %v15775_v14 = vpop.permute.xlu1 %1744  ;;  %v15777_v15 = vpop.permute.xlu0 %1746 }
 0x299   : > { %1540 = vmatprep.mubr.f32.mxu0 %v15018_v5  ;;  %v1767_v32 = vsel %vm596_vm1, %v1743_v48, %v15775_v14  ;;  %v1768_v59 = vsel %vm596_vm1, %v15775_v14, %v15777_v15 }
 0x29a   : > { %11736 = vmatmul.mubr.msk.f32.vlgmr.msra.gmra.mxu1 %vm657_vm4, %v1084_v34 }
 0x29b   : > { %1829 = vmatpush1.msra.mxu1 %v1770_v0  ;;  %1623 = vmatprep.mubr.f32.mxu1 %v15018_v5 }
 0x29c   : > { %1830 = vmatprep.subr.mxu1 %v1765_v4  ;;  %11734 = vmatmul.mubr.msk.f32.gmra.mxu0 %vm657_vm4, %v1086_v16  ;;  %v1749_v18 = vpop.permute.xlu1 %1748  ;;  %v2113_v21 = vpop.permute.xlu0 %2112  ;;  %v11763_v4 = vld [vmem:[%s18125_s3 + $0x78] sm:$0xff] }
 0x29d   : > { %1831 = vmatpush1.msra.mxu1 %v1764_v17  ;;  %1546 = vmatprep.mubr.f32.mxu0 %v15018_v5  ;;  %v1769_v52 = vsel %vm596_vm1, %v15777_v15, %v1749_v18 }
 0x29e   : > { %11737 = vmatmul.mubr.msk.f32.gmra.mxu1 %vm657_vm4, %v1085_v11 }
 0x29f   : > { %1629 = vmatprep.mubr.f32.mxu1 %v15018_v5 }
 0x2a0   : > { %11735 = vmatmul.mubr.msk.f32.gmra.mxu0 %vm657_vm4, %v1087_v26  ;;  %v15798_v27 = vpop.permute.xlu1 %2114  ;;  %v2111_v28 = vpop.permute.xlu0 %2110 }
 0x2a1   : > { %1706 = vmatprep.mubr.f32.mxu0 %v15018_v5  ;;  %v2131_v35 = vsel %vm624_vm0, %v2113_v21, %v15798_v27  ;;  %v2130_v53 = vsel %vm624_vm0, %v2111_v28, %v2113_v21 }
 0x2a2   : > { %11738 = vmatmul.mubr.msk.f32.gmra.mxu1 %vm657_vm4, %v1086_v16 }
 0x2a3   : > { %1635 = vmatprep.mubr.f32.mxu1 %v15018_v5 }
 0x2a4   : > { %11740 = vmatmul.mubr.msk.f32.vlgmr.msra.gmra.mxu0 %vm657_vm4, %v1084_v34  ;;  %v2099_v30 = vpop.permute.xlu1 %2098  ;;  %v15806_v31 = vpop.permute.xlu0 %2100  ;;  %v11761_v34 = vld [vmem:[%s18125_s3 + $0x68] sm:$0xff] }
 0x2a5   : > { %1918 = vmatpush1.msra.mxu0 %v1772_v29  ;;  %1712 = vmatprep.mubr.f32.mxu0 %v15018_v5  ;;  %v2125_v56 = vsel %vm624_vm0, %v2099_v30, %v15806_v31 }
 0x2a6   : > { %1919 = vmatprep.subr.mxu0 %v1767_v32  ;;  %11739 = vmatmul.mubr.msk.f32.gmra.mxu1 %vm657_vm4, %v1087_v26 }
 0x2a7   : > { %1920 = vmatpush1.msra.mxu0 %v1766_v36  ;;  %1864 = vmatprep.mubr.f32.mxu1 %v15018_v5 }
 0x2a8   : > { %2188 = vmatprep.subr.mxu0 %v2131_v35  ;;  %11741 = vmatmul.mubr.msk.f32.gmra.mxu0 %vm657_vm4, %v1085_v11  ;;  %v2117_v38 = vpop.permute.xlu1 %2116  ;;  %v15821_v39 = vpop.permute.xlu0 %2118  ;;  %v11762_v11 = vld [vmem:[%s18125_s3 + $0x70] sm:$0xff]  ;;  %v11776_v35 = vld [vmem:[%s18125_s3 + $0x80] sm:$0xff] }
 0x2a9   : > { %1718 = vmatprep.mubr.f32.mxu0 %v15018_v5  ;;  %v2133_v60 = vsel %vm624_vm0, %v2117_v38, %v15821_v39  ;;  %v2132_v63 = vsel %vm624_vm0, %v15798_v27, %v2117_v38 }
 0x2aa   : > { %11748 = vmatmul.mubr.msk.f32.vlgmr.msra.gmra.mxu1 %vm657_vm4, %v11744_v37 }
 0x2ab   : > { %1870 = vmatprep.mubr.f32.mxu1 %v15018_v5 }
 0x2ac   : > { %11742 = vmatmul.mubr.msk.f32.gmra.mxu0 %vm657_vm4, %v1086_v16  ;;  %v2097_v42 = vpop.permute.xlu1 %2096  ;;  %v2103_v43 = vpop.permute.xlu0 %2102 }
 0x2ad   : > { %1724 = vmatprep.mubr.f32.mxu0 %v15018_v5  ;;  %v2124_v58 = vsel %vm624_vm0, %v2097_v42, %v2099_v30  ;;  %v2126_v2 = vsel %vm624_vm0, %v15806_v31, %v2103_v43 }
 0x2ae   : > { %11749 = vmatmul.mubr.msk.f32.gmra.mxu1 %vm657_vm4, %v11745_v41 }
 0x2af   : > { %1876 = vmatprep.mubr.f32.mxu1 %v15018_v5 }
 0x2b0   : > { %11743 = vmatmul.mubr.msk.f32.gmra.mxu0 %vm657_vm4, %v1087_v26  ;;  %v1763_v46 = vpop.permute.xlu1 %1762  ;;  %v15837_v47 = vpop.permute.xlu0 %2120 }
 0x2b1   : > { %1953 = vmatprep.mubr.f32.mxu0 %v15018_v5  ;;  %v1775_v49 = vsel %vm596_vm1, %v15761_v10, %v1763_v46  ;;  %v2134_v26 = vsel %vm624_vm0, %v15821_v39, %v15837_v47 }
 0x2b2   : > { %11750 = vmatmul.mubr.msk.f32.gmra.mxu1 %vm657_vm4, %v11746_v44  ;;  %2006 = vmatprep.subr.mxu1 %v1775_v49  ;;  %v11778_v49 = vld [vmem:[%s18125_s3 + $0x90] sm:$0xff] }
 0x2b3   : > { %1882 = vmatprep.mubr.f32.mxu1 %v15018_v5  ;;  %2007 = vmatpush1.msra.mxu1 %v1774_v50 }
 0x2b4   : > { %11752 = vmatmul.mubr.msk.f32.vlgmr.msra.gmra.mxu0 %vm657_vm4, %v11744_v37  ;;  %v15854_v54 = vpop.permute.xlu1 %2104  ;;  %2008 = vmatprep.subr.mxu1 %v1769_v52  ;;  %v15856_v55 = vpop.permute.xlu0 %2106 }
 0x2b5   : > { %2189 = vmatpush1.msra.mxu0 %v2130_v53  ;;  %1959 = vmatprep.mubr.f32.mxu0 %v15018_v5  ;;  %v2127_v1 = vsel %vm624_vm0, %v2103_v43, %v15854_v54  ;;  %v2128_v28 = vsel %vm624_vm0, %v15854_v54, %v15856_v55  ;;  %v11779_v54 = vld [vmem:[%s18125_s3 + $0x98] sm:$0xff] }
 0x2b6   : > { %2190 = vmatprep.subr.mxu0 %v2125_v56  ;;  %11751 = vmatmul.mubr.msk.f32.gmra.mxu1 %vm657_vm4, %v11747_v51 }
 0x2b7   : > { %2191 = vmatpush1.msra.mxu0 %v2124_v58  ;;  %2009 = vmatpush1.msra.mxu1 %v1768_v59 }
 0x2b8   : > { %2277 = vmatprep.subr.mxu1 %v2133_v60  ;;  %11753 = vmatmul.mubr.msk.f32.gmra.mxu0 %vm657_vm4, %v11745_v41  ;;  %v15869_v25 = vpop.permute.xlu1 %2108  ;;  %v2473_v23 = vpop.permute.xlu0 %2472 }
 0x2b9   : > { %2042 = vmatprep.mubr.f32.mxu1 %v15018_v5  ;;  %1965 = vmatprep.mubr.f32.mxu0 %v15018_v5  ;;  %v2129_v27 = vsel %vm624_vm0, %v15856_v55, %v15869_v25 }
 0x2ba   : > { %11756 = vmatmul.mubr.msk.f32.vlgmr.msra.gmra.mxu1 %vm657_vm4, %v11744_v37 }
 0x2bb   : > { %2278 = vmatpush1.msra.mxu1 %v2132_v63  ;;  %2048 = vmatprep.mubr.f32.mxu1 %v15018_v5 }
 0x2bc   : > { %2279 = vmatprep.subr.mxu1 %v2127_v1  ;;  %11754 = vmatmul.mubr.msk.f32.gmra.mxu0 %vm657_vm4, %v11746_v44  ;;  %v2475_v24 = vpop.permute.xlu1 %2474  ;;  %v2471_v57 = vpop.permute.xlu0 %2470 }
 0x2bd   : > { %2280 = vmatpush1.msra.mxu1 %v2126_v2  ;;  %1971 = vmatprep.mubr.f32.mxu0 %v15018_v5  ;;  %v2492_v3 = vsel %vm2484_vm6, %v2473_v23, %v2475_v24  ;;  %v2491_v13 = vsel %vm2484_vm6, %v2471_v57, %v2473_v23 }
 0x2be   : > { %11757 = vmatmul.mubr.msk.f32.gmra.mxu1 %vm657_vm4, %v11745_v41  ;;  %2549 = vmatprep.subr.mxu1 %v2492_v3  ;;  %v11777_v41 = vld [vmem:[%s18125_s3 + $0x88] sm:$0xff] }
 0x2bf   : > { %2054 = vmatprep.mubr.f32.mxu1 %v15018_v5 }
 0x2c0   : > { %11755 = vmatmul.mubr.msk.f32.gmra.mxu0 %vm657_vm4, %v11747_v51  ;;  %v2459_v6 = vpop.permute.xlu1 %2458  ;;  %v2461_v8 = vpop.permute.xlu0 %2460 }
 0x2c1   : > { %2224 = vmatprep.mubr.f32.mxu0 %v15018_v5  ;;  %v2486_v14 = vsel %vm2484_vm6, %v2459_v6, %v2461_v8 }
 0x2c2   : > { %11758 = vmatmul.mubr.msk.f32.gmra.mxu1 %vm657_vm4, %v11746_v44 }
 0x2c3   : > { %2060 = vmatprep.mubr.f32.mxu1 %v15018_v5 }
 0x2c4   : > { %11764 = vmatmul.mubr.msk.f32.vlgmr.msra.gmra.mxu0 %vm657_vm4, %v11760_v7  ;;  %v2457_v40 = vpop.permute.xlu1 %2456  ;;  %v2477_v48 = vpop.permute.xlu0 %2476 }
 0x2c5   : > { %2230 = vmatprep.mubr.f32.mxu0 %v15018_v5  ;;  %v2485_v15 = vsel %vm2484_vm6, %v2457_v40, %v2459_v6  ;;  %v2493_v32 = vsel %vm2484_vm6, %v2475_v24, %v2477_v48 }
 0x2c6   : > { %11759 = vmatmul.mubr.msk.f32.gmra.mxu1 %vm657_vm4, %v11747_v51 }
 0x2c7   : > { %2313 = vmatprep.mubr.f32.mxu1 %v15018_v5 }
 0x2c8   : > { %11765 = vmatmul.mubr.msk.f32.gmra.mxu0 %vm657_vm4, %v11761_v34  ;;  %v15901_v9 = vpop.permute.xlu1 %2478  ;;  %v2463_v10 = vpop.permute.xlu0 %2462 }
 0x2c9   : > { %2236 = vmatprep.mubr.f32.mxu0 %v15018_v5  ;;  %v2494_v31 = vsel %vm2484_vm6, %v2477_v48, %v15901_v9  ;;  %v2487_v39 = vsel %vm2484_vm6, %v2461_v8, %v2463_v10 }
 0x2ca   : > { %11768 = vmatmul.mubr.msk.f32.vlgmr.msra.gmra.mxu1 %vm657_vm4, %v11760_v7 }
 0x2cb   : > { %2550 = vmatpush1.msra.mxu1 %v2491_v13  ;;  %2319 = vmatprep.mubr.f32.mxu1 %v15018_v5  ;;  %v2984_v13 = vld [vmem:[%s18123_s1] sm:$0xff] }
 0x2cc   : > { %2551 = vmatprep.subr.mxu1 %v2486_v14  ;;  %11766 = vmatmul.mubr.msk.f32.gmra.mxu0 %vm657_vm4, %v11762_v11  ;;  %v15913_v16 = vpop.permute.xlu1 %2464  ;;  %v2481_v0 = vpop.permute.xlu0 %2480 }
 0x2cd   : > { %2552 = vmatpush1.msra.mxu1 %v2485_v15  ;;  %2242 = vmatprep.mubr.f32.mxu0 %v15018_v5  ;;  %v2488_v37 = vsel %vm2484_vm6, %v2463_v10, %v15913_v16  ;;  %v2495_v53 = vsel %vm2484_vm6, %v15901_v9, %v2481_v0 }
 0x2ce   : > { %11769 = vmatmul.mubr.msk.f32.gmra.mxu1 %vm657_vm4, %v11761_v34 }
 0x2cf   : > { %2325 = vmatprep.mubr.f32.mxu1 %v15018_v5 }
 0x2d0   : > { %11767 = vmatmul.mubr.msk.f32.gmra.mxu0 %vm657_vm4, %v11763_v4  ;;  %v2123_v17 = vpop.permute.xlu1 %2122  ;;  %v15922_v18 = vpop.permute.xlu0 %2466 }
 0x2d1   : > { %v2135_v21 = vsel %vm624_vm0, %v15837_v47, %v2123_v17  ;;  %2402 = vmatprep.mubr.f32.mxu0 %v15018_v5  ;;  %v2489_v25 = vsel %vm2484_vm6, %v15913_v16, %v15922_v18 }
 0x2d2   : > { %11770 = vmatmul.mubr.msk.f32.gmra.mxu1 %vm657_vm4, %v11762_v11  ;;  %2366 = vmatprep.subr.mxu0 %v2135_v21 }
 0x2d3   : > { %2331 = vmatprep.mubr.f32.mxu1 %v15018_v5  ;;  %2367 = vmatpush1.msra.mxu0 %v2134_v26 }
 0x2d4   : > { %v2469_v29 = vpop.permute.xlu1 %2468  ;;  %2368 = vmatprep.subr.mxu0 %v2129_v27  ;;  %v2919_v30 = vpop.permute.xlu0 %2918 }
 0x2d5   : > { %2369 = vmatpush1.msra.mxu0 %v2128_v28  ;;  %v2490_v56 = vsel %vm2484_vm6, %v15922_v18, %v2469_v29  ;;  %v2985_v18 = vld [vmem:[%s18123_s1 + $0x8] sm:$0xff] }
 0x2d6   : > { %11771 = vmatmul.mubr.msk.f32.gmra.mxu1 %vm657_vm4, %v11763_v4  ;;  %11772 = vmatmul.mubr.msk.f32.vlgmr.msra.gmra.mxu0 %vm657_vm4, %v11760_v7 }
 0x2d7   : > { %2638 = vmatprep.subr.mxu0 %v2494_v31  ;;  %2585 = vmatprep.mubr.f32.mxu1 %v15018_v5 }
 0x2d8   : > { %2639 = vmatpush1.msra.mxu0 %v2493_v32  ;;  %v15947_v36 = vpop.permute.xlu1 %2920  ;;  %2408 = vmatprep.mubr.f32.mxu0 %v15018_v5  ;;  %v2946_v38 = vpop.permute.xlu0 %2945 }
 0x2d9   : > { %2640 = vmatprep.subr.mxu0 %v2488_v37  ;;  %v2931_v44 = vsel %vm596_vm1, %v2919_v30, %v15947_v36 }
 0x2da   : > { %11780 = vmatmul.mubr.msk.f32.vlgmr.msra.gmra.mxu1 %vm657_vm4, %v11776_v35  ;;  %2641 = vmatpush1.msra.mxu0 %v2487_v39 }
 0x2db   : > { %11773 = vmatmul.mubr.msk.f32.gmra.mxu0 %vm657_vm4, %v11761_v34  ;;  %2591 = vmatprep.mubr.f32.mxu1 %v15018_v5 }
 0x2dc   : > { %v2948_v42 = vpop.permute.xlu1 %2947  ;;  %2414 = vmatprep.mubr.f32.mxu0 %v15018_v5  ;;  %v2917_v43 = vpop.permute.xlu0 %2916 }
 0x2dd   : > { %v2958_v46 = vsel %vm624_vm0, %v2946_v38, %v2948_v42  ;;  %v2930_v58 = vsel %vm596_vm1, %v2917_v43, %v2919_v30 }
 0x2de   : > { %11781 = vmatmul.mubr.msk.f32.gmra.mxu1 %vm657_vm4, %v11777_v41  ;;  %v2978_v47 = vsel %vm638_vm2, %v2931_v44, %v2958_v46 }
 0x2df   : > { %11774 = vmatmul.mubr.msk.f32.gmra.mxu0 %vm657_vm4, %v11762_v11  ;;  %2597 = vmatprep.mubr.f32.mxu1 %v15018_v5 }
 0x2e0   : > { %3028 = vmatprep.subr.mxu0 %v2978_v47  ;;  %v2483_v50 = vpop.permute.xlu1 %2482  ;;  %2420 = vmatprep.mubr.f32.mxu0 %v15018_v5  ;;  %v2892_v51 = vpop.permute.xlu0 %2891 }
 0x2e1   : > { %v2496_v52 = vsel %vm2484_vm6, %v2481_v0, %v2483_v50 }
 0x2e2   : > { %11782 = vmatmul.mubr.msk.f32.gmra.mxu1 %vm657_vm4, %v11778_v49  ;;  %2727 = vmatprep.subr.mxu1 %v2496_v52 }
 0x2e3   : > { %11775 = vmatmul.mubr.msk.f32.gmra.mxu0 %vm657_vm4, %v11763_v4  ;;  %2603 = vmatprep.mubr.f32.mxu1 %v15018_v5 }
 0x2e4   : > { %2728 = vmatpush1.msra.mxu1 %v2495_v53  ;;  %v2944_v55 = vpop.permute.xlu1 %2943  ;;  %2674 = vmatprep.mubr.f32.mxu0 %v15018_v5 }
 0x2e5   : > { %v2957_v59 = vsel %vm624_vm0, %v2944_v55, %v2946_v38  ;;  %2729 = vmatprep.subr.mxu1 %v2490_v56  ;;  %v2923_v60 = vpop.permute.xlu0 %2922 }
 0x2e6   : > { %11783 = vmatmul.mubr.msk.f32.gmra.mxu1 %vm657_vm4, %v11779_v54  ;;  %v2977_v23 = vsel %vm638_vm2, %v2930_v58, %v2957_v59  ;;  %v2932_v10 = vsel %vm596_vm1, %v15947_v36, %v2923_v60 }
 0x2e7   : > { %2730 = vmatpush1.msra.mxu1 %v2489_v25  ;;  %11784 = vmatmul.mubr.msk.f32.vlgmr.msra.gmra.mxu0 %vm657_vm4, %v11776_v35 }
 0x2e8   : > { %2763 = vmatprep.mubr.f32.mxu1 %v15018_v5  ;;  %3029 = vmatpush1.msra.mxu0 %v2977_v23  ;;  %v2894_v63 = vpop.permute.xlu1 %2893 }
 0x2e9   : > { %v2904_v1 = vsel %vm568_vm3, %v2892_v51, %v2894_v63  ;;  %2680 = vmatprep.mubr.f32.mxu0 %v15018_v5  ;;  %v2950_v2 = vpop.permute.xlu0 %2949 }
 0x2ea   : > { %11788 = vmatmul.mubr.msk.f32.vlgmr.msra.gmra.mxu1 %vm657_vm4, %v11776_v35  ;;  %v2971_v24 = vsel %vm638_vm2, %v15607_v20, %v2904_v1  ;;  %v2959_v7 = vsel %vm624_vm0, %v2948_v42, %v2950_v2  ;;  %v2987_v35 = vld [vmem:[%s18123_s1 + $0x18] sm:$0xff] }
 0x2eb   : > { %11785 = vmatmul.mubr.msk.f32.gmra.mxu0 %vm657_vm4, %v11777_v41  ;;  %2769 = vmatprep.mubr.f32.mxu1 %v15018_v5  ;;  %v2979_v11 = vsel %vm638_vm2, %v2932_v10, %v2959_v7 }
 0x2ec   : > { %3030 = vmatprep.subr.mxu0 %v2971_v24  ;;  %v2925_v57 = vpop.permute.xlu1 %2924  ;;  %2686 = vmatprep.mubr.f32.mxu0 %v15018_v5 }
 0x2ed   : > { %v2890_v3 = vpop.permute.xlu0 %2889  ;;  %v2933_v40 = vsel %vm596_vm1, %v2923_v60, %v2925_v57 }
 0x2ee   : > { %11789 = vmatmul.mubr.msk.f32.gmra.mxu1 %vm657_vm4, %v11777_v41  ;;  %v2903_v6 = vsel %vm568_vm3, %v2890_v3, %v2892_v51 }
 0x2ef   : > { %11786 = vmatmul.mubr.msk.f32.gmra.mxu0 %vm657_vm4, %v11778_v49  ;;  %2775 = vmatprep.mubr.f32.mxu1 %v15018_v5  ;;  %v2970_v20 = vsel %vm638_vm2, %v15600_v19, %v2903_v6 }
 0x2f0   : > { %v2952_v8 = vpop.permute.xlu1 %2951  ;;  %2692 = vmatprep.mubr.f32.mxu0 %v15018_v5  ;;  %3031 = vmatpush1.msra.mxu0 %v2970_v20 }
 0x2f1   : > { %v2960_v48 = vsel %vm624_vm0, %v2950_v2, %v2952_v8  ;;  %v2898_v34 = vpop.permute.xlu0 %2897 }
 0x2f2   : > { %11790 = vmatmul.mubr.msk.f32.gmra.mxu1 %vm657_vm4, %v11778_v49  ;;  %v2980_v9 = vsel %vm638_vm2, %v2933_v40, %v2960_v48 }
 0x2f3   : > { %11787 = vmatmul.mubr.msk.f32.gmra.mxu0 %vm657_vm4, %v11779_v54  ;;  %2781 = vmatprep.mubr.f32.mxu1 %v15018_v5 }
 0x2f4   : > { %3117 = vmatprep.subr.mxu1 %v2980_v9  ;;  %v2896_v19 = vpop.permute.xlu1 %2895  ;;  %3064 = vmatprep.mubr.f32.mxu0 %v15018_v5 }
 0x2f5   : > { %v2905_v14 = vsel %vm568_vm3, %v2894_v63, %v2896_v19  ;;  %v2906_v15 = vsel %vm568_vm3, %v2896_v19, %v2898_v34  ;;  %3118 = vmatpush1.msra.mxu1 %v2979_v11 }
 0x2f6   : > { %11791 = vmatmul.mubr.msk.f32.gmra.mxu1 %vm657_vm4, %v11779_v54  ;;  %v2929_v16 = vpop.permute.xlu0 %2928  ;;  %v2973_v0 = vsel %vm638_vm2, %v15634_v33, %v2906_v15  ;;  %v2972_v4 = vsel %vm638_vm2, %v15615_v22, %v2905_v14  ;;  %v2986_v33 = vld [vmem:[%s18123_s1 + $0x10] sm:$0xff] }
 0x2f7   : > { %11796 = vmatmul.mubr.msk.f32.vlgmr.msra.gmra.mxu0 %vm657_vm4, %v2984_v13  ;;  %3119 = vmatprep.subr.mxu1 %v2973_v0 }
 0x2f8   : > { %v2927_v17 = vpop.permute.xlu1 %2926  ;;  %3120 = vmatpush1.msra.mxu1 %v2972_v4  ;;  %3153 = vmatprep.mubr.f32.mxu1 %v15018_v5 }
 0x2f9   : > { %3070 = vmatprep.mubr.f32.mxu0 %v15018_v5  ;;  %v2934_v27 = vsel %vm596_vm1, %v2925_v57, %v2927_v17  ;;  %v2935_v28 = vsel %vm596_vm1, %v2927_v17, %v2929_v16 }
 0x2fa   : > { %11800 = vmatmul.mubr.msk.f32.vlgmr.msra.gmra.mxu1 %vm657_vm4, %v2984_v13 }
 0x2fb   : > { %v2956_v21 = vpop.permute.xlu0 %2955  ;;  %11797 = vmatmul.mubr.msk.f32.gmra.mxu0 %vm657_vm4, %v2985_v18  ;;  %3159 = vmatprep.mubr.f32.mxu1 %v15018_v5 }
 0x2fc   : > { %v2983_v22 = vsel %vm638_vm2, %v2929_v16, %v2956_v21  ;;  %3076 = vmatprep.mubr.f32.mxu0 %v15018_v5 }
 0x2fd   : > { %v2954_v26 = vpop.permute.xlu1 %2953  ;;  %13402 = vmatprep.subr.mxu1 %v2983_v22 }
 0x2fe   : > { %v2961_v29 = vsel %vm624_vm0, %v2952_v8, %v2954_v26  ;;  %v2962_v30 = vsel %vm624_vm0, %v2954_v26, %v2956_v21  ;;  %11801 = vmatmul.mubr.msk.f32.gmra.mxu1 %vm657_vm4, %v2985_v18 }
 0x2ff   : > { %13403 = vmatpush3.msra.mxu1 %v2983_v22  ;;  %11798 = vmatmul.mubr.msk.f32.gmra.mxu0 %vm657_vm4, %v2986_v33  ;;  %v2982_v31 = vsel %vm638_vm2, %v2935_v28, %v2962_v30  ;;  %v2981_v32 = vsel %vm638_vm2, %v2934_v27, %v2961_v29 }
 0x300   : > { %3206 = vmatprep.subr.mxu0 %v2982_v31  ;;  %3165 = vmatprep.mubr.f32.mxu1 %v15018_v5 }
 0x301   : > { %v2900_v36 = vpop.permute.xlu1 %2899  ;;  %3207 = vmatpush1.msra.mxu0 %v2981_v32  ;;  %3082 = vmatprep.mubr.f32.mxu0 %v15018_v5 }
 0x302   : > { %v2907_v37 = vsel %vm568_vm3, %v2898_v34, %v2900_v36  ;;  %v2902_v38 = vpop.permute.xlu0 %2901  ;;  %11802 = vmatmul.mubr.msk.f32.gmra.mxu1 %vm657_vm4, %v2986_v33 }
 0x303   : > { %v2908_v39 = vsel %vm568_vm3, %v2900_v36, %v2902_v38  ;;  %11799 = vmatmul.mubr.msk.f32.gmra.mxu0 %vm657_vm4, %v2987_v35  ;;  %3171 = vmatprep.mubr.f32.mxu1 %v15018_v5  ;;  %v2974_v41 = vsel %vm638_vm2, %v15661_v45, %v2907_v37  ;;  %v2976_v42 = vsel %vm638_vm2, %v15698_v61, %v2902_v38 }
 0x304   : > { %v2975_v43 = vsel %vm638_vm2, %v15705_v62, %v2908_v39  ;;  %13404 = vmatprep.subr.mxu1 %v2976_v42  ;;  %3242 = vmatprep.mubr.f32.mxu0 %v15018_v5 }
 0x305   : > { %3208 = vmatprep.subr.mxu0 %v2975_v43  ;;  %13405 = vmatpush3.msra.mxu1 %v2976_v42 }
 0x306   : > { %3209 = vmatpush1.msra.mxu0 %v2974_v41  ;;  %11803 = vmatmul.mubr.msk.f32.gmra.mxu1 %vm657_vm4, %v2987_v35 }
 0x307   : > { %11804 = vmatmul.mubr.msk.f32.vlgmr.msra.gmra.mxu0 %vm657_vm4, %v2984_v13  ;;  %13406 = vmatprep.mubr.msk.f32.mxu1 %vm657_vm4, %v2984_v13 }
 0x308   : > { %3248 = vmatprep.mubr.f32.mxu0 %v15018_v5 }
 0x30a   : > { %13407 = vmatmul.mubr.msk.f32.vlgmr.msra.gmra.mxu1 %vm657_vm4, %v2985_v18 }
 0x30b   : > { %11805 = vmatmul.mubr.msk.f32.gmra.mxu0 %vm657_vm4, %v2985_v18  ;;  %13409 = vmatprep.mubr.msk.f32.mxu1 %vm657_vm4, %v2986_v33 }
 0x30c   : > { %3254 = vmatprep.mubr.f32.mxu0 %v15018_v5 }
 0x30e   : > { %13410 = vmatmul.mubr.msk.f32.gmra.mxu1 %vm657_vm4, %v2987_v35 }
 0x30f   : > { %11806 = vmatmul.mubr.msk.f32.gmra.mxu0 %vm657_vm4, %v2986_v33  ;;  %3661 = vmatprep.mubr.f32.mxu1 %v15018_v5 }
 0x310   : > { %3260 = vmatprep.mubr.f32.mxu0 %v15018_v5 }
 0x313   : > { %11807 = vmatmul.mubr.msk.f32.gmra.mxu0 %vm657_vm4, %v2987_v35 }
 0x314   : > { %3572 = vmatprep.mubr.f32.mxu0 %v15018_v5 }
 0x335   : > { %v1251_v45 = vpop.f32.mrf.mxu1 }
 0x337   : > { %v16081_v61 = vpop.f32.mrf.mxu1 }
 0x339   : > { %v1257_v62 = vpop.f32.mrf.mxu1 }
 0x33b   : > { %v16083_v44 = vpop.f32.mrf.mxu1 }
 0x33d   : > { %v1263_v46 = vpop.f32.mrf.mxu1 }
 0x33f   : > { %v16085_v47 = vpop.f32.mrf.mxu1 }
 0x340   : > { %v1340_v49 = vpop.f32.mrf.mxu0 }
 0x342   : > { %v16087_v50 = vpop.f32.mrf.mxu0 }
 0x344   : > { %v1269_v51 = vpop.f32.mrf.mxu1 }
 0x346   : > { %v16089_v52 = vpop.f32.mrf.mxu1  ;;  %v1346_v53 = vpop.f32.mrf.mxu0 }
 0x348   : > { %v16091_v54 = vpop.f32.mrf.mxu0 }
 0x349   : > { %v1429_v55 = vpop.f32.mrf.mxu1 }
 0x34b   : > { %v16093_v56 = vpop.f32.mrf.mxu1 }
 0x34c   : > { %v1352_v58 = vpop.f32.mrf.mxu0 }
 0x34e   : > { %v16095_v59 = vpop.f32.mrf.mxu0  ;;  %v1435_v60 = vpop.f32.mrf.mxu1 }
 0x350   : > { %v1358_v25 = vpop.f32.mrf.mxu0  ;;  %v16097_v23 = vpop.f32.mrf.mxu1 }
 0x352   : > { %v16099_v63 = vpop.f32.mrf.mxu0  ;;  %v1441_v1 = vpop.f32.mrf.mxu1 }
 0x354   : > { %v16101_v2 = vpop.f32.mrf.mxu1  ;;  %v1530_v24 = vpop.f32.mrf.mxu0 }
 0x355   : > { %v1531_v57 = vadd.f32 %v1530_v24, %v1251_v45 }
 0x356   : > { %v1447_v3 = vpop.f32.mrf.mxu1  ;;  %v16103_v6 = vpop.f32.mrf.mxu0 }
 0x358   : > { %v16105_v20 = vpop.f32.mrf.mxu1  ;;  %v1536_v8 = vpop.f32.mrf.mxu0 }
 0x359   : > { %v1537_v7 = vadd.f32 %v1536_v8, %v1257_v62 }
 0x35a   : > { %v16107_v40 = vpop.f32.mrf.mxu0  ;;  %v1619_v48 = vpop.f32.mrf.mxu1 }
 0x35b   : > { %v1620_v34 = vadd.f32 %v1619_v48, %v1340_v49 }
 0x35c   : > { %v1542_v9 = vpop.f32.mrf.mxu0  ;;  %v16109_v10 = vpop.f32.mrf.mxu1 }
 0x35d   : > { %v1543_v19 = vadd.f32 %v1542_v9, %v1263_v46 }
 0x35e   : > { %v16111_v11 = vpop.f32.mrf.mxu0  ;;  %v1625_v13 = vpop.f32.mrf.mxu1 }
 0x35f   : > { %v1626_v14 = vadd.f32 %v1625_v13, %v1346_v53 }
 0x360   : > { %v1548_v15 = vpop.f32.mrf.mxu0  ;;  %v16113_v16 = vpop.f32.mrf.mxu1 }
 0x361   : > { %v1549_v0 = vadd.f32 %v1548_v15, %v1269_v51 }
 0x362   : > { %v16115_v4 = vpop.f32.mrf.mxu0  ;;  %v1631_v17 = vpop.f32.mrf.mxu1 }
 0x363   : > { %v1632_v18 = vadd.f32 %v1631_v17, %v1352_v58 }
 0x364   : > { %v1633_v21 = vpop.f32.mrf.mxu1  ;;  %v1708_v22 = vpop.f32.mrf.mxu0 }
 0x365   : > { %v1709_v33 = vadd.f32 %v1708_v22, %v1429_v55 }
 0x366   : > { %v1637_v26 = vpop.f32.mrf.mxu1  ;;  %v16117_v27 = vpop.f32.mrf.mxu0 }
 0x367   : > { %v1638_v28 = vadd.f32 %v1637_v26, %v1358_v25 }
 0x368   : > { %v1639_v29 = vpop.f32.mrf.mxu1  ;;  %v1714_v30 = vpop.f32.mrf.mxu0 }
 0x369   : > { %v1715_v31 = vadd.f32 %v1714_v30, %v1435_v60 }
 0x36a   : > { %v16119_v32 = vpop.f32.mrf.mxu0  ;;  %v1866_v35 = vpop.f32.mrf.mxu1 }
 0x36b   : > { %v2067_v36 = vadd.f32 %v1866_v35, %v1531_v57 }
 0x36c   : > { %v1720_v37 = vpop.f32.mrf.mxu0  ;;  %v1868_v38 = vpop.f32.mrf.mxu1 }
 0x36d   : > { %v1721_v39 = vadd.f32 %v1720_v37, %v1441_v1 }
 0x36e   : > { %v16121_v41 = vpop.f32.mrf.mxu0  ;;  %v1872_v42 = vpop.f32.mrf.mxu1 }
 0x36f   : > { %v2073_v43 = vadd.f32 %v1872_v42, %v1537_v7 }
 0x370   : > { %v1726_v45 = vpop.f32.mrf.mxu0  ;;  %v1874_v62 = vpop.f32.mrf.mxu1 }
 0x371   : > { %v1727_v46 = vadd.f32 %v1726_v45, %v1447_v3  ;;  %v1634_v3 = vadd.f32 %v1633_v21, %v16095_v59 }
 0x372   : > { %v16123_v49 = vpop.f32.mrf.mxu0  ;;  %v1878_v51 = vpop.f32.mrf.mxu1 }
 0x373   : > { %v2079_v53 = vadd.f32 %v1878_v51, %v1543_v19 }
 0x374   : > { %v1880_v55 = vpop.f32.mrf.mxu1  ;;  %v1955_v58 = vpop.f32.mrf.mxu0 }
 0x375   : > { %v2069_v60 = vadd.f32 %v1955_v58, %v1620_v34 }
 0x376   : > { %v1884_v25 = vpop.f32.mrf.mxu1  ;;  %v1957_v24 = vpop.f32.mrf.mxu0 }
 0x377   : > { %v2085_v57 = vadd.f32 %v1884_v25, %v1549_v0  ;;  %v1640_v0 = vadd.f32 %v1639_v29, %v16099_v63 }
 0x378   : > { %v1886_v8 = vpop.f32.mrf.mxu1  ;;  %v1961_v48 = vpop.f32.mrf.mxu0 }
 0x379   : > { %v2075_v1 = vadd.f32 %v1961_v48, %v1626_v14 }
 0x37a   : > { %v1963_v9 = vpop.f32.mrf.mxu0  ;;  %v2044_v13 = vpop.f32.mrf.mxu1 }
 0x37b   : > { %v16125_v15 = vadd.f32 %v2044_v13, %v1709_v33  ;;  %v1533_v33 = vadd.f32 %v16103_v6, %v16081_v61  ;;  %v1539_v13 = vadd.f32 %v16107_v40, %v16083_v44  ;;  %v1622_v61 = vadd.f32 %v16109_v10, %v16087_v50 }
 0x37c   : > { %v1967_v7 = vpop.f32.mrf.mxu0  ;;  %v2046_v17 = vpop.f32.mrf.mxu1 }
 0x37d   : > { %v2081_v22 = vadd.f32 %v1967_v7, %v1632_v18  ;;  %v2068_v21 = vadd.f32 %v1868_v38, %v1533_v33  ;;  %v2074_v6 = vadd.f32 %v1874_v62, %v1539_v13  ;;  %v2070_v38 = vadd.f32 %v1957_v24, %v1622_v61 }
 0x37e   : > { %v1969_v26 = vpop.f32.mrf.mxu0  ;;  %v2050_v19 = vpop.f32.mrf.mxu1 }
 0x37f   : > { %v2082_v30 = vadd.f32 %v1969_v26, %v1634_v3  ;;  %v16128_v35 = vadd.f32 %v2050_v19, %v1715_v31 }
 0x380   : > { %v1973_v34 = vpop.f32.mrf.mxu0  ;;  %v16130_v37 = vpop.f32.mrf.mxu1 }
 0x381   : > { %v2087_v14 = vadd.f32 %v1973_v34, %v1638_v28 }
 0x382   : > { %v1975_v42 = vpop.f32.mrf.mxu0  ;;  %v2056_v45 = vpop.f32.mrf.mxu1 }
 0x383   : > { %v2088_v51 = vadd.f32 %v1975_v42, %v1640_v0  ;;  %v16135_v58 = vadd.f32 %v2056_v45, %v1721_v39 }
 0x384   : > { %v16137_v59 = vpop.f32.mrf.mxu1  ;;  %v2226_v18 = vpop.f32.mrf.mxu0 }
 0x385   : > { %v2427_v31 = vadd.f32 %v2226_v18, %v2067_v36  ;;  %v1545_v36 = vadd.f32 %v16111_v11, %v16085_v47 }
 0x386   : > { %v2062_v25 = vpop.f32.mrf.mxu1  ;;  %v2228_v48 = vpop.f32.mrf.mxu0 }
 0x387   : > { %v16141_v63 = vadd.f32 %v2062_v25, %v1727_v46  ;;  %v2428_v28 = vadd.f32 %v2228_v48, %v2068_v21  ;;  %v1628_v46 = vadd.f32 %v16113_v16, %v16091_v54  ;;  %v2080_v0 = vadd.f32 %v1880_v55, %v1545_v36 }
 0x388   : > { %v16143_v29 = vpop.f32.mrf.mxu1  ;;  %v2232_v7 = vpop.f32.mrf.mxu0  ;;  %v1711_v48 = vadd.f32 %v16117_v27, %v16093_v56 }
 0x389   : > { %v2433_v39 = vadd.f32 %v2232_v7, %v2073_v43  ;;  %v1551_v43 = vadd.f32 %v16115_v4, %v16089_v52  ;;  %v2076_v62 = vadd.f32 %v1963_v9, %v1628_v46 }
 0x38a   : > { %v2234_v3 = vpop.f32.mrf.mxu0  ;;  %v2315_v26 = vpop.f32.mrf.mxu1  ;;  %v2072_v9 = vadd.f32 %v2046_v17, %v1711_v48 }
 0x38b   : > { %v2434_v19 = vadd.f32 %v2234_v3, %v2074_v6  ;;  %v16149_v34 = vadd.f32 %v2315_v26, %v2069_v60  ;;  %v2086_v33 = vadd.f32 %v1886_v8, %v1551_v43 }
 0x38c   : > { %v2238_v44 = vpop.f32.mrf.mxu0  ;;  %v2317_v40 = vpop.f32.mrf.mxu1 }
 0x38d   : > { %v2439_v42 = vadd.f32 %v2238_v44, %v2079_v53  ;;  %v16153_v45 = vadd.f32 %v2317_v40, %v2070_v38 }
 0x38e   : > { %v2240_v50 = vpop.f32.mrf.mxu0  ;;  %v2321_v10 = vpop.f32.mrf.mxu1 }
 0x38f   : > { %v2440_v47 = vadd.f32 %v2240_v50, %v2080_v0  ;;  %v16157_v11 = vadd.f32 %v2321_v10, %v2075_v1 }
 0x390   : > { %v2244_v60 = vpop.f32.mrf.mxu0  ;;  %v2323_v24 = vpop.f32.mrf.mxu1 }
 0x391   : > { %v2445_v18 = vadd.f32 %v2244_v60, %v2085_v57  ;;  %v16159_v21 = vadd.f32 %v2323_v24, %v2076_v62 }
 0x392   : > { %v2246_v54 = vpop.f32.mrf.mxu0  ;;  %v2327_v16 = vpop.f32.mrf.mxu1 }
 0x393   : > { %v2446_v53 = vadd.f32 %v2246_v54, %v2086_v33  ;;  %v16161_v55 = vadd.f32 %v2327_v16, %v2081_v22  ;;  %v1717_v22 = vadd.f32 %v16119_v32, %v16097_v23 }
 0x394   : > { %v2329_v25 = vpop.f32.mrf.mxu1 }
 0x395   : > { %v16165_v52 = vadd.f32 %v2329_v25, %v2082_v30  ;;  %v2078_v27 = vadd.f32 %v16130_v37, %v1717_v22 }
 0x396   : > { %v2333_v4 = vpop.f32.mrf.mxu1  ;;  %v2404_v1 = vpop.f32.mrf.mxu0 }
 0x397   : > { %v16167_v13 = vadd.f32 %v2333_v4, %v2087_v14  ;;  %v2431_v57 = vadd.f32 %v2404_v1, %v16125_v15 }
 0x398   : > { %v2335_v8 = vpop.f32.mrf.mxu1  ;;  %v2406_v7 = vpop.f32.mrf.mxu0 }
 0x399   : > { %v16170_v61 = vadd.f32 %v2335_v8, %v2088_v51  ;;  %v2432_v6 = vadd.f32 %v2406_v7, %v2072_v9  ;;  %v1723_v51 = vadd.f32 %v16121_v41, %v16101_v2 }
 0x39a   : > { %v2587_v3 = vpop.f32.mrf.mxu1 }
 0x39b   : > { %v16174_v26 = vadd.f32 %v2587_v3, %v2427_v31  ;;  %v2410_v56 = vpop.f32.mrf.mxu0  ;;  %v2084_v32 = vadd.f32 %v16137_v59, %v1723_v51 }
 0x39c   : > { %v2437_v17 = vadd.f32 %v2410_v56, %v16128_v35  ;;  %v2589_v30 = vpop.f32.mrf.mxu1 }
 0x39d   : > { %v16178_v14 = vadd.f32 %v2589_v30, %v2428_v28  ;;  %v2412_v15 = vpop.f32.mrf.mxu0  ;;  %v1729_v28 = vadd.f32 %v16123_v49, %v16105_v20 }
 0x39e   : > { %v2438_v36 = vadd.f32 %v2412_v15, %v2078_v27  ;;  %v2593_v38 = vpop.f32.mrf.mxu1 }
 0x39f   : > { %v16182_v44 = vadd.f32 %v2593_v38, %v2433_v39  ;;  %v2416_v23 = vpop.f32.mrf.mxu0  ;;  %v2090_v41 = vadd.f32 %v16143_v29, %v1729_v28 }
 0x3a0   : > { %v2443_v31 = vadd.f32 %v2416_v23, %v16135_v58  ;;  %v2595_v40 = vpop.f32.mrf.mxu1 }
 0x3a1   : > { %v16186_v37 = vadd.f32 %v2595_v40, %v2434_v19  ;;  %v2418_v35 = vpop.f32.mrf.mxu0 }
 0x3a2   : > { %v2444_v46 = vadd.f32 %v2418_v35, %v2084_v32  ;;  %v2599_v0 = vpop.f32.mrf.mxu1 }
 0x3a3   : > { %v16190_v50 = vadd.f32 %v2599_v0, %v2439_v42  ;;  %v2422_v2 = vpop.f32.mrf.mxu0 }
 0x3a4   : > { %v2449_v39 = vadd.f32 %v2422_v2, %v16141_v63  ;;  %v2601_v10 = vpop.f32.mrf.mxu1 }
 0x3a5   : > { %v2812_v58 = vmax.f32 %v16174_v26, %v16190_v50  ;;  %v16196_v59 = vadd.f32 %v2601_v10, %v2440_v47  ;;  %v2424_v19 = vpop.f32.mrf.mxu0 }
 0x3a6   : > { %v2450_v43 = vadd.f32 %v2424_v19, %v2090_v41  ;;  %v2605_v62 = vpop.f32.mrf.mxu1 }
 0x3a7   : > { %v2813_v20 = vmax.f32 %v16178_v14, %v16196_v59  ;;  %v16200_v49 = vadd.f32 %v2605_v62, %v2445_v18  ;;  %v2676_v42 = vpop.f32.mrf.mxu0 }
 0x3a8   : > { %v2607_v60 = vpop.f32.mrf.mxu1  ;;  %v16203_v29 = vadd.f32 %v2676_v42, %v16149_v34 }
 0x3a9   : > { %v2818_v63 = vmax.f32 %v16182_v44, %v16200_v49  ;;  %v16207_v24 = vadd.f32 %v2607_v60, %v2446_v53  ;;  %v2678_v47 = vpop.f32.mrf.mxu0 }
 0x3aa   : > { %v16210_v33 = vadd.f32 %v2678_v47, %v16153_v45  ;;  %v2765_v54 = vpop.f32.mrf.mxu1 }
 0x3ab   : > { %v2819_v16 = vmax.f32 %v16186_v37, %v16207_v24  ;;  %v16214_v18 = vadd.f32 %v2765_v54, %v2431_v57  ;;  %v2682_v25 = vpop.f32.mrf.mxu0 }
 0x3ac   : > { %v16217_v48 = vadd.f32 %v2682_v25, %v16157_v11  ;;  %v2767_v34 = vpop.f32.mrf.mxu1 }
 0x3ad   : > { %v16219_v4 = vadd.f32 %v2767_v34, %v2432_v6  ;;  %v2684_v1 = vpop.f32.mrf.mxu0 }
 0x3ae   : > { %v16222_v53 = vadd.f32 %v2684_v1, %v16159_v21  ;;  %v2771_v9 = vpop.f32.mrf.mxu1 }
 0x3af   : > { %v16224_v45 = vadd.f32 %v2771_v9, %v2437_v17  ;;  %v2688_v8 = vpop.f32.mrf.mxu0 }
 0x3b0   : > { %v16227_v7 = vadd.f32 %v2688_v8, %v16161_v55  ;;  %v2773_v57 = vpop.f32.mrf.mxu1 }
 0x3b1   : > { %v16229_v22 = vadd.f32 %v2773_v57, %v2438_v36  ;;  %v2690_v3 = vpop.f32.mrf.mxu0 }
 0x3b2   : > { %v2814_v11 = vmax.f32 %v16203_v29, %v16227_v7  ;;  %v16234_v6 = vadd.f32 %v2690_v3, %v16165_v52  ;;  %v2777_v56 = vpop.f32.mrf.mxu1 }
 0x3b3   : > { %v16236_v21 = vadd.f32 %v2777_v56, %v2443_v31  ;;  %v2694_v27 = vpop.f32.mrf.mxu0 }
 0x3b4   : > { %v2815_v17 = vmax.f32 %v16210_v33, %v16234_v6  ;;  %v16241_v55 = vadd.f32 %v2694_v27, %v16167_v13  ;;  %v2779_v30 = vpop.f32.mrf.mxu1 }
 0x3b5   : > { %v2816_v15 = vmax.f32 %v16214_v18, %v16236_v21  ;;  %v16245_v51 = vadd.f32 %v2779_v30, %v2444_v46  ;;  %v2696_v36 = vpop.f32.mrf.mxu0 }
 0x3b6   : > { %v2820_v52 = vmax.f32 %v16217_v48, %v16241_v55  ;;  %v16250_v38 = vadd.f32 %v2696_v36, %v16170_v61  ;;  %v2783_v23 = vpop.f32.mrf.mxu1 }
 0x3b7   : > { %v2817_v32 = vmax.f32 %v16219_v4, %v16245_v51  ;;  %v16254_v31 = vadd.f32 %v2783_v23, %v2449_v39  ;;  %v3066_v13 = vpop.f32.mrf.mxu0 }
 0x3b8   : > { %v2821_v40 = vmax.f32 %v16222_v53, %v16250_v38  ;;  %v2785_v35 = vpop.f32.mrf.mxu1 }
 0x3b9   : > { %v2822_v28 = vmax.f32 %v16224_v45, %v16254_v31  ;;  %v16260_v46 = vadd.f32 %v2785_v35, %v2450_v43  ;;  %v3068_v0 = vpop.f32.mrf.mxu0 }
 0x3ba   : > { %v3155_v2 = vpop.f32.mrf.mxu1 }
 0x3bb   : > { %v2823_v61 = vmax.f32 %v16229_v22, %v16260_v46  ;;  %v3072_v41 = vpop.f32.mrf.mxu0 }
 0x3bc   : > { %v3352_v10 = vmax.f32 %v3066_v13, %v3072_v41  ;;  %v3157_v19 = vpop.f32.mrf.mxu1 }
 0x3bd   : > { %v3074_v39 = vpop.f32.mrf.mxu0 }
 0x3be   : > { %v3359_v62 = vadd.f32 %v3352_v10, %v15456_v12  ;;  %v3353_v42 = vmax.f32 %v3068_v0, %v3074_v39  ;;  %v3161_v60 = vpop.f32.mrf.mxu1 }
 0x3bf   : > { %v3354_v47 = vmax.f32 %v3155_v2, %v3161_v60  ;;  %v3078_v54 = vpop.f32.mrf.mxu0 }
 0x3c0   : > { %v16265_v25 = vmax.f32 %v3359_v62, 0.0  ;;  %v3360_v43 = vadd.f32 %v3353_v42, %v15456_v12  ;;  %v3163_v34 = vpop.f32.mrf.mxu1 }
 0x3c1   : > { %v3361_v1 = vadd.f32 %v3354_v47, %v15456_v12  ;;  %v3355_v9 = vmax.f32 %v3157_v19, %v3163_v34  ;;  %v3080_v8 = vpop.f32.mrf.mxu0 }
 0x3c2   : > { %v16269_v57 = vmax.f32 %v3360_v43, 0.0  ;;  %v3167_v3 = vpop.f32.mrf.mxu1 }
 0x3c3   : > { %v16271_v56 = vmax.f32 %v3361_v1, 0.0  ;;  %v3362_v27 = vadd.f32 %v3355_v9, %v15456_v12  ;;  %v3084_v30 = vpop.f32.mrf.mxu0 }
 0x3c4   : > { %v3373_v36 = vmax.f32 %v3078_v54, %v3084_v30  ;;  %v3169_v23 = vpop.f32.mrf.mxu1  ;;  %3446 = vrot.lane.b32.xlu0 %v16269_v57, %s15019_s30 }
 0x3c5   : > { %v16276_v13 = vmax.f32 %v3362_v27, 0.0  ;;  %v3086_v35 = vpop.f32.mrf.mxu0 }
 0x3c6   : > { %v3380_v0 = vadd.f32 %v3373_v36, %v15456_v12  ;;  %v3374_v2 = vmax.f32 %v3080_v8, %v3086_v35  ;;  %v3173_v41 = vpop.f32.mrf.mxu1 }
 0x3c7   : > { %v3375_v10 = vmax.f32 %v3167_v3, %v3173_v41  ;;  %v3244_v19 = vpop.f32.mrf.mxu0 }
 0x3c8   : > { %v16279_v39 = vmax.f32 %v3380_v0, 0.0  ;;  %v3381_v62 = vadd.f32 %v3374_v2, %v15456_v12  ;;  %v3175_v42 = vpop.f32.mrf.mxu1 }
 0x3c9   : > { %v3382_v60 = vadd.f32 %v3375_v10, %v15456_v12  ;;  %v3376_v47 = vmax.f32 %v3169_v23, %v3175_v42  ;;  %v3246_v54 = vpop.f32.mrf.mxu0 }
 0x3ca   : > { %v16283_v43 = vmax.f32 %v3381_v62, 0.0  ;;  %v13408_v34 = vpop.f32.mrf.mxu1  ;;  %3458 = vrot.lane.b32.xlu1 %v16279_v39, %s15019_s30 }
 0x3cb   : > { %v16287_v1 = vmax.f32 %v3382_v60, 0.0  ;;  %v3383_v9 = vadd.f32 %v3376_v47, %v15456_v12  ;;  %v3250_v8 = vpop.f32.mrf.mxu0 }
 0x3cc   : > { %v3356_v3 = vmax.f32 %v3244_v19, %v3250_v8  ;;  %v3333_v27 = vpop.f32.mrf.mxu1 }
 0x3cd   : > { %v16290_v30 = vmax.f32 %v3383_v9, 0.0  ;;  %v3358_v36 = vmax.f32 %v3333_v27, %v13408_v34  ;;  %v3252_v35 = vpop.f32.mrf.mxu0  ;;  %3462 = vrot.lane.b32.xlu0 %v16287_v1, %s15019_s30 }
 0x3ce   : > { %v3363_v23 = vadd.f32 %v3356_v3, %v15456_v12  ;;  %v3357_v0 = vmax.f32 %v3246_v54, %v3252_v35  ;;  %v13411_v2 = vpop.f32.mrf.mxu1  ;;  %3460 = vrot.lane.b32.xlu1 %v16283_v43, %s15019_s30 }
 0x3cf   : > { %v3365_v41 = vadd.f32 %v3358_v36, %v15456_v12  ;;  %v3256_v10 = vpop.f32.mrf.mxu0 }
 0x3d0   : > { %v16298_v62 = vmax.f32 %v3363_v23, 0.0  ;;  %v3364_v19 = vadd.f32 %v3357_v0, %v15456_v12  ;;  %v3343_v42 = vpop.f32.mrf.mxu1 }
 0x3d1   : > { %v3372_v60 = vmax.f32 %v3365_v41, 0.0  ;;  %v3379_v47 = vmax.f32 %v3343_v42, %v13411_v2  ;;  %v3258_v34 = vpop.f32.mrf.mxu0  ;;  %3444 = vrot.lane.b32.xlu0 %v16265_v25, %s15019_s30  ;;  %v535_v42 = vld [vmem:[%s18126_s4 + $0x8] sm:$0xff] }
 0x3d2   : > { %v16303_v9 = vmax.f32 %v3364_v19, 0.0  ;;  %3448 = vrot.lane.b32.xlu1 %v16271_v56, %s15019_s30 }
 0x3d3   : > { %3400 = vst.msk [vmem:[#allocation2 + $0x30] sm:$0xff] %vm1075_vm5, %v3372_v60  ;;  %v3386_v54 = vadd.f32 %v3379_v47, %v15456_v12  ;;  %v3262_v8 = vpop.f32.mrf.mxu0 }
 0x3d4   : > { %v3377_v3 = vmax.f32 %v3256_v10, %v3262_v8 }
 0x3d5   : > { %v3393_v27 = vmax.f32 %v3386_v54, 0.0  ;;  %v3264_v36 = vpop.f32.mrf.mxu0  ;;  %3452 = vrot.lane.b32.xlu0 %v16298_v62, %s15019_s30 }
 0x3d6   : > { %v3384_v35 = vadd.f32 %v3377_v3, %v15456_v12  ;;  %v3378_v23 = vmax.f32 %v3258_v34, %v3264_v36  ;;  %3450 = vrot.lane.b32.xlu1 %v16276_v13, %s15019_s30 }
 0x3d7   : > { %3407 = vst.msk [vmem:[#allocation2 + $0x68] sm:$0xff] %vm1075_vm5, %v3393_v27 }
 0x3d8   : > { %v16315_v0 = vmax.f32 %v3384_v35, 0.0  ;;  %v3385_v2 = vadd.f32 %v3378_v23, %v15456_v12  ;;  %v534_v12 = vld [vmem:[%s18126_s4] sm:$0xff] }
 0x3d9   : > { %v11812_v23 = vld [vmem:[%s18125_s3 + $0x20] sm:$0xff] }
 0x3da   : > { %v16318_v41 = vmax.f32 %v3385_v2, 0.0  ;;  %3464 = vrot.lane.b32.xlu1 %v16290_v30, %s15019_s30  ;;  %3466 = vrot.lane.b32.xlu0 %v16315_v0, %s15019_s30  ;;  %v3428_v19 = vld [vmem:[#allocation2 + $0x30] sm:$0xff] }
 0x3de   : > { %v3429_v10 = vld [vmem:[#allocation2 + $0x68] sm:$0xff]  ;;  %3468 = vrot.lane.b32.xlu1 %v16318_v41, %s15019_s30 }
 0x3df   : > { %3470 = vrot.lane.b32.xlu0 %v3429_v10, %s15019_s30 }
 0x3e2   : > { %3454 = vrot.lane.b32.xlu1 %v16303_v9, %s15019_s30 }
 0x3e3   : > { %3456 = vrot.lane.b32.xlu0 %v3428_v19, %s15019_s30 }
 0x3e6   : > { %4074 = vrot.lane.b32.xlu1 %v16283_v43, %s15017_s16 }
 0x3e7   : > { %4076 = vrot.lane.b32.xlu0 %v16287_v1, %s15017_s16 }
 0x3ea   : > { %4072 = vrot.lane.b32.xlu1 %v16279_v39, %s15017_s16 }
 0x3eb   : > { %4060 = vrot.lane.b32.xlu0 %v16269_v57, %s15017_s16 }
 0x3ee   : > { %4062 = vrot.lane.b32.xlu1 %v16271_v56, %s15017_s16 }
 0x3ef   : > { %4058 = vrot.lane.b32.xlu0 %v16265_v25, %s15017_s16 }
 0x3f2   : > { %4078 = vrot.lane.b32.xlu1 %v16290_v30, %s15017_s16 }
 0x3f3   : > { %4080 = vrot.lane.b32.xlu0 %v16315_v0, %s15017_s16 }
 0x3f6   : > { %4082 = vrot.lane.b32.xlu1 %v16318_v41, %s15017_s16 }
 0x3f7   : > { %4066 = vrot.lane.b32.xlu0 %v16298_v62, %s15017_s16 }
 0x3fa   : > { %4064 = vrot.lane.b32.xlu1 %v16276_v13, %s15017_s16 }
 0x3fb   : > { %4070 = vrot.lane.b32.xlu0 %v3428_v19, %s15017_s16 }
 0x3fe   : > { %4068 = vrot.lane.b32.xlu1 %v16303_v9, %s15017_s16 }
 0x3ff   : > { %4435 = vrot.lane.b32.xlu0 %v16287_v1, %s15016_s18 }
 0x402   : > { %4433 = vrot.lane.b32.xlu1 %v16283_v43, %s15016_s18 }
 0x403   : > { %4084 = vrot.lane.b32.xlu0 %v3429_v10, %s15017_s16 }
 0x406   : > { %4437 = vrot.lane.b32.xlu1 %v16290_v30, %s15016_s18 }
 0x407   : > { %4439 = vrot.lane.b32.xlu0 %v16315_v0, %s15016_s18 }
 0x40a   : > { %4431 = vrot.lane.b32.xlu1 %v16279_v39, %s15016_s18 }
 0x40b   : > { %4419 = vrot.lane.b32.xlu0 %v16269_v57, %s15016_s18 }
 0x40e   : > { %4421 = vrot.lane.b32.xlu1 %v16271_v56, %s15016_s18 }
 0x40f   : > { %4423 = vrot.lane.b32.xlu0 %v16276_v13, %s15016_s18 }
 0x412   : > { %4425 = vrot.lane.b32.xlu1 %v16298_v62, %s15016_s18 }
 0x413   : > { %4417 = vrot.lane.b32.xlu0 %v16265_v25, %s15016_s18 }
 0x416   : > { %4441 = vrot.lane.b32.xlu1 %v16318_v41, %s15016_s18 }
 0x417   : > { %4794 = vrot.lane.b32.xlu0 %v16287_v1, %s15021_s8 }
 0x41a   : > { %4792 = vrot.lane.b32.xlu1 %v16283_v43, %s15021_s8 }
 0x41b   : > { %4427 = vrot.lane.b32.xlu0 %v16303_v9, %s15016_s18 }
 0x41e   : > { %4790 = vrot.lane.b32.xlu1 %v16279_v39, %s15021_s8 }
 0x41f   : > { %4778 = vrot.lane.b32.xlu0 %v16269_v57, %s15021_s8 }
 0x422   : > { %4429 = vrot.lane.b32.xlu1 %v3428_v19, %s15016_s18 }
 0x423   : > { %4443 = vrot.lane.b32.xlu0 %v3429_v10, %s15016_s18 }
 0x426   : > { %4780 = vrot.lane.b32.xlu1 %v16271_v56, %s15021_s8 }
 0x427   : > { %4776 = vrot.lane.b32.xlu0 %v16265_v25, %s15021_s8 }
 0x42a   : > { %4796 = vrot.lane.b32.xlu1 %v16290_v30, %s15021_s8 }
 0x42b   : > { %4798 = vrot.lane.b32.xlu0 %v16315_v0, %s15021_s8 }
 0x42e   : > { %4800 = vrot.lane.b32.xlu1 %v16318_v41, %s15021_s8 }
 0x42f   : > { %4784 = vrot.lane.b32.xlu0 %v16298_v62, %s15021_s8 }
 0x432   : > { %4782 = vrot.lane.b32.xlu1 %v16276_v13, %s15021_s8 }
 0x433   : > { %4802 = vrot.lane.b32.xlu0 %v3429_v10, %s15021_s8 }
 0x436   : > { %4786 = vrot.lane.b32.xlu1 %v16303_v9, %s15021_s8  ;;  %v3447_v60 = vpop.permute.xlu0 %3446 }
 0x437   : > { %4788 = vrot.lane.b32.xlu0 %v3428_v19, %s15021_s8 }
 0x43a   : > { %2826 = vperm.xlu1 %13537, %v534_v12   ;;  %v11813_v12 = vld [vmem:[%s18125_s3 + $0x28] sm:$0xff] }
 0x43b   : > { %2831 = vperm.xlu0 %13538, %v535_v42  }
 0x43c   : > { %v3459_v47 = vpop.permute.xlu1 %3458 }
 0x43f   : > { %v3463_v34 = vpop.permute.xlu0 %3462 }
 0x440   : > { %v3461_v54 = vpop.permute.xlu1 %3460 }
 0x441   : > { %v3478_v8 = vsel %vm568_vm3, %v3459_v47, %v3461_v54  ;;  %v3479_v3 = vsel %vm568_vm3, %v3461_v54, %v3463_v34 }
 0x442   : > { %3536 = vmatprep.subr.mxu0 %v3479_v3 }
 0x443   : > { %v3445_v27 = vpop.permute.xlu0 %3444  ;;  %3537 = vmatpush1.msra.mxu0 %v3478_v8  ;;  %v11814_v8 = vld [vmem:[%s18125_s3 + $0x30] sm:$0xff] }
 0x444   : > { %v3449_v36 = vpop.permute.xlu1 %3448  ;;  %v3472_v2 = vsel %vm568_vm3, %v3445_v27, %v3447_v60 }
 0x445   : > { %v3473_v35 = vsel %vm568_vm3, %v3447_v60, %v3449_v36 }
 0x446   : > { %3538 = vmatprep.subr.mxu0 %v3473_v35 }
 0x447   : > { %3539 = vmatpush1.msra.mxu0 %v3472_v2  ;;  %v3453_v10 = vpop.permute.xlu0 %3452 }
 0x448   : > { %11816 = vmatmul.mubr.msk.f32.vlgmr.msra.gmra.mxu0 %vm657_vm4, %v11812_v23  ;;  %v3451_v19 = vpop.permute.xlu1 %3450 }
 0x449   : > { %3578 = vmatprep.mubr.f32.mxu0 %v15018_v5  ;;  %v3475_v3 = vsel %vm568_vm3, %v3451_v19, %v3453_v10  ;;  %v3474_v27 = vsel %vm568_vm3, %v3449_v36, %v3451_v19 }
 0x44c   : > { %11817 = vmatmul.mubr.msk.f32.gmra.mxu0 %vm657_vm4, %v11813_v12  ;;  %v3465_v42 = vpop.permute.xlu1 %3464  ;;  %v3467_v47 = vpop.permute.xlu0 %3466 }
 0x44d   : > { %v3480_v54 = vsel %vm568_vm3, %v3463_v34, %v3465_v42  ;;  %v3481_v60 = vsel %vm568_vm3, %v3465_v42, %v3467_v47  ;;  %3584 = vmatprep.mubr.f32.mxu0 %v15018_v5  ;;  %v11815_v42 = vld [vmem:[%s18125_s3 + $0x38] sm:$0xff] }
 0x44e   : > { %3625 = vmatprep.subr.mxu1 %v3481_v60 }
 0x44f   : > { %3626 = vmatpush1.msra.mxu1 %v3480_v54 }
 0x450   : > { %11818 = vmatmul.mubr.msk.f32.gmra.mxu0 %vm657_vm4, %v11814_v8  ;;  %3627 = vmatprep.subr.mxu1 %v3475_v3  ;;  %v3469_v35 = vpop.permute.xlu1 %3468 }
 0x451   : > { %v3471_v2 = vpop.permute.xlu0 %3470  ;;  %3628 = vmatpush1.msra.mxu1 %v3474_v27  ;;  %3590 = vmatprep.mubr.f32.mxu0 %v15018_v5  ;;  %v3482_v36 = vsel %vm568_vm3, %v3467_v47, %v3469_v35 }
 0x452   : > { %11820 = vmatmul.mubr.msk.f32.vlgmr.msra.gmra.mxu1 %vm657_vm4, %v11812_v23  ;;  %v3483_v34 = vsel %vm568_vm3, %v3469_v35, %v3471_v2  ;;  %3815 = vmatprep.subr.mxu1 %v16283_v43  ;;  %v3411_v2 = vld [vmem:[%s18125_s3 + $0x18] sm:$0xff] }
 0x453   : > { %3714 = vmatprep.subr.mxu0 %v3483_v34  ;;  %3816 = vmatpush1.msra.mxu1 %v16279_v39 }
 0x454   : > { %3715 = vmatpush1.msra.mxu0 %v3482_v36  ;;  %3817 = vmatprep.subr.mxu1 %v16269_v57  ;;  %v3455_v19 = vpop.permute.xlu1 %3454 }
 0x455   : > { %11819 = vmatmul.mubr.msk.f32.gmra.mxu0 %vm657_vm4, %v11815_v42  ;;  %v3457_v54 = vpop.permute.xlu0 %3456  ;;  %3667 = vmatprep.mubr.f32.mxu1 %v15018_v5  ;;  %v3476_v47 = vsel %vm568_vm3, %v3453_v10, %v3455_v19 }
 0x456   : > { %3818 = vmatpush1.msra.mxu1 %v16265_v25  ;;  %v3477_v43 = vsel %vm568_vm3, %v3455_v19, %v3457_v54  ;;  %3750 = vmatprep.mubr.f32.mxu0 %v15018_v5 }
 0x457   : > { %11821 = vmatmul.mubr.msk.f32.gmra.mxu1 %vm657_vm4, %v11813_v12  ;;  %3716 = vmatprep.subr.mxu0 %v3477_v43 }
 0x458   : > { %3993 = vmatprep.subr.mxu1 %v16318_v41  ;;  %3717 = vmatpush1.msra.mxu0 %v3476_v47  ;;  %v4075_v57 = vpop.permute.xlu1 %4074 }
 0x459   : > { %v4077_v39 = vpop.permute.xlu0 %4076  ;;  %11824 = vmatmul.mubr.msk.f32.vlgmr.msra.gmra.mxu0 %vm657_vm4, %v11812_v23  ;;  %3904 = vmatprep.subr.mxu0 %v16290_v30  ;;  %v3409_v23 = vld [vmem:[%s18125_s3 + $0x8] sm:$0xff] }
 0x45a   : > { %3673 = vmatprep.mubr.f32.mxu1 %v15018_v5  ;;  %3905 = vmatpush1.msra.mxu0 %v16287_v1  ;;  %v4093_v25 = vsel %vm596_vm1, %v4075_v57, %v4077_v39 }
 0x45b   : > { %11822 = vmatmul.mubr.msk.f32.gmra.mxu1 %vm657_vm4, %v11814_v8  ;;  %3906 = vmatprep.subr.mxu0 %v16276_v13 }
 0x45c   : > { %3756 = vmatprep.mubr.f32.mxu0 %v15018_v5  ;;  %3907 = vmatpush1.msra.mxu0 %v16271_v56  ;;  %v4073_v41 = vpop.permute.xlu1 %4072  ;;  %v3408_v56 = vld [vmem:[%s18125_s3] sm:$0xff] }
 0x45d   : > { %v4061_v10 = vpop.permute.xlu0 %4060  ;;  %11825 = vmatmul.mubr.msk.f32.gmra.mxu0 %vm657_vm4, %v11813_v12  ;;  %4150 = vmatprep.subr.mxu0 %v4093_v25 }
 0x45e   : > { %3679 = vmatprep.mubr.f32.mxu1 %v15018_v5  ;;  %3762 = vmatprep.mubr.f32.mxu0 %v15018_v5 }
 0x45f   : > { %11823 = vmatmul.mubr.msk.f32.gmra.mxu1 %vm657_vm4, %v11815_v42 }
 0x460   : > { %v4063_v1 = vpop.permute.xlu1 %4062  ;;  %3851 = vmatprep.mubr.f32.mxu1 %v15018_v5 }
 0x461   : > { %v4059_v13 = vpop.permute.xlu0 %4058  ;;  %11826 = vmatmul.mubr.msk.f32.gmra.mxu0 %vm657_vm4, %v11814_v8  ;;  %v3410_v8 = vld [vmem:[%s18125_s3 + $0x10] sm:$0xff] }
 0x462   : > { %3768 = vmatprep.mubr.f32.mxu0 %v15018_v5  ;;  %v4086_v27 = vsel %vm596_vm1, %v4059_v13, %v4061_v10 }
 0x463   : > { %11828 = vmatmul.mubr.msk.f32.vlgmr.msra.gmra.mxu1 %vm657_vm4, %v3408_v56 }
 0x464   : > { %3994 = vmatpush1.msra.mxu1 %v16315_v0  ;;  %v4079_v30 = vpop.permute.xlu1 %4078  ;;  %3857 = vmatprep.mubr.f32.mxu1 %v15018_v5 }
 0x465   : > { %3995 = vmatprep.subr.mxu1 %v16303_v9  ;;  %v4081_v12 = vpop.permute.xlu0 %4080  ;;  %11827 = vmatmul.mubr.msk.f32.gmra.mxu0 %vm657_vm4, %v11815_v42  ;;  %v4092_v9 = vsel %vm596_vm1, %v4073_v41, %v4075_v57  ;;  %v4094_v19 = vsel %vm596_vm1, %v4077_v39, %v4079_v30  ;;  %v11840_v41 = vld [vmem:[%s18125_s3 + $0x40] sm:$0xff] }
 0x466   : > { %3996 = vmatpush1.msra.mxu1 %v16298_v62  ;;  %v4095_v60 = vsel %vm596_vm1, %v4079_v30, %v4081_v12  ;;  %3940 = vmatprep.mubr.f32.mxu0 %v15018_v5  ;;  %v4087_v62 = vsel %vm596_vm1, %v4061_v10, %v4063_v1 }
 0x467   : > { %11829 = vmatmul.mubr.msk.f32.gmra.mxu1 %vm657_vm4, %v3409_v23  ;;  %4239 = vmatprep.subr.mxu1 %v4095_v60 }
 0x468   : > { %v4083_v0 = vpop.permute.xlu1 %4082  ;;  %3863 = vmatprep.mubr.f32.mxu1 %v15018_v5 }
 0x469   : > { %v4067_v3 = vpop.permute.xlu0 %4066  ;;  %11832 = vmatmul.mubr.msk.f32.vlgmr.msra.gmra.mxu0 %vm657_vm4, %v3408_v56 }
 0x46a   : > { %4151 = vmatpush1.msra.mxu0 %v4092_v9  ;;  %3946 = vmatprep.mubr.f32.mxu0 %v15018_v5  ;;  %v11842_v9 = vld [vmem:[%s18125_s3 + $0x50] sm:$0xff] }
 0x46b   : > { %4152 = vmatprep.subr.mxu0 %v4087_v62  ;;  %11830 = vmatmul.mubr.msk.f32.gmra.mxu1 %vm657_vm4, %v3410_v8 }
 0x46c   : > { %4153 = vmatpush1.msra.mxu0 %v4086_v27  ;;  %v4065_v35 = vpop.permute.xlu1 %4064  ;;  %3869 = vmatprep.mubr.f32.mxu1 %v15018_v5  ;;  %v11843_v27 = vld [vmem:[%s18125_s3 + $0x58] sm:$0xff] }
 0x46d   : > { %v4071_v34 = vpop.permute.xlu0 %4070  ;;  %11833 = vmatmul.mubr.msk.f32.gmra.mxu0 %vm657_vm4, %v3409_v23  ;;  %v4089_v54 = vsel %vm596_vm1, %v4065_v35, %v4067_v3  ;;  %v4088_v47 = vsel %vm596_vm1, %v4063_v1, %v4065_v35  ;;  %v4096_v1 = vsel %vm596_vm1, %v4081_v12, %v4083_v0 }
 0x46e   : > { %3952 = vmatprep.mubr.f32.mxu0 %v15018_v5 }
 0x46f   : > { %11831 = vmatmul.mubr.msk.f32.gmra.mxu1 %vm657_vm4, %v3411_v2 }
 0x470   : > { %v4069_v42 = vpop.permute.xlu1 %4068  ;;  %4029 = vmatprep.mubr.f32.mxu1 %v15018_v5 }
 0x471   : > { %v16503_v36 = vpop.permute.xlu0 %4435  ;;  %11834 = vmatmul.mubr.msk.f32.gmra.mxu0 %vm657_vm4, %v3410_v8  ;;  %v4091_v13 = vsel %vm596_vm1, %v4069_v42, %v4071_v34  ;;  %v4090_v60 = vsel %vm596_vm1, %v4067_v3, %v4069_v42 }
 0x472   : > { %3958 = vmatprep.mubr.f32.mxu0 %v15018_v5 }
 0x473   : > { %11836 = vmatmul.mubr.msk.f32.vlgmr.msra.gmra.mxu1 %vm657_vm4, %v3408_v56 }
 0x474   : > { %4240 = vmatpush1.msra.mxu1 %v4094_v19  ;;  %v4434_v43 = vpop.permute.xlu1 %4433  ;;  %4035 = vmatprep.mubr.f32.mxu1 %v15018_v5 }
 0x475   : > { %4241 = vmatprep.subr.mxu1 %v4089_v54  ;;  %v4085_v57 = vpop.permute.xlu0 %4084  ;;  %11835 = vmatmul.mubr.msk.f32.gmra.mxu0 %vm657_vm4, %v3411_v2  ;;  %v4452_v25 = vsel %vm624_vm0, %v4434_v43, %v16503_v36 }
 0x476   : > { %4242 = vmatpush1.msra.mxu1 %v4088_v47  ;;  %v4097_v39 = vsel %vm596_vm1, %v4083_v0, %v4085_v57  ;;  %4186 = vmatprep.mubr.f32.mxu0 %v15018_v5 }
 0x477   : > { %11837 = vmatmul.mubr.msk.f32.gmra.mxu1 %vm657_vm4, %v3409_v23  ;;  %4328 = vmatprep.subr.mxu0 %v4097_v39  ;;  %v11841_v23 = vld [vmem:[%s18125_s3 + $0x48] sm:$0xff] }
 0x478   : > { %4509 = vmatprep.subr.mxu1 %v4452_v25  ;;  %v4438_v10 = vpop.permute.xlu1 %4437  ;;  %4041 = vmatprep.mubr.f32.mxu1 %v15018_v5 }
 0x479   : > { %v16523_v56 = vpop.permute.xlu0 %4439  ;;  %11844 = vmatmul.mubr.msk.f32.vlgmr.msra.gmra.mxu0 %vm657_vm4, %v11840_v41  ;;  %v4453_v54 = vsel %vm624_vm0, %v16503_v36, %v4438_v10 }
 0x47a   : > { %4329 = vmatpush1.msra.mxu0 %v4096_v1  ;;  %4192 = vmatprep.mubr.f32.mxu0 %v15018_v5  ;;  %v4454_v30 = vsel %vm624_vm0, %v4438_v10, %v16523_v56  ;;  %v11856_v10 = vld [vmem:[%s18125_s3 + $0x60] sm:$0xff] }
 0x47b   : > { %4330 = vmatprep.subr.mxu0 %v4091_v13  ;;  %11838 = vmatmul.mubr.msk.f32.gmra.mxu1 %vm657_vm4, %v3410_v8 }
 0x47c   : > { %4331 = vmatpush1.msra.mxu0 %v4090_v60  ;;  %v4432_v12 = vpop.permute.xlu1 %4431  ;;  %4047 = vmatprep.mubr.f32.mxu1 %v15018_v5 }
 0x47d   : > { %4598 = vmatprep.subr.mxu0 %v4454_v30  ;;  %v4420_v0 = vpop.permute.xlu0 %4419  ;;  %11845 = vmatmul.mubr.msk.f32.gmra.mxu0 %vm657_vm4, %v11841_v23  ;;  %v4451_v35 = vsel %vm624_vm0, %v4432_v12, %v4434_v43  ;;  %v11857_v30 = vld [vmem:[%s18125_s3 + $0x68] sm:$0xff] }
 0x47e   : > { %4198 = vmatprep.mubr.f32.mxu0 %v15018_v5 }
 0x47f   : > { %11839 = vmatmul.mubr.msk.f32.gmra.mxu1 %vm657_vm4, %v3411_v2 }
 0x480   : > { %v4422_v3 = vpop.permute.xlu1 %4421  ;;  %4275 = vmatprep.mubr.f32.mxu1 %v15018_v5 }
 0x481   : > { %v4424_v8 = vpop.permute.xlu0 %4423  ;;  %11846 = vmatmul.mubr.msk.f32.gmra.mxu0 %vm657_vm4, %v11842_v9  ;;  %v4446_v62 = vsel %vm624_vm0, %v4420_v0, %v4422_v3 }
 0x482   : > { %4204 = vmatprep.mubr.f32.mxu0 %v15018_v5  ;;  %v4447_v57 = vsel %vm624_vm0, %v4422_v3, %v4424_v8  ;;  %v11858_v3 = vld [vmem:[%s18125_s3 + $0x70] sm:$0xff] }
 0x483   : > { %11848 = vmatmul.mubr.msk.f32.vlgmr.msra.gmra.mxu1 %vm657_vm4, %v11840_v41 }
 0x484   : > { %4510 = vmatpush1.msra.mxu1 %v4451_v35  ;;  %v4426_v2 = vpop.permute.xlu1 %4425  ;;  %4281 = vmatprep.mubr.f32.mxu1 %v15018_v5 }
 0x485   : > { %4511 = vmatprep.subr.mxu1 %v4446_v62  ;;  %v4418_v34 = vpop.permute.xlu0 %4417  ;;  %11847 = vmatmul.mubr.msk.f32.gmra.mxu0 %vm657_vm4, %v11843_v27  ;;  %v4448_v47 = vsel %vm624_vm0, %v4424_v8, %v4426_v2 }
 0x486   : > { %v4445_v42 = vsel %vm624_vm0, %v4418_v34, %v4420_v0  ;;  %4364 = vmatprep.mubr.f32.mxu0 %v15018_v5 }
 0x487   : > { %11849 = vmatmul.mubr.msk.f32.gmra.mxu1 %vm657_vm4, %v11841_v23 }
 0x488   : > { %4512 = vmatpush1.msra.mxu1 %v4445_v42  ;;  %v4442_v19 = vpop.permute.xlu1 %4441  ;;  %4287 = vmatprep.mubr.f32.mxu1 %v15018_v5 }
 0x489   : > { %v16559_v43 = vpop.permute.xlu0 %4794  ;;  %11852 = vmatmul.mubr.msk.f32.vlgmr.msra.gmra.mxu0 %vm657_vm4, %v11840_v41  ;;  %v4455_v12 = vsel %vm624_vm0, %v16523_v56, %v4442_v19 }
 0x48a   : > { %4599 = vmatpush1.msra.mxu0 %v4453_v54  ;;  %4370 = vmatprep.mubr.f32.mxu0 %v15018_v5 }
 0x48b   : > { %4600 = vmatprep.subr.mxu0 %v4448_v47  ;;  %11850 = vmatmul.mubr.msk.f32.gmra.mxu1 %vm657_vm4, %v11842_v9 }
 0x48c   : > { %4601 = vmatpush1.msra.mxu0 %v4447_v57  ;;  %v4793_v25 = vpop.permute.xlu1 %4792  ;;  %4293 = vmatprep.mubr.f32.mxu1 %v15018_v5 }
 0x48d   : > { %v4428_v39 = vpop.permute.xlu0 %4427  ;;  %11853 = vmatmul.mubr.msk.f32.gmra.mxu0 %vm657_vm4, %v11841_v23  ;;  %v4811_v36 = vsel %vm2484_vm6, %v4793_v25, %v16559_v43 }
 0x48e   : > { %4868 = vmatprep.subr.mxu0 %v4811_v36  ;;  %4376 = vmatprep.mubr.f32.mxu0 %v15018_v5  ;;  %v4449_v8 = vsel %vm624_vm0, %v4426_v2, %v4428_v39  ;;  %v11859_v2 = vld [vmem:[%s18125_s3 + $0x78] sm:$0xff] }
 0x48f   : > { %11851 = vmatmul.mubr.msk.f32.gmra.mxu1 %vm657_vm4, %v11843_v27 }
 0x490   : > { %v4791_v41 = vpop.permute.xlu1 %4790  ;;  %4545 = vmatprep.mubr.f32.mxu1 %v15018_v5 }
 0x491   : > { %v4779_v1 = vpop.permute.xlu0 %4778  ;;  %11854 = vmatmul.mubr.msk.f32.gmra.mxu0 %vm657_vm4, %v11842_v9  ;;  %v4810_v62 = vsel %vm2484_vm6, %v4791_v41, %v4793_v25 }
 0x492   : > { %4382 = vmatprep.mubr.f32.mxu0 %v15018_v5 }
 0x493   : > { %11860 = vmatmul.mubr.msk.f32.vlgmr.msra.gmra.mxu1 %vm657_vm4, %v11856_v10 }
 0x494   : > { %v4430_v13 = vpop.permute.xlu1 %4429  ;;  %4551 = vmatprep.mubr.f32.mxu1 %v15018_v5 }
 0x495   : > { %v4444_v23 = vpop.permute.xlu0 %4443  ;;  %11855 = vmatmul.mubr.msk.f32.gmra.mxu0 %vm657_vm4, %v11843_v27  ;;  %v4450_v9 = vsel %vm624_vm0, %v4428_v39, %v4430_v13 }
 0x496   : > { %v4456_v60 = vsel %vm624_vm0, %v4442_v19, %v4444_v23  ;;  %4634 = vmatprep.mubr.f32.mxu0 %v15018_v5 }
 0x497   : > { %11861 = vmatmul.mubr.msk.f32.gmra.mxu1 %vm657_vm4, %v11857_v30  ;;  %4687 = vmatprep.subr.mxu1 %v4456_v60 }
 0x498   : > { %4688 = vmatpush1.msra.mxu1 %v4455_v12  ;;  %v4781_v0 = vpop.permute.xlu1 %4780  ;;  %4557 = vmatprep.mubr.f32.mxu1 %v15018_v5  ;;  %v11873_v12 = vld [vmem:[%s18125_s3 + $0x88] sm:$0xff] }
 0x499   : > { %v4777_v27 = vpop.permute.xlu0 %4776  ;;  %11864 = vmatmul.mubr.msk.f32.vlgmr.msra.gmra.mxu0 %vm657_vm4, %v11856_v10  ;;  %4689 = vmatprep.subr.mxu1 %v4450_v9  ;;  %v4805_v56 = vsel %vm2484_vm6, %v4779_v1, %v4781_v0  ;;  %v11875_v9 = vld [vmem:[%s18125_s3 + $0x98] sm:$0xff] }
 0x49a   : > { %v4804_v35 = vsel %vm2484_vm6, %v4777_v27, %v4779_v1  ;;  %4869 = vmatpush1.msra.mxu0 %v4810_v62  ;;  %4690 = vmatpush1.msra.mxu1 %v4449_v8 }
 0x49b   : > { %11862 = vmatmul.mubr.msk.f32.gmra.mxu1 %vm657_vm4, %v11858_v3  ;;  %4870 = vmatprep.subr.mxu0 %v4805_v56 }
 0x49c   : > { %4640 = vmatprep.mubr.f32.mxu0 %v15018_v5  ;;  %4871 = vmatpush1.msra.mxu0 %v4804_v35  ;;  %v4797_v34 = vpop.permute.xlu1 %4796 }
 0x49d   : > { %v4799_v42 = vpop.permute.xlu0 %4798  ;;  %11865 = vmatmul.mubr.msk.f32.gmra.mxu0 %vm657_vm4, %v11857_v30  ;;  %4563 = vmatprep.mubr.f32.mxu1 %v15018_v5  ;;  %v4812_v57 = vsel %vm2484_vm6, %v16559_v43, %v4797_v34  ;;  %v11872_v43 = vld [vmem:[%s18125_s3 + $0x80] sm:$0xff] }
 0x49e   : > { %v4813_v19 = vsel %vm2484_vm6, %v4797_v34, %v4799_v42  ;;  %4646 = vmatprep.mubr.f32.mxu0 %v15018_v5 }
 0x49f   : > { %11863 = vmatmul.mubr.msk.f32.gmra.mxu1 %vm657_vm4, %v11859_v2  ;;  %4957 = vmatprep.subr.mxu1 %v4813_v19 }
 0x4a0   : > { %v4801_v54 = vpop.permute.xlu1 %4800  ;;  %4723 = vmatprep.mubr.f32.mxu1 %v15018_v5 }
 0x4a1   : > { %v4785_v47 = vpop.permute.xlu0 %4784  ;;  %11866 = vmatmul.mubr.msk.f32.gmra.mxu0 %vm657_vm4, %v11858_v3  ;;  %v4814_v13 = vsel %vm2484_vm6, %v4799_v42, %v4801_v54 }
 0x4a2   : > { %4652 = vmatprep.mubr.f32.mxu0 %v15018_v5 }
 0x4a3   : > { %11868 = vmatmul.mubr.msk.f32.vlgmr.msra.gmra.mxu1 %vm657_vm4, %v11856_v10 }
 0x4a4   : > { %4958 = vmatpush1.msra.mxu1 %v4812_v57  ;;  %v4783_v25 = vpop.permute.xlu1 %4782  ;;  %4729 = vmatprep.mubr.f32.mxu1 %v15018_v5 }
 0x4a5   : > { %v4803_v39 = vpop.permute.xlu0 %4802  ;;  %11867 = vmatmul.mubr.msk.f32.gmra.mxu0 %vm657_vm4, %v11859_v2  ;;  %v4806_v36 = vsel %vm2484_vm6, %v4781_v0, %v4783_v25  ;;  %v4807_v41 = vsel %vm2484_vm6, %v4783_v25, %v4785_v47  ;;  %v11874_v0 = vld [vmem:[%s18125_s3 + $0x90] sm:$0xff] }
 0x4a6   : > { %4959 = vmatprep.subr.mxu1 %v4807_v41  ;;  %v4815_v1 = vsel %vm2484_vm6, %v4801_v54, %v4803_v39  ;;  %4904 = vmatprep.mubr.f32.mxu0 %v15018_v5 }
 0x4a7   : > { %11869 = vmatmul.mubr.msk.f32.gmra.mxu1 %vm657_vm4, %v11857_v30  ;;  %5046 = vmatprep.subr.mxu0 %v4815_v1 }
 0x4a8   : > { %4960 = vmatpush1.msra.mxu1 %v4806_v36  ;;  %v4787_v10 = vpop.permute.xlu1 %4786  ;;  %4735 = vmatprep.mubr.f32.mxu1 %v15018_v5 }
 0x4a9   : > { %v4789_v23 = vpop.permute.xlu0 %4788  ;;  %11876 = vmatmul.mubr.msk.f32.vlgmr.msra.gmra.mxu0 %vm657_vm4, %v11872_v43  ;;  %v4808_v30 = vsel %vm2484_vm6, %v4785_v47, %v4787_v10 }
 0x4aa   : > { %5047 = vmatpush1.msra.mxu0 %v4814_v13  ;;  %v4809_v60 = vsel %vm2484_vm6, %v4787_v10, %v4789_v23  ;;  %4910 = vmatprep.mubr.f32.mxu0 %v15018_v5 }
 0x4ab   : > { %11870 = vmatmul.mubr.msk.f32.gmra.mxu1 %vm657_vm4, %v11858_v3  ;;  %5048 = vmatprep.subr.mxu0 %v4809_v60 }
 0x4ac   : > { %5049 = vmatpush1.msra.mxu0 %v4808_v30  ;;  %4741 = vmatprep.mubr.f32.mxu1 %v15018_v5 }
 0x4ad   : > { %11877 = vmatmul.mubr.msk.f32.gmra.mxu0 %vm657_vm4, %v11873_v12 }
 0x4ae   : > { %4916 = vmatprep.mubr.f32.mxu0 %v15018_v5 }
 0x4af   : > { %11871 = vmatmul.mubr.msk.f32.gmra.mxu1 %vm657_vm4, %v11859_v2 }
 0x4b0   : > { %4993 = vmatprep.mubr.f32.mxu1 %v15018_v5 }
 0x4b1   : > { %11878 = vmatmul.mubr.msk.f32.gmra.mxu0 %vm657_vm4, %v11874_v0 }
 0x4b2   : > { %4922 = vmatprep.mubr.f32.mxu0 %v15018_v5 }
 0x4b3   : > { %11880 = vmatmul.mubr.msk.f32.vlgmr.msra.gmra.mxu1 %vm657_vm4, %v11872_v43 }
 0x4b4   : > { %4999 = vmatprep.mubr.f32.mxu1 %v15018_v5 }
 0x4b5   : > { %11879 = vmatmul.mubr.msk.f32.gmra.mxu0 %vm657_vm4, %v11875_v9  ;;  %v16651_v3 = vpop.permute.xlu1 %2826 }
 0x4b6   : > { %v16653_v8 = vpop.permute.xlu0 %2831  ;;  %v2834_v62 = vadd.f32 %v16651_v3, %v2812_v58  ;;  %v2835_v27 = vadd.f32 %v16651_v3, %v2813_v20  ;;  %v2836_v56 = vadd.f32 %v16651_v3, %v2814_v11  ;;  %v2837_v35 = vadd.f32 %v16651_v3, %v2815_v17  ;;  %5082 = vmatprep.mubr.f32.mxu0 %v15018_v5 }
 0x4b7   : > { %18166 = vst [vmem:[#allocation23_spill] sm:$0xff] %v16653_v8  ;;  %v2840_v26 = vadd.f32 %v16653_v8, %v2818_v63  ;;  %v2841_v14 = vadd.f32 %v16653_v8, %v2819_v16  ;;  %v2842_v50 = vadd.f32 %v16653_v8, %v2820_v52  ;;  %v2843_v58 = vadd.f32 %v16653_v8, %v2821_v40 }
 0x4b8   : > { %11881 = vmatmul.mubr.msk.f32.gmra.mxu1 %vm657_vm4, %v11873_v12  ;;  %v2844_v44 = vadd.f32 %v16653_v8, %v2822_v28  ;;  %v2845_v37 = vadd.f32 %v16653_v8, %v2823_v61  ;;  %v2838_v59 = vadd.f32 %v16651_v3, %v2816_v15  ;;  %v2839_v20 = vadd.f32 %v16651_v3, %v2817_v32 }
 0x4b9   : > { %5005 = vmatprep.mubr.f32.mxu1 %v15018_v5  ;;  %v2852_v49 = vmax.f32 %v2840_v26, 0.0  ;;  %v2853_v29 = vmax.f32 %v2841_v14, 0.0  ;;  %v2854_v63 = vmax.f32 %v2842_v50, 0.0  ;;  %v2855_v24 = vmax.f32 %v2843_v58, 0.0  ;;  %11884 = vmatmul.mubr.msk.f32.vlgmr.msra.gmra.mxu0 %vm657_vm4, %v11872_v43 }
 0x4ba   : > { %v2856_v33 = vmax.f32 %v2844_v44, 0.0  ;;  %v2857_v16 = vmax.f32 %v2845_v37, 0.0  ;;  %v2846_v48 = vmax.f32 %v2834_v62, 0.0  ;;  %v2847_v53 = vmax.f32 %v2835_v27, 0.0  ;;  %5088 = vmatprep.mubr.f32.mxu0 %v15018_v5 }
 0x4bb   : > { %2864 = vst [vmem:[#allocation3 + $0x30] sm:$0xff] %v2852_v49  ;;  %2865 = vst [vmem:[#allocation3 + $0x38] sm:$0xff] %v2853_v29  ;;  %v2848_v18 = vmax.f32 %v2836_v56, 0.0  ;;  %v2849_v4 = vmax.f32 %v2837_v35, 0.0  ;;  %v2850_v45 = vmax.f32 %v2838_v59, 0.0  ;;  %v2851_v7 = vmax.f32 %v2839_v20, 0.0 }
 0x4bc   : > { %2866 = vst [vmem:[#allocation3 + $0x40] sm:$0xff] %v2854_v63  ;;  %2867 = vst [vmem:[#allocation3 + $0x48] sm:$0xff] %v2855_v24  ;;  %11882 = vmatmul.mubr.msk.f32.gmra.mxu1 %vm657_vm4, %v11874_v0 }
 0x4bd   : > { %2868 = vst [vmem:[#allocation3 + $0x50] sm:$0xff] %v2856_v33  ;;  %2869 = vst [vmem:[#allocation3 + $0x58] sm:$0xff] %v2857_v16  ;;  %5011 = vmatprep.mubr.f32.mxu1 %v15018_v5  ;;  %11885 = vmatmul.mubr.msk.f32.gmra.mxu0 %vm657_vm4, %v11873_v12 }
 0x4be   : > { %2858 = vst [vmem:[#allocation3] sm:$0xff] %v2846_v48  ;;  %2859 = vst [vmem:[#allocation3 + $0x8] sm:$0xff] %v2847_v53  ;;  %5094 = vmatprep.mubr.f32.mxu0 %v15018_v5 }
 0x4bf   : > { %2860 = vst [vmem:[#allocation3 + $0x10] sm:$0xff] %v2848_v18  ;;  %2861 = vst [vmem:[#allocation3 + $0x18] sm:$0xff] %v2849_v4 }
 0x4c0   : > { %2862 = vst [vmem:[#allocation3 + $0x20] sm:$0xff] %v2850_v45  ;;  %2863 = vst [vmem:[#allocation3 + $0x28] sm:$0xff] %v2851_v7  ;;  %11883 = vmatmul.mubr.msk.f32.gmra.mxu1 %vm657_vm4, %v11875_v9 }
 0x4c1   : > { %11886 = vmatmul.mubr.msk.f32.gmra.mxu0 %vm657_vm4, %v11874_v0 }
 0x4c2   : > { %5100 = vmatprep.mubr.f32.mxu0 %v15018_v5 }
 0x4c5   : > { %11887 = vmatmul.mubr.msk.f32.gmra.mxu0 %vm657_vm4, %v11875_v9 }
 0x508   : > { %v3574_v22 = vpop.f32.mrf.mxu0 }
 0x50a   : > { %v3576_v11 = vpop.f32.mrf.mxu0 }
 0x50c   : > { %v3580_v6 = vpop.f32.mrf.mxu0 }
 0x50e   : > { %v3582_v21 = vpop.f32.mrf.mxu0 }
 0x510   : > { %v3586_v17 = vpop.f32.mrf.mxu0 }
 0x512   : > { %v3588_v55 = vpop.f32.mrf.mxu0  ;;  %v3663_v15 = vpop.f32.mrf.mxu1 }
 0x514   : > { %v3665_v51 = vpop.f32.mrf.mxu1 }
 0x515   : > { %v3592_v52 = vpop.f32.mrf.mxu0 }
 0x517   : > { %v3594_v38 = vpop.f32.mrf.mxu0  ;;  %v3669_v32 = vpop.f32.mrf.mxu1 }
 0x519   : > { %v3671_v31 = vpop.f32.mrf.mxu1  ;;  %v3752_v40 = vpop.f32.mrf.mxu0 }
 0x51b   : > { %v3675_v28 = vpop.f32.mrf.mxu1  ;;  %v3754_v46 = vpop.f32.mrf.mxu0 }
 0x51d   : > { %v3677_v61 = vpop.f32.mrf.mxu1  ;;  %v3758_v34 = vpop.f32.mrf.mxu0 }
 0x51f   : > { %v3681_v5 = vpop.f32.mrf.mxu1  ;;  %v3760_v2 = vpop.f32.mrf.mxu0 }
 0x521   : > { %v3683_v42 = vpop.f32.mrf.mxu1  ;;  %v3764_v19 = vpop.f32.mrf.mxu0 }
 0x523   : > { %v3766_v54 = vpop.f32.mrf.mxu0  ;;  %v3853_v47 = vpop.f32.mrf.mxu1 }
 0x524   : > { %v16716_v57 = vadd.f32 %v3853_v47, %v3574_v22 }
 0x525   : > { %v3770_v25 = vpop.f32.mrf.mxu0  ;;  %v3855_v39 = vpop.f32.mrf.mxu1 }
 0x526   : > { %v16718_v36 = vadd.f32 %v3855_v39, %v3576_v11 }
 0x527   : > { %v3772_v41 = vpop.f32.mrf.mxu0  ;;  %v3859_v1 = vpop.f32.mrf.mxu1 }
 0x528   : > { %v16720_v43 = vadd.f32 %v3859_v1, %v3580_v6 }
 0x529   : > { %v3861_v10 = vpop.f32.mrf.mxu1  ;;  %v3942_v13 = vpop.f32.mrf.mxu0 }
 0x52a   : > { %v16722_v23 = vadd.f32 %v3861_v10, %v3582_v21  ;;  %v16724_v60 = vadd.f32 %v3942_v13, %v3663_v15 }
 0x52b   : > { %v3865_v12 = vpop.f32.mrf.mxu1  ;;  %v3944_v30 = vpop.f32.mrf.mxu0 }
 0x52c   : > { %v16726_v0 = vadd.f32 %v3865_v12, %v3586_v17  ;;  %v16728_v9 = vadd.f32 %v3944_v30, %v3665_v51 }
 0x52d   : > { %v3867_v62 = vpop.f32.mrf.mxu1  ;;  %v3948_v27 = vpop.f32.mrf.mxu0 }
 0x52e   : > { %v16730_v56 = vadd.f32 %v3867_v62, %v3588_v55  ;;  %v16732_v35 = vadd.f32 %v3948_v27, %v3669_v32 }
 0x52f   : > { %v3871_v26 = vpop.f32.mrf.mxu1  ;;  %v3950_v14 = vpop.f32.mrf.mxu0 }
 0x530   : > { %v16734_v50 = vadd.f32 %v3871_v26, %v3592_v52  ;;  %v16736_v58 = vadd.f32 %v3950_v14, %v3671_v31 }
 0x531   : > { %v3873_v44 = vpop.f32.mrf.mxu1  ;;  %v3954_v37 = vpop.f32.mrf.mxu0 }
 0x532   : > { %v16738_v59 = vadd.f32 %v3873_v44, %v3594_v38  ;;  %v16740_v20 = vadd.f32 %v3954_v37, %v3675_v28 }
 0x533   : > { %v3956_v49 = vpop.f32.mrf.mxu0  ;;  %v4031_v29 = vpop.f32.mrf.mxu1 }
 0x534   : > { %v16742_v63 = vadd.f32 %v3956_v49, %v3677_v61  ;;  %v16744_v24 = vadd.f32 %v4031_v29, %v3752_v40 }
 0x535   : > { %v3960_v33 = vpop.f32.mrf.mxu0  ;;  %v4033_v16 = vpop.f32.mrf.mxu1 }
 0x536   : > { %v16746_v48 = vadd.f32 %v3960_v33, %v3681_v5  ;;  %v16748_v53 = vadd.f32 %v4033_v16, %v3754_v46 }
 0x537   : > { %v3962_v18 = vpop.f32.mrf.mxu0  ;;  %v4037_v4 = vpop.f32.mrf.mxu1 }
 0x538   : > { %v16750_v45 = vadd.f32 %v3962_v18, %v3683_v42  ;;  %v16752_v7 = vadd.f32 %v4037_v4, %v3758_v34 }
 0x539   : > { %v4039_v22 = vpop.f32.mrf.mxu1  ;;  %v4188_v11 = vpop.f32.mrf.mxu0 }
 0x53a   : > { %v16754_v6 = vadd.f32 %v4039_v22, %v3760_v2 }
 0x53b   : > { %v4043_v21 = vpop.f32.mrf.mxu1  ;;  %v4190_v17 = vpop.f32.mrf.mxu0 }
 0x53c   : > { %v16756_v55 = vadd.f32 %v4043_v21, %v3764_v19 }
 0x53d   : > { %v4045_v15 = vpop.f32.mrf.mxu1  ;;  %v4194_v51 = vpop.f32.mrf.mxu0 }
 0x53e   : > { %18167 = vst [vmem:[#allocation24_spill] sm:$0xff] %v16756_v55  ;;  %v16758_v52 = vadd.f32 %v4045_v15, %v3766_v54 }
 0x53f   : > { %v4049_v38 = vpop.f32.mrf.mxu1  ;;  %v4196_v32 = vpop.f32.mrf.mxu0 }
 0x540   : > { %18168 = vst [vmem:[#allocation25_spill] sm:$0xff] %v16758_v52  ;;  %v16760_v31 = vadd.f32 %v4049_v38, %v3770_v25 }
 0x541   : > { %v4051_v40 = vpop.f32.mrf.mxu1  ;;  %v4200_v28 = vpop.f32.mrf.mxu0 }
 0x542   : > { %18169 = vst [vmem:[#allocation26_spill] sm:$0xff] %v16760_v31  ;;  %v16762_v46 = vadd.f32 %v4051_v40, %v3772_v41 }
 0x543   : > { %v4202_v61 = vpop.f32.mrf.mxu0  ;;  %v4277_v34 = vpop.f32.mrf.mxu1 }
 0x544   : > { %18170 = vst [vmem:[#allocation27_spill] sm:$0xff] %v16762_v46 }
 0x545   : > { %v4206_v5 = vpop.f32.mrf.mxu0  ;;  %v4279_v2 = vpop.f32.mrf.mxu1 }
 0x547   : > { %v4208_v42 = vpop.f32.mrf.mxu0  ;;  %v4283_v47 = vpop.f32.mrf.mxu1 }
 0x549   : > { %v4285_v19 = vpop.f32.mrf.mxu1  ;;  %v16764_v39 = vpop.f32.mrf.mxu0 }
 0x54b   : > { %v16766_v1 = vpop.f32.mrf.mxu1  ;;  %v16768_v54 = vpop.f32.mrf.mxu0 }
 0x54d   : > { %v16770_v10 = vpop.f32.mrf.mxu1  ;;  %v16772_v25 = vpop.f32.mrf.mxu0 }
 0x54f   : > { %v16774_v13 = vpop.f32.mrf.mxu1  ;;  %v16776_v41 = vpop.f32.mrf.mxu0 }
 0x551   : > { %v16778_v12 = vpop.f32.mrf.mxu1  ;;  %v16780_v30 = vpop.f32.mrf.mxu0 }
 0x552   : > { %18171 = vst [vmem:[#allocation28_spill] sm:$0xff] %v16780_v30 }
 0x553   : > { %v16782_v62 = vpop.f32.mrf.mxu0  ;;  %v4547_v27 = vpop.f32.mrf.mxu1 }
 0x554   : > { %18172 = vst [vmem:[#allocation29_spill] sm:$0xff] %v16782_v62 }
 0x555   : > { %v16784_v26 = vpop.f32.mrf.mxu0  ;;  %v4549_v14 = vpop.f32.mrf.mxu1 }
 0x556   : > { %18173 = vst [vmem:[#allocation30_spill] sm:$0xff] %v16784_v26 }
 0x557   : > { %v16786_v44 = vpop.f32.mrf.mxu0  ;;  %v4553_v37 = vpop.f32.mrf.mxu1 }
 0x558   : > { %18174 = vst [vmem:[#allocation31_spill] sm:$0xff] %v16786_v44 }
 0x559   : > { %v4555_v49 = vpop.f32.mrf.mxu1  ;;  %v16788_v29 = vpop.f32.mrf.mxu0 }
 0x55a   : > { %18175 = vst [vmem:[#allocation32_spill] sm:$0xff] %v16788_v29  ;;  %v4407_v29 = vadd.f32 %v4206_v5, %v16734_v50 }
 0x55b   : > { %v4559_v33 = vpop.f32.mrf.mxu1  ;;  %v16790_v16 = vpop.f32.mrf.mxu0 }
 0x55c   : > { %18176 = vst [vmem:[#allocation33_spill] sm:$0xff] %v16790_v16 }
 0x55d   : > { %v4561_v18 = vpop.f32.mrf.mxu1  ;;  %v16792_v4 = vpop.f32.mrf.mxu0 }
 0x55e   : > { %18177 = vst [vmem:[#allocation34_spill] sm:$0xff] %v16792_v4 }
 0x55f   : > { %v4565_v22 = vpop.f32.mrf.mxu1  ;;  %v16794_v21 = vpop.f32.mrf.mxu0 }
 0x560   : > { %18178 = vst [vmem:[#allocation35_spill] sm:$0xff] %v16794_v21 }
 0x561   : > { %v4567_v15 = vpop.f32.mrf.mxu1  ;;  %v16796_v38 = vpop.f32.mrf.mxu0 }
 0x562   : > { %18179 = vst [vmem:[#allocation36_spill] sm:$0xff] %v16796_v38 }
 0x563   : > { %v16798_v40 = vpop.f32.mrf.mxu0  ;;  %v16800_v46 = vpop.f32.mrf.mxu1 }
 0x564   : > { %18180 = vst [vmem:[#allocation37_spill] sm:$0xff] %v16798_v40  ;;  %18181 = vst [vmem:[#allocation38_spill] sm:$0xff] %v16800_v46  ;;  %v4389_v40 = vadd.f32 %v4188_v11, %v16716_v57  ;;  %v4401_v46 = vadd.f32 %v4200_v28, %v16726_v0  ;;  %v4392_v57 = vadd.f32 %v4279_v2, %v16728_v9 }
 0x565   : > { %v16802_v44 = vpop.f32.mrf.mxu0  ;;  %v16804_v26 = vpop.f32.mrf.mxu1 }
 0x566   : > { %18182 = vst [vmem:[#allocation39_spill] sm:$0xff] %v16802_v44  ;;  %18183 = vst [vmem:[#allocation40_spill] sm:$0xff] %v16804_v26  ;;  %v4390_v44 = vadd.f32 %v4190_v17, %v16718_v36  ;;  %v4748_v8 = vadd.f32 %v4547_v27, %v4389_v40  ;;  %v4760_v38 = vadd.f32 %v4559_v33, %v4401_v46 }
 0x567   : > { %v16806_v31 = vpop.f32.mrf.mxu0  ;;  %v16808_v16 = vpop.f32.mrf.mxu1  ;;  %v4766_v46 = vadd.f32 %v4565_v22, %v4407_v29  ;;  %v4404_v27 = vadd.f32 %v16770_v10, %v16742_v63  ;;  %v4410_v63 = vadd.f32 %v16778_v12, %v16750_v45  ;;  %v18192_v29 = vld [vmem:[#allocation23_spill] sm:$0xff]  ;;  %v18197_v22 = vld [vmem:[#allocation33_spill] sm:$0xff] }
 0x568   : > { %18184 = vst [vmem:[#allocation41_spill] sm:$0xff] %v16806_v31  ;;  %18185 = vst [vmem:[#allocation42_spill] sm:$0xff] %v16808_v16  ;;  %v4395_v16 = vadd.f32 %v4194_v51, %v16720_v43  ;;  %v4749_v11 = vadd.f32 %v4549_v14, %v4390_v44  ;;  %v4408_v43 = vadd.f32 %v4208_v42, %v16738_v59 }
 0x569   : > { %v16810_v62 = vpop.f32.mrf.mxu1  ;;  %v4906_v4 = vpop.f32.mrf.mxu0  ;;  %v4398_v51 = vadd.f32 %v4285_v19, %v16736_v58  ;;  %v4409_v44 = vadd.f32 %v16774_v13, %v16746_v48  ;;  %v18194_v48 = vld [vmem:[#allocation28_spill] sm:$0xff] }
 0x56a   : > { %18186 = vst [vmem:[#allocation43_spill] sm:$0xff] %v16810_v62  ;;  %v4402_v62 = vadd.f32 %v4202_v61, %v16730_v56  ;;  %v5107_v28 = vadd.f32 %v4906_v4, %v4748_v8  ;;  %v4397_v56 = vadd.f32 %v4283_v47, %v16732_v35  ;;  %v4403_v8 = vadd.f32 %v16766_v1, %v16740_v20  ;;  %v18195_v4 = vld [vmem:[#allocation25_spill] sm:$0xff] }
 0x56b   : > { %v16812_v52 = vpop.f32.mrf.mxu1  ;;  %v4908_v21 = vpop.f32.mrf.mxu0  ;;  %v4767_v2 = vadd.f32 %v4567_v15, %v4408_v43  ;;  %v18198_v45 = vld [vmem:[#allocation37_spill] sm:$0xff] }
 0x56c   : > { %18187 = vst [vmem:[#allocation44_spill] sm:$0xff] %v16812_v52  ;;  %v4396_v52 = vadd.f32 %v4196_v32, %v16722_v23  ;;  %v4761_v17 = vadd.f32 %v4561_v18, %v4402_v62  ;;  %v4754_v23 = vadd.f32 %v4553_v37, %v4395_v16  ;;  %v5108_v50 = vadd.f32 %v4908_v21, %v4749_v11  ;;  %v18193_v18 = vld [vmem:[#allocation24_spill] sm:$0xff] }
 0x56d   : > { %v16814_v30 = vpop.f32.mrf.mxu1  ;;  %v4912_v55 = vpop.f32.mrf.mxu0  ;;  %v4394_v62 = vadd.f32 %v16768_v54, %v16748_v53  ;;  %v16848_v53 = vadd.f32 %v16776_v41, %v16754_v6  ;;  %v18190_v54 = vld [vmem:[#allocation32_spill] sm:$0xff]  ;;  %v4405_v13 = vadd.f32 %v18194_v48, %v18193_v18  ;;  %v18196_v6 = vld [vmem:[#allocation29_spill] sm:$0xff]  ;;  %v4751_v21 = vadd.f32 %v18197_v22, %v4392_v57 }
 0x56e   : > { %18188 = vst [vmem:[#allocation45_spill] sm:$0xff] %v16814_v30  ;;  %v4391_v30 = vadd.f32 %v4277_v34, %v16724_v60  ;;  %v4393_v34 = vadd.f32 %v16764_v39, %v16744_v24  ;;  %v4755_v5 = vadd.f32 %v4555_v49, %v4396_v52  ;;  %v5113_v35 = vadd.f32 %v4912_v55, %v4754_v23  ;;  %v18201_v23 = vld [vmem:[#allocation27_spill] sm:$0xff] }
 0x56f   : > { %v16819_v26 = vpop.f32.mrf.mxu1  ;;  %v4914_v31 = vpop.f32.mrf.mxu0  ;;  %v4399_v24 = vadd.f32 %v16772_v25, %v16752_v7  ;;  %v18191_v25 = vld [vmem:[#allocation36_spill] sm:$0xff]  ;;  %v4406_v41 = vadd.f32 %v18196_v6, %v18195_v4  ;;  %v4763_v12 = vadd.f32 %v18198_v45, %v4404_v27 }
 0x570   : > { %18189 = vst [vmem:[#allocation46_spill] sm:$0xff] %v16819_v26  ;;  %v5114_v39 = vadd.f32 %v4914_v31, %v4755_v5  ;;  %v4750_v7 = vadd.f32 %v18190_v54, %v4391_v30  ;;  %v4762_v37 = vadd.f32 %v18191_v25, %v4403_v8 }
 0x571   : > { %v16827_v0 = vpop.f32.mrf.mxu1  ;;  %v4918_v36 = vpop.f32.mrf.mxu0 }
 0x572   : > { %v5119_v26 = vadd.f32 %v4918_v36, %v4760_v38 }
 0x573   : > { %v4920_v32 = vpop.f32.mrf.mxu0  ;;  %v4995_v60 = vpop.f32.mrf.mxu1 }
 0x574   : > { %v5131_v61 = vmax.f32 %v5107_v28, %v5119_v26  ;;  %v5120_v9 = vadd.f32 %v4920_v32, %v4761_v17  ;;  %v5109_v38 = vadd.f32 %v4995_v60, %v4750_v7  ;;  %v18199_v17 = vld [vmem:[#allocation26_spill] sm:$0xff]  ;;  %v18202_v32 = vld [vmem:[#allocation31_spill] sm:$0xff] }
 0x575   : > { %v4924_v59 = vpop.f32.mrf.mxu0  ;;  %v4997_v42 = vpop.f32.mrf.mxu1  ;;  %v18200_v28 = vld [vmem:[#allocation30_spill] sm:$0xff] }
 0x576   : > { %v5143_v58 = vadd.f32 %v5131_v61, %v16651_v3  ;;  %v5132_v47 = vmax.f32 %v5108_v50, %v5120_v9  ;;  %v5125_v19 = vadd.f32 %v4924_v59, %v4766_v46  ;;  %v4411_v43 = vadd.f32 %v18200_v28, %v18199_v17  ;;  %v18203_v50 = vld [vmem:[#allocation34_spill] sm:$0xff]  ;;  %v18204_v9 = vld [vmem:[#allocation39_spill] sm:$0xff] }
 0x577   : > { %v4926_v20 = vpop.f32.mrf.mxu0  ;;  %v4412_v46 = vadd.f32 %v18202_v32, %v18201_v23  ;;  %v4756_v61 = vadd.f32 %v18203_v50, %v4397_v56  ;;  %v4768_v57 = vadd.f32 %v18204_v9, %v4409_v44  ;;  %v18212_v6 = vld [vmem:[#allocation46_spill] sm:$0xff] }
 0x578   : > { %v5001_v52 = vpop.f32.mrf.mxu1  ;;  %v5155_v1 = vmax.f32 %v5143_v58, 0.0  ;;  %v5144_v26 = vadd.f32 %v5132_v47, %v16651_v3  ;;  %v5137_v55 = vmax.f32 %v5113_v35, %v5125_v19  ;;  %v5126_v14 = vadd.f32 %v4926_v20, %v4767_v2  ;;  %v18205_v58 = vld [vmem:[#allocation35_spill] sm:$0xff]  ;;  %v18206_v19 = vld [vmem:[#allocation38_spill] sm:$0xff] }
 0x579   : > { %v5084_v10 = vpop.f32.mrf.mxu0  ;;  %v5110_v2 = vadd.f32 %v4997_v42, %v4751_v21  ;;  %v4757_v47 = vadd.f32 %v18205_v58, %v4398_v51  ;;  %v4752_v27 = vadd.f32 %v18206_v19, %v4393_v34  ;;  %v5115_v56 = vadd.f32 %v5001_v52, %v4756_v61  ;;  %v18209_v42 = vld [vmem:[#allocation42_spill] sm:$0xff] }
 0x57a   : > { %v5003_v31 = vpop.f32.mrf.mxu1  ;;  %5168 = vst [vmem:[#allocation3 + $0x60] sm:$0xff] %v5155_v1  ;;  %v5156_v49 = vmax.f32 %v5144_v26, 0.0  ;;  %v5149_v33 = vadd.f32 %v5137_v55, %v18192_v29  ;;  %v5138_v16 = vmax.f32 %v5114_v39, %v5126_v14  ;;  %v18207_v39 = vld [vmem:[#allocation40_spill] sm:$0xff]  ;;  %v18208_v1 = vld [vmem:[#allocation41_spill] sm:$0xff]  ;;  %v4758_v25 = vadd.f32 %v18209_v42, %v4399_v24 }
 0x57b   : > { %v5086_v15 = vpop.f32.mrf.mxu0  ;;  %v4753_v20 = vadd.f32 %v18207_v39, %v4394_v62  ;;  %v4769_v26 = vadd.f32 %v18208_v1, %v4410_v63  ;;  %v4770_v52 = vadd.f32 %v18212_v6, %v4411_v43  ;;  %v5111_v22 = vadd.f32 %v5084_v10, %v4752_v27 }
 0x57c   : > { %v5007_v30 = vpop.f32.mrf.mxu1  ;;  %5169 = vst [vmem:[#allocation3 + $0x68] sm:$0xff] %v5156_v49  ;;  %v5161_v40 = vmax.f32 %v5149_v33, 0.0  ;;  %v5150_v36 = vadd.f32 %v5138_v16, %v18192_v29  ;;  %v18211_v33 = vld [vmem:[#allocation45_spill] sm:$0xff]  ;;  %v5116_v16 = vadd.f32 %v5003_v31, %v4757_v47  ;;  %v18213_v31 = vld [vmem:[#allocation43_spill] sm:$0xff] }
 0x57d   : > { %v5121_v11 = vadd.f32 %v5007_v30, %v4762_v37  ;;  %v5090_v5 = vpop.f32.mrf.mxu0  ;;  %v18210_v37 = vld [vmem:[#allocation44_spill] sm:$0xff]  ;;  %v4765_v51 = vadd.f32 %v18211_v33, %v4406_v41  ;;  %v5112_v21 = vadd.f32 %v5086_v15, %v4753_v20 }
 0x57e   : > { %v5009_v8 = vpop.f32.mrf.mxu1  ;;  %5174 = vst [vmem:[#allocation3 + $0x90] sm:$0xff] %v5161_v40  ;;  %v5162_v59 = vmax.f32 %v5150_v36, 0.0  ;;  %v4764_v49 = vadd.f32 %v18210_v37, %v4405_v13  ;;  %v4771_v40 = vadd.f32 %v16827_v0, %v4412_v46  ;;  %v5117_v36 = vadd.f32 %v5090_v5, %v4758_v25 }
 0x57f   : > { %v5133_v60 = vmax.f32 %v5109_v38, %v5121_v11  ;;  %v5122_v35 = vadd.f32 %v5009_v8, %v4763_v12  ;;  %v5092_v14 = vpop.f32.mrf.mxu0  ;;  %v4759_v38 = vadd.f32 %v18213_v31, %v16848_v53 }
 0x580   : > { %v5013_v55 = vpop.f32.mrf.mxu1  ;;  %5175 = vst [vmem:[#allocation3 + $0x98] sm:$0xff] %v5162_v59 }
 0x581   : > { %v5145_v44 = vadd.f32 %v5133_v60, %v16651_v3  ;;  %v5134_v54 = vmax.f32 %v5110_v2, %v5122_v35  ;;  %v5127_v7 = vadd.f32 %v5013_v55, %v4768_v57  ;;  %v5096_v18 = vpop.f32.mrf.mxu0  ;;  %v5118_v23 = vadd.f32 %v5092_v14, %v4759_v38 }
 0x582   : > { %v5015_v34 = vpop.f32.mrf.mxu1  ;;  %v5123_v45 = vadd.f32 %v5096_v18, %v4764_v49 }
 0x583   : > { %v5157_v62 = vmax.f32 %v5145_v44, 0.0  ;;  %v5146_v63 = vadd.f32 %v5134_v54, %v16651_v3  ;;  %v5139_v48 = vmax.f32 %v5115_v56, %v5127_v7  ;;  %v5128_v4 = vadd.f32 %v5015_v34, %v4769_v26  ;;  %v5098_v12 = vpop.f32.mrf.mxu0 }
 0x584   : > { %v5124_v41 = vadd.f32 %v5098_v12, %v4765_v51  ;;  %v5135_v11 = vmax.f32 %v5111_v22, %v5123_v45 }
 0x585   : > { %5170 = vst [vmem:[#allocation3 + $0x70] sm:$0xff] %v5157_v62  ;;  %v5158_v24 = vmax.f32 %v5146_v63, 0.0  ;;  %v5151_v13 = vadd.f32 %v5139_v48, %v18192_v29  ;;  %v5140_v30 = vmax.f32 %v5116_v16, %v5128_v4  ;;  %v5102_v17 = vpop.f32.mrf.mxu0 }
 0x586   : > { %v5136_v15 = vmax.f32 %v5112_v21, %v5124_v41  ;;  %v5129_v43 = vadd.f32 %v5102_v17, %v4770_v52  ;;  %v5147_v32 = vadd.f32 %v5135_v11, %v16651_v3 }
 0x587   : > { %5171 = vst [vmem:[#allocation3 + $0x78] sm:$0xff] %v5158_v24  ;;  %v5163_v28 = vmax.f32 %v5151_v13, 0.0  ;;  %v5152_v10 = vadd.f32 %v5140_v30, %v18192_v29  ;;  %v5104_v50 = vpop.f32.mrf.mxu0 }
 0x588   : > { %v5148_v9 = vadd.f32 %v5136_v15, %v16651_v3  ;;  %v5141_v53 = vmax.f32 %v5117_v36, %v5129_v43  ;;  %v5130_v57 = vadd.f32 %v5104_v50, %v4771_v40  ;;  %v5159_v0 = vmax.f32 %v5147_v32, 0.0 }
 0x589   : > { %5176 = vst [vmem:[#allocation3 + $0xa0] sm:$0xff] %v5163_v28  ;;  %v5164_v61 = vmax.f32 %v5152_v10, 0.0 }
 0x58a   : > { %v5160_v46 = vmax.f32 %v5148_v9, 0.0  ;;  %v5153_v8 = vadd.f32 %v5141_v53, %v18192_v29  ;;  %v5142_v5 = vmax.f32 %v5118_v23, %v5130_v57  ;;  %5172 = vst [vmem:[#allocation3 + $0x80] sm:$0xff] %v5159_v0 }
 0x58b   : > { %5177 = vst [vmem:[#allocation3 + $0xa8] sm:$0xff] %v5164_v61 }
 0x58c   : > { %5173 = vst [vmem:[#allocation3 + $0x88] sm:$0xff] %v5160_v46  ;;  %v5165_v2 = vmax.f32 %v5153_v8, 0.0  ;;  %v5154_v59 = vadd.f32 %v5142_v5, %v18192_v29 }
 0x58e   : > { %5178 = vst [vmem:[#allocation3 + $0xb0] sm:$0xff] %v5165_v2  ;;  %v5166_v60 = vmax.f32 %v5154_v59, 0.0 }
 0x590   : > { %5179 = vst [vmem:[#allocation3 + $0xb8] sm:$0xff] %v5166_v60 }
 0x591 PF: > { %v13553_v3 = vld [vmem:[%s15259_s29 + $0x374] ss:$8 sps:$4 sm:$0xff]   ;;  %v13557_v29 = vld [vmem:[%s15259_s29 + $0x370] ss:$8 sps:$4 sm:$0xff]   ;;  %v13559_v47 = vld [vmem:[%s15259_s29 + $0x364] ss:$8 sps:$4 sm:$0xff]  }
 0x592   : > { %v13555_v35 = vld [vmem:[%s15259_s29 + $0x474] ss:$8 sps:$4 sm:$0xff]   ;;  %5935 = vmatprep.subr.bf16.mxu0 %v13553_v3  ;;  %v13558_v58 = vld [vmem:[%s15259_s29 + $0x470] ss:$8 sps:$4 sm:$0xff]   ;;  %v13561_v19 = vld [vmem:[%s15259_s29 + $0x464] ss:$8 sps:$4 sm:$0xff]  }
 0x593   : > { %5976 = vmatprep.subr.bf16.mxu1 %v13555_v35  ;;  %5936 = vmatpush1.bf16.msra.mxu0 %v13557_v29  ;;  %v13563_v27 = vld [vmem:[%s15259_s29 + $0x360] ss:$8 sps:$4 sm:$0xff]   ;;  %v13565_v20 = vld [vmem:[%s15259_s29 + $0x354] ss:$8 sps:$4 sm:$0xff]   ;;  %v13569_v26 = vld [vmem:[%s15259_s29 + $0x350] ss:$8 sps:$4 sm:$0xff]  }
 0x594   : > { %5977 = vmatpush1.bf16.msra.mxu1 %v13558_v58  ;;  %5937 = vmatprep.subr.bf16.mxu0 %v13559_v47  ;;  %v13564_v39 = vld [vmem:[%s15259_s29 + $0x460] ss:$8 sps:$4 sm:$0xff]   ;;  %v13567_v1 = vld [vmem:[%s15259_s29 + $0x454] ss:$8 sps:$4 sm:$0xff]   ;;  %v13570_v55 = vld [vmem:[%s15259_s29 + $0x450] ss:$8 sps:$4 sm:$0xff]  }
 0x595   : > { %5978 = vmatprep.subr.bf16.mxu1 %v13561_v19  ;;  %v13571_v14 = vld [vmem:[%s15259_s29 + $0x344] ss:$8 sps:$4 sm:$0xff]   ;;  %v13575_v44 = vld [vmem:[%s15259_s29 + $0x340] ss:$8 sps:$4 sm:$0xff]   ;;  %v13577_v7 = vld [vmem:[%s15259_s29 + $0x334] ss:$8 sps:$4 sm:$0xff]  }
 0x596   : > { %v13573_v56 = vld [vmem:[%s15259_s29 + $0x444] ss:$8 sps:$4 sm:$0xff]   ;;  %v13576_v54 = vld [vmem:[%s15259_s29 + $0x440] ss:$8 sps:$4 sm:$0xff]   ;;  %v13579_v42 = vld [vmem:[%s15259_s29 + $0x434] ss:$8 sps:$4 sm:$0xff]  }
 0x597   : > { %5938 = vmatpush1.bf16.msra.mxu0 %v13563_v27  ;;  %v13581_v25 = vld [vmem:[%s15259_s29 + $0x330] ss:$8 sps:$4 sm:$0xff]   ;;  %v13583_v49 = vld [vmem:[%s15259_s29 + $0x324] ss:$8 sps:$4 sm:$0xff]   ;;  %v13587_v51 = vld [vmem:[%s15259_s29 + $0x320] ss:$8 sps:$4 sm:$0xff]  }
 0x598   : > { %5979 = vmatpush1.bf16.msra.mxu1 %v13564_v39  ;;  %5939 = vmatprep.subr.bf16.mxu0 %v13565_v20  ;;  %v13582_v37 = vld [vmem:[%s15259_s29 + $0x430] ss:$8 sps:$4 sm:$0xff]   ;;  %v13585_v33 = vld [vmem:[%s15259_s29 + $0x424] ss:$8 sps:$4 sm:$0xff]   ;;  %v13588_v16 = vld [vmem:[%s15259_s29 + $0x420] ss:$8 sps:$4 sm:$0xff]  }
 0x599   : > { %5980 = vmatprep.subr.bf16.mxu1 %v13567_v1  ;;  %v13589_v34 = vld [vmem:[%s15259_s29 + $0x314] ss:$8 sps:$4 sm:$0xff]   ;;  %v13593_v62 = vld [vmem:[%s15259_s29 + $0x310] ss:$8 sps:$4 sm:$0xff]   ;;  %v13595_v48 = vld [vmem:[%s15259_s29 + $0x304] ss:$8 sps:$4 sm:$0xff]  }
 0x59a   : > { %v13591_v18 = vld [vmem:[%s15259_s29 + $0x414] ss:$8 sps:$4 sm:$0xff]   ;;  %v13594_v63 = vld [vmem:[%s15259_s29 + $0x410] ss:$8 sps:$4 sm:$0xff]   ;;  %v13597_v4 = vld [vmem:[%s15259_s29 + $0x404] ss:$8 sps:$4 sm:$0xff]  }
 0x59b   : > { %5940 = vmatpush1.bf16.msra.mxu0 %v13569_v26  ;;  %v13599_v6 = vld [vmem:[%s15259_s29 + $0x300] ss:$8 sps:$4 sm:$0xff]   ;;  %v13601_v22 = vld [vmem:[%s15259_s29 + $0x3f4] ss:$8 sps:$4 sm:$0xff]   ;;  %s11888_s30 = sshll.u32 %s15115_s14, 3  ;;  %vm5219_vm7 = vcmask 1040384  }
 0x59c   : > { %5981 = vmatpush1.bf16.msra.mxu1 %v13570_v55  ;;  %5941 = vmatprep.subr.bf16.mxu0 %v13571_v14  ;;  %v13600_v52 = vld [vmem:[%s15259_s29 + $0x400] ss:$8 sps:$4 sm:$0xff]   ;;  %v13603_v21 = vld [vmem:[%s15259_s29 + $0x4f4] ss:$8 sps:$4 sm:$0xff]   ;;  %v13605_v45 = vld [vmem:[%s15259_s29 + $0x3f0] ss:$8 sps:$4 sm:$0xff]  }
 0x59d   : > { %5982 = vmatprep.subr.bf16.mxu1 %v13573_v56  ;;  %v13606_v12 = vld [vmem:[%s15259_s29 + $0x4f0] ss:$8 sps:$4 sm:$0xff]   ;;  %v13607_v24 = vld [vmem:[%s15259_s29 + $0x3e4] ss:$8 sps:$4 sm:$0xff]   ;;  %s5181_s25 = sshra.s32 %s11888_s30, 3  ;;  %p13337_p10 = scmp.ne.s32.totalorder %s15115_s14, 1 }
 0x59e   : > { %v13609_v13 = vld [vmem:[%s15259_s29 + $0x4e4] ss:$8 sps:$4 sm:$0xff]   ;;  %v13611_v30 = vld [vmem:[%s15259_s29 + $0x3e0] ss:$8 sps:$4 sm:$0xff]   ;;  %s13344_s8 = smul.u32 48, %s5181_s25 }
 0x59f   : > { %5942 = vmatpush1.bf16.msra.mxu0 %v13575_v44  ;;  %v13612_v41 = vld [vmem:[%s15259_s29 + $0x4e0] ss:$8 sps:$4 sm:$0xff]   ;;  %v13613_v31 = vld [vmem:[%s15259_s29 + $0x3d4] ss:$8 sps:$4 sm:$0xff]   ;;  %v13617_v40 = vld [vmem:[%s15259_s29 + $0x3d0] ss:$8 sps:$4 sm:$0xff]  }
 0x5a0   : > { %5983 = vmatpush1.bf16.msra.mxu1 %v13576_v54  ;;  %5943 = vmatprep.subr.bf16.mxu0 %v13577_v7  ;;  %v13615_v38 = vld [vmem:[%s15259_s29 + $0x4d4] ss:$8 sps:$4 sm:$0xff]   ;;  %v13618_v36 = vld [vmem:[%s15259_s29 + $0x4d0] ss:$8 sps:$4 sm:$0xff]   ;;  %v13619_v11 = vld [vmem:[%s15259_s29 + $0x3c4] ss:$8 sps:$4 sm:$0xff]  }
 0x5a1   : > { %5984 = vmatprep.subr.bf16.mxu1 %v13579_v42  ;;  %v13621_v17 = vld [vmem:[%s15259_s29 + $0x4c4] ss:$8 sps:$4 sm:$0xff]   ;;  %v13623_v28 = vld [vmem:[%s15259_s29 + $0x3c0] ss:$8 sps:$4 sm:$0xff]   ;;  %s16935_s17 = scalar_lea.vmem [#allocation3], %s13344_s8 }
 0x5a2   : > { %v16938_v10 = vld [vmem:[%s16935_s17 + $0x8] sm:$0xff]  ;;  %v16945_v23 = vld [vmem:[%s16935_s17 + $0x18] sm:$0xff]  ;;  %v16967_v47 = vld [vmem:[%s16935_s17] sm:$0xff] }
 0x5a3   : > { %5944 = vmatpush1.bf16.msra.mxu0 %v13581_v25  ;;  %v16941_v15 = vld [vmem:[%s16935_s17 + $0x68] sm:$0xff]  ;;  %v5335_v43 = vrot.slane %v16938_v10, 1  ;;  %v16948_v32 = vld [vmem:[%s16935_s17 + $0x78] sm:$0xff]  ;;  %v5337_v9 = vrot.slane %v16945_v23, 1  ;;  %v5188_v19 = vld [vmem:[%s16935_s17 + $0x10] sm:$0xff]  ;;  %v5334_v55 = vrot.slane %v16967_v47, 1 }
 0x5a4   : > { %5985 = vmatpush1.bf16.msra.mxu1 %v13582_v37  ;;  %5945 = vmatprep.subr.bf16.mxu0 %v13583_v49  ;;  %v13624_v50 = vld [vmem:[%s15259_s29 + $0x4c0] ss:$8 sps:$4 sm:$0xff]   ;;  %v13625_v61 = vld [vmem:[%s15259_s29 + $0x3b4] ss:$8 sps:$4 sm:$0xff]   ;;  %v13629_v8 = vld [vmem:[%s15259_s29 + $0x3b0] ss:$8 sps:$4 sm:$0xff]  }
 0x5a5   : > { %5986 = vmatprep.subr.bf16.mxu1 %v13585_v33  ;;  %v13627_v53 = vld [vmem:[%s15259_s29 + $0x4b4] ss:$8 sps:$4 sm:$0xff]   ;;  %v5347_v57 = vsel %vm5219_vm7, %v5335_v43, %v16941_v15  ;;  %v5349_v46 = vsel %vm5219_vm7, %v5337_v9, %v16948_v32  ;;  %v13630_v5 = vld [vmem:[%s15259_s29 + $0x4b0] ss:$8 sps:$4 sm:$0xff]   ;;  %v13631_v59 = vld [vmem:[%s15259_s29 + $0x3a4] ss:$8 sps:$4 sm:$0xff]  }
 0x5a6   : > { %v5353_v0 = vpack.c.bf16 %v5347_v57, %v5347_v57  ;;  %v5355_v2 = vpack.c.bf16 %v5349_v46, %v5349_v46  ;;  %v13633_v60 = vld [vmem:[%s15259_s29 + $0x4a4] ss:$8 sps:$4 sm:$0xff]   ;;  %v13635_v3 = vld [vmem:[%s15259_s29 + $0x3a0] ss:$8 sps:$4 sm:$0xff]   ;;  %v13637_v29 = vld [vmem:[%s15259_s29 + $0x394] ss:$8 sps:$4 sm:$0xff]  }
 0x5a7   : > { %5946 = vmatpush1.bf16.msra.mxu0 %v13587_v51  ;;  %v13636_v35 = vld [vmem:[%s15259_s29 + $0x4a0] ss:$8 sps:$4 sm:$0xff]   ;;  %v13639_v58 = vld [vmem:[%s15259_s29 + $0x494] ss:$8 sps:$4 sm:$0xff]   ;;  %v13641_v27 = vld [vmem:[%s15259_s29 + $0x390] ss:$8 sps:$4 sm:$0xff]  }
 0x5a8   : > { %5987 = vmatpush1.bf16.msra.mxu1 %v13588_v16  ;;  %5947 = vmatprep.subr.bf16.mxu0 %v13589_v34  ;;  %v13642_v39 = vld [vmem:[%s15259_s29 + $0x490] ss:$8 sps:$4 sm:$0xff]   ;;  %v13643_v20 = vld [vmem:[%s15259_s29 + $0x384] ss:$8 sps:$4 sm:$0xff]   ;;  %v5336_v14 = vrot.slane %v5188_v19, 1  ;;  %v16979_v56 = vld [vmem:[%s16935_s17 + $0x70] sm:$0xff] }
 0x5a9   : > { %5988 = vmatprep.subr.bf16.mxu1 %v13591_v18  ;;  %5967 = vmatprep.mubr.bf16.mxu0 %v5353_v0  ;;  %v13645_v1 = vld [vmem:[%s15259_s29 + $0x484] ss:$8 sps:$4 sm:$0xff]   ;;  %v13647_v44 = vld [vmem:[%s15259_s29 + $0x380] ss:$8 sps:$4 sm:$0xff]   ;;  %v5208_v7 = vrot.slane %v16941_v15, 7  ;;  %v17020_v9 = vld [vmem:[%s16935_s17 + $0x28] sm:$0xff] }
 0x5aa   : > { %6008 = vmatprep.mubr.bf16.mxu1 %v5355_v2  ;;  %v16975_v26 = vld [vmem:[%s16935_s17 + $0x60] sm:$0xff]  ;;  %v13648_v54 = vld [vmem:[%s15259_s29 + $0x480] ss:$8 sps:$4 sm:$0xff]   ;;  %v5348_v25 = vsel %vm5219_vm7, %v5336_v14, %v16979_v56  ;;  %v13651_v37 = vld [vmem:[%s15259_s29 + $0x574] ss:$8 sps:$4 sm:$0xff]   ;;  %v5339_v0 = vrot.slane %v17020_v9, 1 }
 0x5ab   : > { %5948 = vmatpush1.bf16.msra.mxu0 %v13593_v62  ;;  %v5346_v42 = vsel %vm5219_vm7, %v5334_v55, %v16975_v26  ;;  %v13654_v49 = vld [vmem:[%s15259_s29 + $0x74] ss:$8 sps:$4 sm:$0xff]   ;;  %v5354_v51 = vpack.c.bf16 %v5348_v25, %v5348_v25  ;;  %v13649_v16 = vld [vmem:[%s15259_s29 + $0x570] ss:$8 sps:$4 sm:$0xff]   ;;  %v5221_v18 = vsel %vm5219_vm7, %v16938_v10, %v5208_v7  ;;  %v13657_v62 = vld [vmem:[%s15259_s29 + $0x564] ss:$8 sps:$4 sm:$0xff]  }
 0x5ac   : > { %5989 = vmatpush1.bf16.msra.mxu1 %v13594_v63  ;;  %5949 = vmatprep.subr.bf16.mxu0 %v13595_v48  ;;  %v5352_v33 = vpack.c.bf16 %v5346_v42, %v5346_v42  ;;  %v13652_v34 = vld [vmem:[%s15259_s29 + $0x70] ss:$8 sps:$4 sm:$0xff]   ;;  %v13660_v63 = vld [vmem:[%s15259_s29 + $0x64] ss:$8 sps:$4 sm:$0xff]   ;;  %v5227_v48 = vpack.c.bf16 %v5221_v18, %v5221_v18  ;;  %v13687_v10 = vld [vmem:[%s15259_s29 + $0x514] ss:$8 sps:$4 sm:$0xff]  }
 0x5ad   : > { %5990 = vmatprep.subr.bf16.mxu1 %v13597_v4  ;;  %v13655_v4 = vld [vmem:[%s15259_s29 + $0x560] ss:$8 sps:$4 sm:$0xff]   ;;  %v13690_v15 = vld [vmem:[%s15259_s29 + $0x14] ss:$8 sps:$4 sm:$0xff]   ;;  %v13685_v43 = vld [vmem:[%s15259_s29 + $0x510] ss:$8 sps:$4 sm:$0xff]  }
 0x5ae   : > { %v13696_v57 = vld [vmem:[%s15259_s29 + $0x4] ss:$8 sps:$4 sm:$0xff]   ;;  %v13691_v46 = vld [vmem:[%s15259_s29 + $0x500] ss:$8 sps:$4 sm:$0xff]   ;;  %v13699_v2 = vld [vmem:[%s15259_s29 + $0x5f4] ss:$8 sps:$4 sm:$0xff]  }
 0x5af   : > { %5950 = vmatpush1.bf16.msra.mxu0 %v13599_v6  ;;  %v13658_v6 = vld [vmem:[%s15259_s29 + $0x60] ss:$8 sps:$4 sm:$0xff]   ;;  %v13712_v55 = vld [vmem:[%s15259_s29 + $0xd0] ss:$8 sps:$4 sm:$0xff]   ;;  %v13717_v14 = vld [vmem:[%s15259_s29 + $0x5c4] ss:$8 sps:$4 sm:$0xff]  }
 0x5b0   : > { %5991 = vmatpush1.bf16.msra.mxu1 %v13600_v52  ;;  %5951 = vmatprep.subr.bf16.mxu0 %v13601_v22  ;;  %v13663_v52 = vld [vmem:[%s15259_s29 + $0x554] ss:$8 sps:$4 sm:$0xff]   ;;  %v13703_v19 = vld [vmem:[%s15259_s29 + $0x5e0] ss:$8 sps:$4 sm:$0xff]  }
 0x5b1   : > { %5992 = vmatprep.subr.bf16.mxu1 %v13603_v21  ;;  %v13666_v22 = vld [vmem:[%s15259_s29 + $0x54] ss:$8 sps:$4 sm:$0xff]   ;;  %v13661_v21 = vld [vmem:[%s15259_s29 + $0x550] ss:$8 sps:$4 sm:$0xff]   ;;  %v13718_v7 = vld [vmem:[%s15259_s29 + $0xc0] ss:$8 sps:$4 sm:$0xff]  }
 0x5b2   : > { %v13723_v42 = vld [vmem:[%s15259_s29 + $0x5b4] ss:$8 sps:$4 sm:$0xff]  }
 0x5b3   : > { %5952 = vmatpush2.bf16.msra.mxu0 %v13605_v45  ;;  %v13664_v45 = vld [vmem:[%s15259_s29 + $0x50] ss:$8 sps:$4 sm:$0xff]   ;;  %v13726_v25 = vld [vmem:[%s15259_s29 + $0xb4] ss:$8 sps:$4 sm:$0xff]  }
 0x5b4   : > { %5993 = vmatpush2.bf16.msra.mxu1 %v13606_v12  ;;  %5953 = vmatprep.subr.bf16.mxu0 %v13607_v24  ;;  %v13669_v12 = vld [vmem:[%s15259_s29 + $0x544] ss:$8 sps:$4 sm:$0xff]   ;;  %v13735_v18 = vld [vmem:[%s15259_s29 + $0x594] ss:$8 sps:$4 sm:$0xff]  }
 0x5b5   : > { %5994 = vmatprep.subr.bf16.mxu1 %v13609_v13  ;;  %v13672_v24 = vld [vmem:[%s15259_s29 + $0x44] ss:$8 sps:$4 sm:$0xff]   ;;  %v13667_v13 = vld [vmem:[%s15259_s29 + $0x540] ss:$8 sps:$4 sm:$0xff]  }
 0x5b7   : > { %5954 = vmatpush2.bf16.msra.mxu0 %v13611_v30  ;;  %v13670_v30 = vld [vmem:[%s15259_s29 + $0x40] ss:$8 sps:$4 sm:$0xff]  }
 0x5b8   : > { %5995 = vmatpush2.bf16.msra.mxu1 %v13612_v41  ;;  %5955 = vmatprep.subr.bf16.mxu0 %v13613_v31  ;;  %v13675_v41 = vld [vmem:[%s15259_s29 + $0x534] ss:$8 sps:$4 sm:$0xff]  }
 0x5b9   : > { %5996 = vmatprep.subr.bf16.mxu1 %v13615_v38  ;;  %v13678_v31 = vld [vmem:[%s15259_s29 + $0x34] ss:$8 sps:$4 sm:$0xff]   ;;  %v13673_v38 = vld [vmem:[%s15259_s29 + $0x530] ss:$8 sps:$4 sm:$0xff]  }
 0x5bb   : > { %5956 = vmatpush2.bf16.msra.mxu0 %v13617_v40  ;;  %v13676_v40 = vld [vmem:[%s15259_s29 + $0x30] ss:$8 sps:$4 sm:$0xff]  }
 0x5bc   : > { %5997 = vmatpush2.bf16.msra.mxu1 %v13618_v36  ;;  %5957 = vmatprep.subr.bf16.mxu0 %v13619_v11  ;;  %v13681_v36 = vld [vmem:[%s15259_s29 + $0x524] ss:$8 sps:$4 sm:$0xff]  }
 0x5bd   : > { %5998 = vmatprep.subr.bf16.mxu1 %v13621_v17  ;;  %v13684_v11 = vld [vmem:[%s15259_s29 + $0x24] ss:$8 sps:$4 sm:$0xff]   ;;  %v13679_v17 = vld [vmem:[%s15259_s29 + $0x520] ss:$8 sps:$4 sm:$0xff]  }
 0x5bf   : > { %5958 = vmatpush2.bf16.msra.mxu0 %v13623_v28  ;;  %v13682_v28 = vld [vmem:[%s15259_s29 + $0x20] ss:$8 sps:$4 sm:$0xff]  }
 0x5c0   : > { %5999 = vmatpush2.bf16.msra.mxu1 %v13624_v50  ;;  %5959 = vmatprep.subr.bf16.mxu0 %v13625_v61  ;;  %v13688_v50 = vld [vmem:[%s15259_s29 + $0x10] ss:$8 sps:$4 sm:$0xff]   ;;  %v13693_v61 = vld [vmem:[%s15259_s29 + $0x504] ss:$8 sps:$4 sm:$0xff]  }
 0x5c1   : > { %6000 = vmatprep.subr.bf16.mxu1 %v13627_v53  ;;  %v17023_v53 = vld [vmem:[%s16935_s17 + $0x88] sm:$0xff] }
 0x5c3   : > { %5960 = vmatpush2.bf16.msra.mxu0 %v13629_v8  ;;  %v13694_v8 = vld [vmem:[%s15259_s29] ss:$8 sps:$4 sm:$0xff]  }
 0x5c4   : > { %6001 = vmatpush2.bf16.msra.mxu1 %v13630_v5  ;;  %5961 = vmatprep.subr.bf16.mxu0 %v13631_v59  ;;  %v5351_v5 = vsel %vm5219_vm7, %v5339_v0, %v17023_v53  ;;  %v13765_v0 = vld [vmem:[%s15259_s29 + $0x144] ss:$8 sps:$4 sm:$0xff]  }
 0x5c5   : > { %6002 = vmatprep.subr.bf16.mxu1 %v13633_v60  ;;  %v5357_v59 = vpack.c.bf16 %v5351_v5, %v5351_v5  ;;  %v13702_v60 = vld [vmem:[%s15259_s29 + $0xf4] ss:$8 sps:$4 sm:$0xff]   ;;  %v13766_v5 = vld [vmem:[%s15259_s29 + $0x240] ss:$8 sps:$4 sm:$0xff]  }
 0x5c7   : > { %5962 = vmatpush2.bf16.msra.mxu0 %v13635_v3  ;;  %v13697_v3 = vld [vmem:[%s15259_s29 + $0x5f0] ss:$8 sps:$4 sm:$0xff]  }
 0x5c8   : > { %6003 = vmatpush2.bf16.msra.mxu1 %v13636_v35  ;;  %5963 = vmatprep.subr.bf16.mxu0 %v13637_v29  ;;  %v13700_v35 = vld [vmem:[%s15259_s29 + $0xf0] ss:$8 sps:$4 sm:$0xff]   ;;  %v13705_v29 = vld [vmem:[%s15259_s29 + $0x5e4] ss:$8 sps:$4 sm:$0xff]  }
 0x5c9   : > { %6004 = vmatprep.subr.bf16.mxu1 %v13639_v58  ;;  %v13708_v58 = vld [vmem:[%s15259_s29 + $0xe4] ss:$8 sps:$4 sm:$0xff]  }
 0x5cb   : > { %5964 = vmatpush2.bf16.msra.mxu0 %v13641_v27  ;;  %v13706_v27 = vld [vmem:[%s15259_s29 + $0xe0] ss:$8 sps:$4 sm:$0xff]  }
 0x5cc   : > { %6005 = vmatpush2.bf16.msra.mxu1 %v13642_v39  ;;  %5965 = vmatprep.subr.bf16.mxu0 %v13643_v20  ;;  %v13711_v39 = vld [vmem:[%s15259_s29 + $0x5d4] ss:$8 sps:$4 sm:$0xff]  }
 0x5cd   : > { %6006 = vmatprep.subr.bf16.mxu1 %v13645_v1  ;;  %v13714_v20 = vld [vmem:[%s15259_s29 + $0xd4] ss:$8 sps:$4 sm:$0xff]   ;;  %v13709_v1 = vld [vmem:[%s15259_s29 + $0x5d0] ss:$8 sps:$4 sm:$0xff]  }
 0x5cf   : > { %5966 = vmatpush2.bf16.msra.mxu0 %v13647_v44  ;;  %v13720_v44 = vld [vmem:[%s15259_s29 + $0xc4] ss:$8 sps:$4 sm:$0xff]  }
 0x5d0   : > { %6007 = vmatpush2.bf16.msra.mxu1 %v13648_v54  ;;  %6017 = vmatprep.subr.bf16.mxu0 %v13651_v37  ;;  %v13715_v54 = vld [vmem:[%s15259_s29 + $0x5c0] ss:$8 sps:$4 sm:$0xff]   ;;  %v13721_v37 = vld [vmem:[%s15259_s29 + $0x5b0] ss:$8 sps:$4 sm:$0xff]  }
 0x5d1   : > { %6538 = vmatprep.subr.bf16.mxu1 %v13654_v49  ;;  %v13724_v49 = vld [vmem:[%s15259_s29 + $0xb0] ss:$8 sps:$4 sm:$0xff]  }
 0x5d2   : > { %5968 = vmatmul.mubr.bf16.vlgmr.msra.gmra.mxu0 %v5352_v33  ;;  %v13729_v33 = vld [vmem:[%s15259_s29 + $0x5a4] ss:$8 sps:$4 sm:$0xff]  }
 0x5d3   : > { %6009 = vmatmul.mubr.bf16.vlgmr.msra.gmra.mxu1 %v5354_v51  ;;  %6018 = vmatpush1.bf16.msra.mxu0 %v13649_v16  ;;  %v13732_v51 = vld [vmem:[%s15259_s29 + $0xa4] ss:$8 sps:$4 sm:$0xff]   ;;  %v13727_v16 = vld [vmem:[%s15259_s29 + $0x5a0] ss:$8 sps:$4 sm:$0xff]  }
 0x5d4   : > { %6539 = vmatpush1.bf16.msra.mxu1 %v13652_v34  ;;  %6019 = vmatprep.subr.bf16.mxu0 %v13657_v62  ;;  %v13730_v34 = vld [vmem:[%s15259_s29 + $0xa0] ss:$8 sps:$4 sm:$0xff]   ;;  %v13738_v62 = vld [vmem:[%s15259_s29 + $0x94] ss:$8 sps:$4 sm:$0xff]  }
 0x5d5   : > { %6540 = vmatprep.subr.bf16.mxu1 %v13660_v63  ;;  %6570 = vmatprep.mubr.bf16.mxu1 %v5227_v48  ;;  %v17058_v63 = vld [vmem:[%s16935_s17 + $0x20] sm:$0xff] }
 0x5d6   : > { %6049 = vmatprep.mubr.bf16.mxu0 %v5357_v59  ;;  %v13733_v48 = vld [vmem:[%s15259_s29 + $0x590] ss:$8 sps:$4 sm:$0xff]   ;;  %v13774_v59 = vld [vmem:[%s15259_s29 + $0x234] ss:$8 sps:$4 sm:$0xff]  }
 0x5d7   : > { %6020 = vmatpush1.bf16.msra.mxu0 %v13655_v4  ;;  %v13736_v4 = vld [vmem:[%s15259_s29 + $0x90] ss:$8 sps:$4 sm:$0xff]  }
 0x5d8   : > { %6541 = vmatpush1.bf16.msra.mxu1 %v13658_v6  ;;  %6021 = vmatprep.subr.bf16.mxu0 %v13663_v52  ;;  %v13741_v6 = vld [vmem:[%s15259_s29 + $0x584] ss:$8 sps:$4 sm:$0xff]  }
 0x5d9   : > { %6542 = vmatprep.subr.bf16.mxu1 %v13666_v22  ;;  %v13744_v52 = vld [vmem:[%s15259_s29 + $0x84] ss:$8 sps:$4 sm:$0xff]   ;;  %v5338_v22 = vrot.slane %v17058_v63, 1 }
 0x5db   : > { %6022 = vmatpush1.bf16.msra.mxu0 %v13661_v21  ;;  %v5207_v21 = vrot.slane %v16975_v26, 7 }
 0x5dc   : > { %6543 = vmatpush1.bf16.msra.mxu1 %v13664_v45  ;;  %6023 = vmatprep.subr.bf16.mxu0 %v13669_v12  ;;  %v17067_v45 = vld [vmem:[%s16935_s17 + $0x80] sm:$0xff]  ;;  %v5210_v12 = vrot.slane %v16948_v32, 7 }
 0x5dd   : > { %6544 = vmatprep.subr.bf16.mxu1 %v13672_v24  ;;  %v13739_v24 = vld [vmem:[%s15259_s29 + $0x580] ss:$8 sps:$4 sm:$0xff]   ;;  %v5220_v26 = vsel %vm5219_vm7, %v16967_v47, %v5207_v21  ;;  %v13753_v47 = vld [vmem:[%s15259_s29 + $0x164] ss:$8 sps:$4 sm:$0xff]   ;;  %v13819_v21 = vld [vmem:[%s15259_s29 + $0x1b4] ss:$8 sps:$4 sm:$0xff]  }
 0x5de   : > { %v5226_v32 = vpack.c.bf16 %v5220_v26, %v5220_v26  ;;  %v13823_v26 = vld [vmem:[%s15259_s29 + $0x1a0] ss:$8 sps:$4 sm:$0xff]  }
 0x5df   : > { %6024 = vmatpush1.bf16.msra.mxu0 %v13667_v13  ;;  %v13742_v13 = vld [vmem:[%s15259_s29 + $0x80] ss:$8 sps:$4 sm:$0xff]  }
 0x5e0   : > { %6545 = vmatpush1.bf16.msra.mxu1 %v13670_v30  ;;  %6025 = vmatprep.subr.bf16.mxu0 %v13675_v41  ;;  %v5212_v30 = vrot.slane %v17023_v53, 7  ;;  %v5350_v41 = vsel %vm5219_vm7, %v5338_v22, %v17067_v45  ;;  %v13757_v53 = vld [vmem:[%s15259_s29 + $0x150] ss:$8 sps:$4 sm:$0xff]   ;;  %v13814_v22 = vld [vmem:[%s15259_s29 + $0x2c0] ss:$8 sps:$4 sm:$0xff]  }
 0x5e1   : > { %6546 = vmatprep.subr.bf16.mxu1 %v13678_v31  ;;  %v13747_v31 = vld [vmem:[%s15259_s29 + $0x174] ss:$8 sps:$4 sm:$0xff]  }
 0x5e3   : > { %6026 = vmatpush1.bf16.msra.mxu0 %v13673_v38  ;;  %v13750_v38 = vld [vmem:[%s15259_s29 + $0x274] ss:$8 sps:$4 sm:$0xff]  }
 0x5e4   : > { %6547 = vmatpush1.bf16.msra.mxu1 %v13676_v40  ;;  %6027 = vmatprep.subr.bf16.mxu0 %v13681_v36  ;;  %v5356_v40 = vpack.c.bf16 %v5350_v41, %v5350_v41  ;;  %v13745_v36 = vld [vmem:[%s15259_s29 + $0x170] ss:$8 sps:$4 sm:$0xff]   ;;  %v13828_v41 = vld [vmem:[%s15259_s29 + $0x2a4] ss:$8 sps:$4 sm:$0xff]  }
 0x5e5   : > { %6548 = vmatprep.subr.bf16.mxu1 %v13684_v11  ;;  %v13748_v11 = vld [vmem:[%s15259_s29 + $0x270] ss:$8 sps:$4 sm:$0xff]  }
 0x5e7   : > { %6028 = vmatpush1.bf16.msra.mxu0 %v13679_v17  ;;  %v5223_v17 = vsel %vm5219_vm7, %v16945_v23, %v5210_v12  ;;  %v13754_v23 = vld [vmem:[%s15259_s29 + $0x260] ss:$8 sps:$4 sm:$0xff]   ;;  %v13822_v12 = vld [vmem:[%s15259_s29 + $0x2b4] ss:$8 sps:$4 sm:$0xff]  }
 0x5e8   : > { %6549 = vmatpush1.bf16.msra.mxu1 %v13682_v28  ;;  %6029 = vmatprep.subr.bf16.mxu0 %v13687_v10  ;;  %v5225_v28 = vsel %vm5219_vm7, %v17020_v9, %v5212_v30  ;;  %v13756_v10 = vld [vmem:[%s15259_s29 + $0x264] ss:$8 sps:$4 sm:$0xff]   ;;  %v13762_v9 = vld [vmem:[%s15259_s29 + $0x254] ss:$8 sps:$4 sm:$0xff]  }
 0x5e9   : > { %6550 = vmatprep.subr.bf16.mxu1 %v13690_v15  ;;  %v5229_v15 = vpack.c.bf16 %v5223_v17, %v5223_v17  ;;  %v13825_v30 = vld [vmem:[%s15259_s29 + $0x1a4] ss:$8 sps:$4 sm:$0xff]   ;;  %v5209_v17 = vrot.slane %v16979_v56, 7  ;;  %v13835_v56 = vld [vmem:[%s15259_s29 + $0x180] ss:$8 sps:$4 sm:$0xff]  }
 0x5eb   : > { %6030 = vmatpush1.bf16.msra.mxu0 %v13685_v43  ;;  %v5231_v43 = vpack.c.bf16 %v5225_v28, %v5225_v28  ;;  %v5211_v28 = vrot.slane %v17067_v45, 7  ;;  %v13838_v45 = vld [vmem:[%s15259_s29 + $0x280] ss:$8 sps:$4 sm:$0xff]  }
 0x5ec   : > { %6551 = vmatpush1.bf16.msra.mxu1 %v13688_v50  ;;  %6031 = vmatprep.subr.bf16.mxu0 %v13693_v61  ;;  %v13751_v50 = vld [vmem:[%s15259_s29 + $0x160] ss:$8 sps:$4 sm:$0xff]   ;;  %v13759_v61 = vld [vmem:[%s15259_s29 + $0x154] ss:$8 sps:$4 sm:$0xff]  }
 0x5ed   : > { %6552 = vmatprep.subr.bf16.mxu1 %v13696_v57  ;;  %v13760_v57 = vld [vmem:[%s15259_s29 + $0x250] ss:$8 sps:$4 sm:$0xff]  }
 0x5ef   : > { %6032 = vmatpush1.bf16.msra.mxu0 %v13691_v46  ;;  %v13768_v46 = vld [vmem:[%s15259_s29 + $0x244] ss:$8 sps:$4 sm:$0xff]  }
 0x5f0   : > { %6553 = vmatpush1.bf16.msra.mxu1 %v13694_v8  ;;  %6033 = vmatprep.subr.bf16.mxu0 %v13699_v2  ;;  %v13763_v8 = vld [vmem:[%s15259_s29 + $0x140] ss:$8 sps:$4 sm:$0xff]   ;;  %v13771_v2 = vld [vmem:[%s15259_s29 + $0x134] ss:$8 sps:$4 sm:$0xff]  }
 0x5f1   : > { %6554 = vmatprep.subr.bf16.mxu1 %v13702_v60  ;;  %v13769_v60 = vld [vmem:[%s15259_s29 + $0x130] ss:$8 sps:$4 sm:$0xff]  }
 0x5f3   : > { %6034 = vmatpush2.bf16.msra.mxu0 %v13697_v3  ;;  %v13772_v3 = vld [vmem:[%s15259_s29 + $0x230] ss:$8 sps:$4 sm:$0xff]  }
 0x5f4   : > { %6555 = vmatpush2.bf16.msra.mxu1 %v13700_v35  ;;  %6035 = vmatprep.subr.bf16.mxu0 %v13705_v29  ;;  %v13777_v35 = vld [vmem:[%s15259_s29 + $0x124] ss:$8 sps:$4 sm:$0xff]  }
 0x5f5   : > { %6556 = vmatprep.subr.bf16.mxu1 %v13708_v58  ;;  %v13780_v29 = vld [vmem:[%s15259_s29 + $0x224] ss:$8 sps:$4 sm:$0xff]   ;;  %v13775_v58 = vld [vmem:[%s15259_s29 + $0x120] ss:$8 sps:$4 sm:$0xff]  }
 0x5f7   : > { %6036 = vmatpush2.bf16.msra.mxu0 %v13703_v19  ;;  %v13778_v19 = vld [vmem:[%s15259_s29 + $0x220] ss:$8 sps:$4 sm:$0xff]  }
 0x5f8   : > { %6557 = vmatpush2.bf16.msra.mxu1 %v13706_v27  ;;  %6037 = vmatprep.subr.bf16.mxu0 %v13711_v39  ;;  %v13783_v27 = vld [vmem:[%s15259_s29 + $0x114] ss:$8 sps:$4 sm:$0xff]  }
 0x5f9   : > { %6558 = vmatprep.subr.bf16.mxu1 %v13714_v20  ;;  %v13786_v39 = vld [vmem:[%s15259_s29 + $0x214] ss:$8 sps:$4 sm:$0xff]   ;;  %v13781_v20 = vld [vmem:[%s15259_s29 + $0x110] ss:$8 sps:$4 sm:$0xff]  }
 0x5fb   : > { %6038 = vmatpush2.bf16.msra.mxu0 %v13709_v1  ;;  %v13784_v1 = vld [vmem:[%s15259_s29 + $0x210] ss:$8 sps:$4 sm:$0xff]  }
 0x5fc   : > { %6559 = vmatpush2.bf16.msra.mxu1 %v13712_v55  ;;  %6039 = vmatprep.subr.bf16.mxu0 %v13717_v14  ;;  %v13789_v55 = vld [vmem:[%s15259_s29 + $0x104] ss:$8 sps:$4 sm:$0xff]  }
 0x5fd   : > { %6560 = vmatprep.subr.bf16.mxu1 %v13720_v44  ;;  %v13792_v14 = vld [vmem:[%s15259_s29 + $0x204] ss:$8 sps:$4 sm:$0xff]   ;;  %v13787_v44 = vld [vmem:[%s15259_s29 + $0x100] ss:$8 sps:$4 sm:$0xff]  }
 0x5ff   : > { %6040 = vmatpush2.bf16.msra.mxu0 %v13715_v54  ;;  %v13790_v54 = vld [vmem:[%s15259_s29 + $0x200] ss:$8 sps:$4 sm:$0xff]  }
 0x600   : > { %6561 = vmatpush2.bf16.msra.mxu1 %v13718_v7  ;;  %6041 = vmatprep.subr.bf16.mxu0 %v13723_v42  ;;  %v13795_v7 = vld [vmem:[%s15259_s29 + $0x1f4] ss:$8 sps:$4 sm:$0xff]  }
 0x601   : > { %6562 = vmatprep.subr.bf16.mxu1 %v13726_v25  ;;  %v13798_v42 = vld [vmem:[%s15259_s29 + $0x2f4] ss:$8 sps:$4 sm:$0xff]   ;;  %v13793_v25 = vld [vmem:[%s15259_s29 + $0x1f0] ss:$8 sps:$4 sm:$0xff]  }
 0x603   : > { %6042 = vmatpush2.bf16.msra.mxu0 %v13721_v37  ;;  %v13796_v37 = vld [vmem:[%s15259_s29 + $0x2f0] ss:$8 sps:$4 sm:$0xff]  }
 0x604   : > { %6563 = vmatpush2.bf16.msra.mxu1 %v13724_v49  ;;  %6043 = vmatprep.subr.bf16.mxu0 %v13729_v33  ;;  %v13801_v49 = vld [vmem:[%s15259_s29 + $0x1e4] ss:$8 sps:$4 sm:$0xff]  }
 0x605   : > { %6564 = vmatprep.subr.bf16.mxu1 %v13732_v51  ;;  %v13804_v33 = vld [vmem:[%s15259_s29 + $0x2e4] ss:$8 sps:$4 sm:$0xff]   ;;  %v13799_v51 = vld [vmem:[%s15259_s29 + $0x1e0] ss:$8 sps:$4 sm:$0xff]  }
 0x607   : > { %6044 = vmatpush2.bf16.msra.mxu0 %v13727_v16  ;;  %v13802_v16 = vld [vmem:[%s15259_s29 + $0x2e0] ss:$8 sps:$4 sm:$0xff]  }
 0x608   : > { %6565 = vmatpush2.bf16.msra.mxu1 %v13730_v34  ;;  %6045 = vmatprep.subr.bf16.mxu0 %v13735_v18  ;;  %v13807_v34 = vld [vmem:[%s15259_s29 + $0x1d4] ss:$8 sps:$4 sm:$0xff]  }
 0x609   : > { %6566 = vmatprep.subr.bf16.mxu1 %v13738_v62  ;;  %v13810_v18 = vld [vmem:[%s15259_s29 + $0x2d4] ss:$8 sps:$4 sm:$0xff]   ;;  %v13805_v62 = vld [vmem:[%s15259_s29 + $0x1d0] ss:$8 sps:$4 sm:$0xff]  }
 0x60b   : > { %6046 = vmatpush2.bf16.msra.mxu0 %v13733_v48  ;;  %v13808_v48 = vld [vmem:[%s15259_s29 + $0x2d0] ss:$8 sps:$4 sm:$0xff]  }
 0x60c   : > { %6567 = vmatpush2.bf16.msra.mxu1 %v13736_v4  ;;  %6047 = vmatprep.subr.bf16.mxu0 %v13741_v6  ;;  %v13813_v4 = vld [vmem:[%s15259_s29 + $0x1c4] ss:$8 sps:$4 sm:$0xff]  }
 0x60d   : > { %6568 = vmatprep.subr.bf16.mxu1 %v13744_v52  ;;  %v13816_v6 = vld [vmem:[%s15259_s29 + $0x2c4] ss:$8 sps:$4 sm:$0xff]   ;;  %v13811_v52 = vld [vmem:[%s15259_s29 + $0x1c0] ss:$8 sps:$4 sm:$0xff]  }
 0x60f   : > { %6048 = vmatpush2.bf16.msra.mxu0 %v13739_v24  ;;  %v13817_v24 = vld [vmem:[%s15259_s29 + $0x1b0] ss:$8 sps:$4 sm:$0xff]  }
 0x610   : > { %6569 = vmatpush2.bf16.msra.mxu1 %v13742_v13  ;;  %6579 = vmatprep.subr.bf16.mxu0 %v13747_v31  ;;  %v13820_v13 = vld [vmem:[%s15259_s29 + $0x2b0] ss:$8 sps:$4 sm:$0xff]   ;;  %v13826_v31 = vld [vmem:[%s15259_s29 + $0x2a0] ss:$8 sps:$4 sm:$0xff]  }
 0x611   : > { %6620 = vmatprep.subr.bf16.mxu1 %v13750_v38  ;;  %v13831_v38 = vld [vmem:[%s15259_s29 + $0x194] ss:$8 sps:$4 sm:$0xff]  }
 0x612   : > { %6050 = vmatmul.mubr.bf16.vlgmr.msra.gmra.mxu0 %v5356_v40  ;;  %v13834_v40 = vld [vmem:[%s15259_s29 + $0x294] ss:$8 sps:$4 sm:$0xff]  }
 0x613   : > { %6571 = vmatmul.mubr.bf16.vlgmr.msra.gmra.mxu1 %v5226_v32  ;;  %6580 = vmatpush1.bf16.msra.mxu0 %v13745_v36  ;;  %v13829_v32 = vld [vmem:[%s15259_s29 + $0x190] ss:$8 sps:$4 sm:$0xff]  }
 0x614   : > { %6621 = vmatpush1.bf16.msra.mxu1 %v13748_v11  ;;  %6581 = vmatprep.subr.bf16.mxu0 %v13753_v47  ;;  %v13832_v36 = vld [vmem:[%s15259_s29 + $0x290] ss:$8 sps:$4 sm:$0xff]   ;;  %v13837_v11 = vld [vmem:[%s15259_s29 + $0x184] ss:$8 sps:$4 sm:$0xff]  }
 0x615   : > { %6622 = vmatprep.subr.bf16.mxu1 %v13756_v10  ;;  %6611 = vmatprep.mubr.bf16.mxu0 %v5229_v15  ;;  %v13840_v47 = vld [vmem:[%s15259_s29 + $0x284] ss:$8 sps:$4 sm:$0xff]   ;;  %v17146_v10 = vld [vmem:[%s16935_s17 + $0x8] sm:$0xff] }
 0x616   : > { %6652 = vmatprep.mubr.bf16.mxu1 %v5231_v43  ;;  %v6662_v15 = vrot.slane %v17146_v10, 2  ;;  %v17150_v43 = vld [vmem:[%s16935_s17 + $0x68] sm:$0xff] }
 0x617   : > { %6582 = vmatpush1.bf16.msra.mxu0 %v13751_v50  ;;  %v6674_v50 = vrot.slane %v17150_v43, 1 }
 0x618   : > { %6623 = vmatpush1.bf16.msra.mxu1 %v13754_v23  ;;  %6583 = vmatprep.subr.bf16.mxu0 %v13759_v61  ;;  %v14707_v23 = vld [vmem:[%s16935_s17 + $0x18] sm:$0xff] }
 0x619   : > { %6624 = vmatprep.subr.bf16.mxu1 %v13762_v9  ;;  %v6664_v61 = vrot.slane %v14707_v23, 2  ;;  %v14708_v9 = vld [vmem:[%s16935_s17 + $0x78] sm:$0xff] }
 0x61a   : > { %v13910_v23 = vld [vmem:[%s15259_s29 + $0x7c0] ss:$8 sps:$4 sm:$0xff]  }
 0x61b   : > { %6584 = vmatpush1.bf16.msra.mxu0 %v13757_v53  ;;  %v6676_v53 = vrot.slane %v14708_v9, 1  ;;  %v13916_v9 = vld [vmem:[%s15259_s29 + $0x7b0] ss:$8 sps:$4 sm:$0xff]  }
 0x61c   : > { %6625 = vmatpush1.bf16.msra.mxu1 %v13760_v57  ;;  %6585 = vmatprep.subr.bf16.mxu0 %v13765_v0  ;;  %v17158_v57 = vld [vmem:[%s16935_s17 + $0x10] sm:$0xff] }
 0x61d   : > { %6626 = vmatprep.subr.bf16.mxu1 %v13768_v46  ;;  %v5222_v0 = vsel %vm5219_vm7, %v17158_v57, %v5209_v17  ;;  %v5224_v46 = vsel %vm5219_vm7, %v17058_v63, %v5211_v28  ;;  %v13849_v63 = vld [vmem:[%s15259_s29 + $0x664] ss:$8 sps:$4 sm:$0xff]   ;;  %v13901_v17 = vld [vmem:[%s15259_s29 + $0x6d0] ss:$8 sps:$4 sm:$0xff]  }
 0x61e   : > { %v13904_v28 = vld [vmem:[%s15259_s29 + $0x7d0] ss:$8 sps:$4 sm:$0xff]  }
 0x61f   : > { %6586 = vmatpush1.bf16.msra.mxu0 %v13763_v8  ;;  %v13843_v8 = vld [vmem:[%s15259_s29 + $0x674] ss:$8 sps:$4 sm:$0xff]  }
 0x620   : > { %6627 = vmatpush1.bf16.msra.mxu1 %v13766_v5  ;;  %6587 = vmatprep.subr.bf16.mxu0 %v13771_v2  ;;  %v13846_v5 = vld [vmem:[%s15259_s29 + $0x774] ss:$8 sps:$4 sm:$0xff]   ;;  %v5228_v2 = vpack.c.bf16 %v5222_v0, %v5222_v0  ;;  %v13924_v0 = vld [vmem:[%s15259_s29 + $0x7a4] ss:$8 sps:$4 sm:$0xff]  }
 0x621   : > { %6628 = vmatprep.subr.bf16.mxu1 %v13774_v59  ;;  %v5230_v59 = vpack.c.bf16 %v5224_v46, %v5224_v46  ;;  %v13919_v46 = vld [vmem:[%s15259_s29 + $0x6a0] ss:$8 sps:$4 sm:$0xff]  }
 0x623   : > { %6588 = vmatpush1.bf16.msra.mxu0 %v13769_v60  ;;  %v13841_v60 = vld [vmem:[%s15259_s29 + $0x670] ss:$8 sps:$4 sm:$0xff]  }
 0x624   : > { %6629 = vmatpush1.bf16.msra.mxu1 %v13772_v3  ;;  %6589 = vmatprep.subr.bf16.mxu0 %v13777_v35  ;;  %v13844_v3 = vld [vmem:[%s15259_s29 + $0x770] ss:$8 sps:$4 sm:$0xff]   ;;  %v6686_v35 = vsel %vm5219_vm7, %v6662_v15, %v6674_v50  ;;  %v13912_v15 = vld [vmem:[%s15259_s29 + $0x7c4] ss:$8 sps:$4 sm:$0xff]   ;;  %v13907_v50 = vld [vmem:[%s15259_s29 + $0x6c0] ss:$8 sps:$4 sm:$0xff]  }
 0x625   : > { %6630 = vmatprep.subr.bf16.mxu1 %v13780_v29  ;;  %v6688_v29 = vsel %vm5219_vm7, %v6664_v61, %v6676_v53  ;;  %v13915_v61 = vld [vmem:[%s15259_s29 + $0x6b4] ss:$8 sps:$4 sm:$0xff]   ;;  %v13921_v53 = vld [vmem:[%s15259_s29 + $0x6a4] ss:$8 sps:$4 sm:$0xff]  }
 0x627   : > { %6590 = vmatpush1.bf16.msra.mxu0 %v13775_v58  ;;  %v13852_v58 = vld [vmem:[%s15259_s29 + $0x764] ss:$8 sps:$4 sm:$0xff]  }
 0x628   : > { %6631 = vmatpush1.bf16.msra.mxu1 %v13778_v19  ;;  %6591 = vmatprep.subr.bf16.mxu0 %v13783_v27  ;;  %v6692_v19 = vpack.c.bf16 %v6686_v35, %v6686_v35  ;;  %v6694_v27 = vpack.c.bf16 %v6688_v29, %v6688_v29  ;;  %v13928_v35 = vld [vmem:[%s15259_s29 + $0x790] ss:$8 sps:$4 sm:$0xff]  }
 0x629   : > { %6632 = vmatprep.subr.bf16.mxu1 %v13786_v39  ;;  %v13847_v39 = vld [vmem:[%s15259_s29 + $0x660] ss:$8 sps:$4 sm:$0xff]   ;;  %v17231_v29 = vld [vmem:[%s16935_s17 + $0x60] sm:$0xff] }
 0x62b   : > { %6592 = vmatpush1.bf16.msra.mxu0 %v13781_v20  ;;  %v13850_v20 = vld [vmem:[%s15259_s29 + $0x760] ss:$8 sps:$4 sm:$0xff]  }
 0x62c   : > { %6633 = vmatpush1.bf16.msra.mxu1 %v13784_v1  ;;  %6593 = vmatprep.subr.bf16.mxu0 %v13789_v55  ;;  %v13855_v1 = vld [vmem:[%s15259_s29 + $0x654] ss:$8 sps:$4 sm:$0xff]  }
 0x62d   : > { %6634 = vmatprep.subr.bf16.mxu1 %v13792_v14  ;;  %v13858_v55 = vld [vmem:[%s15259_s29 + $0x754] ss:$8 sps:$4 sm:$0xff]   ;;  %v13853_v14 = vld [vmem:[%s15259_s29 + $0x650] ss:$8 sps:$4 sm:$0xff]  }
 0x62f   : > { %6594 = vmatpush1.bf16.msra.mxu0 %v13787_v44  ;;  %v13856_v44 = vld [vmem:[%s15259_s29 + $0x750] ss:$8 sps:$4 sm:$0xff]  }
 0x630   : > { %6635 = vmatpush1.bf16.msra.mxu1 %v13790_v54  ;;  %6595 = vmatprep.subr.bf16.mxu0 %v13795_v7  ;;  %v13861_v54 = vld [vmem:[%s15259_s29 + $0x644] ss:$8 sps:$4 sm:$0xff]  }
 0x631   : > { %6636 = vmatprep.subr.bf16.mxu1 %v13798_v42  ;;  %v13864_v7 = vld [vmem:[%s15259_s29 + $0x744] ss:$8 sps:$4 sm:$0xff]   ;;  %v13859_v42 = vld [vmem:[%s15259_s29 + $0x640] ss:$8 sps:$4 sm:$0xff]  }
 0x633   : > { %6596 = vmatpush2.bf16.msra.mxu0 %v13793_v25  ;;  %v13862_v25 = vld [vmem:[%s15259_s29 + $0x740] ss:$8 sps:$4 sm:$0xff]  }
 0x634   : > { %6637 = vmatpush2.bf16.msra.mxu1 %v13796_v37  ;;  %6597 = vmatprep.subr.bf16.mxu0 %v13801_v49  ;;  %v13867_v37 = vld [vmem:[%s15259_s29 + $0x634] ss:$8 sps:$4 sm:$0xff]  }
 0x635   : > { %6638 = vmatprep.subr.bf16.mxu1 %v13804_v33  ;;  %v13870_v49 = vld [vmem:[%s15259_s29 + $0x734] ss:$8 sps:$4 sm:$0xff]   ;;  %v13865_v33 = vld [vmem:[%s15259_s29 + $0x630] ss:$8 sps:$4 sm:$0xff]  }
 0x637   : > { %6598 = vmatpush2.bf16.msra.mxu0 %v13799_v51  ;;  %v13868_v51 = vld [vmem:[%s15259_s29 + $0x730] ss:$8 sps:$4 sm:$0xff]  }
 0x638   : > { %6639 = vmatpush2.bf16.msra.mxu1 %v13802_v16  ;;  %6599 = vmatprep.subr.bf16.mxu0 %v13807_v34  ;;  %v13873_v16 = vld [vmem:[%s15259_s29 + $0x624] ss:$8 sps:$4 sm:$0xff]  }
 0x639   : > { %6640 = vmatprep.subr.bf16.mxu1 %v13810_v18  ;;  %v13876_v34 = vld [vmem:[%s15259_s29 + $0x724] ss:$8 sps:$4 sm:$0xff]   ;;  %v13871_v18 = vld [vmem:[%s15259_s29 + $0x620] ss:$8 sps:$4 sm:$0xff]  }
 0x63b   : > { %6600 = vmatpush2.bf16.msra.mxu0 %v13805_v62  ;;  %v13874_v62 = vld [vmem:[%s15259_s29 + $0x720] ss:$8 sps:$4 sm:$0xff]  }
 0x63c   : > { %6641 = vmatpush2.bf16.msra.mxu1 %v13808_v48  ;;  %6601 = vmatprep.subr.bf16.mxu0 %v13813_v4  ;;  %v13879_v48 = vld [vmem:[%s15259_s29 + $0x614] ss:$8 sps:$4 sm:$0xff]  }
 0x63d   : > { %6642 = vmatprep.subr.bf16.mxu1 %v13816_v6  ;;  %v13882_v4 = vld [vmem:[%s15259_s29 + $0x714] ss:$8 sps:$4 sm:$0xff]   ;;  %v13877_v6 = vld [vmem:[%s15259_s29 + $0x610] ss:$8 sps:$4 sm:$0xff]  }
 0x63f   : > { %6602 = vmatpush2.bf16.msra.mxu0 %v13811_v52  ;;  %v13880_v52 = vld [vmem:[%s15259_s29 + $0x710] ss:$8 sps:$4 sm:$0xff]  }
 0x640   : > { %6643 = vmatpush2.bf16.msra.mxu1 %v13814_v22  ;;  %6603 = vmatprep.subr.bf16.mxu0 %v13819_v21  ;;  %v13885_v22 = vld [vmem:[%s15259_s29 + $0x604] ss:$8 sps:$4 sm:$0xff]  }
 0x641   : > { %6644 = vmatprep.subr.bf16.mxu1 %v13822_v12  ;;  %v13888_v21 = vld [vmem:[%s15259_s29 + $0x704] ss:$8 sps:$4 sm:$0xff]   ;;  %v13883_v12 = vld [vmem:[%s15259_s29 + $0x600] ss:$8 sps:$4 sm:$0xff]  }
 0x643   : > { %6604 = vmatpush2.bf16.msra.mxu0 %v13817_v24  ;;  %v13886_v24 = vld [vmem:[%s15259_s29 + $0x700] ss:$8 sps:$4 sm:$0xff]  }
 0x644   : > { %6645 = vmatpush2.bf16.msra.mxu1 %v13820_v13  ;;  %6605 = vmatprep.subr.bf16.mxu0 %v13825_v30  ;;  %v13891_v13 = vld [vmem:[%s15259_s29 + $0x6f4] ss:$8 sps:$4 sm:$0xff]  }
 0x645   : > { %6646 = vmatprep.subr.bf16.mxu1 %v13828_v41  ;;  %v13894_v30 = vld [vmem:[%s15259_s29 + $0x7f4] ss:$8 sps:$4 sm:$0xff]   ;;  %v13889_v41 = vld [vmem:[%s15259_s29 + $0x6f0] ss:$8 sps:$4 sm:$0xff]  }
 0x647   : > { %6606 = vmatpush2.bf16.msra.mxu0 %v13823_v26  ;;  %v13892_v26 = vld [vmem:[%s15259_s29 + $0x7f0] ss:$8 sps:$4 sm:$0xff]  }
 0x648   : > { %6647 = vmatpush2.bf16.msra.mxu1 %v13826_v31  ;;  %6607 = vmatprep.subr.bf16.mxu0 %v13831_v38  ;;  %v13897_v31 = vld [vmem:[%s15259_s29 + $0x6e4] ss:$8 sps:$4 sm:$0xff]  }
 0x649   : > { %6648 = vmatprep.subr.bf16.mxu1 %v13834_v40  ;;  %v13900_v38 = vld [vmem:[%s15259_s29 + $0x7e4] ss:$8 sps:$4 sm:$0xff]   ;;  %v13895_v40 = vld [vmem:[%s15259_s29 + $0x6e0] ss:$8 sps:$4 sm:$0xff]  }
 0x64b   : > { %6608 = vmatpush2.bf16.msra.mxu0 %v13829_v32  ;;  %v13898_v32 = vld [vmem:[%s15259_s29 + $0x7e0] ss:$8 sps:$4 sm:$0xff]  }
 0x64c   : > { %6649 = vmatpush2.bf16.msra.mxu1 %v13832_v36  ;;  %6609 = vmatprep.subr.bf16.mxu0 %v13837_v11  ;;  %v13903_v36 = vld [vmem:[%s15259_s29 + $0x6d4] ss:$8 sps:$4 sm:$0xff]  }
 0x64d   : > { %6650 = vmatprep.subr.bf16.mxu1 %v13840_v47  ;;  %v13906_v11 = vld [vmem:[%s15259_s29 + $0x7d4] ss:$8 sps:$4 sm:$0xff]   ;;  %v13909_v47 = vld [vmem:[%s15259_s29 + $0x6c4] ss:$8 sps:$4 sm:$0xff]  }
 0x64f   : > { %6610 = vmatpush2.bf16.msra.mxu0 %v13835_v56  ;;  %v13918_v56 = vld [vmem:[%s15259_s29 + $0x7b4] ss:$8 sps:$4 sm:$0xff]  }
 0x650   : > { %6651 = vmatpush2.bf16.msra.mxu1 %v13838_v45  ;;  %7274 = vmatprep.subr.bf16.mxu0 %v13843_v8  ;;  %v13913_v45 = vld [vmem:[%s15259_s29 + $0x6b0] ss:$8 sps:$4 sm:$0xff]   ;;  %v13922_v8 = vld [vmem:[%s15259_s29 + $0x7a0] ss:$8 sps:$4 sm:$0xff]  }
 0x651   : > { %7315 = vmatprep.subr.bf16.mxu1 %v13846_v5  ;;  %v13927_v5 = vld [vmem:[%s15259_s29 + $0x694] ss:$8 sps:$4 sm:$0xff]  }
 0x652   : > { %6612 = vmatmul.mubr.bf16.vlgmr.msra.gmra.mxu0 %v5228_v2  ;;  %v13930_v2 = vld [vmem:[%s15259_s29 + $0x794] ss:$8 sps:$4 sm:$0xff]  }
 0x653   : > { %6653 = vmatmul.mubr.bf16.vlgmr.msra.gmra.mxu1 %v5230_v59  ;;  %7275 = vmatpush1.bf16.msra.mxu0 %v13841_v60  ;;  %v17225_v59 = vld [vmem:[%s16935_s17] sm:$0xff] }
 0x654   : > { %7316 = vmatpush1.bf16.msra.mxu1 %v13844_v3  ;;  %7276 = vmatprep.subr.bf16.mxu0 %v13849_v63  ;;  %v6661_v60 = vrot.slane %v17225_v59, 2  ;;  %v13925_v3 = vld [vmem:[%s15259_s29 + $0x690] ss:$8 sps:$4 sm:$0xff]   ;;  %v6673_v63 = vrot.slane %v17231_v29, 1 }
 0x655   : > { %7317 = vmatprep.subr.bf16.mxu1 %v13852_v58  ;;  %7306 = vmatprep.mubr.bf16.mxu0 %v6692_v19  ;;  %v13933_v58 = vld [vmem:[%s15259_s29 + $0x684] ss:$8 sps:$4 sm:$0xff]   ;;  %v6663_v19 = vrot.slane %v17158_v57, 2  ;;  %v7400_v57 = vrot.slane %v17146_v10, 3 }
 0x656   : > { %7347 = vmatprep.mubr.bf16.mxu1 %v6694_v27  ;;  %v14712_v27 = vld [vmem:[%s16935_s17 + $0x70] sm:$0xff] }
 0x657   : > { %7277 = vmatpush1.bf16.msra.mxu0 %v13847_v39  ;;  %v6675_v39 = vrot.slane %v14712_v27, 1  ;;  %v13990_v27 = vld [vmem:[%s15259_s29 + $0x9f4] ss:$8 sps:$4 sm:$0xff]  }
 0x658   : > { %7318 = vmatpush1.bf16.msra.mxu1 %v13850_v20  ;;  %7278 = vmatprep.subr.bf16.mxu0 %v13855_v1  ;;  %v13936_v20 = vld [vmem:[%s15259_s29 + $0x784] ss:$8 sps:$4 sm:$0xff]   ;;  %v13931_v1 = vld [vmem:[%s15259_s29 + $0x680] ss:$8 sps:$4 sm:$0xff]  }
 0x659   : > { %7319 = vmatprep.subr.bf16.mxu1 %v13858_v55  ;;  %v13934_v55 = vld [vmem:[%s15259_s29 + $0x780] ss:$8 sps:$4 sm:$0xff]  }
 0x65b   : > { %7279 = vmatpush1.bf16.msra.mxu0 %v13853_v14  ;;  %v17241_v14 = vld [vmem:[%s16935_s17 + $0x28] sm:$0xff] }
 0x65c   : > { %7320 = vmatpush1.bf16.msra.mxu1 %v13856_v44  ;;  %7280 = vmatprep.subr.bf16.mxu0 %v13861_v54  ;;  %v6666_v44 = vrot.slane %v17241_v14, 2  ;;  %v17245_v54 = vld [vmem:[%s16935_s17 + $0x88] sm:$0xff] }
 0x65d   : > { %7321 = vmatprep.subr.bf16.mxu1 %v13864_v7  ;;  %v6678_v7 = vrot.slane %v17245_v54, 1 }
 0x65f   : > { %7281 = vmatpush1.bf16.msra.mxu0 %v13859_v42  ;;  %v7412_v42 = vrot.slane %v17150_v43, 2  ;;  %v6690_v10 = vsel %vm5219_vm7, %v6666_v44, %v6678_v7  ;;  %v13991_v44 = vld [vmem:[%s15259_s29 + $0x8e0] ss:$8 sps:$4 sm:$0xff]  }
 0x660   : > { %7322 = vmatpush1.bf16.msra.mxu1 %v13862_v25  ;;  %7282 = vmatprep.subr.bf16.mxu0 %v13867_v37  ;;  %v6685_v25 = vsel %vm5219_vm7, %v6661_v60, %v6673_v63  ;;  %v6687_v37 = vsel %vm5219_vm7, %v6663_v19, %v6675_v39  ;;  %v13976_v60 = vld [vmem:[%s15259_s29 + $0x910] ss:$8 sps:$4 sm:$0xff]   ;;  %v13979_v63 = vld [vmem:[%s15259_s29 + $0x800] ss:$8 sps:$4 sm:$0xff]   ;;  %v13987_v19 = vld [vmem:[%s15259_s29 + $0x8f4] ss:$8 sps:$4 sm:$0xff]  }
 0x661   : > { %7323 = vmatprep.subr.bf16.mxu1 %v13870_v49  ;;  %v13939_v49 = vld [vmem:[%s15259_s29 + $0x874] ss:$8 sps:$4 sm:$0xff]   ;;  %v7424_v43 = vsel %vm5219_vm7, %v7400_v57, %v7412_v42  ;;  %v13985_v39 = vld [vmem:[%s15259_s29 + $0x8f0] ss:$8 sps:$4 sm:$0xff]   ;;  %v13994_v7 = vld [vmem:[%s15259_s29 + $0x9e0] ss:$8 sps:$4 sm:$0xff]  }
 0x662   : > { %v13999_v57 = vld [vmem:[%s15259_s29 + $0x8d4] ss:$8 sps:$4 sm:$0xff]  }
 0x663   : > { %7283 = vmatpush1.bf16.msra.mxu0 %v13865_v33  ;;  %v13942_v33 = vld [vmem:[%s15259_s29 + $0x974] ss:$8 sps:$4 sm:$0xff]  }
 0x664   : > { %7324 = vmatpush1.bf16.msra.mxu1 %v13868_v51  ;;  %7284 = vmatprep.subr.bf16.mxu0 %v13873_v16  ;;  %v6691_v51 = vpack.c.bf16 %v6685_v25, %v6685_v25  ;;  %v6693_v16 = vpack.c.bf16 %v6687_v37, %v6687_v37  ;;  %v14002_v42 = vld [vmem:[%s15259_s29 + $0x9d4] ss:$8 sps:$4 sm:$0xff]   ;;  %v13997_v25 = vld [vmem:[%s15259_s29 + $0x8d0] ss:$8 sps:$4 sm:$0xff]  }
 0x665   : > { %7325 = vmatprep.subr.bf16.mxu1 %v13876_v34  ;;  %v13937_v34 = vld [vmem:[%s15259_s29 + $0x870] ss:$8 sps:$4 sm:$0xff]  }
 0x666   : > { %v14000_v37 = vld [vmem:[%s15259_s29 + $0x9d0] ss:$8 sps:$4 sm:$0xff]  }
 0x667   : > { %7285 = vmatpush1.bf16.msra.mxu0 %v13871_v18  ;;  %v13940_v18 = vld [vmem:[%s15259_s29 + $0x970] ss:$8 sps:$4 sm:$0xff]  }
 0x668   : > { %7326 = vmatpush1.bf16.msra.mxu1 %v13874_v62  ;;  %7286 = vmatprep.subr.bf16.mxu0 %v13879_v48  ;;  %v13945_v62 = vld [vmem:[%s15259_s29 + $0x864] ss:$8 sps:$4 sm:$0xff]  }
 0x669   : > { %7327 = vmatprep.subr.bf16.mxu1 %v13882_v4  ;;  %v13948_v48 = vld [vmem:[%s15259_s29 + $0x964] ss:$8 sps:$4 sm:$0xff]   ;;  %v6696_v4 = vpack.c.bf16 %v6690_v10, %v6690_v10  ;;  %v14009_v10 = vld [vmem:[%s15259_s29 + $0x8b0] ss:$8 sps:$4 sm:$0xff]  }
 0x66b   : > { %7287 = vmatpush1.bf16.msra.mxu0 %v13877_v6  ;;  %v7430_v6 = vpack.c.bf16 %v7424_v43, %v7424_v43  ;;  %v14012_v43 = vld [vmem:[%s15259_s29 + $0x9b0] ss:$8 sps:$4 sm:$0xff]  }
 0x66c   : > { %7328 = vmatpush1.bf16.msra.mxu1 %v13880_v52  ;;  %7288 = vmatprep.subr.bf16.mxu0 %v13885_v22 }
 0x66d   : > { %7329 = vmatprep.subr.bf16.mxu1 %v13888_v21  ;;  %v13943_v21 = vld [vmem:[%s15259_s29 + $0x860] ss:$8 sps:$4 sm:$0xff]  }
 0x66f   : > { %7289 = vmatpush1.bf16.msra.mxu0 %v13883_v12  ;;  %v13946_v12 = vld [vmem:[%s15259_s29 + $0x960] ss:$8 sps:$4 sm:$0xff]  }
 0x670   : > { %7330 = vmatpush1.bf16.msra.mxu1 %v13886_v24  ;;  %7290 = vmatprep.subr.bf16.mxu0 %v13891_v13  ;;  %v13951_v13 = vld [vmem:[%s15259_s29 + $0x854] ss:$8 sps:$4 sm:$0xff]  }
 0x671   : > { %7331 = vmatprep.subr.bf16.mxu1 %v13894_v30 }
 0x673   : > { %7291 = vmatpush2.bf16.msra.mxu0 %v13889_v41 }
 0x674   : > { %7332 = vmatpush2.bf16.msra.mxu1 %v13892_v26  ;;  %7292 = vmatprep.subr.bf16.mxu0 %v13897_v31  ;;  %v13954_v26 = vld [vmem:[%s15259_s29 + $0x954] ss:$8 sps:$4 sm:$0xff]  }
 0x675   : > { %7333 = vmatprep.subr.bf16.mxu1 %v13900_v38 }
 0x677   : > { %7293 = vmatpush2.bf16.msra.mxu0 %v13895_v40 }
 0x678   : > { %7334 = vmatpush2.bf16.msra.mxu1 %v13898_v32  ;;  %7294 = vmatprep.subr.bf16.mxu0 %v13903_v36  ;;  %v13949_v32 = vld [vmem:[%s15259_s29 + $0x850] ss:$8 sps:$4 sm:$0xff]  }
 0x679   : > { %7335 = vmatprep.subr.bf16.mxu1 %v13906_v11  ;;  %v13952_v36 = vld [vmem:[%s15259_s29 + $0x950] ss:$8 sps:$4 sm:$0xff]   ;;  %v13957_v11 = vld [vmem:[%s15259_s29 + $0x844] ss:$8 sps:$4 sm:$0xff]  }
 0x67b   : > { %7295 = vmatpush2.bf16.msra.mxu0 %v13901_v17 }
 0x67c   : > { %7336 = vmatpush2.bf16.msra.mxu1 %v13904_v28  ;;  %7296 = vmatprep.subr.bf16.mxu0 %v13909_v47  ;;  %v13960_v47 = vld [vmem:[%s15259_s29 + $0x944] ss:$8 sps:$4 sm:$0xff]  }
 0x67d   : > { %7337 = vmatprep.subr.bf16.mxu1 %v13912_v15  ;;  %v13955_v15 = vld [vmem:[%s15259_s29 + $0x840] ss:$8 sps:$4 sm:$0xff]  }
 0x67f   : > { %7297 = vmatpush2.bf16.msra.mxu0 %v13907_v50  ;;  %v13958_v50 = vld [vmem:[%s15259_s29 + $0x940] ss:$8 sps:$4 sm:$0xff]  }
 0x680   : > { %7338 = vmatpush2.bf16.msra.mxu1 %v13910_v23  ;;  %7298 = vmatprep.subr.bf16.mxu0 %v13915_v61  ;;  %v13963_v23 = vld [vmem:[%s15259_s29 + $0x834] ss:$8 sps:$4 sm:$0xff]  }
 0x681   : > { %7339 = vmatprep.subr.bf16.mxu1 %v13918_v56  ;;  %v13966_v61 = vld [vmem:[%s15259_s29 + $0x934] ss:$8 sps:$4 sm:$0xff]   ;;  %v13961_v56 = vld [vmem:[%s15259_s29 + $0x830] ss:$8 sps:$4 sm:$0xff]  }
 0x683   : > { %7299 = vmatpush2.bf16.msra.mxu0 %v13913_v45  ;;  %v13964_v45 = vld [vmem:[%s15259_s29 + $0x930] ss:$8 sps:$4 sm:$0xff]  }
 0x684   : > { %7340 = vmatpush2.bf16.msra.mxu1 %v13916_v9  ;;  %7300 = vmatprep.subr.bf16.mxu0 %v13921_v53  ;;  %v13969_v9 = vld [vmem:[%s15259_s29 + $0x824] ss:$8 sps:$4 sm:$0xff]  }
 0x685   : > { %7341 = vmatprep.subr.bf16.mxu1 %v13924_v0  ;;  %v13972_v53 = vld [vmem:[%s15259_s29 + $0x924] ss:$8 sps:$4 sm:$0xff]   ;;  %v13967_v0 = vld [vmem:[%s15259_s29 + $0x820] ss:$8 sps:$4 sm:$0xff]  }
 0x687   : > { %7301 = vmatpush2.bf16.msra.mxu0 %v13919_v46  ;;  %v13970_v46 = vld [vmem:[%s15259_s29 + $0x920] ss:$8 sps:$4 sm:$0xff]  }
 0x688   : > { %7342 = vmatpush2.bf16.msra.mxu1 %v13922_v8  ;;  %7302 = vmatprep.subr.bf16.mxu0 %v13927_v5  ;;  %v13975_v8 = vld [vmem:[%s15259_s29 + $0x814] ss:$8 sps:$4 sm:$0xff]  }
 0x689   : > { %7343 = vmatprep.subr.bf16.mxu1 %v13930_v2  ;;  %v13978_v5 = vld [vmem:[%s15259_s29 + $0x914] ss:$8 sps:$4 sm:$0xff]   ;;  %v13973_v2 = vld [vmem:[%s15259_s29 + $0x810] ss:$8 sps:$4 sm:$0xff]  }
 0x68b   : > { %7303 = vmatpush2.bf16.msra.mxu0 %v13925_v3  ;;  %v13981_v3 = vld [vmem:[%s15259_s29 + $0x804] ss:$8 sps:$4 sm:$0xff]  }
 0x68c   : > { %7344 = vmatpush2.bf16.msra.mxu1 %v13928_v35  ;;  %7304 = vmatprep.subr.bf16.mxu0 %v13933_v58  ;;  %v13984_v35 = vld [vmem:[%s15259_s29 + $0x904] ss:$8 sps:$4 sm:$0xff]   ;;  %v13982_v58 = vld [vmem:[%s15259_s29 + $0x900] ss:$8 sps:$4 sm:$0xff]  }
 0x68d   : > { %7345 = vmatprep.subr.bf16.mxu1 %v13936_v20  ;;  %v13988_v20 = vld [vmem:[%s15259_s29 + $0x9f0] ss:$8 sps:$4 sm:$0xff]  }
 0x68f   : > { %7305 = vmatpush2.bf16.msra.mxu0 %v13931_v1  ;;  %v13993_v1 = vld [vmem:[%s15259_s29 + $0x8e4] ss:$8 sps:$4 sm:$0xff]  }
 0x690   : > { %7346 = vmatpush2.bf16.msra.mxu1 %v13934_v55  ;;  %7356 = vmatprep.subr.bf16.mxu0 %v13939_v49  ;;  %v13996_v55 = vld [vmem:[%s15259_s29 + $0x9e4] ss:$8 sps:$4 sm:$0xff]  }
 0x691   : > { %8012 = vmatprep.subr.bf16.mxu1 %v13942_v33  ;;  %v14005_v49 = vld [vmem:[%s15259_s29 + $0x8c4] ss:$8 sps:$4 sm:$0xff]  }
 0x692   : > { %v5969_v52 = vpop.f32.mrf.mxu0  ;;  %7307 = vmatmul.mubr.bf16.vlgmr.msra.gmra.mxu0 %v6691_v51  ;;  %v14008_v33 = vld [vmem:[%s15259_s29 + $0x9c4] ss:$8 sps:$4 sm:$0xff]   ;;  %v14003_v51 = vld [vmem:[%s15259_s29 + $0x8c0] ss:$8 sps:$4 sm:$0xff]  }
 0x693   : > { %v6010_v22 = vpop.f32.mrf.mxu1  ;;  %7348 = vmatmul.mubr.bf16.vlgmr.msra.gmra.mxu1 %v6693_v16  ;;  %7357 = vmatpush1.bf16.msra.mxu0 %v13937_v34  ;;  %v14006_v16 = vld [vmem:[%s15259_s29 + $0x9c0] ss:$8 sps:$4 sm:$0xff]   ;;  %v14011_v34 = vld [vmem:[%s15259_s29 + $0x8b4] ss:$8 sps:$4 sm:$0xff]  }
 0x694   : > { %v17262_v24 = vadd.f32 %v6010_v22, %v5969_v52  ;;  %8013 = vmatpush1.bf16.msra.mxu1 %v13940_v18  ;;  %v5971_v30 = vpop.f32.mrf.mxu0  ;;  %7358 = vmatprep.subr.bf16.mxu0 %v13945_v62  ;;  %v14014_v18 = vld [vmem:[%s15259_s29 + $0x9b4] ss:$8 sps:$4 sm:$0xff]   ;;  %v14017_v62 = vld [vmem:[%s15259_s29 + $0x8a4] ss:$8 sps:$4 sm:$0xff]  }
 0x695   : > { %v6012_v41 = vpop.f32.mrf.mxu1  ;;  %8014 = vmatprep.subr.bf16.mxu1 %v13948_v48  ;;  %7388 = vmatprep.mubr.bf16.mxu0 %v6696_v4  ;;  %v14020_v48 = vld [vmem:[%s15259_s29 + $0x9a4] ss:$8 sps:$4 sm:$0xff]   ;;  %v14015_v4 = vld [vmem:[%s15259_s29 + $0x8a0] ss:$8 sps:$4 sm:$0xff]   ;;  %v14023_v52 = vld [vmem:[%s15259_s29 + $0x894] ss:$8 sps:$4 sm:$0xff]  }
 0x696   : > { %v17266_v31 = vadd.f32 %v6012_v41, %v5971_v30  ;;  %8044 = vmatprep.mubr.bf16.mxu1 %v7430_v6  ;;  %v5973_v38 = vpop.f32.mrf.mxu0  ;;  %v14018_v6 = vld [vmem:[%s15259_s29 + $0x9a0] ss:$8 sps:$4 sm:$0xff]   ;;  %v14026_v22 = vld [vmem:[%s15259_s29 + $0x994] ss:$8 sps:$4 sm:$0xff]   ;;  %v7399_v41 = vrot.slane %v17225_v59, 3 }
 0x697   : > { %v6014_v40 = vpop.f32.mrf.mxu1  ;;  %7359 = vmatpush1.bf16.msra.mxu0 %v13943_v21  ;;  %v17317_v21 = vld [vmem:[%s16935_s17 + $0x20] sm:$0xff]  ;;  %v17335_v59 = vld [vmem:[%s16935_s17 + $0x78] sm:$0xff] }
 0x698   : > { %8015 = vmatpush1.bf16.msra.mxu1 %v13946_v12  ;;  %v5974_v17 = vpop.f32.mrf.mxu0  ;;  %7360 = vmatprep.subr.bf16.mxu0 %v13951_v13  ;;  %v6665_v12 = vrot.slane %v17317_v21, 2  ;;  %v17321_v13 = vld [vmem:[%s16935_s17 + $0x80] sm:$0xff]  ;;  %v7411_v40 = vrot.slane %v17231_v29, 2  ;;  %v7416_v29 = vrot.slane %v17245_v54, 2 }
 0x699   : > { %v6015_v28 = vpop.f32.mrf.mxu1  ;;  %8016 = vmatprep.subr.bf16.mxu1 %v13954_v26  ;;  %v6677_v30 = vrot.slane %v17321_v13, 1  ;;  %v14021_v26 = vld [vmem:[%s15259_s29 + $0x890] ss:$8 sps:$4 sm:$0xff]  }
 0x69a   : > { %v14024_v38 = vld [vmem:[%s15259_s29 + $0x990] ss:$8 sps:$4 sm:$0xff]   ;;  %v7414_v28 = vrot.slane %v17335_v59, 2 }
 0x69b   : > { %7361 = vmatpush1.bf16.msra.mxu0 %v13949_v32  ;;  %v14029_v32 = vld [vmem:[%s15259_s29 + $0x884] ss:$8 sps:$4 sm:$0xff]  }
 0x69c   : > { %8017 = vmatpush1.bf16.msra.mxu1 %v13952_v36  ;;  %7362 = vmatprep.subr.bf16.mxu0 %v13957_v11  ;;  %v14032_v36 = vld [vmem:[%s15259_s29 + $0x984] ss:$8 sps:$4 sm:$0xff]  }
 0x69d   : > { %8018 = vmatprep.subr.bf16.mxu1 %v13960_v47  ;;  %v17331_v11 = vld [vmem:[%s16935_s17 + $0x18] sm:$0xff]  ;;  %v7404_v47 = vrot.slane %v17241_v14, 3  ;;  %v14036_v14 = vld [vmem:[%s15259_s29 + $0xb70] ss:$8 sps:$4 sm:$0xff]  }
 0x69e   : > { %v7402_v17 = vrot.slane %v17331_v11, 3 }
 0x69f   : > { %7363 = vmatpush1.bf16.msra.mxu0 %v13955_v15  ;;  %v14027_v15 = vld [vmem:[%s15259_s29 + $0x880] ss:$8 sps:$4 sm:$0xff]  }
 0x6a0   : > { %8019 = vmatpush1.bf16.msra.mxu1 %v13958_v50  ;;  %7364 = vmatprep.subr.bf16.mxu0 %v13963_v23  ;;  %v14030_v50 = vld [vmem:[%s15259_s29 + $0x980] ss:$8 sps:$4 sm:$0xff]   ;;  %v6689_v23 = vsel %vm5219_vm7, %v6665_v12, %v6677_v30  ;;  %v14069_v12 = vld [vmem:[%s15259_s29 + $0xa10] ss:$8 sps:$4 sm:$0xff]  }
 0x6a1   : > { %8020 = vmatprep.subr.bf16.mxu1 %v13966_v61  ;;  %v7423_v61 = vsel %vm5219_vm7, %v7399_v41, %v7411_v40  ;;  %v14072_v30 = vld [vmem:[%s15259_s29 + $0xb10] ss:$8 sps:$4 sm:$0xff]   ;;  %v14077_v41 = vld [vmem:[%s15259_s29 + $0xa04] ss:$8 sps:$4 sm:$0xff]   ;;  %v14078_v40 = vld [vmem:[%s15259_s29 + $0xb00] ss:$8 sps:$4 sm:$0xff]  }
 0x6a2   : > { %v7429_v54 = vpack.c.bf16 %v7423_v61, %v7423_v61  ;;  %v14098_v61 = vld [vmem:[%s15259_s29 + $0xbd4] ss:$8 sps:$4 sm:$0xff]  }
 0x6a3   : > { %7365 = vmatpush1.bf16.msra.mxu0 %v13961_v56  ;;  %v14035_v56 = vld [vmem:[%s15259_s29 + $0xa74] ss:$8 sps:$4 sm:$0xff]  }
 0x6a4   : > { %8021 = vmatpush1.bf16.msra.mxu1 %v13964_v45  ;;  %7366 = vmatprep.subr.bf16.mxu0 %v13969_v9  ;;  %v14038_v45 = vld [vmem:[%s15259_s29 + $0xb74] ss:$8 sps:$4 sm:$0xff]   ;;  %v14033_v9 = vld [vmem:[%s15259_s29 + $0xa70] ss:$8 sps:$4 sm:$0xff]  }
 0x6a5   : > { %8022 = vmatprep.subr.bf16.mxu1 %v13972_v53  ;;  %v6695_v53 = vpack.c.bf16 %v6689_v23, %v6689_v23  ;;  %v14095_v23 = vld [vmem:[%s15259_s29 + $0xad4] ss:$8 sps:$4 sm:$0xff]  }
 0x6a7   : > { %7367 = vmatpush1.bf16.msra.mxu0 %v13967_v0  ;;  %v7426_v0 = vsel %vm5219_vm7, %v7402_v17, %v7414_v28  ;;  %v14081_v17 = vld [vmem:[%s15259_s29 + $0xaf0] ss:$8 sps:$4 sm:$0xff]  }
 0x6a8   : > { %8023 = vmatpush1.bf16.msra.mxu1 %v13970_v46  ;;  %7368 = vmatprep.subr.bf16.mxu0 %v13975_v8  ;;  %v7428_v46 = vsel %vm5219_vm7, %v7404_v47, %v7416_v29  ;;  %v14041_v8 = vld [vmem:[%s15259_s29 + $0xa64] ss:$8 sps:$4 sm:$0xff]   ;;  %v14084_v28 = vld [vmem:[%s15259_s29 + $0xbf0] ss:$8 sps:$4 sm:$0xff]  }
 0x6a9   : > { %8024 = vmatprep.subr.bf16.mxu1 %v13978_v5  ;;  %v14044_v5 = vld [vmem:[%s15259_s29 + $0xb64] ss:$8 sps:$4 sm:$0xff]  }
 0x6aa   : > { %v14089_v47 = vld [vmem:[%s15259_s29 + $0xae4] ss:$8 sps:$4 sm:$0xff]  }
 0x6ab   : > { %7369 = vmatpush1.bf16.msra.mxu0 %v13973_v2  ;;  %v14039_v2 = vld [vmem:[%s15259_s29 + $0xa60] ss:$8 sps:$4 sm:$0xff]   ;;  %v14092_v29 = vld [vmem:[%s15259_s29 + $0xbe4] ss:$8 sps:$4 sm:$0xff]  }
 0x6ac   : > { %8025 = vmatpush1.bf16.msra.mxu1 %v13976_v60  ;;  %7370 = vmatprep.subr.bf16.mxu0 %v13981_v3  ;;  %v14042_v60 = vld [vmem:[%s15259_s29 + $0xb60] ss:$8 sps:$4 sm:$0xff]   ;;  %v7432_v3 = vpack.c.bf16 %v7426_v0, %v7426_v0  ;;  %v14107_v0 = vld [vmem:[%s15259_s29 + $0xab4] ss:$8 sps:$4 sm:$0xff]  }
 0x6ad   : > { %8026 = vmatprep.subr.bf16.mxu1 %v13984_v35  ;;  %v7434_v35 = vpack.c.bf16 %v7428_v46, %v7428_v46  ;;  %v14110_v46 = vld [vmem:[%s15259_s29 + $0xbb4] ss:$8 sps:$4 sm:$0xff]  }
 0x6af   : > { %7371 = vmatpush1.bf16.msra.mxu0 %v13979_v63 }
 0x6b0   : > { %8027 = vmatpush1.bf16.msra.mxu1 %v13982_v58  ;;  %7372 = vmatprep.subr.bf16.mxu0 %v13987_v19 }
 0x6b1   : > { %8028 = vmatprep.subr.bf16.mxu1 %v13990_v27 }
 0x6b3   : > { %7373 = vmatpush2.bf16.msra.mxu0 %v13985_v39 }
 0x6b4   : > { %8029 = vmatpush2.bf16.msra.mxu1 %v13988_v20  ;;  %7374 = vmatprep.subr.bf16.mxu0 %v13993_v1  ;;  %v14047_v20 = vld [vmem:[%s15259_s29 + $0xa54] ss:$8 sps:$4 sm:$0xff]  }
 0x6b5   : > { %8030 = vmatprep.subr.bf16.mxu1 %v13996_v55  ;;  %v14050_v1 = vld [vmem:[%s15259_s29 + $0xb54] ss:$8 sps:$4 sm:$0xff]  }
 0x6b7   : > { %7375 = vmatpush2.bf16.msra.mxu0 %v13991_v44 }
 0x6b8   : > { %8031 = vmatpush2.bf16.msra.mxu1 %v13994_v7  ;;  %7376 = vmatprep.subr.bf16.mxu0 %v13999_v57  ;;  %v14045_v7 = vld [vmem:[%s15259_s29 + $0xa50] ss:$8 sps:$4 sm:$0xff]  }
 0x6b9   : > { %8032 = vmatprep.subr.bf16.mxu1 %v14002_v42  ;;  %v14048_v57 = vld [vmem:[%s15259_s29 + $0xb50] ss:$8 sps:$4 sm:$0xff]  }
 0x6bb   : > { %7377 = vmatpush2.bf16.msra.mxu0 %v13997_v25 }
 0x6bc   : > { %8033 = vmatpush2.bf16.msra.mxu1 %v14000_v37  ;;  %7378 = vmatprep.subr.bf16.mxu0 %v14005_v49 }
 0x6bd   : > { %8034 = vmatprep.subr.bf16.mxu1 %v14008_v33  ;;  %v14056_v33 = vld [vmem:[%s15259_s29 + $0xb44] ss:$8 sps:$4 sm:$0xff]  }
 0x6bf   : > { %7379 = vmatpush2.bf16.msra.mxu0 %v14003_v51  ;;  %v14051_v51 = vld [vmem:[%s15259_s29 + $0xa40] ss:$8 sps:$4 sm:$0xff]  }
 0x6c0   : > { %8035 = vmatpush2.bf16.msra.mxu1 %v14006_v16  ;;  %7380 = vmatprep.subr.bf16.mxu0 %v14011_v34  ;;  %v14054_v16 = vld [vmem:[%s15259_s29 + $0xb40] ss:$8 sps:$4 sm:$0xff]   ;;  %v14059_v34 = vld [vmem:[%s15259_s29 + $0xa34] ss:$8 sps:$4 sm:$0xff]  }
 0x6c1   : > { %8036 = vmatprep.subr.bf16.mxu1 %v14014_v18  ;;  %v14062_v18 = vld [vmem:[%s15259_s29 + $0xb34] ss:$8 sps:$4 sm:$0xff]  }
 0x6c3   : > { %7381 = vmatpush2.bf16.msra.mxu0 %v14009_v10  ;;  %v14057_v10 = vld [vmem:[%s15259_s29 + $0xa30] ss:$8 sps:$4 sm:$0xff]  }
 0x6c4   : > { %8037 = vmatpush2.bf16.msra.mxu1 %v14012_v43  ;;  %7382 = vmatprep.subr.bf16.mxu0 %v14017_v62  ;;  %v14060_v43 = vld [vmem:[%s15259_s29 + $0xb30] ss:$8 sps:$4 sm:$0xff]   ;;  %v14065_v62 = vld [vmem:[%s15259_s29 + $0xa24] ss:$8 sps:$4 sm:$0xff]  }
 0x6c5   : > { %8038 = vmatprep.subr.bf16.mxu1 %v14020_v48  ;;  %v14068_v48 = vld [vmem:[%s15259_s29 + $0xb24] ss:$8 sps:$4 sm:$0xff]  }
 0x6c7   : > { %7383 = vmatpush2.bf16.msra.mxu0 %v14015_v4  ;;  %v14063_v4 = vld [vmem:[%s15259_s29 + $0xa20] ss:$8 sps:$4 sm:$0xff]  }
 0x6c8   : > { %8039 = vmatpush2.bf16.msra.mxu1 %v14018_v6  ;;  %7384 = vmatprep.subr.bf16.mxu0 %v14023_v52  ;;  %v14066_v6 = vld [vmem:[%s15259_s29 + $0xb20] ss:$8 sps:$4 sm:$0xff]   ;;  %v14071_v52 = vld [vmem:[%s15259_s29 + $0xa14] ss:$8 sps:$4 sm:$0xff]  }
 0x6c9   : > { %8040 = vmatprep.subr.bf16.mxu1 %v14026_v22  ;;  %v14074_v22 = vld [vmem:[%s15259_s29 + $0xb14] ss:$8 sps:$4 sm:$0xff]  }
 0x6cb   : > { %7385 = vmatpush2.bf16.msra.mxu0 %v14021_v26  ;;  %v14080_v26 = vld [vmem:[%s15259_s29 + $0xb04] ss:$8 sps:$4 sm:$0xff]  }
 0x6cc   : > { %8041 = vmatpush2.bf16.msra.mxu1 %v14024_v38  ;;  %7386 = vmatprep.subr.bf16.mxu0 %v14029_v32  ;;  %v14075_v38 = vld [vmem:[%s15259_s29 + $0xa00] ss:$8 sps:$4 sm:$0xff]   ;;  %v14083_v32 = vld [vmem:[%s15259_s29 + $0xaf4] ss:$8 sps:$4 sm:$0xff]  }
 0x6cd   : > { %8042 = vmatprep.subr.bf16.mxu1 %v14032_v36  ;;  %v14086_v36 = vld [vmem:[%s15259_s29 + $0xbf4] ss:$8 sps:$4 sm:$0xff]  }
 0x6cf   : > { %7387 = vmatpush2.bf16.msra.mxu0 %v14027_v15  ;;  %v14087_v15 = vld [vmem:[%s15259_s29 + $0xae0] ss:$8 sps:$4 sm:$0xff]  }
 0x6d0   : > { %8043 = vmatpush2.bf16.msra.mxu1 %v14030_v50  ;;  %8053 = vmatprep.subr.bf16.mxu0 %v14035_v56  ;;  %v14090_v50 = vld [vmem:[%s15259_s29 + $0xbe0] ss:$8 sps:$4 sm:$0xff]   ;;  %v14093_v56 = vld [vmem:[%s15259_s29 + $0xad0] ss:$8 sps:$4 sm:$0xff]  }
 0x6d1   : > { %8094 = vmatprep.subr.bf16.mxu1 %v14038_v45  ;;  %v14096_v45 = vld [vmem:[%s15259_s29 + $0xbd0] ss:$8 sps:$4 sm:$0xff]  }
 0x6d2   : > { %v6051_v63 = vpop.f32.mrf.mxu0  ;;  %7389 = vmatmul.mubr.bf16.vlgmr.msra.gmra.mxu0 %v6695_v53  ;;  %v14099_v53 = vld [vmem:[%s15259_s29 + $0xac0] ss:$8 sps:$4 sm:$0xff]  }
 0x6d3   : > { %v6572_v58 = vpop.f32.mrf.mxu1  ;;  %8045 = vmatmul.mubr.bf16.vlgmr.msra.gmra.mxu1 %v7429_v54  ;;  %v6052_v19 = vadd.f32 %v6051_v63, %v17262_v24  ;;  %8054 = vmatpush1.bf16.msra.mxu0 %v14033_v9  ;;  %v14101_v9 = vld [vmem:[%s15259_s29 + $0xac4] ss:$8 sps:$4 sm:$0xff]   ;;  %v14102_v54 = vld [vmem:[%s15259_s29 + $0xbc0] ss:$8 sps:$4 sm:$0xff]   ;;  %v14119_v63 = vld [vmem:[%s15259_s29 + $0xa94] ss:$8 sps:$4 sm:$0xff]  }
 0x6d4   : > { %8095 = vmatpush1.bf16.msra.mxu1 %v14036_v14  ;;  %v6053_v27 = vpop.f32.mrf.mxu0  ;;  %8055 = vmatprep.subr.bf16.mxu0 %v14041_v8  ;;  %v14104_v14 = vld [vmem:[%s15259_s29 + $0xbc4] ss:$8 sps:$4 sm:$0xff]   ;;  %v14105_v8 = vld [vmem:[%s15259_s29 + $0xab0] ss:$8 sps:$4 sm:$0xff]  }
 0x6d5   : > { %v6574_v39 = vpop.f32.mrf.mxu1  ;;  %8096 = vmatprep.subr.bf16.mxu1 %v14044_v5  ;;  %v17357_v55 = vadd.f32 %v6572_v58, %v6052_v19  ;;  %v6054_v44 = vadd.f32 %v6053_v27, %v17266_v31  ;;  %8085 = vmatprep.mubr.bf16.mxu0 %v7432_v3  ;;  %v14053_v31 = vld [vmem:[%s15259_s29 + $0xa44] ss:$8 sps:$4 sm:$0xff]   ;;  %v14108_v5 = vld [vmem:[%s15259_s29 + $0xbb0] ss:$8 sps:$4 sm:$0xff]   ;;  %v14111_v3 = vld [vmem:[%s15259_s29 + $0xaa0] ss:$8 sps:$4 sm:$0xff]  }
 0x6d6   : > { %8126 = vmatprep.mubr.bf16.mxu1 %v7434_v35  ;;  %v6055_v24 = vpop.f32.mrf.mxu0  ;;  %v14114_v35 = vld [vmem:[%s15259_s29 + $0xba0] ss:$8 sps:$4 sm:$0xff]   ;;  %v14122_v58 = vld [vmem:[%s15259_s29 + $0xb94] ss:$8 sps:$4 sm:$0xff]   ;;  %v14117_v19 = vld [vmem:[%s15259_s29 + $0xa90] ss:$8 sps:$4 sm:$0xff]  }
 0x6d7   : > { %v6576_v42 = vpop.f32.mrf.mxu1  ;;  %v17362_v25 = vadd.f32 %v6574_v39, %v6054_v44  ;;  %8056 = vmatpush1.bf16.msra.mxu0 %v14039_v2  ;;  %v14113_v2 = vld [vmem:[%s15259_s29 + $0xaa4] ss:$8 sps:$4 sm:$0xff]   ;;  %v14120_v27 = vld [vmem:[%s15259_s29 + $0xb90] ss:$8 sps:$4 sm:$0xff]   ;;  %v17413_v39 = vld [vmem:[%s16935_s17 + $0x10] sm:$0xff] }
 0x6d8   : > { %8097 = vmatpush1.bf16.msra.mxu1 %v14042_v60  ;;  %v6056_v37 = vpop.f32.mrf.mxu0  ;;  %8057 = vmatprep.subr.bf16.mxu0 %v14047_v20  ;;  %v14116_v60 = vld [vmem:[%s15259_s29 + $0xba4] ss:$8 sps:$4 sm:$0xff]   ;;  %v7401_v20 = vrot.slane %v17413_v39, 3 }
 0x6d9   : > { %v6577_v49 = vpop.f32.mrf.mxu1  ;;  %8098 = vmatprep.subr.bf16.mxu1 %v14050_v1  ;;  %v17417_v1 = vld [vmem:[%s16935_s17 + $0x70] sm:$0xff]  ;;  %v14125_v24 = vld [vmem:[%s15259_s29 + $0xa84] ss:$8 sps:$4 sm:$0xff]   ;;  %v17425_v37 = vld [vmem:[%s16935_s17 + $0x8] sm:$0xff] }
 0x6da   : > { %v7413_v44 = vrot.slane %v17417_v1, 2  ;;  %v14128_v42 = vld [vmem:[%s15259_s29 + $0xb84] ss:$8 sps:$4 sm:$0xff]   ;;  %v8138_v49 = vrot.slane %v17425_v37, 4 }
 0x6db   : > { %8058 = vmatpush1.bf16.msra.mxu0 %v14045_v7  ;;  %v7403_v7 = vrot.slane %v17317_v21, 3  ;;  %v8140_v21 = vrot.slane %v17331_v11, 4  ;;  %v14132_v11 = vld [vmem:[%s15259_s29 + $0xd70] ss:$8 sps:$4 sm:$0xff]  }
 0x6dc   : > { %8099 = vmatpush1.bf16.msra.mxu1 %v14048_v57  ;;  %8059 = vmatprep.subr.bf16.mxu0 %v14053_v31  ;;  %v7415_v57 = vrot.slane %v17321_v13, 2  ;;  %v17429_v31 = vld [vmem:[%s16935_s17 + $0x68] sm:$0xff]  ;;  %v8152_v13 = vrot.slane %v17335_v59, 3 }
 0x6dd   : > { %8100 = vmatprep.subr.bf16.mxu1 %v14056_v33  ;;  %v8150_v33 = vrot.slane %v17429_v31, 3 }
 0x6df   : > { %8060 = vmatpush1.bf16.msra.mxu0 %v14051_v51  ;;  %v14123_v51 = vld [vmem:[%s15259_s29 + $0xa80] ss:$8 sps:$4 sm:$0xff]  }
 0x6e0   : > { %8101 = vmatpush1.bf16.msra.mxu1 %v14054_v16  ;;  %8061 = vmatprep.subr.bf16.mxu0 %v14059_v34  ;;  %v14126_v16 = vld [vmem:[%s15259_s29 + $0xb80] ss:$8 sps:$4 sm:$0xff]   ;;  %v7425_v34 = vsel %vm5219_vm7, %v7401_v20, %v7413_v44  ;;  %v14173_v20 = vld [vmem:[%s15259_s29 + $0xc04] ss:$8 sps:$4 sm:$0xff]  }
 0x6e1   : > { %8102 = vmatprep.subr.bf16.mxu1 %v14062_v18  ;;  %v7427_v18 = vsel %vm5219_vm7, %v7403_v7, %v7415_v57  ;;  %v14176_v44 = vld [vmem:[%s15259_s29 + $0xd04] ss:$8 sps:$4 sm:$0xff]   ;;  %v14171_v7 = vld [vmem:[%s15259_s29 + $0xc00] ss:$8 sps:$4 sm:$0xff]  }
 0x6e2   : > { %v7433_v59 = vpack.c.bf16 %v7427_v18, %v7427_v18  ;;  %v14174_v57 = vld [vmem:[%s15259_s29 + $0xd00] ss:$8 sps:$4 sm:$0xff]   ;;  %v14194_v18 = vld [vmem:[%s15259_s29 + $0xdd4] ss:$8 sps:$4 sm:$0xff]  }
 0x6e3   : > { %8062 = vmatpush1.bf16.msra.mxu0 %v14057_v10  ;;  %v14131_v10 = vld [vmem:[%s15259_s29 + $0xc74] ss:$8 sps:$4 sm:$0xff]  }
 0x6e4   : > { %8103 = vmatpush1.bf16.msra.mxu1 %v14060_v43  ;;  %8063 = vmatprep.subr.bf16.mxu0 %v14065_v62  ;;  %v14134_v43 = vld [vmem:[%s15259_s29 + $0xd74] ss:$8 sps:$4 sm:$0xff]   ;;  %v14129_v62 = vld [vmem:[%s15259_s29 + $0xc70] ss:$8 sps:$4 sm:$0xff]  }
 0x6e5   : > { %8104 = vmatprep.subr.bf16.mxu1 %v14068_v48  ;;  %v7431_v48 = vpack.c.bf16 %v7425_v34, %v7425_v34  ;;  %v14191_v34 = vld [vmem:[%s15259_s29 + $0xcd4] ss:$8 sps:$4 sm:$0xff]  }
 0x6e7   : > { %8064 = vmatpush1.bf16.msra.mxu0 %v14063_v4  ;;  %v8162_v4 = vsel %vm5219_vm7, %v8138_v49, %v8150_v33  ;;  %v14177_v49 = vld [vmem:[%s15259_s29 + $0xcf0] ss:$8 sps:$4 sm:$0xff]  }
 0x6e8   : > { %8105 = vmatpush1.bf16.msra.mxu1 %v14066_v6  ;;  %8065 = vmatprep.subr.bf16.mxu0 %v14071_v52  ;;  %v8164_v6 = vsel %vm5219_vm7, %v8140_v21, %v8152_v13  ;;  %v14137_v52 = vld [vmem:[%s15259_s29 + $0xc64] ss:$8 sps:$4 sm:$0xff]   ;;  %v14180_v33 = vld [vmem:[%s15259_s29 + $0xdf0] ss:$8 sps:$4 sm:$0xff]  }
 0x6e9   : > { %8106 = vmatprep.subr.bf16.mxu1 %v14074_v22  ;;  %v14140_v22 = vld [vmem:[%s15259_s29 + $0xd64] ss:$8 sps:$4 sm:$0xff]  }
 0x6ea   : > { %v14185_v21 = vld [vmem:[%s15259_s29 + $0xce4] ss:$8 sps:$4 sm:$0xff]  }
 0x6eb   : > { %8066 = vmatpush1.bf16.msra.mxu0 %v14069_v12  ;;  %v14135_v12 = vld [vmem:[%s15259_s29 + $0xc60] ss:$8 sps:$4 sm:$0xff]   ;;  %v14188_v13 = vld [vmem:[%s15259_s29 + $0xde4] ss:$8 sps:$4 sm:$0xff]  }
 0x6ec   : > { %8107 = vmatpush1.bf16.msra.mxu1 %v14072_v30  ;;  %8067 = vmatprep.subr.bf16.mxu0 %v14077_v41  ;;  %v14138_v30 = vld [vmem:[%s15259_s29 + $0xd60] ss:$8 sps:$4 sm:$0xff]   ;;  %v8168_v41 = vpack.c.bf16 %v8162_v4, %v8162_v4  ;;  %v14203_v4 = vld [vmem:[%s15259_s29 + $0xcb4] ss:$8 sps:$4 sm:$0xff]  }
 0x6ed   : > { %8108 = vmatprep.subr.bf16.mxu1 %v14080_v26  ;;  %v8170_v26 = vpack.c.bf16 %v8164_v6, %v8164_v6  ;;  %v14206_v6 = vld [vmem:[%s15259_s29 + $0xdb4] ss:$8 sps:$4 sm:$0xff]  }
 0x6ef   : > { %8068 = vmatpush1.bf16.msra.mxu0 %v14075_v38 }
 0x6f0   : > { %8109 = vmatpush1.bf16.msra.mxu1 %v14078_v40  ;;  %8069 = vmatprep.subr.bf16.mxu0 %v14083_v32 }
 0x6f1   : > { %8110 = vmatprep.subr.bf16.mxu1 %v14086_v36 }
 0x6f3   : > { %8070 = vmatpush2.bf16.msra.mxu0 %v14081_v17 }
 0x6f4   : > { %8111 = vmatpush2.bf16.msra.mxu1 %v14084_v28  ;;  %8071 = vmatprep.subr.bf16.mxu0 %v14089_v47  ;;  %v14143_v28 = vld [vmem:[%s15259_s29 + $0xc54] ss:$8 sps:$4 sm:$0xff]  }
 0x6f5   : > { %8112 = vmatprep.subr.bf16.mxu1 %v14092_v29  ;;  %v14146_v47 = vld [vmem:[%s15259_s29 + $0xd54] ss:$8 sps:$4 sm:$0xff]  }
 0x6f7   : > { %8072 = vmatpush2.bf16.msra.mxu0 %v14087_v15 }
 0x6f8   : > { %8113 = vmatpush2.bf16.msra.mxu1 %v14090_v50  ;;  %8073 = vmatprep.subr.bf16.mxu0 %v14095_v23  ;;  %v14141_v50 = vld [vmem:[%s15259_s29 + $0xc50] ss:$8 sps:$4 sm:$0xff]  }
 0x6f9   : > { %8114 = vmatprep.subr.bf16.mxu1 %v14098_v61  ;;  %v14144_v23 = vld [vmem:[%s15259_s29 + $0xd50] ss:$8 sps:$4 sm:$0xff]  }
 0x6fb   : > { %8074 = vmatpush2.bf16.msra.mxu0 %v14093_v56 }
 0x6fc   : > { %8115 = vmatpush2.bf16.msra.mxu1 %v14096_v45  ;;  %8075 = vmatprep.subr.bf16.mxu0 %v14101_v9 }
 0x6fd   : > { %8116 = vmatprep.subr.bf16.mxu1 %v14104_v14  ;;  %v14152_v14 = vld [vmem:[%s15259_s29 + $0xd44] ss:$8 sps:$4 sm:$0xff]  }
 0x6ff   : > { %8076 = vmatpush2.bf16.msra.mxu0 %v14099_v53  ;;  %v14147_v53 = vld [vmem:[%s15259_s29 + $0xc40] ss:$8 sps:$4 sm:$0xff]  }
 0x700   : > { %8117 = vmatpush2.bf16.msra.mxu1 %v14102_v54  ;;  %8077 = vmatprep.subr.bf16.mxu0 %v14107_v0  ;;  %v14150_v54 = vld [vmem:[%s15259_s29 + $0xd40] ss:$8 sps:$4 sm:$0xff]   ;;  %v14155_v0 = vld [vmem:[%s15259_s29 + $0xc34] ss:$8 sps:$4 sm:$0xff]  }
 0x701   : > { %8118 = vmatprep.subr.bf16.mxu1 %v14110_v46  ;;  %v14158_v46 = vld [vmem:[%s15259_s29 + $0xd34] ss:$8 sps:$4 sm:$0xff]  }
 0x703   : > { %8078 = vmatpush2.bf16.msra.mxu0 %v14105_v8  ;;  %v14153_v8 = vld [vmem:[%s15259_s29 + $0xc30] ss:$8 sps:$4 sm:$0xff]  }
 0x704   : > { %8119 = vmatpush2.bf16.msra.mxu1 %v14108_v5  ;;  %8079 = vmatprep.subr.bf16.mxu0 %v14113_v2  ;;  %v14156_v5 = vld [vmem:[%s15259_s29 + $0xd30] ss:$8 sps:$4 sm:$0xff]   ;;  %v14161_v2 = vld [vmem:[%s15259_s29 + $0xc24] ss:$8 sps:$4 sm:$0xff]  }
 0x705   : > { %8120 = vmatprep.subr.bf16.mxu1 %v14116_v60  ;;  %v14164_v60 = vld [vmem:[%s15259_s29 + $0xd24] ss:$8 sps:$4 sm:$0xff]  }
 0x707   : > { %8080 = vmatpush2.bf16.msra.mxu0 %v14111_v3  ;;  %v14159_v3 = vld [vmem:[%s15259_s29 + $0xc20] ss:$8 sps:$4 sm:$0xff]  }
 0x708   : > { %8121 = vmatpush2.bf16.msra.mxu1 %v14114_v35  ;;  %8081 = vmatprep.subr.bf16.mxu0 %v14119_v63  ;;  %v14162_v35 = vld [vmem:[%s15259_s29 + $0xd20] ss:$8 sps:$4 sm:$0xff]   ;;  %v14167_v63 = vld [vmem:[%s15259_s29 + $0xc14] ss:$8 sps:$4 sm:$0xff]  }
 0x709   : > { %8122 = vmatprep.subr.bf16.mxu1 %v14122_v58  ;;  %v14170_v58 = vld [vmem:[%s15259_s29 + $0xd14] ss:$8 sps:$4 sm:$0xff]  }
 0x70b   : > { %8082 = vmatpush2.bf16.msra.mxu0 %v14117_v19  ;;  %v14165_v19 = vld [vmem:[%s15259_s29 + $0xc10] ss:$8 sps:$4 sm:$0xff]  }
 0x70c   : > { %8123 = vmatpush2.bf16.msra.mxu1 %v14120_v27  ;;  %8083 = vmatprep.subr.bf16.mxu0 %v14125_v24  ;;  %v14168_v27 = vld [vmem:[%s15259_s29 + $0xd10] ss:$8 sps:$4 sm:$0xff]   ;;  %v14179_v24 = vld [vmem:[%s15259_s29 + $0xcf4] ss:$8 sps:$4 sm:$0xff]  }
 0x70d   : > { %8124 = vmatprep.subr.bf16.mxu1 %v14128_v42  ;;  %v14182_v42 = vld [vmem:[%s15259_s29 + $0xdf4] ss:$8 sps:$4 sm:$0xff]  }
 0x70f   : > { %8084 = vmatpush2.bf16.msra.mxu0 %v14123_v51  ;;  %v14183_v51 = vld [vmem:[%s15259_s29 + $0xce0] ss:$8 sps:$4 sm:$0xff]  }
 0x710   : > { %8125 = vmatpush2.bf16.msra.mxu1 %v14126_v16  ;;  %8750 = vmatprep.subr.bf16.mxu0 %v14131_v10  ;;  %v14186_v16 = vld [vmem:[%s15259_s29 + $0xde0] ss:$8 sps:$4 sm:$0xff]   ;;  %v14189_v10 = vld [vmem:[%s15259_s29 + $0xcd0] ss:$8 sps:$4 sm:$0xff]  }
 0x711   : > { %8791 = vmatprep.subr.bf16.mxu1 %v14134_v43  ;;  %v14192_v43 = vld [vmem:[%s15259_s29 + $0xdd0] ss:$8 sps:$4 sm:$0xff]  }
 0x712   : > { %v6613_v38 = vpop.f32.mrf.mxu0  ;;  %8086 = vmatmul.mubr.bf16.vlgmr.msra.gmra.mxu0 %v7431_v48  ;;  %v14195_v48 = vld [vmem:[%s15259_s29 + $0xcc0] ss:$8 sps:$4 sm:$0xff]  }
 0x713   : > { %v6654_v40 = vpop.f32.mrf.mxu1  ;;  %8127 = vmatmul.mubr.bf16.vlgmr.msra.gmra.mxu1 %v7433_v59  ;;  %v6614_v32 = vadd.f32 %v6613_v38, %v17357_v55  ;;  %8751 = vmatpush1.bf16.msra.mxu0 %v14129_v62  ;;  %v14197_v62 = vld [vmem:[%s15259_s29 + $0xcc4] ss:$8 sps:$4 sm:$0xff]   ;;  %v14198_v59 = vld [vmem:[%s15259_s29 + $0xdc0] ss:$8 sps:$4 sm:$0xff]   ;;  %v14215_v38 = vld [vmem:[%s15259_s29 + $0xc94] ss:$8 sps:$4 sm:$0xff]  }
 0x714   : > { %8792 = vmatpush1.bf16.msra.mxu1 %v14132_v11  ;;  %v6615_v36 = vpop.f32.mrf.mxu0  ;;  %8752 = vmatprep.subr.bf16.mxu0 %v14137_v52  ;;  %v14200_v11 = vld [vmem:[%s15259_s29 + $0xdc4] ss:$8 sps:$4 sm:$0xff]   ;;  %v14201_v52 = vld [vmem:[%s15259_s29 + $0xcb0] ss:$8 sps:$4 sm:$0xff]  }
 0x715   : > { %v6656_v17 = vpop.f32.mrf.mxu1  ;;  %8793 = vmatprep.subr.bf16.mxu1 %v14140_v22  ;;  %v17451_v29 = vadd.f32 %v6654_v40, %v6614_v32  ;;  %v6616_v15 = vadd.f32 %v6615_v36, %v17362_v25  ;;  %8782 = vmatprep.mubr.bf16.mxu0 %v8168_v41  ;;  %v14149_v25 = vld [vmem:[%s15259_s29 + $0xc44] ss:$8 sps:$4 sm:$0xff]   ;;  %v14204_v22 = vld [vmem:[%s15259_s29 + $0xdb0] ss:$8 sps:$4 sm:$0xff]   ;;  %v14207_v41 = vld [vmem:[%s15259_s29 + $0xca0] ss:$8 sps:$4 sm:$0xff]  }
 0x716   : > { %8823 = vmatprep.mubr.bf16.mxu1 %v8170_v26  ;;  %v6617_v55 = vpop.f32.mrf.mxu0  ;;  %v14210_v26 = vld [vmem:[%s15259_s29 + $0xda0] ss:$8 sps:$4 sm:$0xff]   ;;  %v14218_v40 = vld [vmem:[%s15259_s29 + $0xd94] ss:$8 sps:$4 sm:$0xff]   ;;  %v14213_v32 = vld [vmem:[%s15259_s29 + $0xc90] ss:$8 sps:$4 sm:$0xff]  }
 0x717   : > { %v6658_v61 = vpop.f32.mrf.mxu1  ;;  %v17456_v56 = vadd.f32 %v6656_v17, %v6616_v15  ;;  %8753 = vmatpush1.bf16.msra.mxu0 %v14135_v12  ;;  %v14209_v12 = vld [vmem:[%s15259_s29 + $0xca4] ss:$8 sps:$4 sm:$0xff]   ;;  %v14216_v36 = vld [vmem:[%s15259_s29 + $0xd90] ss:$8 sps:$4 sm:$0xff]  }
 0x718   : > { %8794 = vmatpush1.bf16.msra.mxu1 %v14138_v30  ;;  %v6618_v45 = vpop.f32.mrf.mxu0  ;;  %8754 = vmatprep.subr.bf16.mxu0 %v14143_v28  ;;  %v14212_v30 = vld [vmem:[%s15259_s29 + $0xda4] ss:$8 sps:$4 sm:$0xff]  }
 0x719   : > { %v6659_v9 = vpop.f32.mrf.mxu1  ;;  %8795 = vmatprep.subr.bf16.mxu1 %v14146_v47  ;;  %v17507_v17 = vld [vmem:[%s16935_s17] sm:$0xff]  ;;  %v17519_v45 = vld [vmem:[%s16935_s17 + $0x28] sm:$0xff] }
 0x71a   : > { %v8137_v28 = vrot.slane %v17507_v17, 4  ;;  %v17511_v47 = vld [vmem:[%s16935_s17 + $0x60] sm:$0xff]  ;;  %v8142_v9 = vrot.slane %v17519_v45, 4 }
 0x71b   : > { %8755 = vmatpush1.bf16.msra.mxu0 %v14141_v50  ;;  %v8149_v15 = vrot.slane %v17511_v47, 3  ;;  %v8139_v50 = vrot.slane %v17413_v39, 4  ;;  %v14221_v55 = vld [vmem:[%s15259_s29 + $0xc84] ss:$8 sps:$4 sm:$0xff]   ;;  %v8876_v39 = vrot.slane %v17425_v37, 5 }
 0x71c   : > { %8796 = vmatpush1.bf16.msra.mxu1 %v14144_v23  ;;  %8756 = vmatprep.subr.bf16.mxu0 %v14149_v25  ;;  %v8151_v23 = vrot.slane %v17417_v1, 3  ;;  %v14224_v61 = vld [vmem:[%s15259_s29 + $0xd84] ss:$8 sps:$4 sm:$0xff]   ;;  %v17523_v25 = vld [vmem:[%s16935_s17 + $0x88] sm:$0xff]  ;;  %v8888_v1 = vrot.slane %v17429_v31, 4 }
 0x71d   : > { %8797 = vmatprep.subr.bf16.mxu1 %v14152_v14  ;;  %v8154_v14 = vrot.slane %v17523_v25, 3  ;;  %v14228_v37 = vld [vmem:[%s15259_s29 + $0xf70] ss:$8 sps:$4 sm:$0xff]  }
 0x71f   : > { %8757 = vmatpush1.bf16.msra.mxu0 %v14147_v53  ;;  %v14219_v53 = vld [vmem:[%s15259_s29 + $0xc80] ss:$8 sps:$4 sm:$0xff]  }
 0x720   : > { %8798 = vmatpush1.bf16.msra.mxu1 %v14150_v54  ;;  %8758 = vmatprep.subr.bf16.mxu0 %v14155_v0  ;;  %v14222_v54 = vld [vmem:[%s15259_s29 + $0xd80] ss:$8 sps:$4 sm:$0xff]   ;;  %v8161_v0 = vsel %vm5219_vm7, %v8137_v28, %v8149_v15  ;;  %v14269_v28 = vld [vmem:[%s15259_s29 + $0xe04] ss:$8 sps:$4 sm:$0xff]  }
 0x721   : > { %8799 = vmatprep.subr.bf16.mxu1 %v14158_v46  ;;  %v8163_v46 = vsel %vm5219_vm7, %v8139_v50, %v8151_v23  ;;  %v14272_v15 = vld [vmem:[%s15259_s29 + $0xf04] ss:$8 sps:$4 sm:$0xff]   ;;  %v14267_v50 = vld [vmem:[%s15259_s29 + $0xe00] ss:$8 sps:$4 sm:$0xff]  }
 0x722   : > { %v8169_v31 = vpack.c.bf16 %v8163_v46, %v8163_v46  ;;  %v14270_v23 = vld [vmem:[%s15259_s29 + $0xf00] ss:$8 sps:$4 sm:$0xff]   ;;  %v14290_v46 = vld [vmem:[%s15259_s29 + $0xfd4] ss:$8 sps:$4 sm:$0xff]  }
 0x723   : > { %8759 = vmatpush1.bf16.msra.mxu0 %v14153_v8  ;;  %v14227_v8 = vld [vmem:[%s15259_s29 + $0xe74] ss:$8 sps:$4 sm:$0xff]  }
 0x724   : > { %8800 = vmatpush1.bf16.msra.mxu1 %v14156_v5  ;;  %8760 = vmatprep.subr.bf16.mxu0 %v14161_v2  ;;  %v14230_v5 = vld [vmem:[%s15259_s29 + $0xf74] ss:$8 sps:$4 sm:$0xff]   ;;  %v14225_v2 = vld [vmem:[%s15259_s29 + $0xe70] ss:$8 sps:$4 sm:$0xff]  }
 0x725   : > { %8801 = vmatprep.subr.bf16.mxu1 %v14164_v60  ;;  %v8167_v60 = vpack.c.bf16 %v8161_v0, %v8161_v0  ;;  %v14287_v0 = vld [vmem:[%s15259_s29 + $0xed4] ss:$8 sps:$4 sm:$0xff]  }
 0x727   : > { %8761 = vmatpush1.bf16.msra.mxu0 %v14159_v3  ;;  %v8166_v3 = vsel %vm5219_vm7, %v8142_v9, %v8154_v14  ;;  %v14273_v9 = vld [vmem:[%s15259_s29 + $0xef0] ss:$8 sps:$4 sm:$0xff]  }
 0x728   : > { %8802 = vmatpush1.bf16.msra.mxu1 %v14162_v35  ;;  %8762 = vmatprep.subr.bf16.mxu0 %v14167_v63  ;;  %v8900_v35 = vsel %vm5219_vm7, %v8876_v39, %v8888_v1  ;;  %v14233_v63 = vld [vmem:[%s15259_s29 + $0xe64] ss:$8 sps:$4 sm:$0xff]   ;;  %v14276_v14 = vld [vmem:[%s15259_s29 + $0xff0] ss:$8 sps:$4 sm:$0xff]  }
 0x729   : > { %8803 = vmatprep.subr.bf16.mxu1 %v14170_v58  ;;  %v14236_v58 = vld [vmem:[%s15259_s29 + $0xf64] ss:$8 sps:$4 sm:$0xff]  }
 0x72a   : > { %v14281_v39 = vld [vmem:[%s15259_s29 + $0xee4] ss:$8 sps:$4 sm:$0xff]  }
 0x72b   : > { %8763 = vmatpush1.bf16.msra.mxu0 %v14165_v19  ;;  %v14231_v19 = vld [vmem:[%s15259_s29 + $0xe60] ss:$8 sps:$4 sm:$0xff]   ;;  %v14284_v1 = vld [vmem:[%s15259_s29 + $0xfe4] ss:$8 sps:$4 sm:$0xff]  }
 0x72c   : > { %8804 = vmatpush1.bf16.msra.mxu1 %v14168_v27  ;;  %8764 = vmatprep.subr.bf16.mxu0 %v14173_v20  ;;  %v14234_v27 = vld [vmem:[%s15259_s29 + $0xf60] ss:$8 sps:$4 sm:$0xff]   ;;  %v8172_v20 = vpack.c.bf16 %v8166_v3, %v8166_v3  ;;  %v14299_v3 = vld [vmem:[%s15259_s29 + $0xeb4] ss:$8 sps:$4 sm:$0xff]  }
 0x72d   : > { %8805 = vmatprep.subr.bf16.mxu1 %v14176_v44  ;;  %v8906_v44 = vpack.c.bf16 %v8900_v35, %v8900_v35  ;;  %v14302_v35 = vld [vmem:[%s15259_s29 + $0xfb4] ss:$8 sps:$4 sm:$0xff]  }
 0x72f   : > { %8765 = vmatpush1.bf16.msra.mxu0 %v14171_v7 }
 0x730   : > { %8806 = vmatpush1.bf16.msra.mxu1 %v14174_v57  ;;  %8766 = vmatprep.subr.bf16.mxu0 %v14179_v24 }
 0x731   : > { %8807 = vmatprep.subr.bf16.mxu1 %v14182_v42 }
 0x733   : > { %8767 = vmatpush2.bf16.msra.mxu0 %v14177_v49 }
 0x734   : > { %8808 = vmatpush2.bf16.msra.mxu1 %v14180_v33  ;;  %8768 = vmatprep.subr.bf16.mxu0 %v14185_v21  ;;  %v14239_v33 = vld [vmem:[%s15259_s29 + $0xe54] ss:$8 sps:$4 sm:$0xff]  }
 0x735   : > { %8809 = vmatprep.subr.bf16.mxu1 %v14188_v13  ;;  %v14242_v21 = vld [vmem:[%s15259_s29 + $0xf54] ss:$8 sps:$4 sm:$0xff]  }
 0x737   : > { %8769 = vmatpush2.bf16.msra.mxu0 %v14183_v51  ;;  %v14237_v51 = vld [vmem:[%s15259_s29 + $0xe50] ss:$8 sps:$4 sm:$0xff]  }
 0x738   : > { %8810 = vmatpush2.bf16.msra.mxu1 %v14186_v16  ;;  %8770 = vmatprep.subr.bf16.mxu0 %v14191_v34 }
 0x739   : > { %8811 = vmatprep.subr.bf16.mxu1 %v14194_v18  ;;  %v14240_v18 = vld [vmem:[%s15259_s29 + $0xf50] ss:$8 sps:$4 sm:$0xff]  }
 0x73b   : > { %8771 = vmatpush2.bf16.msra.mxu0 %v14189_v10 }
 0x73c   : > { %8812 = vmatpush2.bf16.msra.mxu1 %v14192_v43  ;;  %8772 = vmatprep.subr.bf16.mxu0 %v14197_v62  ;;  %v14245_v62 = vld [vmem:[%s15259_s29 + $0xe44] ss:$8 sps:$4 sm:$0xff]  }
 0x73d   : > { %8813 = vmatprep.subr.bf16.mxu1 %v14200_v11  ;;  %v14248_v11 = vld [vmem:[%s15259_s29 + $0xf44] ss:$8 sps:$4 sm:$0xff]  }
 0x73f   : > { %8773 = vmatpush2.bf16.msra.mxu0 %v14195_v48  ;;  %v14243_v48 = vld [vmem:[%s15259_s29 + $0xe40] ss:$8 sps:$4 sm:$0xff]  }
 0x740   : > { %8814 = vmatpush2.bf16.msra.mxu1 %v14198_v59  ;;  %8774 = vmatprep.subr.bf16.mxu0 %v14203_v4  ;;  %v14246_v59 = vld [vmem:[%s15259_s29 + $0xf40] ss:$8 sps:$4 sm:$0xff]   ;;  %v14251_v4 = vld [vmem:[%s15259_s29 + $0xe34] ss:$8 sps:$4 sm:$0xff]  }
 0x741   : > { %8815 = vmatprep.subr.bf16.mxu1 %v14206_v6  ;;  %v14254_v6 = vld [vmem:[%s15259_s29 + $0xf34] ss:$8 sps:$4 sm:$0xff]  }
 0x743   : > { %8775 = vmatpush2.bf16.msra.mxu0 %v14201_v52  ;;  %v14249_v52 = vld [vmem:[%s15259_s29 + $0xe30] ss:$8 sps:$4 sm:$0xff]  }
 0x744   : > { %8816 = vmatpush2.bf16.msra.mxu1 %v14204_v22  ;;  %8776 = vmatprep.subr.bf16.mxu0 %v14209_v12  ;;  %v14252_v22 = vld [vmem:[%s15259_s29 + $0xf30] ss:$8 sps:$4 sm:$0xff]   ;;  %v14257_v12 = vld [vmem:[%s15259_s29 + $0xe24] ss:$8 sps:$4 sm:$0xff]  }
 0x745   : > { %8817 = vmatprep.subr.bf16.mxu1 %v14212_v30  ;;  %v14260_v30 = vld [vmem:[%s15259_s29 + $0xf24] ss:$8 sps:$4 sm:$0xff]  }
 0x747   : > { %8777 = vmatpush2.bf16.msra.mxu0 %v14207_v41  ;;  %v14255_v41 = vld [vmem:[%s15259_s29 + $0xe20] ss:$8 sps:$4 sm:$0xff]  }
 0x748   : > { %8818 = vmatpush2.bf16.msra.mxu1 %v14210_v26  ;;  %8778 = vmatprep.subr.bf16.mxu0 %v14215_v38  ;;  %v14258_v26 = vld [vmem:[%s15259_s29 + $0xf20] ss:$8 sps:$4 sm:$0xff]   ;;  %v14263_v38 = vld [vmem:[%s15259_s29 + $0xe14] ss:$8 sps:$4 sm:$0xff]  }
 0x749   : > { %8819 = vmatprep.subr.bf16.mxu1 %v14218_v40  ;;  %v14266_v40 = vld [vmem:[%s15259_s29 + $0xf14] ss:$8 sps:$4 sm:$0xff]  }
 0x74b   : > { %8779 = vmatpush2.bf16.msra.mxu0 %v14213_v32  ;;  %v14261_v32 = vld [vmem:[%s15259_s29 + $0xe10] ss:$8 sps:$4 sm:$0xff]  }
 0x74c   : > { %8820 = vmatpush2.bf16.msra.mxu1 %v14216_v36  ;;  %8780 = vmatprep.subr.bf16.mxu0 %v14221_v55  ;;  %v14264_v36 = vld [vmem:[%s15259_s29 + $0xf10] ss:$8 sps:$4 sm:$0xff]   ;;  %v14275_v55 = vld [vmem:[%s15259_s29 + $0xef4] ss:$8 sps:$4 sm:$0xff]  }
 0x74d   : > { %8821 = vmatprep.subr.bf16.mxu1 %v14224_v61  ;;  %v14278_v61 = vld [vmem:[%s15259_s29 + $0xff4] ss:$8 sps:$4 sm:$0xff]  }
 0x74f   : > { %8781 = vmatpush2.bf16.msra.mxu0 %v14219_v53  ;;  %v14279_v53 = vld [vmem:[%s15259_s29 + $0xee0] ss:$8 sps:$4 sm:$0xff]  }
 0x750   : > { %8822 = vmatpush2.bf16.msra.mxu1 %v14222_v54  ;;  %8832 = vmatprep.subr.bf16.mxu0 %v14227_v8  ;;  %v14282_v54 = vld [vmem:[%s15259_s29 + $0xfe0] ss:$8 sps:$4 sm:$0xff]   ;;  %v14285_v8 = vld [vmem:[%s15259_s29 + $0xed0] ss:$8 sps:$4 sm:$0xff]  }
 0x751   : > { %9488 = vmatprep.subr.bf16.mxu1 %v14230_v5  ;;  %v14288_v5 = vld [vmem:[%s15259_s29 + $0xfd0] ss:$8 sps:$4 sm:$0xff]  }
 0x752   : > { %v7308_v7 = vpop.f32.mrf.mxu0  ;;  %8783 = vmatmul.mubr.bf16.vlgmr.msra.gmra.mxu0 %v8167_v60  ;;  %v14291_v60 = vld [vmem:[%s15259_s29 + $0xec0] ss:$8 sps:$4 sm:$0xff]  }
 0x753   : > { %v7349_v57 = vpop.f32.mrf.mxu1  ;;  %8824 = vmatmul.mubr.bf16.vlgmr.msra.gmra.mxu1 %v8169_v31  ;;  %8833 = vmatpush1.bf16.msra.mxu0 %v14225_v2  ;;  %v14293_v2 = vld [vmem:[%s15259_s29 + $0xec4] ss:$8 sps:$4 sm:$0xff]   ;;  %v14294_v31 = vld [vmem:[%s15259_s29 + $0xfc0] ss:$8 sps:$4 sm:$0xff]  }
 0x754   : > { %v17542_v24 = vadd.f32 %v7349_v57, %v7308_v7  ;;  %9489 = vmatpush1.bf16.msra.mxu1 %v14228_v37  ;;  %v7310_v42 = vpop.f32.mrf.mxu0  ;;  %8834 = vmatprep.subr.bf16.mxu0 %v14233_v63  ;;  %v14296_v37 = vld [vmem:[%s15259_s29 + $0xfc4] ss:$8 sps:$4 sm:$0xff]   ;;  %v14297_v63 = vld [vmem:[%s15259_s29 + $0xeb0] ss:$8 sps:$4 sm:$0xff]   ;;  %v14311_v7 = vld [vmem:[%s15259_s29 + $0xe94] ss:$8 sps:$4 sm:$0xff]  }
 0x755   : > { %v7351_v49 = vpop.f32.mrf.mxu1  ;;  %9490 = vmatprep.subr.bf16.mxu1 %v14236_v58  ;;  %8864 = vmatprep.mubr.bf16.mxu0 %v8172_v20  ;;  %v14300_v58 = vld [vmem:[%s15259_s29 + $0xfb0] ss:$8 sps:$4 sm:$0xff]   ;;  %v14303_v20 = vld [vmem:[%s15259_s29 + $0xea0] ss:$8 sps:$4 sm:$0xff]   ;;  %v14314_v57 = vld [vmem:[%s15259_s29 + $0xf94] ss:$8 sps:$4 sm:$0xff]  }
 0x756   : > { %v17546_v13 = vadd.f32 %v7351_v49, %v7310_v42  ;;  %9520 = vmatprep.mubr.bf16.mxu1 %v8906_v44  ;;  %v7312_v16 = vpop.f32.mrf.mxu0  ;;  %v14306_v44 = vld [vmem:[%s15259_s29 + $0xfa0] ss:$8 sps:$4 sm:$0xff]   ;;  %v14309_v42 = vld [vmem:[%s15259_s29 + $0xe90] ss:$8 sps:$4 sm:$0xff]  }
 0x757   : > { %v7353_v34 = vpop.f32.mrf.mxu1  ;;  %8835 = vmatpush1.bf16.msra.mxu0 %v14231_v19  ;;  %v14305_v19 = vld [vmem:[%s15259_s29 + $0xea4] ss:$8 sps:$4 sm:$0xff]   ;;  %v14312_v49 = vld [vmem:[%s15259_s29 + $0xf90] ss:$8 sps:$4 sm:$0xff]  }
 0x758   : > { %9491 = vmatpush1.bf16.msra.mxu1 %v14234_v27  ;;  %v7313_v10 = vpop.f32.mrf.mxu0  ;;  %8836 = vmatprep.subr.bf16.mxu0 %v14239_v33  ;;  %v14308_v27 = vld [vmem:[%s15259_s29 + $0xfa4] ss:$8 sps:$4 sm:$0xff]   ;;  %v8875_v34 = vrot.slane %v17507_v17, 5  ;;  %v8892_v17 = vrot.slane %v17523_v25, 4 }
 0x759   : > { %v7354_v43 = vpop.f32.mrf.mxu1  ;;  %9492 = vmatprep.subr.bf16.mxu1 %v14242_v21  ;;  %v17599_v33 = vld [vmem:[%s16935_s17 + $0x20] sm:$0xff] }
 0x75a   : > { %v8141_v21 = vrot.slane %v17599_v33, 4  ;;  %v14317_v10 = vld [vmem:[%s15259_s29 + $0xe84] ss:$8 sps:$4 sm:$0xff]  }
 0x75b   : > { %8837 = vmatpush1.bf16.msra.mxu0 %v14237_v51  ;;  %v17603_v51 = vld [vmem:[%s16935_s17 + $0x80] sm:$0xff] }
 0x75c   : > { %9493 = vmatpush1.bf16.msra.mxu1 %v14240_v18  ;;  %8838 = vmatprep.subr.bf16.mxu0 %v14245_v62  ;;  %v8153_v16 = vrot.slane %v17603_v51, 3  ;;  %v8887_v18 = vrot.slane %v17511_v47, 4  ;;  %v14320_v43 = vld [vmem:[%s15259_s29 + $0xf84] ss:$8 sps:$4 sm:$0xff]   ;;  %v14315_v47 = vld [vmem:[%s15259_s29 + $0xe80] ss:$8 sps:$4 sm:$0xff]  }
 0x75d   : > { %9494 = vmatprep.subr.bf16.mxu1 %v14248_v11  ;;  %v17611_v62 = vld [vmem:[%s16935_s17 + $0x18] sm:$0xff] }
 0x75e   : > { %v8878_v11 = vrot.slane %v17611_v62, 5 }
 0x75f   : > { %8839 = vmatpush1.bf16.msra.mxu0 %v14243_v48  ;;  %v17615_v48 = vld [vmem:[%s16935_s17 + $0x78] sm:$0xff] }
 0x760   : > { %9495 = vmatpush1.bf16.msra.mxu1 %v14246_v59  ;;  %8840 = vmatprep.subr.bf16.mxu0 %v14251_v4  ;;  %v8890_v59 = vrot.slane %v17615_v48, 4  ;;  %v8880_v4 = vrot.slane %v17519_v45, 5 }
 0x761   : > { %9496 = vmatprep.subr.bf16.mxu1 %v14254_v6  ;;  %v14318_v6 = vld [vmem:[%s15259_s29 + $0xf80] ss:$8 sps:$4 sm:$0xff]  }
 0x763   : > { %8841 = vmatpush1.bf16.msra.mxu0 %v14249_v52  ;;  %v8165_v52 = vsel %vm5219_vm7, %v8141_v21, %v8153_v16  ;;  %v14357_v21 = vld [vmem:[%s15259_s29 + $0x1010] ss:$8 sps:$4 sm:$0xff]  }
 0x764   : > { %9497 = vmatpush1.bf16.msra.mxu1 %v14252_v22  ;;  %8842 = vmatprep.subr.bf16.mxu0 %v14257_v12  ;;  %v8899_v22 = vsel %vm5219_vm7, %v8875_v34, %v8887_v18  ;;  %v14323_v12 = vld [vmem:[%s15259_s29 + $0x1074] ss:$8 sps:$4 sm:$0xff]   ;;  %v14360_v16 = vld [vmem:[%s15259_s29 + $0x1110] ss:$8 sps:$4 sm:$0xff]   ;;  %v14365_v34 = vld [vmem:[%s15259_s29 + $0x1004] ss:$8 sps:$4 sm:$0xff]  }
 0x765   : > { %9498 = vmatprep.subr.bf16.mxu1 %v14260_v30  ;;  %v14326_v30 = vld [vmem:[%s15259_s29 + $0x1174] ss:$8 sps:$4 sm:$0xff]   ;;  %v14368_v18 = vld [vmem:[%s15259_s29 + $0x1104] ss:$8 sps:$4 sm:$0xff]  }
 0x767   : > { %8843 = vmatpush1.bf16.msra.mxu0 %v14255_v41  ;;  %v8171_v41 = vpack.c.bf16 %v8165_v52, %v8165_v52  ;;  %v14375_v52 = vld [vmem:[%s15259_s29 + $0x10e0] ss:$8 sps:$4 sm:$0xff]  }
 0x768   : > { %9499 = vmatpush1.bf16.msra.mxu1 %v14258_v26  ;;  %8844 = vmatprep.subr.bf16.mxu0 %v14263_v38  ;;  %v8905_v26 = vpack.c.bf16 %v8899_v22, %v8899_v22  ;;  %v8902_v38 = vsel %vm5219_vm7, %v8878_v11, %v8890_v59  ;;  %v14371_v11 = vld [vmem:[%s15259_s29 + $0x10f4] ss:$8 sps:$4 sm:$0xff]   ;;  %v14378_v22 = vld [vmem:[%s15259_s29 + $0x11e0] ss:$8 sps:$4 sm:$0xff]  }
 0x769   : > { %9500 = vmatprep.subr.bf16.mxu1 %v14266_v40  ;;  %v8904_v40 = vsel %vm5219_vm7, %v8880_v4, %v8892_v17  ;;  %v14374_v59 = vld [vmem:[%s15259_s29 + $0x11f4] ss:$8 sps:$4 sm:$0xff]   ;;  %v14369_v4 = vld [vmem:[%s15259_s29 + $0x10f0] ss:$8 sps:$4 sm:$0xff]  }
 0x76a   : > { %v14372_v17 = vld [vmem:[%s15259_s29 + $0x11f0] ss:$8 sps:$4 sm:$0xff]  }
 0x76b   : > { %8845 = vmatpush1.bf16.msra.mxu0 %v14261_v32  ;;  %v14321_v32 = vld [vmem:[%s15259_s29 + $0x1070] ss:$8 sps:$4 sm:$0xff]  }
 0x76c   : > { %9501 = vmatpush1.bf16.msra.mxu1 %v14264_v36  ;;  %8846 = vmatprep.subr.bf16.mxu0 %v14269_v28  ;;  %v14324_v36 = vld [vmem:[%s15259_s29 + $0x1170] ss:$8 sps:$4 sm:$0xff]   ;;  %v14329_v28 = vld [vmem:[%s15259_s29 + $0x1064] ss:$8 sps:$4 sm:$0xff]  }
 0x76d   : > { %9502 = vmatprep.subr.bf16.mxu1 %v14272_v15  ;;  %v14332_v15 = vld [vmem:[%s15259_s29 + $0x1164] ss:$8 sps:$4 sm:$0xff]  }
 0x76f   : > { %8847 = vmatpush1.bf16.msra.mxu0 %v14267_v50  ;;  %v8908_v50 = vpack.c.bf16 %v8902_v38, %v8902_v38  ;;  %v14389_v38 = vld [vmem:[%s15259_s29 + $0x10c4] ss:$8 sps:$4 sm:$0xff]  }
 0x770   : > { %9503 = vmatpush1.bf16.msra.mxu1 %v14270_v23  ;;  %8848 = vmatprep.subr.bf16.mxu0 %v14275_v55  ;;  %v8910_v23 = vpack.c.bf16 %v8904_v40, %v8904_v40  ;;  %v14392_v40 = vld [vmem:[%s15259_s29 + $0x11c4] ss:$8 sps:$4 sm:$0xff]  }
 0x771   : > { %9504 = vmatprep.subr.bf16.mxu1 %v14278_v61 }
 0x773   : > { %8849 = vmatpush2.bf16.msra.mxu0 %v14273_v9 }
 0x774   : > { %9505 = vmatpush2.bf16.msra.mxu1 %v14276_v14  ;;  %8850 = vmatprep.subr.bf16.mxu0 %v14281_v39  ;;  %v14327_v14 = vld [vmem:[%s15259_s29 + $0x1060] ss:$8 sps:$4 sm:$0xff]  }
 0x775   : > { %9506 = vmatprep.subr.bf16.mxu1 %v14284_v1  ;;  %v14330_v39 = vld [vmem:[%s15259_s29 + $0x1160] ss:$8 sps:$4 sm:$0xff]  }
 0x777   : > { %8851 = vmatpush2.bf16.msra.mxu0 %v14279_v53 }
 0x778   : > { %9507 = vmatpush2.bf16.msra.mxu1 %v14282_v54  ;;  %8852 = vmatprep.subr.bf16.mxu0 %v14287_v0  ;;  %v14335_v54 = vld [vmem:[%s15259_s29 + $0x1054] ss:$8 sps:$4 sm:$0xff]  }
 0x779   : > { %9508 = vmatprep.subr.bf16.mxu1 %v14290_v46  ;;  %v14338_v0 = vld [vmem:[%s15259_s29 + $0x1154] ss:$8 sps:$4 sm:$0xff]  }
 0x77b   : > { %8853 = vmatpush2.bf16.msra.mxu0 %v14285_v8 }
 0x77c   : > { %9509 = vmatpush2.bf16.msra.mxu1 %v14288_v5  ;;  %8854 = vmatprep.subr.bf16.mxu0 %v14293_v2 }
 0x77d   : > { %9510 = vmatprep.subr.bf16.mxu1 %v14296_v37  ;;  %v14333_v37 = vld [vmem:[%s15259_s29 + $0x1050] ss:$8 sps:$4 sm:$0xff]  }
 0x77f   : > { %8855 = vmatpush2.bf16.msra.mxu0 %v14291_v60  ;;  %v14336_v60 = vld [vmem:[%s15259_s29 + $0x1150] ss:$8 sps:$4 sm:$0xff]  }
 0x780   : > { %9511 = vmatpush2.bf16.msra.mxu1 %v14294_v31  ;;  %8856 = vmatprep.subr.bf16.mxu0 %v14299_v3  ;;  %v14344_v3 = vld [vmem:[%s15259_s29 + $0x1144] ss:$8 sps:$4 sm:$0xff]  }
 0x781   : > { %9512 = vmatprep.subr.bf16.mxu1 %v14302_v35  ;;  %v14342_v35 = vld [vmem:[%s15259_s29 + $0x1140] ss:$8 sps:$4 sm:$0xff]  }
 0x783   : > { %8857 = vmatpush2.bf16.msra.mxu0 %v14297_v63  ;;  %v14347_v63 = vld [vmem:[%s15259_s29 + $0x1034] ss:$8 sps:$4 sm:$0xff]  }
 0x784   : > { %9513 = vmatpush2.bf16.msra.mxu1 %v14300_v58  ;;  %8858 = vmatprep.subr.bf16.mxu0 %v14305_v19  ;;  %v14350_v58 = vld [vmem:[%s15259_s29 + $0x1134] ss:$8 sps:$4 sm:$0xff]   ;;  %v14345_v19 = vld [vmem:[%s15259_s29 + $0x1030] ss:$8 sps:$4 sm:$0xff]  }
 0x785   : > { %9514 = vmatprep.subr.bf16.mxu1 %v14308_v27  ;;  %v14348_v27 = vld [vmem:[%s15259_s29 + $0x1130] ss:$8 sps:$4 sm:$0xff]  }
 0x787   : > { %8859 = vmatpush2.bf16.msra.mxu0 %v14303_v20  ;;  %v14353_v20 = vld [vmem:[%s15259_s29 + $0x1024] ss:$8 sps:$4 sm:$0xff]  }
 0x788   : > { %9515 = vmatpush2.bf16.msra.mxu1 %v14306_v44  ;;  %8860 = vmatprep.subr.bf16.mxu0 %v14311_v7  ;;  %v14356_v44 = vld [vmem:[%s15259_s29 + $0x1124] ss:$8 sps:$4 sm:$0xff]   ;;  %v14351_v7 = vld [vmem:[%s15259_s29 + $0x1020] ss:$8 sps:$4 sm:$0xff]  }
 0x789   : > { %9516 = vmatprep.subr.bf16.mxu1 %v14314_v57  ;;  %v14354_v57 = vld [vmem:[%s15259_s29 + $0x1120] ss:$8 sps:$4 sm:$0xff]  }
 0x78b   : > { %8861 = vmatpush2.bf16.msra.mxu0 %v14309_v42  ;;  %v14359_v42 = vld [vmem:[%s15259_s29 + $0x1014] ss:$8 sps:$4 sm:$0xff]  }
 0x78c   : > { %9517 = vmatpush2.bf16.msra.mxu1 %v14312_v49  ;;  %8862 = vmatprep.subr.bf16.mxu0 %v14317_v10  ;;  %v14362_v49 = vld [vmem:[%s15259_s29 + $0x1114] ss:$8 sps:$4 sm:$0xff]   ;;  %v14363_v10 = vld [vmem:[%s15259_s29 + $0x1000] ss:$8 sps:$4 sm:$0xff]  }
 0x78d   : > { %9518 = vmatprep.subr.bf16.mxu1 %v14320_v43  ;;  %v14366_v43 = vld [vmem:[%s15259_s29 + $0x1100] ss:$8 sps:$4 sm:$0xff]  }
 0x78f   : > { %8863 = vmatpush2.bf16.msra.mxu0 %v14315_v47  ;;  %v14377_v47 = vld [vmem:[%s15259_s29 + $0x10e4] ss:$8 sps:$4 sm:$0xff]  }
 0x790   : > { %9519 = vmatpush2.bf16.msra.mxu1 %v14318_v6  ;;  %9529 = vmatprep.subr.bf16.mxu0 %v14323_v12  ;;  %v14380_v6 = vld [vmem:[%s15259_s29 + $0x11e4] ss:$8 sps:$4 sm:$0xff]   ;;  %v14383_v12 = vld [vmem:[%s15259_s29 + $0x10d4] ss:$8 sps:$4 sm:$0xff]  }
 0x791   : > { %9570 = vmatprep.subr.bf16.mxu1 %v14326_v30  ;;  %v14386_v30 = vld [vmem:[%s15259_s29 + $0x11d4] ss:$8 sps:$4 sm:$0xff]  }
 0x792   : > { %v7390_v55 = vpop.f32.mrf.mxu0  ;;  %8865 = vmatmul.mubr.bf16.vlgmr.msra.gmra.mxu0 %v8171_v41  ;;  %v14381_v41 = vld [vmem:[%s15259_s29 + $0x10d0] ss:$8 sps:$4 sm:$0xff]  }
 0x793   : > { %v17632_v61 = vpop.f32.mrf.mxu1  ;;  %9521 = vmatmul.mubr.bf16.vlgmr.msra.gmra.mxu1 %v8905_v26  ;;  %v7391_v9 = vadd.f32 %v7390_v55, %v17542_v24  ;;  %9530 = vmatpush1.bf16.msra.mxu0 %v14321_v32  ;;  %v14384_v26 = vld [vmem:[%s15259_s29 + $0x11d0] ss:$8 sps:$4 sm:$0xff]   ;;  %v14387_v32 = vld [vmem:[%s15259_s29 + $0x10c0] ss:$8 sps:$4 sm:$0xff]   ;;  %v14401_v55 = vld [vmem:[%s15259_s29 + $0x10a4] ss:$8 sps:$4 sm:$0xff]  }
 0x794   : > { %9571 = vmatpush1.bf16.msra.mxu1 %v14324_v36  ;;  %v7392_v1 = vpop.f32.mrf.mxu0  ;;  %9531 = vmatprep.subr.bf16.mxu0 %v14329_v28  ;;  %v14390_v36 = vld [vmem:[%s15259_s29 + $0x11c0] ss:$8 sps:$4 sm:$0xff]   ;;  %v14395_v28 = vld [vmem:[%s15259_s29 + $0x10b4] ss:$8 sps:$4 sm:$0xff]  }
 0x795   : > { %v17637_v53 = vpop.f32.mrf.mxu1  ;;  %9572 = vmatprep.subr.bf16.mxu1 %v14332_v15  ;;  %v17642_v46 = vadd.f32 %v7391_v9, %v17451_v29  ;;  %v7393_v24 = vadd.f32 %v7392_v1, %v17546_v13  ;;  %9561 = vmatprep.mubr.bf16.mxu0 %v8908_v50  ;;  %v14341_v13 = vld [vmem:[%s15259_s29 + $0x1044] ss:$8 sps:$4 sm:$0xff]   ;;  %v14398_v15 = vld [vmem:[%s15259_s29 + $0x11b4] ss:$8 sps:$4 sm:$0xff]   ;;  %v14393_v50 = vld [vmem:[%s15259_s29 + $0x10b0] ss:$8 sps:$4 sm:$0xff]  }
 0x796   : > { %9602 = vmatprep.mubr.bf16.mxu1 %v8910_v23  ;;  %v7394_v8 = vpop.f32.mrf.mxu0  ;;  %v14396_v23 = vld [vmem:[%s15259_s29 + $0x11b0] ss:$8 sps:$4 sm:$0xff]   ;;  %v14404_v9 = vld [vmem:[%s15259_s29 + $0x11a4] ss:$8 sps:$4 sm:$0xff]   ;;  %v14407_v1 = vld [vmem:[%s15259_s29 + $0x1094] ss:$8 sps:$4 sm:$0xff]  }
 0x797   : > { %v8050_v5 = vpop.f32.mrf.mxu1  ;;  %v17646_v2 = vadd.f32 %v7393_v24, %v17456_v56  ;;  %9532 = vmatpush1.bf16.msra.mxu0 %v14327_v14  ;;  %v14339_v56 = vld [vmem:[%s15259_s29 + $0x1040] ss:$8 sps:$4 sm:$0xff]   ;;  %v14408_v24 = vld [vmem:[%s15259_s29 + $0x1190] ss:$8 sps:$4 sm:$0xff]  }
 0x798   : > { %9573 = vmatpush1.bf16.msra.mxu1 %v14330_v39  ;;  %v7395_v29 = vpop.f32.mrf.mxu0  ;;  %9533 = vmatprep.subr.bf16.mxu0 %v14335_v54  ;;  %v14399_v14 = vld [vmem:[%s15259_s29 + $0x10a0] ss:$8 sps:$4 sm:$0xff]   ;;  %v14410_v54 = vld [vmem:[%s15259_s29 + $0x1194] ss:$8 sps:$4 sm:$0xff]  }
 0x799   : > { %v8051_v31 = vpop.f32.mrf.mxu1  ;;  %9574 = vmatprep.subr.bf16.mxu1 %v14338_v0  ;;  %v14402_v39 = vld [vmem:[%s15259_s29 + $0x11a0] ss:$8 sps:$4 sm:$0xff]   ;;  %v14405_v0 = vld [vmem:[%s15259_s29 + $0x1090] ss:$8 sps:$4 sm:$0xff]   ;;  %v8879_v29 = vrot.slane %v17599_v33, 5 }
 0x79a   : > { %v17699_v8 = vld [vmem:[%s16935_s17 + $0x10] sm:$0xff]  ;;  %v8891_v31 = vrot.slane %v17603_v51, 4 }
 0x79b   : > { %9534 = vmatpush1.bf16.msra.mxu0 %v14333_v37  ;;  %v8877_v5 = vrot.slane %v17699_v8, 5  ;;  %v17703_v37 = vld [vmem:[%s16935_s17 + $0x70] sm:$0xff] }
 0x79c   : > { %9575 = vmatpush1.bf16.msra.mxu1 %v14336_v60  ;;  %9535 = vmatprep.subr.bf16.mxu0 %v14341_v13  ;;  %v8889_v60 = vrot.slane %v17703_v37, 4  ;;  %v14413_v13 = vld [vmem:[%s15259_s29 + $0x1084] ss:$8 sps:$4 sm:$0xff]  }
 0x79d   : > { %9576 = vmatprep.subr.bf16.mxu1 %v14344_v3  ;;  %v14416_v3 = vld [vmem:[%s15259_s29 + $0x1184] ss:$8 sps:$4 sm:$0xff]  }
 0x79f   : > { %9536 = vmatpush1.bf16.msra.mxu0 %v14339_v56  ;;  %v17711_v56 = vld [vmem:[%s16935_s17 + $0x8] sm:$0xff] }
 0x7a0   : > { %9577 = vmatpush1.bf16.msra.mxu1 %v14342_v35  ;;  %9537 = vmatprep.subr.bf16.mxu0 %v14347_v63  ;;  %v9614_v35 = vrot.slane %v17711_v56, 6  ;;  %v17715_v63 = vld [vmem:[%s16935_s17 + $0x68] sm:$0xff] }
 0x7a1   : > { %9578 = vmatprep.subr.bf16.mxu1 %v14350_v58  ;;  %v9626_v58 = vrot.slane %v17715_v63, 5 }
 0x7a3   : > { %9538 = vmatpush1.bf16.msra.mxu0 %v14345_v19  ;;  %v9616_v19 = vrot.slane %v17611_v62, 6 }
 0x7a4   : > { %9579 = vmatpush1.bf16.msra.mxu1 %v14348_v27  ;;  %9539 = vmatprep.subr.bf16.mxu0 %v14353_v20  ;;  %v9628_v27 = vrot.slane %v17615_v48, 5  ;;  %v14411_v20 = vld [vmem:[%s15259_s29 + $0x1080] ss:$8 sps:$4 sm:$0xff]  }
 0x7a5   : > { %9580 = vmatprep.subr.bf16.mxu1 %v14356_v44  ;;  %v14414_v44 = vld [vmem:[%s15259_s29 + $0x1180] ss:$8 sps:$4 sm:$0xff]  }
 0x7a7   : > { %9540 = vmatpush1.bf16.msra.mxu0 %v14351_v7  ;;  %v8901_v7 = vsel %vm5219_vm7, %v8877_v5, %v8889_v60  ;;  %v14444_v5 = vld [vmem:[%s15259_s29 + $0x1330] ss:$8 sps:$4 sm:$0xff]   ;;  %v14452_v60 = vld [vmem:[%s15259_s29 + $0x1324] ss:$8 sps:$4 sm:$0xff]  }
 0x7a8   : > { %9581 = vmatpush1.bf16.msra.mxu1 %v14354_v57  ;;  %9541 = vmatprep.subr.bf16.mxu0 %v14359_v42  ;;  %v8903_v57 = vsel %vm5219_vm7, %v8879_v29, %v8891_v31  ;;  %v14419_v42 = vld [vmem:[%s15259_s29 + $0x1274] ss:$8 sps:$4 sm:$0xff]   ;;  %v14447_v29 = vld [vmem:[%s15259_s29 + $0x1220] ss:$8 sps:$4 sm:$0xff]  }
 0x7a9   : > { %9582 = vmatprep.subr.bf16.mxu1 %v14362_v49  ;;  %v14422_v49 = vld [vmem:[%s15259_s29 + $0x1374] ss:$8 sps:$4 sm:$0xff]   ;;  %v14450_v31 = vld [vmem:[%s15259_s29 + $0x1320] ss:$8 sps:$4 sm:$0xff]  }
 0x7ab   : > { %9542 = vmatpush1.bf16.msra.mxu0 %v14357_v21  ;;  %v8907_v21 = vpack.c.bf16 %v8901_v7, %v8901_v7  ;;  %v14467_v7 = vld [vmem:[%s15259_s29 + $0x12f4] ss:$8 sps:$4 sm:$0xff]  }
 0x7ac   : > { %9583 = vmatpush1.bf16.msra.mxu1 %v14360_v16  ;;  %9543 = vmatprep.subr.bf16.mxu0 %v14365_v34  ;;  %v8909_v16 = vpack.c.bf16 %v8903_v57, %v8903_v57  ;;  %v9638_v34 = vsel %vm5219_vm7, %v9614_v35, %v9626_v58  ;;  %v14453_v35 = vld [vmem:[%s15259_s29 + $0x1210] ss:$8 sps:$4 sm:$0xff]   ;;  %v14470_v57 = vld [vmem:[%s15259_s29 + $0x13f4] ss:$8 sps:$4 sm:$0xff]  }
 0x7ad   : > { %9584 = vmatprep.subr.bf16.mxu1 %v14368_v18  ;;  %v9640_v18 = vsel %vm5219_vm7, %v9616_v19, %v9628_v27  ;;  %v14456_v58 = vld [vmem:[%s15259_s29 + $0x1310] ss:$8 sps:$4 sm:$0xff]   ;;  %v14461_v19 = vld [vmem:[%s15259_s29 + $0x1204] ss:$8 sps:$4 sm:$0xff]  }
 0x7ae   : > { %v14464_v27 = vld [vmem:[%s15259_s29 + $0x1304] ss:$8 sps:$4 sm:$0xff]  }
 0x7af   : > { %9544 = vmatpush1.bf16.msra.mxu0 %v14363_v10  ;;  %v14417_v10 = vld [vmem:[%s15259_s29 + $0x1270] ss:$8 sps:$4 sm:$0xff]  }
 0x7b0   : > { %9585 = vmatpush1.bf16.msra.mxu1 %v14366_v43  ;;  %9545 = vmatprep.subr.bf16.mxu0 %v14371_v11  ;;  %v14420_v43 = vld [vmem:[%s15259_s29 + $0x1370] ss:$8 sps:$4 sm:$0xff]   ;;  %v14425_v11 = vld [vmem:[%s15259_s29 + $0x1264] ss:$8 sps:$4 sm:$0xff]  }
 0x7b1   : > { %9586 = vmatprep.subr.bf16.mxu1 %v14374_v59  ;;  %v14428_v59 = vld [vmem:[%s15259_s29 + $0x1364] ss:$8 sps:$4 sm:$0xff]  }
 0x7b3   : > { %9546 = vmatpush2.bf16.msra.mxu0 %v14369_v4  ;;  %v9644_v4 = vpack.c.bf16 %v9638_v34, %v9638_v34  ;;  %v14471_v34 = vld [vmem:[%s15259_s29 + $0x12e0] ss:$8 sps:$4 sm:$0xff]  }
 0x7b4   : > { %9587 = vmatpush2.bf16.msra.mxu1 %v14372_v17  ;;  %9547 = vmatprep.subr.bf16.mxu0 %v14377_v47  ;;  %v9646_v17 = vpack.c.bf16 %v9640_v18, %v9640_v18  ;;  %v14474_v18 = vld [vmem:[%s15259_s29 + $0x13e0] ss:$8 sps:$4 sm:$0xff]  }
 0x7b5   : > { %9588 = vmatprep.subr.bf16.mxu1 %v14380_v6 }
 0x7b7   : > { %9548 = vmatpush2.bf16.msra.mxu0 %v14375_v52 }
 0x7b8   : > { %9589 = vmatpush2.bf16.msra.mxu1 %v14378_v22  ;;  %9549 = vmatprep.subr.bf16.mxu0 %v14383_v12  ;;  %v14423_v22 = vld [vmem:[%s15259_s29 + $0x1260] ss:$8 sps:$4 sm:$0xff]  }
 0x7b9   : > { %9590 = vmatprep.subr.bf16.mxu1 %v14386_v30  ;;  %v14426_v12 = vld [vmem:[%s15259_s29 + $0x1360] ss:$8 sps:$4 sm:$0xff]  }
 0x7bb   : > { %9550 = vmatpush2.bf16.msra.mxu0 %v14381_v41 }
 0x7bc   : > { %9591 = vmatpush2.bf16.msra.mxu1 %v14384_v26  ;;  %9551 = vmatprep.subr.bf16.mxu0 %v14389_v38  ;;  %v14431_v26 = vld [vmem:[%s15259_s29 + $0x1254] ss:$8 sps:$4 sm:$0xff]  }
 0x7bd   : > { %9592 = vmatprep.subr.bf16.mxu1 %v14392_v40  ;;  %v14434_v38 = vld [vmem:[%s15259_s29 + $0x1354] ss:$8 sps:$4 sm:$0xff]  }
 0x7bf   : > { %9552 = vmatpush2.bf16.msra.mxu0 %v14387_v32 }
 0x7c0   : > { %9593 = vmatpush2.bf16.msra.mxu1 %v14390_v36  ;;  %9553 = vmatprep.subr.bf16.mxu0 %v14395_v28 }
 0x7c1   : > { %9594 = vmatprep.subr.bf16.mxu1 %v14398_v15 }
 0x7c3   : > { %9554 = vmatpush2.bf16.msra.mxu0 %v14393_v50  ;;  %v14429_v50 = vld [vmem:[%s15259_s29 + $0x1250] ss:$8 sps:$4 sm:$0xff]  }
 0x7c4   : > { %9595 = vmatpush2.bf16.msra.mxu1 %v14396_v23  ;;  %9555 = vmatprep.subr.bf16.mxu0 %v14401_v55  ;;  %v14432_v23 = vld [vmem:[%s15259_s29 + $0x1350] ss:$8 sps:$4 sm:$0xff]  }
 0x7c5   : > { %9596 = vmatprep.subr.bf16.mxu1 %v14404_v9 }
 0x7c7   : > { %9556 = vmatpush2.bf16.msra.mxu0 %v14399_v14  ;;  %v14440_v14 = vld [vmem:[%s15259_s29 + $0x1344] ss:$8 sps:$4 sm:$0xff]  }
 0x7c8   : > { %9597 = vmatpush2.bf16.msra.mxu1 %v14402_v39  ;;  %9557 = vmatprep.subr.bf16.mxu0 %v14407_v1  ;;  %v14435_v39 = vld [vmem:[%s15259_s29 + $0x1240] ss:$8 sps:$4 sm:$0xff]  }
 0x7c9   : > { %9598 = vmatprep.subr.bf16.mxu1 %v14410_v54  ;;  %v14438_v1 = vld [vmem:[%s15259_s29 + $0x1340] ss:$8 sps:$4 sm:$0xff]   ;;  %v14443_v54 = vld [vmem:[%s15259_s29 + $0x1234] ss:$8 sps:$4 sm:$0xff]  }
 0x7cb   : > { %9558 = vmatpush2.bf16.msra.mxu0 %v14405_v0  ;;  %v14446_v0 = vld [vmem:[%s15259_s29 + $0x1334] ss:$8 sps:$4 sm:$0xff]  }
 0x7cc   : > { %9599 = vmatpush2.bf16.msra.mxu1 %v14408_v24  ;;  %9559 = vmatprep.subr.bf16.mxu0 %v14413_v13  ;;  %v14441_v24 = vld [vmem:[%s15259_s29 + $0x1230] ss:$8 sps:$4 sm:$0xff]   ;;  %v14455_v13 = vld [vmem:[%s15259_s29 + $0x1214] ss:$8 sps:$4 sm:$0xff]  }
 0x7cd   : > { %9600 = vmatprep.subr.bf16.mxu1 %v14416_v3  ;;  %v14458_v3 = vld [vmem:[%s15259_s29 + $0x1314] ss:$8 sps:$4 sm:$0xff]  }
 0x7cf   : > { %9560 = vmatpush2.bf16.msra.mxu0 %v14411_v20  ;;  %v14459_v20 = vld [vmem:[%s15259_s29 + $0x1200] ss:$8 sps:$4 sm:$0xff]  }
 0x7d0   : > { %9601 = vmatpush2.bf16.msra.mxu1 %v14414_v44  ;;  %10226 = vmatprep.subr.bf16.mxu0 %v14419_v42  ;;  %v14462_v44 = vld [vmem:[%s15259_s29 + $0x1300] ss:$8 sps:$4 sm:$0xff]   ;;  %v14465_v42 = vld [vmem:[%s15259_s29 + $0x12f0] ss:$8 sps:$4 sm:$0xff]  }
 0x7d1   : > { %10267 = vmatprep.subr.bf16.mxu1 %v14422_v49  ;;  %v14468_v49 = vld [vmem:[%s15259_s29 + $0x13f0] ss:$8 sps:$4 sm:$0xff]  }
 0x7d2   : > { %v8087_v47 = vpop.f32.mrf.mxu0  ;;  %9562 = vmatmul.mubr.bf16.vlgmr.msra.gmra.mxu0 %v8907_v21  ;;  %v14473_v21 = vld [vmem:[%s15259_s29 + $0x12e4] ss:$8 sps:$4 sm:$0xff]  }
 0x7d3   : > { %v8128_v6 = vpop.f32.mrf.mxu1  ;;  %9603 = vmatmul.mubr.bf16.vlgmr.msra.gmra.mxu1 %v8909_v16  ;;  %v8088_v52 = vadd.f32 %v8087_v47, %v17632_v61  ;;  %10227 = vmatpush1.bf16.msra.mxu0 %v14417_v10  ;;  %v14476_v16 = vld [vmem:[%s15259_s29 + $0x13e4] ss:$8 sps:$4 sm:$0xff]   ;;  %v14479_v10 = vld [vmem:[%s15259_s29 + $0x12d4] ss:$8 sps:$4 sm:$0xff]   ;;  %v14483_v47 = vld [vmem:[%s15259_s29 + $0x12c0] ss:$8 sps:$4 sm:$0xff]  }
 0x7d4   : > { %10268 = vmatpush1.bf16.msra.mxu1 %v14420_v43  ;;  %v8089_v30 = vpop.f32.mrf.mxu0  ;;  %10228 = vmatprep.subr.bf16.mxu0 %v14425_v11  ;;  %v14482_v43 = vld [vmem:[%s15259_s29 + $0x13d4] ss:$8 sps:$4 sm:$0xff]   ;;  %v14477_v11 = vld [vmem:[%s15259_s29 + $0x12d0] ss:$8 sps:$4 sm:$0xff]  }
 0x7d5   : > { %v8130_v41 = vpop.f32.mrf.mxu1  ;;  %10269 = vmatprep.subr.bf16.mxu1 %v14428_v59  ;;  %v8129_v40 = vadd.f32 %v8128_v6, %v8088_v52  ;;  %v8090_v32 = vadd.f32 %v8089_v30, %v17637_v53  ;;  %10258 = vmatprep.mubr.bf16.mxu0 %v9644_v4  ;;  %v14437_v53 = vld [vmem:[%s15259_s29 + $0x1244] ss:$8 sps:$4 sm:$0xff]   ;;  %v14480_v59 = vld [vmem:[%s15259_s29 + $0x13d0] ss:$8 sps:$4 sm:$0xff]   ;;  %v14486_v6 = vld [vmem:[%s15259_s29 + $0x13c0] ss:$8 sps:$4 sm:$0xff]  }
 0x7d6   : > { %10299 = vmatprep.mubr.bf16.mxu1 %v9646_v17  ;;  %v8091_v61 = vpop.f32.mrf.mxu0  ;;  %v14485_v4 = vld [vmem:[%s15259_s29 + $0x12c4] ss:$8 sps:$4 sm:$0xff]   ;;  %v14491_v52 = vld [vmem:[%s15259_s29 + $0x12b4] ss:$8 sps:$4 sm:$0xff]   ;;  %v14492_v30 = vld [vmem:[%s15259_s29 + $0x13b0] ss:$8 sps:$4 sm:$0xff]  }
 0x7d7   : > { %v8132_v36 = vpop.f32.mrf.mxu1  ;;  %v17739_v28 = vadd.f32 %v8129_v40, %v17642_v46  ;;  %v8131_v15 = vadd.f32 %v8130_v41, %v8090_v32  ;;  %10229 = vmatpush1.bf16.msra.mxu0 %v14423_v22  ;;  %v14488_v17 = vld [vmem:[%s15259_s29 + $0x13c4] ss:$8 sps:$4 sm:$0xff]   ;;  %v14494_v22 = vld [vmem:[%s15259_s29 + $0x13b4] ss:$8 sps:$4 sm:$0xff]   ;;  %v14498_v40 = vld [vmem:[%s15259_s29 + $0x13a0] ss:$8 sps:$4 sm:$0xff]  }
 0x7d8   : > { %10270 = vmatpush1.bf16.msra.mxu1 %v14426_v12  ;;  %v8092_v55 = vpop.f32.mrf.mxu0  ;;  %10230 = vmatprep.subr.bf16.mxu0 %v14431_v26  ;;  %v14489_v12 = vld [vmem:[%s15259_s29 + $0x12b0] ss:$8 sps:$4 sm:$0xff]   ;;  %v14497_v41 = vld [vmem:[%s15259_s29 + $0x12a4] ss:$8 sps:$4 sm:$0xff]   ;;  %v14503_v32 = vld [vmem:[%s15259_s29 + $0x1294] ss:$8 sps:$4 sm:$0xff]  }
 0x7d9   : > { %v8133_v9 = vpop.f32.mrf.mxu1  ;;  %10271 = vmatprep.subr.bf16.mxu1 %v14434_v38  ;;  %v17746_v46 = vadd.f32 %v8131_v15, %v17646_v2  ;;  %v14449_v2 = vld [vmem:[%s15259_s29 + $0x1224] ss:$8 sps:$4 sm:$0xff]   ;;  %v14495_v38 = vld [vmem:[%s15259_s29 + $0x12a0] ss:$8 sps:$4 sm:$0xff]   ;;  %v14506_v61 = vld [vmem:[%s15259_s29 + $0x1394] ss:$8 sps:$4 sm:$0xff]  }
 0x7da   : > { %v14500_v26 = vld [vmem:[%s15259_s29 + $0x13a4] ss:$8 sps:$4 sm:$0xff]   ;;  %v14501_v36 = vld [vmem:[%s15259_s29 + $0x1290] ss:$8 sps:$4 sm:$0xff]  }
 0x7db   : > { %10231 = vmatpush1.bf16.msra.mxu0 %v14429_v50  ;;  %v14504_v15 = vld [vmem:[%s15259_s29 + $0x1390] ss:$8 sps:$4 sm:$0xff]  }
 0x7dc   : > { %10272 = vmatpush1.bf16.msra.mxu1 %v14432_v23  ;;  %10232 = vmatprep.subr.bf16.mxu0 %v14437_v53  ;;  %v17795_v50 = vld [vmem:[%s16935_s17] sm:$0xff]  ;;  %v9615_v53 = vrot.slane %v17699_v8, 6 }
 0x7dd   : > { %10273 = vmatprep.subr.bf16.mxu1 %v14440_v14  ;;  %v9613_v23 = vrot.slane %v17795_v50, 6  ;;  %v17799_v55 = vld [vmem:[%s16935_s17 + $0x60] sm:$0xff]  ;;  %v9627_v14 = vrot.slane %v17703_v37, 5 }
 0x7de   : > { %v9625_v9 = vrot.slane %v17799_v55, 5 }
 0x7df   : > { %10233 = vmatpush1.bf16.msra.mxu0 %v14435_v39  ;;  %v14509_v39 = vld [vmem:[%s15259_s29 + $0x1284] ss:$8 sps:$4 sm:$0xff]  }
 0x7e0   : > { %10274 = vmatpush1.bf16.msra.mxu1 %v14438_v1  ;;  %10234 = vmatprep.subr.bf16.mxu0 %v14443_v54  ;;  %v14512_v1 = vld [vmem:[%s15259_s29 + $0x1384] ss:$8 sps:$4 sm:$0xff]   ;;  %v9618_v54 = vrot.slane %v17519_v45, 6  ;;  %v14515_v45 = vld [vmem:[%s15259_s29 + $0x1474] ss:$8 sps:$4 sm:$0xff]  }
 0x7e1   : > { %10275 = vmatprep.subr.bf16.mxu1 %v14446_v0  ;;  %v9630_v0 = vrot.slane %v17523_v25, 5  ;;  %v14518_v25 = vld [vmem:[%s15259_s29 + $0x1574] ss:$8 sps:$4 sm:$0xff]  }
 0x7e3   : > { %10235 = vmatpush1.bf16.msra.mxu0 %v14441_v24  ;;  %v10352_v24 = vrot.slane %v17711_v56, 7 }
 0x7e4   : > { %10276 = vmatpush1.bf16.msra.mxu1 %v14444_v5  ;;  %10236 = vmatprep.subr.bf16.mxu0 %v14449_v2  ;;  %v10364_v5 = vrot.slane %v17715_v63, 6  ;;  %v14507_v2 = vld [vmem:[%s15259_s29 + $0x1280] ss:$8 sps:$4 sm:$0xff]   ;;  %v9642_v63 = vsel %vm5219_vm7, %v9618_v54, %v9630_v0 }
 0x7e5   : > { %10277 = vmatprep.subr.bf16.mxu1 %v14452_v60  ;;  %v14510_v60 = vld [vmem:[%s15259_s29 + $0x1380] ss:$8 sps:$4 sm:$0xff]  }
 0x7e6   : > { %v14555_v54 = vld [vmem:[%s15259_s29 + $0x1400] ss:$8 sps:$4 sm:$0xff]  }
 0x7e7   : > { %10237 = vmatpush1.bf16.msra.mxu0 %v14447_v29  ;;  %v9637_v29 = vsel %vm5219_vm7, %v9613_v23, %v9625_v9  ;;  %v14551_v23 = vld [vmem:[%s15259_s29 + $0x1414] ss:$8 sps:$4 sm:$0xff]   ;;  %v14558_v0 = vld [vmem:[%s15259_s29 + $0x1500] ss:$8 sps:$4 sm:$0xff]  }
 0x7e8   : > { %10278 = vmatpush1.bf16.msra.mxu1 %v14450_v31  ;;  %10238 = vmatprep.subr.bf16.mxu0 %v14455_v13  ;;  %v9639_v31 = vsel %vm5219_vm7, %v9615_v53, %v9627_v14  ;;  %v9643_v13 = vpack.c.bf16 %v9637_v29, %v9637_v29  ;;  %v14554_v9 = vld [vmem:[%s15259_s29 + $0x1514] ss:$8 sps:$4 sm:$0xff]   ;;  %v14549_v53 = vld [vmem:[%s15259_s29 + $0x1410] ss:$8 sps:$4 sm:$0xff]   ;;  %v14569_v29 = vld [vmem:[%s15259_s29 + $0x14e4] ss:$8 sps:$4 sm:$0xff]  }
 0x7e9   : > { %10279 = vmatprep.subr.bf16.mxu1 %v14458_v3  ;;  %v9645_v56 = vpack.c.bf16 %v9639_v31, %v9639_v31  ;;  %v10376_v3 = vsel %vm5219_vm7, %v10352_v24, %v10364_v5  ;;  %v14552_v14 = vld [vmem:[%s15259_s29 + $0x1510] ss:$8 sps:$4 sm:$0xff]   ;;  %v14563_v24 = vld [vmem:[%s15259_s29 + $0x14f4] ss:$8 sps:$4 sm:$0xff]   ;;  %v14572_v31 = vld [vmem:[%s15259_s29 + $0x15e4] ss:$8 sps:$4 sm:$0xff]  }
 0x7ea   : > { %v14566_v5 = vld [vmem:[%s15259_s29 + $0x15f4] ss:$8 sps:$4 sm:$0xff]  }
 0x7eb   : > { %10239 = vmatpush1.bf16.msra.mxu0 %v14453_v35  ;;  %v14513_v35 = vld [vmem:[%s15259_s29 + $0x1470] ss:$8 sps:$4 sm:$0xff]  }
 0x7ec   : > { %10280 = vmatpush1.bf16.msra.mxu1 %v14456_v58  ;;  %10240 = vmatprep.subr.bf16.mxu0 %v14461_v19  ;;  %v14516_v58 = vld [vmem:[%s15259_s29 + $0x1570] ss:$8 sps:$4 sm:$0xff]   ;;  %v14521_v19 = vld [vmem:[%s15259_s29 + $0x1464] ss:$8 sps:$4 sm:$0xff]  }
 0x7ed   : > { %10281 = vmatprep.subr.bf16.mxu1 %v14464_v27  ;;  %v14524_v27 = vld [vmem:[%s15259_s29 + $0x1564] ss:$8 sps:$4 sm:$0xff]  }
 0x7ef   : > { %10241 = vmatpush1.bf16.msra.mxu0 %v14459_v20  ;;  %v9648_v20 = vpack.c.bf16 %v9642_v63, %v9642_v63  ;;  %v14573_v63 = vld [vmem:[%s15259_s29 + $0x14d0] ss:$8 sps:$4 sm:$0xff]  }
 0x7f0   : > { %10282 = vmatpush1.bf16.msra.mxu1 %v14462_v44  ;;  %10242 = vmatprep.subr.bf16.mxu0 %v14467_v7  ;;  %v10382_v44 = vpack.c.bf16 %v10376_v3, %v10376_v3  ;;  %v14576_v3 = vld [vmem:[%s15259_s29 + $0x15d0] ss:$8 sps:$4 sm:$0xff]  }
 0x7f1   : > { %10283 = vmatprep.subr.bf16.mxu1 %v14470_v57 }
 0x7f3   : > { %10243 = vmatpush2.bf16.msra.mxu0 %v14465_v42 }
 0x7f4   : > { %10284 = vmatpush2.bf16.msra.mxu1 %v14468_v49  ;;  %10244 = vmatprep.subr.bf16.mxu0 %v14473_v21  ;;  %v14519_v49 = vld [vmem:[%s15259_s29 + $0x1460] ss:$8 sps:$4 sm:$0xff]  }
 0x7f5   : > { %10285 = vmatprep.subr.bf16.mxu1 %v14476_v16  ;;  %v14522_v21 = vld [vmem:[%s15259_s29 + $0x1560] ss:$8 sps:$4 sm:$0xff]  }
 0x7f7   : > { %10245 = vmatpush2.bf16.msra.mxu0 %v14471_v34 }
 0x7f8   : > { %10286 = vmatpush2.bf16.msra.mxu1 %v14474_v18  ;;  %10246 = vmatprep.subr.bf16.mxu0 %v14479_v10  ;;  %v14527_v18 = vld [vmem:[%s15259_s29 + $0x1454] ss:$8 sps:$4 sm:$0xff]  }
 0x7f9   : > { %10287 = vmatprep.subr.bf16.mxu1 %v14482_v43  ;;  %v14530_v10 = vld [vmem:[%s15259_s29 + $0x1554] ss:$8 sps:$4 sm:$0xff]  }
 0x7fb   : > { %10247 = vmatpush2.bf16.msra.mxu0 %v14477_v11 }
 0x7fc   : > { %10288 = vmatpush2.bf16.msra.mxu1 %v14480_v59  ;;  %10248 = vmatprep.subr.bf16.mxu0 %v14485_v4  ;;  %v14525_v4 = vld [vmem:[%s15259_s29 + $0x1450] ss:$8 sps:$4 sm:$0xff]  }
 0x7fd   : > { %10289 = vmatprep.subr.bf16.mxu1 %v14488_v17  ;;  %v14528_v17 = vld [vmem:[%s15259_s29 + $0x1550] ss:$8 sps:$4 sm:$0xff]  }
 0x7ff   : > { %10249 = vmatpush2.bf16.msra.mxu0 %v14483_v47 }
 0x800   : > { %10290 = vmatpush2.bf16.msra.mxu1 %v14486_v6  ;;  %10250 = vmatprep.subr.bf16.mxu0 %v14491_v52  ;;  %v14533_v52 = vld [vmem:[%s15259_s29 + $0x1444] ss:$8 sps:$4 sm:$0xff]  }
 0x801   : > { %10291 = vmatprep.subr.bf16.mxu1 %v14494_v22  ;;  %v14536_v22 = vld [vmem:[%s15259_s29 + $0x1544] ss:$8 sps:$4 sm:$0xff]  }
 0x803   : > { %10251 = vmatpush2.bf16.msra.mxu0 %v14489_v12  ;;  %v14531_v12 = vld [vmem:[%s15259_s29 + $0x1440] ss:$8 sps:$4 sm:$0xff]  }
 0x804   : > { %10292 = vmatpush2.bf16.msra.mxu1 %v14492_v30  ;;  %10252 = vmatprep.subr.bf16.mxu0 %v14497_v41  ;;  %v14534_v30 = vld [vmem:[%s15259_s29 + $0x1540] ss:$8 sps:$4 sm:$0xff]   ;;  %v14539_v41 = vld [vmem:[%s15259_s29 + $0x1434] ss:$8 sps:$4 sm:$0xff]  }
 0x805   : > { %10293 = vmatprep.subr.bf16.mxu1 %v14500_v26  ;;  %v14542_v26 = vld [vmem:[%s15259_s29 + $0x1534] ss:$8 sps:$4 sm:$0xff]  }
 0x807   : > { %10253 = vmatpush2.bf16.msra.mxu0 %v14495_v38  ;;  %v14537_v38 = vld [vmem:[%s15259_s29 + $0x1430] ss:$8 sps:$4 sm:$0xff]  }
 0x808   : > { %10294 = vmatpush2.bf16.msra.mxu1 %v14498_v40  ;;  %10254 = vmatprep.subr.bf16.mxu0 %v14503_v32  ;;  %v14540_v40 = vld [vmem:[%s15259_s29 + $0x1530] ss:$8 sps:$4 sm:$0xff]   ;;  %v14545_v32 = vld [vmem:[%s15259_s29 + $0x1424] ss:$8 sps:$4 sm:$0xff]  }
 0x809   : > { %10295 = vmatprep.subr.bf16.mxu1 %v14506_v61  ;;  %v14548_v61 = vld [vmem:[%s15259_s29 + $0x1524] ss:$8 sps:$4 sm:$0xff]  }
 0x80b   : > { %10255 = vmatpush2.bf16.msra.mxu0 %v14501_v36  ;;  %v14543_v36 = vld [vmem:[%s15259_s29 + $0x1420] ss:$8 sps:$4 sm:$0xff]  }
 0x80c   : > { %10296 = vmatpush2.bf16.msra.mxu1 %v14504_v15  ;;  %10256 = vmatprep.subr.bf16.mxu0 %v14509_v39  ;;  %v14546_v15 = vld [vmem:[%s15259_s29 + $0x1520] ss:$8 sps:$4 sm:$0xff]   ;;  %v14557_v39 = vld [vmem:[%s15259_s29 + $0x1404] ss:$8 sps:$4 sm:$0xff]  }
 0x80d   : > { %10297 = vmatprep.subr.bf16.mxu1 %v14512_v1  ;;  %v14560_v1 = vld [vmem:[%s15259_s29 + $0x1504] ss:$8 sps:$4 sm:$0xff]  }
 0x80f   : > { %10257 = vmatpush2.bf16.msra.mxu0 %v14507_v2  ;;  %v14561_v2 = vld [vmem:[%s15259_s29 + $0x14f0] ss:$8 sps:$4 sm:$0xff]  }
 0x810   : > { %10298 = vmatpush2.bf16.msra.mxu1 %v14510_v60  ;;  %10308 = vmatprep.subr.bf16.mxu0 %v14515_v45  ;;  %v14564_v60 = vld [vmem:[%s15259_s29 + $0x15f0] ss:$8 sps:$4 sm:$0xff]   ;;  %v14567_v45 = vld [vmem:[%s15259_s29 + $0x14e0] ss:$8 sps:$4 sm:$0xff]  }
 0x811   : > { %10964 = vmatprep.subr.bf16.mxu1 %v14518_v25  ;;  %v14570_v25 = vld [vmem:[%s15259_s29 + $0x15e0] ss:$8 sps:$4 sm:$0xff]  }
 0x812   : > { %v8784_v7 = vpop.f32.mrf.mxu0  ;;  %10259 = vmatmul.mubr.bf16.vlgmr.msra.gmra.mxu0 %v9643_v13  ;;  %v14575_v13 = vld [vmem:[%s15259_s29 + $0x14d4] ss:$8 sps:$4 sm:$0xff]  }
 0x813   : > { %v8825_v57 = vpop.f32.mrf.mxu1  ;;  %10300 = vmatmul.mubr.bf16.vlgmr.msra.gmra.mxu1 %v9645_v56  ;;  %10309 = vmatpush1.bf16.msra.mxu0 %v14513_v35  ;;  %v14578_v56 = vld [vmem:[%s15259_s29 + $0x15d4] ss:$8 sps:$4 sm:$0xff]   ;;  %v14581_v35 = vld [vmem:[%s15259_s29 + $0x14c4] ss:$8 sps:$4 sm:$0xff]  }
 0x814   : > { %v17822_v42 = vadd.f32 %v8825_v57, %v8784_v7  ;;  %10965 = vmatpush1.bf16.msra.mxu1 %v14516_v58  ;;  %v8786_v16 = vpop.f32.mrf.mxu0  ;;  %10310 = vmatprep.subr.bf16.mxu0 %v14521_v19  ;;  %v14584_v58 = vld [vmem:[%s15259_s29 + $0x15c4] ss:$8 sps:$4 sm:$0xff]   ;;  %v14579_v19 = vld [vmem:[%s15259_s29 + $0x14c0] ss:$8 sps:$4 sm:$0xff]   ;;  %v14585_v7 = vld [vmem:[%s15259_s29 + $0x14b0] ss:$8 sps:$4 sm:$0xff]  }
 0x815   : > { %v8827_v34 = vpop.f32.mrf.mxu1  ;;  %10966 = vmatprep.subr.bf16.mxu1 %v14524_v27  ;;  %10340 = vmatprep.mubr.bf16.mxu0 %v9648_v20  ;;  %v14582_v27 = vld [vmem:[%s15259_s29 + $0x15c0] ss:$8 sps:$4 sm:$0xff]   ;;  %v14587_v20 = vld [vmem:[%s15259_s29 + $0x14b4] ss:$8 sps:$4 sm:$0xff]   ;;  %v14588_v57 = vld [vmem:[%s15259_s29 + $0x15b0] ss:$8 sps:$4 sm:$0xff]  }
 0x816   : > { %v17828_v43 = vadd.f32 %v8827_v34, %v8786_v16  ;;  %10996 = vmatprep.mubr.bf16.mxu1 %v10382_v44  ;;  %v8788_v11 = vpop.f32.mrf.mxu0  ;;  %v14590_v44 = vld [vmem:[%s15259_s29 + $0x15b4] ss:$8 sps:$4 sm:$0xff]   ;;  %v14591_v16 = vld [vmem:[%s15259_s29 + $0x14a0] ss:$8 sps:$4 sm:$0xff]  }
 0x817   : > { %v8829_v59 = vpop.f32.mrf.mxu1  ;;  %10311 = vmatpush1.bf16.msra.mxu0 %v14519_v49  ;;  %v14593_v49 = vld [vmem:[%s15259_s29 + $0x14a4] ss:$8 sps:$4 sm:$0xff]   ;;  %v14594_v34 = vld [vmem:[%s15259_s29 + $0x15a0] ss:$8 sps:$4 sm:$0xff]   ;;  %v14597_v11 = vld [vmem:[%s15259_s29 + $0x1490] ss:$8 sps:$4 sm:$0xff]  }
 0x818   : > { %10967 = vmatpush1.bf16.msra.mxu1 %v14522_v21  ;;  %v8789_v47 = vpop.f32.mrf.mxu0  ;;  %10312 = vmatprep.subr.bf16.mxu0 %v14527_v18  ;;  %v14596_v21 = vld [vmem:[%s15259_s29 + $0x15a4] ss:$8 sps:$4 sm:$0xff]   ;;  %v14599_v18 = vld [vmem:[%s15259_s29 + $0x1494] ss:$8 sps:$4 sm:$0xff]   ;;  %v14600_v59 = vld [vmem:[%s15259_s29 + $0x1590] ss:$8 sps:$4 sm:$0xff]  }
 0x819   : > { %v8830_v6 = vpop.f32.mrf.mxu1  ;;  %10968 = vmatprep.subr.bf16.mxu1 %v14530_v10  ;;  %v14602_v10 = vld [vmem:[%s15259_s29 + $0x1594] ss:$8 sps:$4 sm:$0xff]   ;;  %v10351_v47 = vrot.slane %v17795_v50, 7  ;;  %v14606_v50 = vld [vmem:[%s15259_s29 + $0x1580] ss:$8 sps:$4 sm:$0xff]  }
 0x81a   : > { %v10363_v6 = vrot.slane %v17799_v55, 6 }
 0x81b   : > { %10313 = vmatpush1.bf16.msra.mxu0 %v14525_v4  ;;  %v9617_v4 = vrot.slane %v17599_v33, 6 }
 0x81c   : > { %10969 = vmatpush1.bf16.msra.mxu1 %v14528_v17  ;;  %10314 = vmatprep.subr.bf16.mxu0 %v14533_v52  ;;  %v9629_v17 = vrot.slane %v17603_v51, 5  ;;  %v14605_v52 = vld [vmem:[%s15259_s29 + $0x1484] ss:$8 sps:$4 sm:$0xff]   ;;  %v14603_v51 = vld [vmem:[%s15259_s29 + $0x1480] ss:$8 sps:$4 sm:$0xff]  }
 0x81d   : > { %10970 = vmatprep.subr.bf16.mxu1 %v14536_v22  ;;  %v14608_v22 = vld [vmem:[%s15259_s29 + $0x1584] ss:$8 sps:$4 sm:$0xff]  }
 0x81e   : > { %v9641_v55 = vsel %vm5219_vm7, %v9617_v4, %v9629_v17  ;;  %v14653_v4 = vld [vmem:[%s15259_s29 + $0x1604] ss:$8 sps:$4 sm:$0xff]  }
 0x81f   : > { %10315 = vmatpush1.bf16.msra.mxu0 %v14531_v12  ;;  %v10354_v12 = vrot.slane %v17611_v62, 7  ;;  %v14611_v62 = vld [vmem:[%s15259_s29 + $0x1674] ss:$8 sps:$4 sm:$0xff]   ;;  %v14656_v17 = vld [vmem:[%s15259_s29 + $0x1704] ss:$8 sps:$4 sm:$0xff]  }
 0x820   : > { %10971 = vmatpush1.bf16.msra.mxu1 %v14534_v30  ;;  %10316 = vmatprep.subr.bf16.mxu0 %v14539_v41  ;;  %v10366_v30 = vrot.slane %v17615_v48, 6  ;;  %v14737_v41 = vld [vmem:[%s16935_s17 + $0x28] sm:$0xff] }
 0x821   : > { %10972 = vmatprep.subr.bf16.mxu1 %v14542_v26  ;;  %v10356_v33 = vrot.slane %v14737_v41, 7  ;;  %v14738_v26 = vld [vmem:[%s16935_s17 + $0x88] sm:$0xff]  ;;  %v14665_v41 = vld [vmem:[%s15259_s29 + $0x16e4] ss:$8 sps:$4 sm:$0xff]  }
 0x822   : > { %v14614_v48 = vld [vmem:[%s15259_s29 + $0x1774] ss:$8 sps:$4 sm:$0xff]  }
 0x823   : > { %10317 = vmatpush1.bf16.msra.mxu0 %v14537_v38  ;;  %v10368_v38 = vrot.slane %v14738_v26, 6  ;;  %v14663_v26 = vld [vmem:[%s15259_s29 + $0x16e0] ss:$8 sps:$4 sm:$0xff]  }
 0x824   : > { %10973 = vmatpush1.bf16.msra.mxu1 %v14540_v40  ;;  %10318 = vmatprep.subr.bf16.mxu0 %v14545_v32  ;;  %v10375_v40 = vsel %vm5219_vm7, %v10351_v47, %v10363_v6  ;;  %v9647_v32 = vpack.c.bf16 %v9641_v55, %v9641_v55  ;;  %v14651_v47 = vld [vmem:[%s15259_s29 + $0x1600] ss:$8 sps:$4 sm:$0xff]   ;;  %v14669_v55 = vld [vmem:[%s15259_s29 + $0x16d0] ss:$8 sps:$4 sm:$0xff]  }
 0x825   : > { %10974 = vmatprep.subr.bf16.mxu1 %v14548_v61  ;;  %v10381_v61 = vpack.c.bf16 %v10375_v40, %v10375_v40  ;;  %v14654_v6 = vld [vmem:[%s15259_s29 + $0x1700] ss:$8 sps:$4 sm:$0xff]   ;;  %v14672_v40 = vld [vmem:[%s15259_s29 + $0x17d0] ss:$8 sps:$4 sm:$0xff]  }
 0x827   : > { %10319 = vmatpush1.bf16.msra.mxu0 %v14543_v36  ;;  %v10378_v36 = vsel %vm5219_vm7, %v10354_v12, %v10366_v30  ;;  %v14657_v12 = vld [vmem:[%s15259_s29 + $0x16f0] ss:$8 sps:$4 sm:$0xff]  }
 0x828   : > { %10975 = vmatpush1.bf16.msra.mxu1 %v14546_v15  ;;  %10320 = vmatprep.subr.bf16.mxu0 %v14551_v23  ;;  %v10380_v15 = vsel %vm5219_vm7, %v10356_v33, %v10368_v38  ;;  %v14609_v23 = vld [vmem:[%s15259_s29 + $0x1670] ss:$8 sps:$4 sm:$0xff]   ;;  %v14668_v33 = vld [vmem:[%s15259_s29 + $0x17e4] ss:$8 sps:$4 sm:$0xff]   ;;  %v14666_v38 = vld [vmem:[%s15259_s29 + $0x17e0] ss:$8 sps:$4 sm:$0xff]  }
 0x829   : > { %10976 = vmatprep.subr.bf16.mxu1 %v14554_v9  ;;  %v14612_v9 = vld [vmem:[%s15259_s29 + $0x1770] ss:$8 sps:$4 sm:$0xff]  }
 0x82a   : > { %v14660_v30 = vld [vmem:[%s15259_s29 + $0x17f0] ss:$8 sps:$4 sm:$0xff]  }
 0x82b   : > { %10321 = vmatpush1.bf16.msra.mxu0 %v14549_v53  ;;  %v14617_v53 = vld [vmem:[%s15259_s29 + $0x1664] ss:$8 sps:$4 sm:$0xff]  }
 0x82c   : > { %10977 = vmatpush1.bf16.msra.mxu1 %v14552_v14  ;;  %10322 = vmatprep.subr.bf16.mxu0 %v14557_v39  ;;  %v14620_v14 = vld [vmem:[%s15259_s29 + $0x1764] ss:$8 sps:$4 sm:$0xff]   ;;  %v10384_v39 = vpack.c.bf16 %v10378_v36, %v10378_v36  ;;  %v14683_v36 = vld [vmem:[%s15259_s29 + $0x16b4] ss:$8 sps:$4 sm:$0xff]  }
 0x82d   : > { %10978 = vmatprep.subr.bf16.mxu1 %v14560_v1  ;;  %v10386_v1 = vpack.c.bf16 %v10380_v15, %v10380_v15  ;;  %v14686_v15 = vld [vmem:[%s15259_s29 + $0x17b4] ss:$8 sps:$4 sm:$0xff]  }
 0x82f   : > { %10323 = vmatpush1.bf16.msra.mxu0 %v14555_v54 }
 0x830   : > { %10979 = vmatpush1.bf16.msra.mxu1 %v14558_v0  ;;  %10324 = vmatprep.subr.bf16.mxu0 %v14563_v24 }
 0x831   : > { %10980 = vmatprep.subr.bf16.mxu1 %v14566_v5  ;;  %v14615_v5 = vld [vmem:[%s15259_s29 + $0x1660] ss:$8 sps:$4 sm:$0xff]  }
 0x833   : > { %10325 = vmatpush2.bf16.msra.mxu0 %v14561_v2  ;;  %v14618_v2 = vld [vmem:[%s15259_s29 + $0x1760] ss:$8 sps:$4 sm:$0xff]  }
 0x834   : > { %10981 = vmatpush2.bf16.msra.mxu1 %v14564_v60  ;;  %10326 = vmatprep.subr.bf16.mxu0 %v14569_v29 }
 0x835   : > { %10982 = vmatprep.subr.bf16.mxu1 %v14572_v31  ;;  %v14623_v31 = vld [vmem:[%s15259_s29 + $0x1654] ss:$8 sps:$4 sm:$0xff]  }
 0x837   : > { %10327 = vmatpush2.bf16.msra.mxu0 %v14567_v45  ;;  %v14626_v45 = vld [vmem:[%s15259_s29 + $0x1754] ss:$8 sps:$4 sm:$0xff]  }
 0x838   : > { %10983 = vmatpush2.bf16.msra.mxu1 %v14570_v25  ;;  %10328 = vmatprep.subr.bf16.mxu0 %v14575_v13 }
 0x839   : > { %10984 = vmatprep.subr.bf16.mxu1 %v14578_v56 }
 0x83b   : > { %10329 = vmatpush2.bf16.msra.mxu0 %v14573_v63 }
 0x83c   : > { %10985 = vmatpush2.bf16.msra.mxu1 %v14576_v3  ;;  %10330 = vmatprep.subr.bf16.mxu0 %v14581_v35  ;;  %v14621_v3 = vld [vmem:[%s15259_s29 + $0x1650] ss:$8 sps:$4 sm:$0xff]  }
 0x83d   : > { %10986 = vmatprep.subr.bf16.mxu1 %v14584_v58  ;;  %v14624_v35 = vld [vmem:[%s15259_s29 + $0x1750] ss:$8 sps:$4 sm:$0xff]  }
 0x83f   : > { %10331 = vmatpush2.bf16.msra.mxu0 %v14579_v19  ;;  %v14632_v19 = vld [vmem:[%s15259_s29 + $0x1744] ss:$8 sps:$4 sm:$0xff]  }
 0x840   : > { %10987 = vmatpush2.bf16.msra.mxu1 %v14582_v27  ;;  %10332 = vmatprep.subr.bf16.mxu0 %v14587_v20  ;;  %v14630_v27 = vld [vmem:[%s15259_s29 + $0x1740] ss:$8 sps:$4 sm:$0xff]   ;;  %v14635_v20 = vld [vmem:[%s15259_s29 + $0x1634] ss:$8 sps:$4 sm:$0xff]  }
 0x841   : > { %10988 = vmatprep.subr.bf16.mxu1 %v14590_v44  ;;  %v14638_v44 = vld [vmem:[%s15259_s29 + $0x1734] ss:$8 sps:$4 sm:$0xff]  }
 0x843   : > { %10333 = vmatpush2.bf16.msra.mxu0 %v14585_v7  ;;  %v14633_v7 = vld [vmem:[%s15259_s29 + $0x1630] ss:$8 sps:$4 sm:$0xff]  }
 0x844   : > { %10989 = vmatpush2.bf16.msra.mxu1 %v14588_v57  ;;  %10334 = vmatprep.subr.bf16.mxu0 %v14593_v49  ;;  %v14636_v57 = vld [vmem:[%s15259_s29 + $0x1730] ss:$8 sps:$4 sm:$0xff]   ;;  %v14641_v49 = vld [vmem:[%s15259_s29 + $0x1624] ss:$8 sps:$4 sm:$0xff]  }
 0x845   : > { %10990 = vmatprep.subr.bf16.mxu1 %v14596_v21  ;;  %v14644_v21 = vld [vmem:[%s15259_s29 + $0x1724] ss:$8 sps:$4 sm:$0xff]  }
 0x847   : > { %10335 = vmatpush2.bf16.msra.mxu0 %v14591_v16  ;;  %v14639_v16 = vld [vmem:[%s15259_s29 + $0x1620] ss:$8 sps:$4 sm:$0xff]  }
 0x848   : > { %10991 = vmatpush2.bf16.msra.mxu1 %v14594_v34  ;;  %10336 = vmatprep.subr.bf16.mxu0 %v14599_v18  ;;  %v14642_v34 = vld [vmem:[%s15259_s29 + $0x1720] ss:$8 sps:$4 sm:$0xff]   ;;  %v14647_v18 = vld [vmem:[%s15259_s29 + $0x1614] ss:$8 sps:$4 sm:$0xff]  }
 0x849   : > { %10992 = vmatprep.subr.bf16.mxu1 %v14602_v10  ;;  %v14650_v10 = vld [vmem:[%s15259_s29 + $0x1714] ss:$8 sps:$4 sm:$0xff]  }
 0x84b   : > { %10337 = vmatpush2.bf16.msra.mxu0 %v14597_v11  ;;  %v14645_v11 = vld [vmem:[%s15259_s29 + $0x1610] ss:$8 sps:$4 sm:$0xff]  }
 0x84c   : > { %10993 = vmatpush2.bf16.msra.mxu1 %v14600_v59  ;;  %10338 = vmatprep.subr.bf16.mxu0 %v14605_v52  ;;  %v14648_v59 = vld [vmem:[%s15259_s29 + $0x1710] ss:$8 sps:$4 sm:$0xff]   ;;  %v14659_v52 = vld [vmem:[%s15259_s29 + $0x16f4] ss:$8 sps:$4 sm:$0xff]  }
 0x84d   : > { %10994 = vmatprep.subr.bf16.mxu1 %v14608_v22  ;;  %v14662_v22 = vld [vmem:[%s15259_s29 + $0x17f4] ss:$8 sps:$4 sm:$0xff]  }
 0x84f   : > { %10339 = vmatpush2.bf16.msra.mxu0 %v14603_v51  ;;  %v14671_v51 = vld [vmem:[%s15259_s29 + $0x16d4] ss:$8 sps:$4 sm:$0xff]  }
 0x850   : > { %10995 = vmatpush2.bf16.msra.mxu1 %v14606_v50  ;;  %11005 = vmatprep.subr.bf16.mxu0 %v14611_v62  ;;  %v14674_v50 = vld [vmem:[%s15259_s29 + $0x17d4] ss:$8 sps:$4 sm:$0xff]   ;;  %v14677_v62 = vld [vmem:[%s15259_s29 + $0x16c4] ss:$8 sps:$4 sm:$0xff]  }
 0x851   : > { %11046 = vmatprep.subr.bf16.mxu1 %v14614_v48  ;;  %v14680_v48 = vld [vmem:[%s15259_s29 + $0x17c4] ss:$8 sps:$4 sm:$0xff]  }
 0x852   : > { %v8866_v54 = vpop.f32.mrf.mxu0  ;;  %10341 = vmatmul.mubr.bf16.vlgmr.msra.gmra.mxu0 %v9647_v32  ;;  %v14675_v32 = vld [vmem:[%s15259_s29 + $0x16c0] ss:$8 sps:$4 sm:$0xff]  }
 0x853   : > { %v17902_v0 = vpop.f32.mrf.mxu1  ;;  %10997 = vmatmul.mubr.bf16.vlgmr.msra.gmra.mxu1 %v10381_v61  ;;  %v8867_v24 = vadd.f32 %v8866_v54, %v17822_v42  ;;  %11006 = vmatpush1.bf16.msra.mxu0 %v14609_v23  ;;  %v14678_v61 = vld [vmem:[%s15259_s29 + $0x17c0] ss:$8 sps:$4 sm:$0xff]   ;;  %v14681_v23 = vld [vmem:[%s15259_s29 + $0x16b0] ss:$8 sps:$4 sm:$0xff]   ;;  %v14695_v54 = vld [vmem:[%s15259_s29 + $0x1694] ss:$8 sps:$4 sm:$0xff]  }
 0x854   : > { %11047 = vmatpush1.bf16.msra.mxu1 %v14612_v9  ;;  %v8868_v60 = vpop.f32.mrf.mxu0  ;;  %11007 = vmatprep.subr.bf16.mxu0 %v14617_v53  ;;  %v14684_v9 = vld [vmem:[%s15259_s29 + $0x17b0] ss:$8 sps:$4 sm:$0xff]   ;;  %v14689_v53 = vld [vmem:[%s15259_s29 + $0x16a4] ss:$8 sps:$4 sm:$0xff]  }
 0x855   : > { %v17907_v29 = vpop.f32.mrf.mxu1  ;;  %11048 = vmatprep.subr.bf16.mxu1 %v14620_v14  ;;  %v17912_v25 = vadd.f32 %v8867_v24, %v17739_v28  ;;  %v8869_v42 = vadd.f32 %v8868_v60, %v17828_v43  ;;  %11037 = vmatprep.mubr.bf16.mxu0 %v10384_v39  ;;  %v14629_v43 = vld [vmem:[%s15259_s29 + $0x1644] ss:$8 sps:$4 sm:$0xff]   ;;  %v14687_v39 = vld [vmem:[%s15259_s29 + $0x16a0] ss:$8 sps:$4 sm:$0xff]   ;;  %v14698_v24 = vld [vmem:[%s15259_s29 + $0x1794] ss:$8 sps:$4 sm:$0xff]  }
 0x856   : > { %11078 = vmatprep.mubr.bf16.mxu1 %v10386_v1  ;;  %v8870_v13 = vpop.f32.mrf.mxu0  ;;  %v14692_v14 = vld [vmem:[%s15259_s29 + $0x17a4] ss:$8 sps:$4 sm:$0xff]   ;;  %v14690_v1 = vld [vmem:[%s15259_s29 + $0x17a0] ss:$8 sps:$4 sm:$0xff]   ;;  %v10353_v60 = vrot.slane %v17699_v8, 7 }
 0x857   : > { %v9526_v56 = vpop.f32.mrf.mxu1  ;;  %v17916_v63 = vadd.f32 %v8869_v42, %v17746_v46  ;;  %11008 = vmatpush1.bf16.msra.mxu0 %v14615_v5  ;;  %v14627_v46 = vld [vmem:[%s15259_s29 + $0x1640] ss:$8 sps:$4 sm:$0xff]   ;;  %v14693_v5 = vld [vmem:[%s15259_s29 + $0x1690] ss:$8 sps:$4 sm:$0xff]  }
 0x858   : > { %11049 = vmatpush1.bf16.msra.mxu1 %v14618_v2  ;;  %v8871_v28 = vpop.f32.mrf.mxu0  ;;  %11009 = vmatprep.subr.bf16.mxu0 %v14623_v31  ;;  %v14696_v2 = vld [vmem:[%s15259_s29 + $0x1790] ss:$8 sps:$4 sm:$0xff]   ;;  %v10365_v31 = vrot.slane %v17703_v37, 6 }
 0x859   : > { %v9527_v58 = vpop.f32.mrf.mxu1  ;;  %11050 = vmatprep.subr.bf16.mxu1 %v14626_v45  ;;  %v14739_v45 = vld [vmem:[%s16935_s17 + $0x20] sm:$0xff]  ;;  %v14699_v28 = vld [vmem:[%s15259_s29 + $0x1680] ss:$8 sps:$4 sm:$0xff]  }
 0x85a   : > { %v10355_v42 = vrot.slane %v14739_v45, 7  ;;  %v14740_v13 = vld [vmem:[%s16935_s17 + $0x80] sm:$0xff]  ;;  %v14702_v58 = vld [vmem:[%s15259_s29 + $0x1780] ss:$8 sps:$4 sm:$0xff]  }
 0x85b   : > { %11010 = vmatpush1.bf16.msra.mxu0 %v14621_v3  ;;  %v10367_v56 = vrot.slane %v14740_v13, 6  ;;  %v14701_v3 = vld [vmem:[%s15259_s29 + $0x1684] ss:$8 sps:$4 sm:$0xff]  }
 0x85c   : > { %11051 = vmatpush1.bf16.msra.mxu1 %v14624_v35  ;;  %11011 = vmatprep.subr.bf16.mxu0 %v14629_v43  ;;  %v14704_v35 = vld [vmem:[%s15259_s29 + $0x1784] ss:$8 sps:$4 sm:$0xff]   ;;  %v10377_v43 = vsel %vm5219_vm7, %v10353_v60, %v10365_v31 }
 0x85d   : > { %11052 = vmatprep.subr.bf16.mxu1 %v14632_v19  ;;  %v10379_v19 = vsel %vm5219_vm7, %v10355_v42, %v10367_v56  ;;  %v10383_v8 = vpack.c.bf16 %v10377_v43, %v10377_v43 }
 0x85e   : > { %v10385_v37 = vpack.c.bf16 %v10379_v19, %v10379_v19 }
 0x85f   : > { %11012 = vmatpush1.bf16.msra.mxu0 %v14627_v46 }
 0x860   : > { %11053 = vmatpush1.bf16.msra.mxu1 %v14630_v27  ;;  %11013 = vmatprep.subr.bf16.mxu0 %v14635_v20 }
 0x861   : > { %11054 = vmatprep.subr.bf16.mxu1 %v14638_v44 }
 0x863   : > { %11014 = vmatpush1.bf16.msra.mxu0 %v14633_v7 }
 0x864   : > { %11055 = vmatpush1.bf16.msra.mxu1 %v14636_v57  ;;  %11015 = vmatprep.subr.bf16.mxu0 %v14641_v49 }
 0x865   : > { %11056 = vmatprep.subr.bf16.mxu1 %v14644_v21 }
 0x867   : > { %11016 = vmatpush1.bf16.msra.mxu0 %v14639_v16 }
 0x868   : > { %11057 = vmatpush1.bf16.msra.mxu1 %v14642_v34  ;;  %11017 = vmatprep.subr.bf16.mxu0 %v14647_v18 }
 0x869   : > { %11058 = vmatprep.subr.bf16.mxu1 %v14650_v10 }
 0x86b   : > { %11018 = vmatpush1.bf16.msra.mxu0 %v14645_v11 }
 0x86c   : > { %11059 = vmatpush1.bf16.msra.mxu1 %v14648_v59  ;;  %11019 = vmatprep.subr.bf16.mxu0 %v14653_v4 }
 0x86d   : > { %11060 = vmatprep.subr.bf16.mxu1 %v14656_v17 }
 0x86f   : > { %11020 = vmatpush1.bf16.msra.mxu0 %v14651_v47 }
 0x870   : > { %11061 = vmatpush1.bf16.msra.mxu1 %v14654_v6  ;;  %11021 = vmatprep.subr.bf16.mxu0 %v14659_v52 }
 0x871   : > { %11062 = vmatprep.subr.bf16.mxu1 %v14662_v22 }
 0x873   : > { %11022 = vmatpush2.bf16.msra.mxu0 %v14657_v12 }
 0x874   : > { %11063 = vmatpush2.bf16.msra.mxu1 %v14660_v30  ;;  %11023 = vmatprep.subr.bf16.mxu0 %v14665_v41 }
 0x875   : > { %11064 = vmatprep.subr.bf16.mxu1 %v14668_v33 }
 0x877   : > { %11024 = vmatpush2.bf16.msra.mxu0 %v14663_v26 }
 0x878   : > { %11065 = vmatpush2.bf16.msra.mxu1 %v14666_v38  ;;  %11025 = vmatprep.subr.bf16.mxu0 %v14671_v51 }
 0x879   : > { %11066 = vmatprep.subr.bf16.mxu1 %v14674_v50 }
 0x87b   : > { %11026 = vmatpush2.bf16.msra.mxu0 %v14669_v55 }
 0x87c   : > { %11067 = vmatpush2.bf16.msra.mxu1 %v14672_v40  ;;  %11027 = vmatprep.subr.bf16.mxu0 %v14677_v62 }
 0x87d   : > { %11068 = vmatprep.subr.bf16.mxu1 %v14680_v48 }
 0x87f   : > { %11028 = vmatpush2.bf16.msra.mxu0 %v14675_v32  ;;  %v15022_v32 = vmov 1983009808  }
 0x880   : > { %11069 = vmatpush2.bf16.msra.mxu1 %v14678_v61  ;;  %11029 = vmatprep.subr.bf16.mxu0 %v14683_v36  ;;  %v11094_v61 = vunpack.c.l.s4 %v15022_v32  ;;  %v11096_v36 = vlaneseq }
 0x881   : > { %11070 = vmatprep.subr.bf16.mxu1 %v14686_v15 }
 0x883   : > { %11030 = vmatpush2.bf16.msra.mxu0 %v14681_v23 }
 0x884   : > { %11071 = vmatpush2.bf16.msra.mxu1 %v14684_v9  ;;  %11031 = vmatprep.subr.bf16.mxu0 %v14689_v53 }
 0x885   : > { %11072 = vmatprep.subr.bf16.mxu1 %v14692_v14 }
 0x887   : > { %11032 = vmatpush2.bf16.msra.mxu0 %v14687_v39 }
 0x888   : > { %11073 = vmatpush2.bf16.msra.mxu1 %v14690_v1  ;;  %11033 = vmatprep.subr.bf16.mxu0 %v14695_v54  ;;  %v11095_v54 = vunpack.c.0.s8 %v11094_v61 }
 0x889   : > { %11074 = vmatprep.subr.bf16.mxu1 %v14698_v24  ;;  %v17982_v24 = vshrl.u32 %v11096_v36, 7 }
 0x88b   : > { %11034 = vmatpush2.bf16.msra.mxu0 %v14693_v5  ;;  %v17985_v56 = vsub.s32 %v11095_v54, %v17982_v24 }
 0x88c   : > { %11075 = vmatpush2.bf16.msra.mxu1 %v14696_v2  ;;  %11035 = vmatprep.subr.bf16.mxu0 %v14701_v3 }
 0x88d   : > { %11076 = vmatprep.subr.bf16.mxu1 %v14704_v35  ;;  %v11089_v35 = vld [vmem:[#allocation4] sm:$0xf] }
 0x88f   : > { %11036 = vmatpush2.bf16.msra.mxu0 %v14699_v28 }
 0x890   : > { %11077 = vmatpush2.bf16.msra.mxu1 %v14702_v58 }
 0x892   : > { %v9563_v46 = vpop.f32.mrf.mxu0  ;;  %11038 = vmatmul.mubr.bf16.vlgmr.msra.gmra.mxu0 %v10383_v8 }
 0x893   : > { %v9604_v27 = vpop.f32.mrf.mxu1  ;;  %11079 = vmatmul.mubr.bf16.vlgmr.msra.gmra.mxu1 %v10385_v37  ;;  %v9564_v20 = vadd.f32 %v9563_v46, %v17902_v0 }
 0x894   : > { %v9565_v44 = vpop.f32.mrf.mxu0 }
 0x895   : > { %v9606_v7 = vpop.f32.mrf.mxu1  ;;  %v9605_v57 = vadd.f32 %v9604_v27, %v9564_v20  ;;  %v9566_v49 = vadd.f32 %v9565_v44, %v17907_v29 }
 0x896   : > { %v9567_v21 = vpop.f32.mrf.mxu0 }
 0x897   : > { %v9608_v16 = vpop.f32.mrf.mxu1  ;;  %v9611_v34 = vadd.f32 %v9605_v57, %v17912_v25  ;;  %v9607_v18 = vadd.f32 %v9606_v7, %v9566_v49 }
 0x898   : > { %v9568_v10 = vpop.f32.mrf.mxu0 }
 0x899   : > { %v9609_v11 = vpop.f32.mrf.mxu1  ;;  %v9612_v59 = vadd.f32 %v9607_v18, %v17916_v63 }
 0x8d2   : > { %v10260_v4 = vpop.f32.mrf.mxu0 }
 0x8d3   : > { %v10301_v17 = vpop.f32.mrf.mxu1 }
 0x8d4   : > { %v10302_v47 = vadd.f32 %v10301_v17, %v10260_v4  ;;  %v10262_v6 = vpop.f32.mrf.mxu0 }
 0x8d5   : > { %v10303_v52 = vpop.f32.mrf.mxu1 }
 0x8d6   : > { %v10304_v0 = vadd.f32 %v10303_v52, %v10262_v6  ;;  %v10264_v22 = vpop.f32.mrf.mxu0 }
 0x8d7   : > { %v10305_v12 = vpop.f32.mrf.mxu1 }
 0x8d8   : > { %v10265_v30 = vpop.f32.mrf.mxu0 }
 0x8d9   : > { %v10306_v41 = vpop.f32.mrf.mxu1 }
 0x912   : > { %v10342_v29 = vpop.f32.mrf.mxu0 }
 0x913   : > { %v10998_v33 = vpop.f32.mrf.mxu1  ;;  %v10343_v26 = vadd.f32 %v10342_v29, %v10302_v47 }
 0x914   : > { %v10344_v38 = vpop.f32.mrf.mxu0 }
 0x915   : > { %v11000_v25 = vpop.f32.mrf.mxu1  ;;  %v10349_v51 = vadd.f32 %v10343_v26, %v9611_v34  ;;  %v10345_v50 = vadd.f32 %v10344_v38, %v10304_v0 }
 0x916   : > { %v10346_v55 = vpop.f32.mrf.mxu0 }
 0x917   : > { %v11002_v40 = vpop.f32.mrf.mxu1  ;;  %v10350_v63 = vadd.f32 %v10345_v50, %v9612_v59 }
 0x918   : > { %v10347_v62 = vpop.f32.mrf.mxu0 }
 0x919   : > { %v11003_v48 = vpop.f32.mrf.mxu1 }
 0x952   : > { %v11039_v15 = vpop.f32.mrf.mxu0 }
 0x953   : > { %v11080_v23 = vpop.f32.mrf.mxu1  ;;  %v11040_v9 = vadd.f32 %v11039_v15, %v10998_v33 }
 0x954   : > { %v11041_v53 = vpop.f32.mrf.mxu0 }
 0x955   : > { %v11082_v14 = vpop.f32.mrf.mxu1  ;;  %v11081_v39 = vadd.f32 %v11080_v23, %v11040_v9  ;;  %v11042_v1 = vadd.f32 %v11041_v53, %v11000_v25 }
 0x956   : > { %v11043_v5 = vpop.f32.mrf.mxu0 }
 0x957   : > { %v11084_v2 = vpop.f32.mrf.mxu1  ;;  %v11087_v60 = vadd.f32 %v11081_v39, %v10349_v51  ;;  %v11083_v31 = vadd.f32 %v11082_v14, %v11042_v1 }
 0x958   : > { %v11044_v45 = vpop.f32.mrf.mxu0 }
 0x959   : > { %v11085_v42 = vpop.f32.mrf.mxu1  ;;  %v11088_v13 = vadd.f32 %v11083_v31, %v10350_v63 }
 0x95b   : > { %v11092_v3 = vcombine.low %v11087_v60, %v11088_v13 }
 0x95d   : > { %v11099_v28 = vrot.slane %v11092_v3, %v17985_v56  ;;  %11106 = sbr.rel (%p13337_p10) target bundleno = 3185 (0xc71), region = 108 }
 0x95f   : > { %v11101_v58 = vadd.f32 %v11099_v28, %v11089_v35 }
 0x961   : > { %11102 = vst [vmem:[#allocation4] sm:$0xf] %v11101_v58 }
 0x962   : > { %v11224_v43 = vld [vmem:[#allocation13 + $0xf8] sm:$0xff]  ;;  %v11223_v8 = vld [vmem:[#allocation13 + $0xf0] sm:$0xff]  ;;  %v11222_v46 = vld [vmem:[#allocation13 + $0xe8] sm:$0xff]  ;;  %vm11547_vm8 = vcmask 33792  }
 0x963   : > { %v11159_v19 = vld [vmem:[#allocation11 + $0xf8] sm:$0xff]  ;;  %11268 = vmatprep.subr.mxu0 %v11224_v43  ;;  %v11158_v37 = vld [vmem:[#allocation11 + $0xf0] sm:$0xff]  ;;  %v11157_v27 = vld [vmem:[#allocation11 + $0xe8] sm:$0xff] }
 0x964   : > { %11350 = vmatprep.subr.mxu1 %v11159_v19  ;;  %11269 = vmatpush1.msra.mxu0 %v11223_v8  ;;  %v11221_v20 = vld [vmem:[#allocation13 + $0xe0] sm:$0xff]  ;;  %v11220_v7 = vld [vmem:[#allocation13 + $0xd8] sm:$0xff]  ;;  %v11219_v49 = vld [vmem:[#allocation13 + $0xd0] sm:$0xff] }
 0x965   : > { %11351 = vmatpush1.msra.mxu1 %v11158_v37  ;;  %v11156_v44 = vld [vmem:[#allocation11 + $0xe0] sm:$0xff]  ;;  %11270 = vmatprep.subr.mxu0 %v11222_v46  ;;  %v11155_v57 = vld [vmem:[#allocation11 + $0xd8] sm:$0xff]  ;;  %v11154_v21 = vld [vmem:[#allocation11 + $0xd0] sm:$0xff] }
 0x966   : > { %11352 = vmatprep.subr.mxu1 %v11157_v27  ;;  %11271 = vmatpush1.msra.mxu0 %v11221_v20  ;;  %v11218_v16 = vld [vmem:[#allocation13 + $0xc8] sm:$0xff]  ;;  %v11217_v18 = vld [vmem:[#allocation13 + $0xc0] sm:$0xff]  ;;  %v11216_v11 = vld [vmem:[#allocation13 + $0xb8] sm:$0xff] }
 0x967   : > { %11353 = vmatpush1.msra.mxu1 %v11156_v44  ;;  %v11153_v34 = vld [vmem:[#allocation11 + $0xc8] sm:$0xff]  ;;  %11272 = vmatprep.subr.mxu0 %v11220_v7  ;;  %v11152_v10 = vld [vmem:[#allocation11 + $0xc0] sm:$0xff]  ;;  %v11151_v59 = vld [vmem:[#allocation11 + $0xb8] sm:$0xff] }
 0x968   : > { %11354 = vmatprep.subr.mxu1 %v11155_v57  ;;  %11273 = vmatpush1.msra.mxu0 %v11219_v49  ;;  %v11215_v4 = vld [vmem:[#allocation13 + $0xb0] sm:$0xff]  ;;  %v11214_v47 = vld [vmem:[#allocation13 + $0xa8] sm:$0xff]  ;;  %v11213_v52 = vld [vmem:[#allocation13 + $0xa0] sm:$0xff] }
 0x969   : > { %11355 = vmatpush1.msra.mxu1 %v11154_v21  ;;  %11274 = vmatprep.subr.mxu0 %v11218_v16  ;;  %v11150_v17 = vld [vmem:[#allocation11 + $0xb0] sm:$0xff]  ;;  %v11149_v6 = vld [vmem:[#allocation11 + $0xa8] sm:$0xff]  ;;  %v11148_v0 = vld [vmem:[#allocation11 + $0xa0] sm:$0xff] }
 0x96a   : > { %11356 = vmatprep.subr.mxu1 %v11153_v34  ;;  %11275 = vmatpush1.msra.mxu0 %v11217_v18  ;;  %v11212_v22 = vld [vmem:[#allocation13 + $0x98] sm:$0xff]  ;;  %v11211_v30 = vld [vmem:[#allocation13 + $0x90] sm:$0xff]  ;;  %v11210_v29 = vld [vmem:[#allocation13 + $0x88] sm:$0xff] }
 0x96b   : > { %11357 = vmatpush1.msra.mxu1 %v11152_v10  ;;  %11276 = vmatprep.subr.mxu0 %v11216_v11  ;;  %v11147_v12 = vld [vmem:[#allocation11 + $0x98] sm:$0xff]  ;;  %v11146_v41 = vld [vmem:[#allocation11 + $0x90] sm:$0xff]  ;;  %v11145_v33 = vld [vmem:[#allocation11 + $0x88] sm:$0xff] }
 0x96c   : > { %11358 = vmatprep.subr.mxu1 %v11151_v59  ;;  %11277 = vmatpush1.msra.mxu0 %v11215_v4  ;;  %v11209_v26 = vld [vmem:[#allocation13 + $0x80] sm:$0xff]  ;;  %v11208_v25 = vld [vmem:[#allocation13 + $0x78] sm:$0xff]  ;;  %v11207_v50 = vld [vmem:[#allocation13 + $0x70] sm:$0xff] }
 0x96d   : > { %11359 = vmatpush1.msra.mxu1 %v11150_v17  ;;  %11278 = vmatprep.subr.mxu0 %v11214_v47  ;;  %v11144_v38 = vld [vmem:[#allocation11 + $0x80] sm:$0xff]  ;;  %v11143_v51 = vld [vmem:[#allocation11 + $0x78] sm:$0xff]  ;;  %v11142_v55 = vld [vmem:[#allocation11 + $0x70] sm:$0xff] }
 0x96e   : > { %11360 = vmatprep.subr.mxu1 %v11149_v6  ;;  %11279 = vmatpush1.msra.mxu0 %v11213_v52  ;;  %v11206_v40 = vld [vmem:[#allocation13 + $0x68] sm:$0xff]  ;;  %v11205_v62 = vld [vmem:[#allocation13 + $0x60] sm:$0xff]  ;;  %v11204_v32 = vld [vmem:[#allocation13 + $0x58] sm:$0xff] }
 0x96f   : > { %11361 = vmatpush1.msra.mxu1 %v11148_v0  ;;  %11280 = vmatprep.subr.mxu0 %v11212_v22  ;;  %v11141_v63 = vld [vmem:[#allocation11 + $0x68] sm:$0xff]  ;;  %v11140_v48 = vld [vmem:[#allocation11 + $0x60] sm:$0xff]  ;;  %v11139_v61 = vld [vmem:[#allocation11 + $0x58] sm:$0xff]  ;;  %v11112_v22 = vsub.s32 0, %v17982_v24 }
 0x970   : > { %11362 = vmatprep.subr.mxu1 %v11147_v12  ;;  %11281 = vmatpush1.msra.mxu0 %v11211_v30  ;;  %v11203_v36 = vld [vmem:[#allocation13 + $0x50] sm:$0xff]  ;;  %v11202_v23 = vld [vmem:[#allocation13 + $0x48] sm:$0xff]  ;;  %v11201_v53 = vld [vmem:[#allocation13 + $0x40] sm:$0xff]  ;;  %v11116_v12 = vsub.s32 1, %v17982_v24 }
 0x971   : > { %11363 = vmatpush1.msra.mxu1 %v11146_v41  ;;  %11282 = vmatprep.subr.mxu0 %v11210_v29  ;;  %v11138_v15 = vld [vmem:[#allocation11 + $0x50] sm:$0xff]  ;;  %v11137_v9 = vld [vmem:[#allocation11 + $0x48] sm:$0xff]  ;;  %v11136_v14 = vld [vmem:[#allocation11 + $0x40] sm:$0xff] }
 0x972   : > { %11364 = vmatprep.subr.mxu1 %v11145_v33  ;;  %11283 = vmatpush1.msra.mxu0 %v11209_v26  ;;  %v11200_v39 = vld [vmem:[#allocation13 + $0x38] sm:$0xff]  ;;  %v11199_v54 = vld [vmem:[#allocation13 + $0x30] sm:$0xff]  ;;  %v11198_v2 = vld [vmem:[#allocation13 + $0x28] sm:$0xff] }
 0x973   : > { %11365 = vmatpush1.msra.mxu1 %v11144_v38  ;;  %11284 = vmatprep.subr.mxu0 %v11208_v25  ;;  %v11135_v1 = vld [vmem:[#allocation11 + $0x38] sm:$0xff]  ;;  %v11134_v5 = vld [vmem:[#allocation11 + $0x30] sm:$0xff]  ;;  %v11133_v60 = vld [vmem:[#allocation11 + $0x28] sm:$0xff] }
 0x974   : > { %11366 = vmatprep.subr.mxu1 %v11143_v51  ;;  %11285 = vmatpush1.msra.mxu0 %v11207_v50  ;;  %v11197_v31 = vld [vmem:[#allocation13 + $0x20] sm:$0xff]  ;;  %v11196_v42 = vld [vmem:[#allocation13 + $0x18] sm:$0xff]  ;;  %v11195_v3 = vld [vmem:[#allocation13 + $0x10] sm:$0xff] }
 0x975   : > { %11367 = vmatpush1.msra.mxu1 %v11142_v55  ;;  %11286 = vmatprep.subr.mxu0 %v11206_v40  ;;  %v11132_v45 = vld [vmem:[#allocation11 + $0x20] sm:$0xff]  ;;  %v11131_v13 = vld [vmem:[#allocation11 + $0x18] sm:$0xff]  ;;  %v11130_v35 = vld [vmem:[#allocation11 + $0x10] sm:$0xff] }
 0x976   : > { %11368 = vmatprep.subr.mxu1 %v11141_v63  ;;  %11287 = vmatpush1.msra.mxu0 %v11205_v62  ;;  %v11194_v28 = vld [vmem:[#allocation13 + $0x8] sm:$0xff]  ;;  %v11193_v43 = vld [vmem:[#allocation13] sm:$0xff]  ;;  %v11256_v8 = vld [vmem:[#allocation13 + $0x1f8] sm:$0xff] }
 0x977   : > { %11369 = vmatpush1.msra.mxu1 %v11140_v48  ;;  %11288 = vmatprep.subr.mxu0 %v11204_v32  ;;  %v11129_v58 = vld [vmem:[#allocation11 + $0x8] sm:$0xff]  ;;  %v11128_v19 = vld [vmem:[#allocation11] sm:$0xff]  ;;  %v11191_v37 = vld [vmem:[#allocation11 + $0x1f8] sm:$0xff] }
 0x978   : > { %11370 = vmatprep.subr.mxu1 %v11139_v61  ;;  %11289 = vmatpush1.msra.mxu0 %v11203_v36  ;;  %v11255_v46 = vld [vmem:[#allocation13 + $0x1f0] sm:$0xff]  ;;  %v11254_v20 = vld [vmem:[#allocation13 + $0x1e8] sm:$0xff]  ;;  %v11253_v7 = vld [vmem:[#allocation13 + $0x1e0] sm:$0xff] }
 0x979   : > { %11371 = vmatpush1.msra.mxu1 %v11138_v15  ;;  %11290 = vmatprep.subr.mxu0 %v11202_v23  ;;  %v11190_v27 = vld [vmem:[#allocation11 + $0x1f0] sm:$0xff]  ;;  %v11189_v44 = vld [vmem:[#allocation11 + $0x1e8] sm:$0xff]  ;;  %v11188_v57 = vld [vmem:[#allocation11 + $0x1e0] sm:$0xff] }
 0x97a   : > { %11372 = vmatprep.subr.mxu1 %v11137_v9  ;;  %11291 = vmatpush1.msra.mxu0 %v11201_v53  ;;  %v11252_v49 = vld [vmem:[#allocation13 + $0x1d8] sm:$0xff]  ;;  %v11251_v16 = vld [vmem:[#allocation13 + $0x1d0] sm:$0xff]  ;;  %v11250_v18 = vld [vmem:[#allocation13 + $0x1c8] sm:$0xff] }
 0x97b   : > { %11373 = vmatpush1.msra.mxu1 %v11136_v14  ;;  %11292 = vmatprep.subr.mxu0 %v11200_v39  ;;  %v11187_v21 = vld [vmem:[#allocation11 + $0x1d8] sm:$0xff]  ;;  %v11186_v34 = vld [vmem:[#allocation11 + $0x1d0] sm:$0xff]  ;;  %v11185_v10 = vld [vmem:[#allocation11 + $0x1c8] sm:$0xff] }
 0x97c   : > { %11374 = vmatprep.subr.mxu1 %v11135_v1  ;;  %11293 = vmatpush1.msra.mxu0 %v11199_v54  ;;  %v11249_v11 = vld [vmem:[#allocation13 + $0x1c0] sm:$0xff]  ;;  %v11248_v4 = vld [vmem:[#allocation13 + $0x1b8] sm:$0xff]  ;;  %v11247_v47 = vld [vmem:[#allocation13 + $0x1b0] sm:$0xff] }
 0x97d   : > { %11375 = vmatpush1.msra.mxu1 %v11134_v5  ;;  %11294 = vmatprep.subr.mxu0 %v11198_v2  ;;  %v11184_v59 = vld [vmem:[#allocation11 + $0x1c0] sm:$0xff]  ;;  %v11183_v17 = vld [vmem:[#allocation11 + $0x1b8] sm:$0xff]  ;;  %v11182_v6 = vld [vmem:[#allocation11 + $0x1b0] sm:$0xff] }
 0x97e   : > { %11376 = vmatprep.subr.mxu1 %v11133_v60  ;;  %11295 = vmatpush1.msra.mxu0 %v11197_v31  ;;  %v11246_v52 = vld [vmem:[#allocation13 + $0x1a8] sm:$0xff]  ;;  %v11245_v30 = vld [vmem:[#allocation13 + $0x1a0] sm:$0xff]  ;;  %v11244_v29 = vld [vmem:[#allocation13 + $0x198] sm:$0xff] }
 0x97f   : > { %11377 = vmatpush1.msra.mxu1 %v11132_v45  ;;  %11296 = vmatprep.subr.mxu0 %v11196_v42  ;;  %v11181_v0 = vld [vmem:[#allocation11 + $0x1a8] sm:$0xff]  ;;  %v11180_v41 = vld [vmem:[#allocation11 + $0x1a0] sm:$0xff]  ;;  %v11179_v33 = vld [vmem:[#allocation11 + $0x198] sm:$0xff] }
 0x980   : > { %11378 = vmatprep.subr.mxu1 %v11131_v13  ;;  %11297 = vmatpush1.msra.mxu0 %v11195_v3  ;;  %v11243_v26 = vld [vmem:[#allocation13 + $0x190] sm:$0xff]  ;;  %v11108_v25 = vld [vmem:[#allocation8] sm:$0x3]  ;;  %v11242_v51 = vld [vmem:[#allocation13 + $0x188] sm:$0xff] }
 0x981   : > { %11379 = vmatpush1.msra.mxu1 %v11130_v35  ;;  %11298 = vmatprep.subr.mxu0 %v11194_v28  ;;  %v11178_v38 = vld [vmem:[#allocation11 + $0x190] sm:$0xff]  ;;  %v11177_v50 = vld [vmem:[#allocation11 + $0x188] sm:$0xff]  ;;  %v11113_v55 = vrot.slane %v11108_v25, %v11112_v22  ;;  %v11117_v40 = vrot.slane %v11108_v25, %v11116_v12  ;;  %v11241_v63 = vld [vmem:[#allocation13 + $0x180] sm:$0xff] }
 0x982   : > { %11380 = vmatprep.subr.mxu1 %v11129_v58  ;;  %11299 = vmatpush1.msra.mxu0 %v11193_v43  ;;  %v11176_v62 = vld [vmem:[#allocation11 + $0x180] sm:$0xff]  ;;  %v11240_v48 = vld [vmem:[#allocation13 + $0x178] sm:$0xff]  ;;  %v11239_v36 = vld [vmem:[#allocation13 + $0x170] sm:$0xff] }
 0x983   : > { %11381 = vmatpush1.msra.mxu1 %v11128_v19  ;;  %11300 = vmatprep.subr.mxu0 %v11256_v8  ;;  %v11175_v32 = vld [vmem:[#allocation11 + $0x178] sm:$0xff]  ;;  %v11118_v61 = vcombine.low %v11113_v55, %v11117_v40  ;;  %v11174_v15 = vld [vmem:[#allocation11 + $0x170] sm:$0xff]  ;;  %v11238_v23 = vld [vmem:[#allocation13 + $0x168] sm:$0xff] }
 0x984   : > { %11382 = vmatprep.subr.mxu1 %v11191_v37  ;;  %11301 = vmatpush2.msra.mxu0 %v11255_v46  ;;  %v11173_v9 = vld [vmem:[#allocation11 + $0x168] sm:$0xff]  ;;  %v11237_v53 = vld [vmem:[#allocation13 + $0x160] sm:$0xff]  ;;  %v11236_v1 = vld [vmem:[#allocation13 + $0x158] sm:$0xff] }
 0x985   : > { %11383 = vmatpush2.msra.mxu1 %v11190_v27  ;;  %11302 = vmatprep.subr.mxu0 %v11254_v20  ;;  %v11172_v14 = vld [vmem:[#allocation11 + $0x160] sm:$0xff]  ;;  %v11125_v39 = vrot.slane %v11118_v61, %v17985_v56  ;;  %v11171_v54 = vld [vmem:[#allocation11 + $0x158] sm:$0xff]  ;;  %v11235_v2 = vld [vmem:[#allocation13 + $0x150] sm:$0xff] }
 0x986   : > { %11384 = vmatprep.subr.mxu1 %v11189_v44  ;;  %11303 = vmatpush2.msra.mxu0 %v11253_v7  ;;  %v11107_v5 = vld [vmem:[#allocation4] sm:$0xf]  ;;  %v11234_v31 = vld [vmem:[#allocation13 + $0x148] sm:$0xff]  ;;  %v11233_v42 = vld [vmem:[#allocation13 + $0x140] sm:$0xff] }
 0x987   : > { %11385 = vmatpush2.msra.mxu1 %v11188_v57  ;;  %11304 = vmatprep.subr.mxu0 %v11252_v49  ;;  %v11170_v60 = vld [vmem:[#allocation11 + $0x150] sm:$0xff]  ;;  %v11169_v45 = vld [vmem:[#allocation11 + $0x148] sm:$0xff]  ;;  %v11168_v13 = vld [vmem:[#allocation11 + $0x140] sm:$0xff]  ;;  %v11127_v3 = vadd.f32 %v11125_v39, %v11107_v5 }
 0x988   : > { %11386 = vmatprep.subr.mxu1 %v11187_v21  ;;  %11305 = vmatpush2.msra.mxu0 %v11251_v16  ;;  %v11232_v35 = vld [vmem:[#allocation13 + $0x138] sm:$0xff]  ;;  %v11231_v58 = vld [vmem:[#allocation13 + $0x130] sm:$0xff]  ;;  %v11230_v19 = vld [vmem:[#allocation13 + $0x128] sm:$0xff] }
 0x989   : > { %11387 = vmatpush2.msra.mxu1 %v11186_v34  ;;  %11306 = vmatprep.subr.mxu0 %v11250_v18  ;;  %v11167_v28 = vld [vmem:[#allocation11 + $0x138] sm:$0xff]  ;;  %v11166_v43 = vld [vmem:[#allocation11 + $0x130] sm:$0xff]  ;;  %v11165_v8 = vld [vmem:[#allocation11 + $0x128] sm:$0xff]  ;;  %v11346_v20 = vrot.slane %v11127_v3, %v17985_v56 }
 0x98a   : > { %11388 = vmatprep.subr.mxu1 %v11185_v10  ;;  %11307 = vmatpush2.msra.mxu0 %v11249_v11  ;;  %v11229_v37 = vld [vmem:[#allocation13 + $0x120] sm:$0xff]  ;;  %v13338_v27 = vld.sshfl [vmem:[#allocation10] sm:$0x33 pattern:$0x76325410]  ;;  %v11227_v57 = vld [vmem:[#allocation13 + $0x110] sm:$0xff] }
 0x98b   : > { %11389 = vmatpush2.msra.mxu1 %v11184_v59  ;;  %11308 = vmatprep.subr.mxu0 %v11248_v4  ;;  %v11164_v46 = vld [vmem:[#allocation11 + $0x120] sm:$0xff]  ;;  %v11228_v44 = vld [vmem:[#allocation13 + $0x118] sm:$0xff]  ;;  %v11162_v49 = vld [vmem:[#allocation11 + $0x110] sm:$0xff]  ;;  %v11265_v34 = vcombine.high %v13338_v27, %v13338_v27  ;;  %v11347_v10 = vcombine.high %v11346_v20, %v11346_v20 }
 0x98c   : > { %11390 = vmatprep.subr.mxu1 %v11183_v17  ;;  %11309 = vmatpush2.msra.mxu0 %v11247_v47  ;;  %v11163_v7 = vld [vmem:[#allocation11 + $0x118] sm:$0xff]  ;;  %v11226_v21 = vld [vmem:[#allocation13 + $0x108] sm:$0xff]  ;;  %v11225_v18 = vld [vmem:[#allocation13 + $0x100] sm:$0xff] }
 0x98d   : > { %11391 = vmatpush2.msra.mxu1 %v11182_v6  ;;  %11310 = vmatprep.subr.mxu0 %v11246_v52  ;;  %v11161_v16 = vld [vmem:[#allocation11 + $0x108] sm:$0xff]  ;;  %v11160_v56 = vld [vmem:[#allocation11 + $0x100] sm:$0xff]  ;;  %v11467_v4 = vld [vmem:[%s18133_s11 + $0xf0] sm:$0xff] }
 0x98e   : > { %11392 = vmatprep.subr.mxu1 %v11181_v0  ;;  %11311 = vmatpush2.msra.mxu0 %v11245_v30  ;;  %v11468_v11 = vld [vmem:[%s18133_s11 + $0xf8] sm:$0xff]  ;;  %v11451_v17 = vld [vmem:[%s18133_s11 + $0x70] sm:$0xff]  ;;  %v11466_v47 = vld [vmem:[%s18133_s11 + $0xe8] sm:$0xff] }
 0x98f   : > { %11393 = vmatpush2.msra.mxu1 %v11180_v41  ;;  %11312 = vmatprep.subr.mxu0 %v11244_v29  ;;  %v11452_v59 = vld [vmem:[%s18133_s11 + $0x78] sm:$0xff]  ;;  %v11450_v6 = vld [vmem:[%s18133_s11 + $0x68] sm:$0xff]  ;;  %v11465_v52 = vld [vmem:[%s18133_s11 + $0xe0] sm:$0xff] }
 0x990   : > { %11394 = vmatprep.subr.mxu1 %v11179_v33  ;;  %11313 = vmatpush2.msra.mxu0 %v11243_v26  ;;  %v11449_v0 = vld [vmem:[%s18133_s11 + $0x60] sm:$0xff]  ;;  %v11464_v30 = vld [vmem:[%s18133_s11 + $0xd8] sm:$0xff]  ;;  %v11463_v29 = vld [vmem:[%s18133_s11 + $0xd0] sm:$0xff] }
 0x991   : > { %11395 = vmatpush2.msra.mxu1 %v11178_v38  ;;  %11314 = vmatprep.subr.mxu0 %v11242_v51  ;;  %v11448_v41 = vld [vmem:[%s18133_s11 + $0x58] sm:$0xff]  ;;  %v11447_v33 = vld [vmem:[%s18133_s11 + $0x50] sm:$0xff]  ;;  %v11462_v26 = vld [vmem:[%s18133_s11 + $0xc8] sm:$0xff] }
 0x992   : > { %11396 = vmatprep.subr.mxu1 %v11177_v50  ;;  %11315 = vmatpush2.msra.mxu0 %v11241_v63  ;;  %v11446_v38 = vld [vmem:[%s18133_s11 + $0x48] sm:$0xff]  ;;  %v11461_v25 = vld [vmem:[%s18133_s11 + $0xc0] sm:$0xff]  ;;  %v11460_v50 = vld [vmem:[%s18133_s11 + $0xb8] sm:$0xff] }
 0x993   : > { %11397 = vmatpush2.msra.mxu1 %v11176_v62  ;;  %11316 = vmatprep.subr.mxu0 %v11240_v48  ;;  %v11445_v51 = vld [vmem:[%s18133_s11 + $0x40] sm:$0xff]  ;;  %v11444_v55 = vld [vmem:[%s18133_s11 + $0x38] sm:$0xff]  ;;  %v11459_v40 = vld [vmem:[%s18133_s11 + $0xb0] sm:$0xff] }
 0x994   : > { %11398 = vmatprep.subr.mxu1 %v11175_v32  ;;  %11317 = vmatpush2.msra.mxu0 %v11239_v36  ;;  %v11443_v63 = vld [vmem:[%s18133_s11 + $0x30] sm:$0xff]  ;;  %v11458_v62 = vld [vmem:[%s18133_s11 + $0xa8] sm:$0xff]  ;;  %v11457_v32 = vld [vmem:[%s18133_s11 + $0xa0] sm:$0xff] }
 0x995   : > { %11399 = vmatpush2.msra.mxu1 %v11174_v15  ;;  %11318 = vmatprep.subr.mxu0 %v11238_v23  ;;  %v11442_v48 = vld [vmem:[%s18133_s11 + $0x28] sm:$0xff]  ;;  %v11441_v61 = vld [vmem:[%s18133_s11 + $0x20] sm:$0xff]  ;;  %v11456_v36 = vld [vmem:[%s18133_s11 + $0x98] sm:$0xff] }
 0x996   : > { %11400 = vmatprep.subr.mxu1 %v11173_v9  ;;  %11319 = vmatpush2.msra.mxu0 %v11237_v53  ;;  %v11440_v15 = vld [vmem:[%s18133_s11 + $0x18] sm:$0xff]  ;;  %v11455_v23 = vld [vmem:[%s18133_s11 + $0x90] sm:$0xff]  ;;  %v11454_v53 = vld [vmem:[%s18133_s11 + $0x88] sm:$0xff] }
 0x997   : > { %11401 = vmatpush2.msra.mxu1 %v11172_v14  ;;  %11320 = vmatprep.subr.mxu0 %v11236_v1  ;;  %v11439_v9 = vld [vmem:[%s18133_s11 + $0x10] sm:$0xff]  ;;  %v11438_v14 = vld [vmem:[%s18133_s11 + $0x8] sm:$0xff]  ;;  %v11453_v39 = vld [vmem:[%s18133_s11 + $0x80] sm:$0xff] }
 0x998   : > { %11402 = vmatprep.subr.mxu1 %v11171_v54  ;;  %11321 = vmatpush2.msra.mxu0 %v11235_v2  ;;  %v11437_v1 = vld [vmem:[%s18133_s11] sm:$0xff]  ;;  %v11421_v54 = vld [vmem:[#allocation14] sm:$0x3] }
 0x999   : > { %11403 = vmatpush2.msra.mxu1 %v11170_v60  ;;  %11322 = vmatprep.subr.mxu0 %v11234_v31  ;;  %v11426_v60 = vrot.slane %v11421_v54, %v11112_v22 }
 0x99a   : > { %11404 = vmatprep.subr.mxu1 %v11169_v45  ;;  %11323 = vmatpush2.msra.mxu0 %v11233_v42  ;;  %v11430_v45 = vrot.slane %v11421_v54, %v11116_v12 }
 0x99b   : > { %11405 = vmatpush2.msra.mxu1 %v11168_v13  ;;  %11324 = vmatprep.subr.mxu0 %v11232_v35 }
 0x99c   : > { %11406 = vmatprep.subr.mxu1 %v11167_v28  ;;  %11325 = vmatpush2.msra.mxu0 %v11231_v58 }
 0x99d   : > { %11407 = vmatpush2.msra.mxu1 %v11166_v43  ;;  %11326 = vmatprep.subr.mxu0 %v11230_v19 }
 0x99e   : > { %11408 = vmatprep.subr.mxu1 %v11165_v8  ;;  %11327 = vmatpush2.msra.mxu0 %v11229_v37  ;;  %v13339_v37 = vld [vmem:[#allocation16] ss:$0 sm:$0xff] }
 0x99f   : > { %11409 = vmatpush2.msra.mxu1 %v11164_v46  ;;  %11328 = vmatprep.subr.mxu0 %v11228_v44 }
 0x9a0   : > { %11410 = vmatprep.subr.mxu1 %v11163_v7  ;;  %11329 = vmatpush2.msra.mxu0 %v11227_v57 }
 0x9a1   : > { %11411 = vmatpush2.msra.mxu1 %v11162_v49  ;;  %11330 = vmatprep.subr.mxu0 %v11226_v21 }
 0x9a2   : > { %11412 = vmatprep.subr.mxu1 %v11161_v16  ;;  %11331 = vmatpush2.msra.mxu0 %v11225_v18 }
 0x9a3   : > { %11332 = vmatprep.mubr.f32.mxu0 %v11265_v34  ;;  %11413 = vmatpush2.msra.mxu1 %v11160_v56 }
 0x9a4   : > { %11414 = vmatprep.mubr.f32.mxu1 %v11347_v10  ;;  %11333 = vmatmul.mubr.f32.vlgmr.msra.gmra.mxu0 %v13338_v27 }
 0x9a5   : > { %11415 = vmatmul.mubr.f32.vlgmr.msra.gmra.mxu1 %v11346_v20  ;;  %13357 = vmatprep.subr.mxu0 %v11468_v11 }
 0x9a6   : > { %13358 = vmatpush3.msra.mxu0 %v11452_v59 }
 0x9a7   : > { %13359 = vmatprep.subr.mxu0 %v11467_v4 }
 0x9a8   : > { %13360 = vmatpush3.msra.mxu0 %v11451_v17 }
 0x9a9   : > { %13361 = vmatprep.subr.mxu0 %v11466_v47 }
 0x9aa   : > { %13362 = vmatpush3.msra.mxu0 %v11450_v6 }
 0x9ab   : > { %13363 = vmatprep.subr.mxu0 %v11465_v52 }
 0x9ac   : > { %13364 = vmatpush3.msra.mxu0 %v11449_v0 }
 0x9ad   : > { %13365 = vmatprep.subr.mxu0 %v11464_v30 }
 0x9ae   : > { %13366 = vmatpush3.msra.mxu0 %v11448_v41 }
 0x9af   : > { %13367 = vmatprep.subr.mxu0 %v11463_v29 }
 0x9b0   : > { %13368 = vmatpush3.msra.mxu0 %v11447_v33 }
 0x9b1   : > { %13369 = vmatprep.subr.mxu0 %v11462_v26 }
 0x9b2   : > { %13370 = vmatpush3.msra.mxu0 %v11446_v38 }
 0x9b3   : > { %13371 = vmatprep.subr.mxu0 %v11461_v25 }
 0x9b4   : > { %13372 = vmatpush3.msra.mxu0 %v11445_v51 }
 0x9b5   : > { %13373 = vmatprep.subr.mxu0 %v11460_v50 }
 0x9b6   : > { %13374 = vmatpush3.msra.mxu0 %v11444_v55 }
 0x9b7   : > { %13375 = vmatprep.subr.mxu0 %v11459_v40 }
 0x9b8   : > { %13376 = vmatpush3.msra.mxu0 %v11443_v63 }
 0x9b9   : > { %13377 = vmatprep.subr.mxu0 %v11458_v62 }
 0x9ba   : > { %13378 = vmatpush3.msra.mxu0 %v11442_v48 }
 0x9bb   : > { %13379 = vmatprep.subr.mxu0 %v11457_v32 }
 0x9bc   : > { %13380 = vmatpush3.msra.mxu0 %v11441_v61 }
 0x9bd   : > { %13381 = vmatprep.subr.mxu0 %v11456_v36 }
 0x9be   : > { %13382 = vmatpush3.msra.mxu0 %v11440_v15 }
 0x9bf   : > { %13383 = vmatprep.subr.mxu0 %v11455_v23 }
 0x9c0   : > { %13384 = vmatpush3.msra.mxu0 %v11439_v9 }
 0x9c1   : > { %13385 = vmatprep.subr.mxu0 %v11454_v53 }
 0x9c2   : > { %13386 = vmatpush3.msra.mxu0 %v11438_v14 }
 0x9c3   : > { %13387 = vmatprep.subr.mxu0 %v11453_v39 }
 0x9c4   : > { %13388 = vmatpush3.msra.mxu0 %v11437_v1 }
 0xa64   : > { %v11334_v5 = vpop.f32.mrf.mxu0 }
 0xa65   : > { %v11416_v2 = vpop.f32.mrf.mxu1 }
 0xa66   : > { %v11417_v31 = vadd.f32 %v11416_v2, %v11334_v5  ;;  %v11336_v42 = vpop.f32.mrf.mxu0 }
 0xa67   : > { %v11418_v13 = vpop.f32.mrf.mxu1 }
 0xa68   : > { %v11419_v3 = vadd.f32 %v11418_v13, %v11336_v42  ;;  %v11433_v35 = vadd.f32 %v11426_v60, %v11417_v31 }
 0xa6a   : > { %v11434_v28 = vadd.f32 %v11430_v45, %v11419_v3  ;;  %v11435_v43 = vmax.f32 %v11433_v35, 0.0 }
 0xa6c   : > { %v11436_v58 = vmax.f32 %v11434_v28, 0.0 }
 0xa6e   : > { %11540 = vmatprep.mubr.f32.mxu0 %v11436_v58 }
 0xa6f   : > { %11541 = vmatmul.mubr.f32.vlgmr.msra.gmra.mxu0 %v11435_v43 }
 0xb2f   : > { %v13389_v19 = vpop.f32.mrf.mxu0 }
 0xb31   : > { %v13390_v8 = vpop.f32.mrf.mxu0 }
 0xb32   : > { %v13391_v46 = vadd.f32 %v13390_v8, %v13389_v19 }
 0xb34   : > { %v11543_v27 = vadd.f32 %v13391_v46, %v13339_v37 }
 0xb36   : > { %v11546_v22 = vmax.f32 %v11543_v27, 0.0 }
 0xb38   : > { %v11548_v20 = vsel %vm11547_vm8, %v11546_v22, -inf }
 0xb39   : > { %11549 = vmax.xlane.f32.xlu0 %v11548_v20 }
 0xbc2   : > { %v11550_v24 = vpop.xlane.xlu0 %11549 }
 0xbc3   : > { %v11551_v12 = vsub.f32 %v11546_v22, %v11550_v24 }
 0xbc5   : > { %v11552_v44 = vmul.f32 1.442695, %v11551_v12 }
 0xbc7   : > { %14741 = vpow2.f32 %v11552_v44 }
 0xbd4   : > { %v14742_v7 = vpop.eup %14741 }
 0xbd5   : > { %v11554_v57 = vsel %vm11547_vm8, %v14742_v7, 0.0 }
 0xbd6   : > { %11555 = vadd.xlane.f32.xlu0 %v11554_v57 }
 0xc5f   : > { %v11556_v49 = vpop.xlane.xlu0 %11555 }
 0xc60   : > { %14743 = vrcp.f32 %v11556_v49 }
 0xc6d   : > { %v14744_v21 = vpop.eup %14743 }
 0xc6e   : > { %v11558_v16 = vmul.f32 %v14744_v21, %v14742_v7 }
 0xc70   : > { %11559 = vst.msk [vmem:[#allocation17] sm:$0x3] %vm11547_vm8, %v11558_v16 }
 0xc71 PF: > { %p13485_p12 = scmp.eq.s32.totalorder %s15115_s14, 1  ;;  %s15023_s23 = smov [#allocation17]  }
 0xc72   : > { %s11567_s24 = sshll.u32 %s15023_s23, 4  ;;  %s11568_s24 = int_to_ptr.vmem [resolvable:$true] %s11567_s24 }
 0xc73   : > { %s14929_s15 = scalar_lea.vmem %s11568_s24, 32  ;;  %p14936_p1 = scmp.lt.s32.totalorder %s11568_s24, %s11568_s24 }
 0xc74   : > { %p14930_p13 = scmp.ne.s32.totalorder %s11568_s24, %s14929_s15  ;;  %p14937_p4 = scmp.lt.s32.totalorder %s14929_s15, %s14929_s15 }
 0xc76   : > { %p14931_p2 = pnand %p14930_p13, %p13485_p12  ;;  %p14938_p0 = por %p14937_p4, %p14936_p1 }
 0xc78   : > { %p14932_p3 = pneg %p14931_p2 }
 0xc7a   : > { %p14939_p6 = pnand %p14938_p0, %p14932_p3 }
 0xc7c   : > { %14942 = shalt.err (!%p14939_p6)
}
 0xc7d   : > { %13446 = dma.vmem_to_hbm [thread:$0]  (%p13485_p12), %s11568_s24, 32, %s18135_s13, [#allocation7]  }
 0xc7e   : > { %14986 = dma.done.wait (%p13485_p12), [#allocation7], 32  }
 0xc7f   : > { %14988 = vsyncadd (%p13485_p12), [#allocation7], 4294967264 }
 0xc80 PF: > { %p27_p5 = scmp.ge.s32.totalorder %s15202_s21, 4   ;;  %s18214_s25 = smov %s14995_s26 }
 0xc81   : > { %s18215_s26 = smov %s14999_s27  ;;  %s18216_s27 = smov %s15214_s6 }
 0xc82   : > { %s18217_s28 = smov %s15202_s21  ;;  %29 = sbr.rel (!%p27_p5) target bundleno = 11 (0xb), region = 156 }
 0xc87   :  { %11580 = vsyncpa [#allocation6], 1 }
 0xc88   :  { %11582 = vsyncpa [#allocation6 + $0x1], 1 }
 0xc89   :  { %11583 = vsyncpa [#allocation9], 1 }
 0xc8a   :  { %11584 = vsyncpa [#allocation12], 1 }
 0xc8b   :  { %11585 = vsyncpa [#allocation15], 1 }
 0xc8c   :  { %11586 = vsyncpa [#allocation7], 1 }
 0xc8d   :  { %11588 = vsyncpa [#allocation7 + $0x1], 1 }

</bundles_post_ra>
